<compile_context>
chip_gen: v7x
topology: tpu7x:2x2x1
jax: 0.10.0
libtpu: 0.0.40
codegen_flags: <defaults>
</compile_context>

<pallas_src>
import math

import jax
import jax.numpy as jnp
from jax.experimental import pallas as pl
from jax.experimental.pallas import tpu as pltpu

# ----------------------- small config (consistent with Net) -----------------
B = 2
NUM_SPEAKERS = 3            # F.one_hot(..., num_classes=3) is hardcoded in Net
L = 8
ENC_DIM = 64
NUM_ENC_LAYERS = 2
DEC_DIM = 32
DEC_BUF_LEN = 8             # decoder ctx_len
NUM_DEC_LAYERS = 1
DEC_CHUNK = 4
OUT_BUF_LEN = 2
NHEAD = 8                   # hardcoded in MaskNet
HEAD_DIM = DEC_DIM // NHEAD
FF_DIM = 2 * DEC_DIM
LABEL_HIDDEN = 512          # hardcoded in Net.label_embedding
T_IN = 64
LN_EPS = 1e-5


# ----------------------------- parameters ------------------------------------
def init_params(key):
    ks = iter(jax.random.split(key, 128))
    bf16 = jnp.bfloat16

    def nrm(shape, dtype=jnp.float32):
        return (jax.random.normal(next(ks), shape, jnp.float32) * 0.1).astype(dtype)

    p = {}
    # in_conv: Conv1d(1, ENC_DIM, 3L, stride=L, bias=False) stored as [3L, ENC_DIM]
    p["in_w"] = nrm((3 * L, ENC_DIM), bf16)
    # label embedding: Linear(3,512) -> LN -> ReLU -> Linear(512,64) -> LN -> ReLU
    p["le_w1"] = nrm((NUM_SPEAKERS, LABEL_HIDDEN), bf16)
    p["le_b1"] = nrm((1, LABEL_HIDDEN))
    p["le_g1"] = jnp.ones((1, LABEL_HIDDEN), jnp.float32)
    p["le_be1"] = jnp.zeros((1, LABEL_HIDDEN), jnp.float32)
    p["le_w2"] = nrm((LABEL_HIDDEN, ENC_DIM), bf16)
    p["le_b2"] = nrm((1, ENC_DIM))
    p["le_g2"] = jnp.ones((1, ENC_DIM), jnp.float32)
    p["le_be2"] = jnp.zeros((1, ENC_DIM), jnp.float32)
    # dilated causal conv encoder
    enc = []
    for _ in range(NUM_ENC_LAYERS):
        enc.append({
            "dw_w": nrm((3, ENC_DIM)),              # depthwise taps (VPU path, f32)
            "dw_b": nrm((1, ENC_DIM)),
            "ln1_g": jnp.ones((1, ENC_DIM), jnp.float32),
            "ln1_b": jnp.zeros((1, ENC_DIM), jnp.float32),
            "pw_w": nrm((ENC_DIM, ENC_DIM), bf16),
            "pw_b": nrm((1, ENC_DIM)),
            "ln2_g": jnp.ones((1, ENC_DIM), jnp.float32),
            "ln2_b": jnp.zeros((1, ENC_DIM), jnp.float32),
        })
    p["enc"] = enc

    # grouped 1x1 projections expanded to (tiny) block-diagonal dense matrices
    rin = ENC_DIM // DEC_DIM

    def e2d_dense():
        wg = jax.random.normal(next(ks), (DEC_DIM, rin), jnp.float32) * 0.1
        dense = jnp.zeros((ENC_DIM, DEC_DIM), jnp.float32)
        for g in range(DEC_DIM):
            dense = dense.at[g * rin:(g + 1) * rin, g].set(wg[g])
        return dense.astype(bf16)

    p["pe2de_w"] = e2d_dense()
    p["pe2de_b"] = nrm((1, DEC_DIM))
    p["pe2dl_w"] = e2d_dense()
    p["pe2dl_b"] = nrm((1, DEC_DIM))
    wg = jax.random.normal(next(ks), (ENC_DIM,), jnp.float32) * 0.1
    dense = jnp.zeros((DEC_DIM, ENC_DIM), jnp.float32)
    for g in range(DEC_DIM):
        for j in range(rin):
            dense = dense.at[g, g * rin + j].set(wg[g * rin + j])
    p["pd2e_w"] = dense.astype(bf16)
    p["pd2e_b"] = nrm((1, ENC_DIM))

    # causal transformer decoder layers (post-norm, relu FFN, dropout=0)
    dec = []
    for _ in range(NUM_DEC_LAYERS):
        dec.append({
            "sa_wq": nrm((DEC_DIM, DEC_DIM), bf16), "sa_bq": nrm((1, DEC_DIM)),
            "sa_wkv": nrm((DEC_DIM, 2 * DEC_DIM), bf16), "sa_bkv": nrm((1, 2 * DEC_DIM)),
            "sa_wo": nrm((DEC_DIM, DEC_DIM), bf16), "sa_bo": nrm((1, DEC_DIM)),
            "ca_wq": nrm((DEC_DIM, DEC_DIM), bf16), "ca_bq": nrm((1, DEC_DIM)),
            "ca_wkv": nrm((DEC_DIM, 2 * DEC_DIM), bf16), "ca_bkv": nrm((1, 2 * DEC_DIM)),
            "ca_wo": nrm((DEC_DIM, DEC_DIM), bf16), "ca_bo": nrm((1, DEC_DIM)),
            "n1_g": jnp.ones((1, DEC_DIM), jnp.float32), "n1_b": jnp.zeros((1, DEC_DIM), jnp.float32),
            "n2_g": jnp.ones((1, DEC_DIM), jnp.float32), "n2_b": jnp.zeros((1, DEC_DIM), jnp.float32),
            "n3_g": jnp.ones((1, DEC_DIM), jnp.float32), "n3_b": jnp.zeros((1, DEC_DIM), jnp.float32),
            "ff_w1": nrm((DEC_DIM, FF_DIM), bf16), "ff_b1": nrm((1, FF_DIM)),
            "ff_w2": nrm((FF_DIM, DEC_DIM), bf16), "ff_b2": nrm((1, DEC_DIM)),
        })
    p["dec"] = dec

    # out_conv: ConvTranspose1d(ENC_DIM, 1, (Q+1)L, stride=L, padding=Q*L, bias=False)
    q = OUT_BUF_LEN
    w_out = jax.random.normal(next(ks), (ENC_DIM, (q + 1) * L), jnp.float32) * 0.1
    taps = jnp.stack([w_out[:, (q - j) * L:(q - j + 1) * L] for j in range(q + 1)],
                     axis=0)                                   # [Q+1, ENC_DIM, L]
    p["out_w"] = taps.astype(bf16)
    return p


# ----------------------------- fused mega kernel ------------------------------
def _make_kernel(treedef, n_w, t_lat, n_win):
    f32 = jnp.float32
    bf16 = jnp.bfloat16
    ctx = DEC_BUF_LEN
    ch = DEC_CHUNK
    scale = 1.0 / math.sqrt(HEAD_DIM)

    def kernel(cols_ref, lab_ref, *rest):
        w_flat = rest[:n_w]
        out_ref = rest[n_w]
        mem_scr, tgt_scr, dec_scr, pad_scr = rest[n_w + 1:]
        p = jax.tree_util.tree_unflatten(treedef, list(w_flat))

        def relu(v):
            return jnp.maximum(v, 0.0)

        def mm(a, w_ref, b_ref=None):
            # bf16 operands, f32 accumulate; f32 bias epilogue.
            y = jnp.dot(a.astype(bf16), w_ref[...], preferred_element_type=f32)
            if b_ref is not None:
                y = y + b_ref[...]
            return y

        def ln(v, g_ref, b_ref):
            mu = jnp.mean(v, axis=-1, keepdims=True)
            c = v - mu
            var = jnp.mean(c * c, axis=-1, keepdims=True)
            return c * jax.lax.rsqrt(var + LN_EPS) * g_ref[...] + b_ref[...]

        # Zero regions standing in for the (all-zero, never-returned) ctx buffers.
        pad_scr[pl.ds(0, t_lat), :] = jnp.zeros((t_lat, ENC_DIM), f32)
        mem_scr[pl.ds(0, ctx), :] = jnp.zeros((ctx, DEC_DIM), f32)
        tgt_scr[pl.ds(0, ctx), :] = jnp.zeros((ctx, DEC_DIM), f32)

        def shift_down(v, s):
            # Causal time shift (channel-last): rows move down by s, zero fill.
            pad_scr[pl.ds(t_lat, t_lat), :] = v
            return pad_scr[pl.ds(t_lat - s, t_lat), :]

        # Per-head lane masks (head h owns channels [h*HEAD_DIM, (h+1)*HEAD_DIM)).
        cid = jax.lax.broadcasted_iota(jnp.int32, (1, DEC_DIM), 1)
        head_masks = [((cid >= h * HEAD_DIM) & (cid < (h + 1) * HEAD_DIM)).astype(f32)
                      for h in range(NHEAD)]

        def mha(q, k, v):
            # head_dim=4: masked full-C (C=32) contractions, never a K=4 matmul.
            qs = q * scale
            kb = k.astype(bf16)
            vb = v.astype(bf16)
            o = jnp.zeros((q.shape[0], DEC_DIM), f32)
            for h in range(NHEAD):
                msk = head_masks[h]
                s = jax.lax.dot_general((qs * msk).astype(bf16), kb,
                                        (((1,), (1,)), ((), ())),
                                        preferred_element_type=f32)      # [lq, lk]
                mmax = jnp.max(s, axis=-1, keepdims=True)
                es = jnp.exp(s - mmax)
                rinv = pl.reciprocal(jnp.sum(es, axis=-1, keepdims=True), approx=True)
                pr = (es * rinv).astype(bf16)
                o = o + msk * jnp.dot(pr, vb, preferred_element_type=f32)
            return o

        def attn_block(q_in, kv_in, wq, bq, wkv, bkv, wo, bo):
            q = mm(q_in, wq, bq)
            kv = mm(kv_in, wkv, bkv)                 # fused K|V projection
            k = kv[:, 0:DEC_DIM]
            v = kv[:, DEC_DIM:2 * DEC_DIM]
            return mm(mha(q, k, v), wo, bo)

        # ---------------- label embedding ----------------
        lab = lab_ref[0]                                               # [1, 3]
        le = relu(ln(mm(lab, p["le_w1"], p["le_b1"]), p["le_g1"], p["le_be1"]))
        le = relu(ln(mm(le, p["le_w2"], p["le_b2"]), p["le_g2"], p["le_be2"]))

        # ---------------- in_conv (strided conv as im2col matmul + ReLU) -------
        xe = relu(mm(cols_ref[0], p["in_w"]))                          # [T', ENC_DIM]

        # ---------------- dilated causal conv encoder --------------------------
        x = xe
        for i in range(NUM_ENC_LAYERS):
            d = 2 ** i
            lp = p["enc"][i]
            dw = lp["dw_w"]
            x_d = shift_down(x, d)
            x_2d = shift_down(x, 2 * d)
            h = (lp["dw_b"][...]
                 + dw[pl.ds(2, 1), :] * x
                 + dw[pl.ds(1, 1), :] * x_d
                 + dw[pl.ds(0, 1), :] * x_2d)
            h = relu(ln(h, lp["ln1_g"], lp["ln1_b"]))
            h = relu(ln(mm(h, lp["pw_w"], lp["pw_b"]), lp["ln2_g"], lp["ln2_b"]))
            x = x + h
        e = x

        # ---------------- label mask + grouped 1x1 projections ------------------
        lx = le * e                                                    # l.unsqueeze(2)*e
        e_p = relu(mm(e, p["pe2de_w"], p["pe2de_b"]))                  # memory  [T', 32]
        m_p = relu(mm(lx, p["pe2dl_w"], p["pe2dl_b"]))                 # target  [T', 32]

        # ---------------- causal transformer decoder ---------------------------
        # TODO(synk): PositionalEncoding class is not defined in the reference
        # source; the use_pos_enc branch is omitted.
        mem_scr[pl.ds(ctx, t_lat), :] = e_p
        tgt_cur = m_p
        for li in range(NUM_DEC_LAYERS):
            dl = p["dec"][li]
            tgt_scr[pl.ds(ctx, t_lat), :] = tgt_cur
            for j in range(n_win):
                tctx = tgt_scr[pl.ds(j * ch, ctx + ch), :]             # [ctx+ch, 32]
                tlast = tgt_scr[pl.ds(j * ch + ctx, ch), :]            # [ch, 32]
                mctx = mem_scr[pl.ds(j * ch, ctx + ch), :]
                sa = attn_block(tlast, tctx,
                                dl["sa_wq"], dl["sa_bq"], dl["sa_wkv"], dl["sa_bkv"],
                                dl["sa_wo"], dl["sa_bo"])
                x1 = ln(tlast + sa, dl["n1_g"], dl["n1_b"])
                ca = attn_block(x1, mctx,
                                dl["ca_wq"], dl["ca_bq"], dl["ca_wkv"], dl["ca_bkv"],
                                dl["ca_wo"], dl["ca_bo"])
                x2 = ln(x1 + ca, dl["n2_g"], dl["n2_b"])
                ff = mm(relu(mm(x2, dl["ff_w1"], dl["ff_b1"])),
                        dl["ff_w2"], dl["ff_b2"])
                dec_scr[pl.ds(j * ch, ch), :] = ln(x2 + ff, dl["n3_g"], dl["n3_b"])
            tgt_cur = dec_scr[...]

        # ---------------- d2e projection + skip + mask --------------------------
        m = relu(mm(tgt_cur, p["pd2e_w"], p["pd2e_b"]))                # [T', ENC_DIM]
        m = lx + m                                                     # skip connection
        xm = xe * m                                                    # x = x * m

        # ---------------- out ConvTranspose (tap-stacked matmuls) + tanh --------
        y = jnp.dot(xm.astype(bf16), p["out_w"][OUT_BUF_LEN],
                    preferred_element_type=f32)
        for j in range(OUT_BUF_LEN):
            y = y + jnp.dot(shift_down(xm, OUT_BUF_LEN - j).astype(bf16),
                            p["out_w"][j], preferred_element_type=f32)
        out_ref[0] = jnp.tanh(y)                                       # [T', L]

    return kernel


# ----------------------------- forward wrapper --------------------------------
@jax.jit
def net_forward(params, x, target_index):
    flat, treedef = jax.tree_util.tree_flatten(params)
    n_w = len(flat)

    # TODO(synk): convnet_pre (CachedConvNet prenet) is config-gated off here.
    label = jax.nn.one_hot(target_index, NUM_SPEAKERS, dtype=jnp.float32)
    label = label[:, None, :]                                          # [B, 1, 3]

    mod = (-x.shape[-1]) % L
    if mod:
        x = jnp.pad(x, ((0, 0), (0, 0), (0, mod)))
    x = jnp.pad(x, ((0, 0), (0, 0), (L, L)))                           # lookahead pad
    bsz, _, t_pad = x.shape
    t_lat = (t_pad - 3 * L) // L + 1
    n_win = t_lat // DEC_CHUNK
    # TODO(synk): decoder-side chunk mod-padding for t_lat % DEC_CHUNK != 0 is
    # not implemented (holds for the config used here).
    assert t_lat % DEC_CHUNK == 0

    # im2col glue for the strided in_conv (kernel = 3L, stride = L).
    xr = x[:, 0, :].reshape(bsz, t_pad // L, L)
    cols = jnp.concatenate([xr[:, j:j + t_lat, :] for j in range(3)], axis=-1)

    kernel = _make_kernel(treedef, n_w, t_lat, n_win)

    def _const_idx(nd):
        return lambda b: (0,) * nd

    in_specs = [pl.BlockSpec((1, t_lat, 3 * L), lambda b: (b, 0, 0)),
                pl.BlockSpec((1, 1, NUM_SPEAKERS), lambda b: (b, 0, 0))]
    in_specs += [pl.BlockSpec(tuple(w.shape), _const_idx(w.ndim)) for w in flat]

    y = pl.pallas_call(
        kernel,
        grid=(bsz,),
        in_specs=in_specs,
        out_specs=pl.BlockSpec((1, t_lat, L), lambda b: (b, 0, 0)),
        out_shape=jax.ShapeDtypeStruct((bsz, t_lat, L), jnp.float32),
        scratch_shapes=[
            pltpu.VMEM((DEC_BUF_LEN + t_lat, DEC_DIM), jnp.float32),   # mem  (ctx | e_p)
            pltpu.VMEM((DEC_BUF_LEN + t_lat, DEC_DIM), jnp.float32),   # tgt  (ctx | m_p)
            pltpu.VMEM((t_lat, DEC_DIM), jnp.float32),                 # decoder output
            pltpu.VMEM((2 * t_lat, ENC_DIM), jnp.float32),             # causal-shift scratch
        ],
        compiler_params=pltpu.CompilerParams(
            dimension_semantics=("parallel",)),
    )(cols, label, *flat)

    y = y.reshape(bsz, 1, t_lat * L)
    if mod:
        y = y[..., :-mod]
    return y


if __name__ == "__main__":
    key = jax.random.PRNGKey(0)
    pkey, xkey = jax.random.split(key)
    params = init_params(pkey)
    x = jax.random.normal(xkey, (B, 1, T_IN), jnp.float32)
    target_index = jnp.array([0, 2], dtype=jnp.int32)
    y = jax.block_until_ready(net_forward(params, x, target_index))
    assert y.shape == (B, 1, T_IN), y.shape
    assert bool(jnp.all(jnp.isfinite(y)))
    print("KERNEL_OK")
</pallas_src>

<mosaic_0001>
module attributes {stable_mosaic.version = 11 : i64} {
  func.func @kernel(%arg0: i32, %arg1: memref<1x8x24xf32, #tpu.memory_space<vmem>>, %arg2: memref<1x1x3xf32, #tpu.memory_space<vmem>>, %arg3: memref<1x64xf32, #tpu.memory_space<vmem>>, %arg4: memref<1x32xf32, #tpu.memory_space<vmem>>, %arg5: memref<1x32xf32, #tpu.memory_space<vmem>>, %arg6: memref<32x64xbf16, #tpu.memory_space<vmem>>, %arg7: memref<32x32xbf16, #tpu.memory_space<vmem>>, %arg8: memref<32x32xbf16, #tpu.memory_space<vmem>>, %arg9: memref<1x64xf32, #tpu.memory_space<vmem>>, %arg10: memref<1x32xf32, #tpu.memory_space<vmem>>, %arg11: memref<32x64xbf16, #tpu.memory_space<vmem>>, %arg12: memref<64x32xbf16, #tpu.memory_space<vmem>>, %arg13: memref<1x32xf32, #tpu.memory_space<vmem>>, %arg14: memref<1x32xf32, #tpu.memory_space<vmem>>, %arg15: memref<1x32xf32, #tpu.memory_space<vmem>>, %arg16: memref<1x32xf32, #tpu.memory_space<vmem>>, %arg17: memref<1x32xf32, #tpu.memory_space<vmem>>, %arg18: memref<1x32xf32, #tpu.memory_space<vmem>>, %arg19: memref<1x64xf32, #tpu.memory_space<vmem>>, %arg20: memref<1x32xf32, #tpu.memory_space<vmem>>, %arg21: memref<1x32xf32, #tpu.memory_space<vmem>>, %arg22: memref<32x64xbf16, #tpu.memory_space<vmem>>, %arg23: memref<32x32xbf16, #tpu.memory_space<vmem>>, %arg24: memref<32x32xbf16, #tpu.memory_space<vmem>>, %arg25: memref<1x64xf32, #tpu.memory_space<vmem>>, %arg26: memref<3x64xf32, #tpu.memory_space<vmem>>, %arg27: memref<1x64xf32, #tpu.memory_space<vmem>>, %arg28: memref<1x64xf32, #tpu.memory_space<vmem>>, %arg29: memref<1x64xf32, #tpu.memory_space<vmem>>, %arg30: memref<1x64xf32, #tpu.memory_space<vmem>>, %arg31: memref<1x64xf32, #tpu.memory_space<vmem>>, %arg32: memref<64x64xbf16, #tpu.memory_space<vmem>>, %arg33: memref<1x64xf32, #tpu.memory_space<vmem>>, %arg34: memref<3x64xf32, #tpu.memory_space<vmem>>, %arg35: memref<1x64xf32, #tpu.memory_space<vmem>>, %arg36: memref<1x64xf32, #tpu.memory_space<vmem>>, %arg37: memref<1x64xf32, #tpu.memory_space<vmem>>, %arg38: memref<1x64xf32, #tpu.memory_space<vmem>>, %arg39: memref<1x64xf32, #tpu.memory_space<vmem>>, %arg40: memref<64x64xbf16, #tpu.memory_space<vmem>>, %arg41: memref<24x64xbf16, #tpu.memory_space<vmem>>, %arg42: memref<1x512xf32, #tpu.memory_space<vmem>>, %arg43: memref<1x64xf32, #tpu.memory_space<vmem>>, %arg44: memref<1x512xf32, #tpu.memory_space<vmem>>, %arg45: memref<1x64xf32, #tpu.memory_space<vmem>>, %arg46: memref<1x512xf32, #tpu.memory_space<vmem>>, %arg47: memref<1x64xf32, #tpu.memory_space<vmem>>, %arg48: memref<3x512xbf16, #tpu.memory_space<vmem>>, %arg49: memref<512x64xbf16, #tpu.memory_space<vmem>>, %arg50: memref<3x64x8xbf16, #tpu.memory_space<vmem>>, %arg51: memref<1x64xf32, #tpu.memory_space<vmem>>, %arg52: memref<32x64xbf16, #tpu.memory_space<vmem>>, %arg53: memref<1x32xf32, #tpu.memory_space<vmem>>, %arg54: memref<64x32xbf16, #tpu.memory_space<vmem>>, %arg55: memref<1x32xf32, #tpu.memory_space<vmem>>, %arg56: memref<64x32xbf16, #tpu.memory_space<vmem>>, %arg57: memref<1x8x8xf32, #tpu.memory_space<vmem>>, %arg58: memref<16x32xf32, #tpu.memory_space<vmem>>, %arg59: memref<16x32xf32, #tpu.memory_space<vmem>>, %arg60: memref<8x32xf32, #tpu.memory_space<vmem>>, %arg61: memref<16x64xf32, #tpu.memory_space<vmem>>) attributes {dimension_semantics = [#tpu.dimension_semantics<parallel>], iteration_bounds = array<i64: 2>, scalar_prefetch = 0 : i64, scratch_operands = 4 : i64, tpu.core_type = #tpu.core_type<tc>, window_params = [{transform_indices = @transform_0, window_bounds = array<i64: 1, 8, 24>}, {transform_indices = @transform_1, window_bounds = array<i64: 1, 1, 3>}, {pipeline_mode = #tpu.pipeline_mode<synchronous>, transform_indices = @transform_2, window_bounds = array<i64: 1, 64>}, {pipeline_mode = #tpu.pipeline_mode<synchronous>, transform_indices = @transform_3, window_bounds = array<i64: 1, 32>}, {pipeline_mode = #tpu.pipeline_mode<synchronous>, transform_indices = @transform_4, window_bounds = array<i64: 1, 32>}, {pipeline_mode = #tpu.pipeline_mode<synchronous>, transform_indices = @transform_5, window_bounds = array<i64: 32, 64>}, {pipeline_mode = #tpu.pipeline_mode<synchronous>, transform_indices = @transform_6, window_bounds = array<i64: 32, 32>}, {pipeline_mode = #tpu.pipeline_mode<synchronous>, transform_indices = @transform_7, window_bounds = array<i64: 32, 32>}, {pipeline_mode = #tpu.pipeline_mode<synchronous>, transform_indices = @transform_8, window_bounds = array<i64: 1, 64>}, {pipeline_mode = #tpu.pipeline_mode<synchronous>, transform_indices = @transform_9, window_bounds = array<i64: 1, 32>}, {pipeline_mode = #tpu.pipeline_mode<synchronous>, transform_indices = @transform_10, window_bounds = array<i64: 32, 64>}, {pipeline_mode = #tpu.pipeline_mode<synchronous>, transform_indices = @transform_11, window_bounds = array<i64: 64, 32>}, {pipeline_mode = #tpu.pipeline_mode<synchronous>, transform_indices = @transform_12, window_bounds = array<i64: 1, 32>}, {pipeline_mode = #tpu.pipeline_mode<synchronous>, transform_indices = @transform_13, window_bounds = array<i64: 1, 32>}, {pipeline_mode = #tpu.pipeline_mode<synchronous>, transform_indices = @transform_14, window_bounds = array<i64: 1, 32>}, {pipeline_mode = #tpu.pipeline_mode<synchronous>, transform_indices = @transform_15, window_bounds = array<i64: 1, 32>}, {pipeline_mode = #tpu.pipeline_mode<synchronous>, transform_indices = @transform_16, window_bounds = array<i64: 1, 32>}, {pipeline_mode = #tpu.pipeline_mode<synchronous>, transform_indices = @transform_17, window_bounds = array<i64: 1, 32>}, {pipeline_mode = #tpu.pipeline_mode<synchronous>, transform_indices = @transform_18, window_bounds = array<i64: 1, 64>}, {pipeline_mode = #tpu.pipeline_mode<synchronous>, transform_indices = @transform_19, window_bounds = array<i64: 1, 32>}, {pipeline_mode = #tpu.pipeline_mode<synchronous>, transform_indices = @transform_20, window_bounds = array<i64: 1, 32>}, {pipeline_mode = #tpu.pipeline_mode<synchronous>, transform_indices = @transform_21, window_bounds = array<i64: 32, 64>}, {pipeline_mode = #tpu.pipeline_mode<synchronous>, transform_indices = @transform_22, window_bounds = array<i64: 32, 32>}, {pipeline_mode = #tpu.pipeline_mode<synchronous>, transform_indices = @transform_23, window_bounds = array<i64: 32, 32>}, {pipeline_mode = #tpu.pipeline_mode<synchronous>, transform_indices = @transform_24, window_bounds = array<i64: 1, 64>}, {pipeline_mode = #tpu.pipeline_mode<synchronous>, transform_indices = @transform_25, window_bounds = array<i64: 3, 64>}, {pipeline_mode = #tpu.pipeline_mode<synchronous>, transform_indices = @transform_26, window_bounds = array<i64: 1, 64>}, {pipeline_mode = #tpu.pipeline_mode<synchronous>, transform_indices = @transform_27, window_bounds = array<i64: 1, 64>}, {pipeline_mode = #tpu.pipeline_mode<synchronous>, transform_indices = @transform_28, window_bounds = array<i64: 1, 64>}, {pipeline_mode = #tpu.pipeline_mode<synchronous>, transform_indices = @transform_29, window_bounds = array<i64: 1, 64>}, {pipeline_mode = #tpu.pipeline_mode<synchronous>, transform_indices = @transform_30, window_bounds = array<i64: 1, 64>}, {pipeline_mode = #tpu.pipeline_mode<synchronous>, transform_indices = @transform_31, window_bounds = array<i64: 64, 64>}, {pipeline_mode = #tpu.pipeline_mode<synchronous>, transform_indices = @transform_32, window_bounds = array<i64: 1, 64>}, {pipeline_mode = #tpu.pipeline_mode<synchronous>, transform_indices = @transform_33, window_bounds = array<i64: 3, 64>}, {pipeline_mode = #tpu.pipeline_mode<synchronous>, transform_indices = @transform_34, window_bounds = array<i64: 1, 64>}, {pipeline_mode = #tpu.pipeline_mode<synchronous>, transform_indices = @transform_35, window_bounds = array<i64: 1, 64>}, {pipeline_mode = #tpu.pipeline_mode<synchronous>, transform_indices = @transform_36, window_bounds = array<i64: 1, 64>}, {pipeline_mode = #tpu.pipeline_mode<synchronous>, transform_indices = @transform_37, window_bounds = array<i64: 1, 64>}, {pipeline_mode = #tpu.pipeline_mode<synchronous>, transform_indices = @transform_38, window_bounds = array<i64: 1, 64>}, {pipeline_mode = #tpu.pipeline_mode<synchronous>, transform_indices = @transform_39, window_bounds = array<i64: 64, 64>}, {pipeline_mode = #tpu.pipeline_mode<synchronous>, transform_indices = @transform_40, window_bounds = array<i64: 24, 64>}, {pipeline_mode = #tpu.pipeline_mode<synchronous>, transform_indices = @transform_41, window_bounds = array<i64: 1, 512>}, {pipeline_mode = #tpu.pipeline_mode<synchronous>, transform_indices = @transform_42, window_bounds = array<i64: 1, 64>}, {pipeline_mode = #tpu.pipeline_mode<synchronous>, transform_indices = @transform_43, window_bounds = array<i64: 1, 512>}, {pipeline_mode = #tpu.pipeline_mode<synchronous>, transform_indices = @transform_44, window_bounds = array<i64: 1, 64>}, {pipeline_mode = #tpu.pipeline_mode<synchronous>, transform_indices = @transform_45, window_bounds = array<i64: 1, 512>}, {pipeline_mode = #tpu.pipeline_mode<synchronous>, transform_indices = @transform_46, window_bounds = array<i64: 1, 64>}, {pipeline_mode = #tpu.pipeline_mode<synchronous>, transform_indices = @transform_47, window_bounds = array<i64: 3, 512>}, {pipeline_mode = #tpu.pipeline_mode<synchronous>, transform_indices = @transform_48, window_bounds = array<i64: 512, 64>}, {pipeline_mode = #tpu.pipeline_mode<synchronous>, transform_indices = @transform_49, window_bounds = array<i64: 3, 64, 8>}, {pipeline_mode = #tpu.pipeline_mode<synchronous>, transform_indices = @transform_50, window_bounds = array<i64: 1, 64>}, {pipeline_mode = #tpu.pipeline_mode<synchronous>, transform_indices = @transform_51, window_bounds = array<i64: 32, 64>}, {pipeline_mode = #tpu.pipeline_mode<synchronous>, transform_indices = @transform_52, window_bounds = array<i64: 1, 32>}, {pipeline_mode = #tpu.pipeline_mode<synchronous>, transform_indices = @transform_53, window_bounds = array<i64: 64, 32>}, {pipeline_mode = #tpu.pipeline_mode<synchronous>, transform_indices = @transform_54, window_bounds = array<i64: 1, 32>}, {pipeline_mode = #tpu.pipeline_mode<synchronous>, transform_indices = @transform_55, window_bounds = array<i64: 64, 32>}, {transform_indices = @transform_56, window_bounds = array<i64: 1, 8, 8>}]} {
    %cst = arith.constant 0.000000e+00 : f32
    %0 = vector.broadcast %cst : f32 to vector<8x64xf32>
    %c0 = arith.constant 0 : index
    %c0_0 = arith.constant 0 : index
    %1 = vector.load %arg61[%c0, %c0_0] : memref<16x64xf32, #tpu.memory_space<vmem>>, vector<8x64xf32>
    tpu.vector_store %arg61[%c0, %c0_0], %0 {strides = array<i32>} : memref<16x64xf32, #tpu.memory_space<vmem>>, vector<8x64xf32>,
    %cst_1 = arith.constant 0.000000e+00 : f32
    %2 = vector.broadcast %cst_1 : f32 to vector<8x32xf32>
    %c0_2 = arith.constant 0 : index
    %c0_3 = arith.constant 0 : index
    %3 = vector.load %arg58[%c0_2, %c0_3] : memref<16x32xf32, #tpu.memory_space<vmem>>, vector<8x32xf32>
    tpu.vector_store %arg58[%c0_2, %c0_3], %2 {strides = array<i32>} : memref<16x32xf32, #tpu.memory_space<vmem>>, vector<8x32xf32>,
    %cst_4 = arith.constant 0.000000e+00 : f32
    %4 = vector.broadcast %cst_4 : f32 to vector<8x32xf32>
    %c0_5 = arith.constant 0 : index
    %c0_6 = arith.constant 0 : index
    %5 = vector.load %arg59[%c0_5, %c0_6] : memref<16x32xf32, #tpu.memory_space<vmem>>, vector<8x32xf32>
    tpu.vector_store %arg59[%c0_5, %c0_6], %4 {strides = array<i32>} : memref<16x32xf32, #tpu.memory_space<vmem>>, vector<8x32xf32>,
    %6 = tpu.iota {dimensions = array<i32: 1>} : vector<1x32xi32>
    %c0_i32 = arith.constant 0 : i32
    %7 = vector.broadcast %c0_i32 : i32 to vector<1x32xi32>
    %8 = arith.cmpi sge, %6, %7 : vector<1x32xi32>
    %c4_i32 = arith.constant 4 : i32
    %9 = vector.broadcast %c4_i32 : i32 to vector<1x32xi32>
    %10 = arith.cmpi slt, %6, %9 : vector<1x32xi32>
    %11 = arith.andi %8, %10 : vector<1x32xi1>
    %12 = arith.extui %11 : vector<1x32xi1> to vector<1x32xi32>
    %13 = arith.sitofp %12 : vector<1x32xi32> to vector<1x32xf32>
    %c4_i32_7 = arith.constant 4 : i32
    %14 = vector.broadcast %c4_i32_7 : i32 to vector<1x32xi32>
    %15 = arith.cmpi sge, %6, %14 : vector<1x32xi32>
    %c8_i32 = arith.constant 8 : i32
    %16 = vector.broadcast %c8_i32 : i32 to vector<1x32xi32>
    %17 = arith.cmpi slt, %6, %16 : vector<1x32xi32>
    %18 = arith.andi %15, %17 : vector<1x32xi1>
    %19 = arith.extui %18 : vector<1x32xi1> to vector<1x32xi32>
    %20 = arith.sitofp %19 : vector<1x32xi32> to vector<1x32xf32>
    %c8_i32_8 = arith.constant 8 : i32
    %21 = vector.broadcast %c8_i32_8 : i32 to vector<1x32xi32>
    %22 = arith.cmpi sge, %6, %21 : vector<1x32xi32>
    %c12_i32 = arith.constant 12 : i32
    %23 = vector.broadcast %c12_i32 : i32 to vector<1x32xi32>
    %24 = arith.cmpi slt, %6, %23 : vector<1x32xi32>
    %25 = arith.andi %22, %24 : vector<1x32xi1>
    %26 = arith.extui %25 : vector<1x32xi1> to vector<1x32xi32>
    %27 = arith.sitofp %26 : vector<1x32xi32> to vector<1x32xf32>
    %c12_i32_9 = arith.constant 12 : i32
    %28 = vector.broadcast %c12_i32_9 : i32 to vector<1x32xi32>
    %29 = arith.cmpi sge, %6, %28 : vector<1x32xi32>
    %c16_i32 = arith.constant 16 : i32
    %30 = vector.broadcast %c16_i32 : i32 to vector<1x32xi32>
    %31 = arith.cmpi slt, %6, %30 : vector<1x32xi32>
    %32 = arith.andi %29, %31 : vector<1x32xi1>
    %33 = arith.extui %32 : vector<1x32xi1> to vector<1x32xi32>
    %34 = arith.sitofp %33 : vector<1x32xi32> to vector<1x32xf32>
    %c16_i32_10 = arith.constant 16 : i32
    %35 = vector.broadcast %c16_i32_10 : i32 to vector<1x32xi32>
    %36 = arith.cmpi sge, %6, %35 : vector<1x32xi32>
    %c20_i32 = arith.constant 20 : i32
    %37 = vector.broadcast %c20_i32 : i32 to vector<1x32xi32>
    %38 = arith.cmpi slt, %6, %37 : vector<1x32xi32>
    %39 = arith.andi %36, %38 : vector<1x32xi1>
    %40 = arith.extui %39 : vector<1x32xi1> to vector<1x32xi32>
    %41 = arith.sitofp %40 : vector<1x32xi32> to vector<1x32xf32>
    %c20_i32_11 = arith.constant 20 : i32
    %42 = vector.broadcast %c20_i32_11 : i32 to vector<1x32xi32>
    %43 = arith.cmpi sge, %6, %42 : vector<1x32xi32>
    %c24_i32 = arith.constant 24 : i32
    %44 = vector.broadcast %c24_i32 : i32 to vector<1x32xi32>
    %45 = arith.cmpi slt, %6, %44 : vector<1x32xi32>
    %46 = arith.andi %43, %45 : vector<1x32xi1>
    %47 = arith.extui %46 : vector<1x32xi1> to vector<1x32xi32>
    %48 = arith.sitofp %47 : vector<1x32xi32> to vector<1x32xf32>
    %c24_i32_12 = arith.constant 24 : i32
    %49 = vector.broadcast %c24_i32_12 : i32 to vector<1x32xi32>
    %50 = arith.cmpi sge, %6, %49 : vector<1x32xi32>
    %c28_i32 = arith.constant 28 : i32
    %51 = vector.broadcast %c28_i32 : i32 to vector<1x32xi32>
    %52 = arith.cmpi slt, %6, %51 : vector<1x32xi32>
    %53 = arith.andi %50, %52 : vector<1x32xi1>
    %54 = arith.extui %53 : vector<1x32xi1> to vector<1x32xi32>
    %55 = arith.sitofp %54 : vector<1x32xi32> to vector<1x32xf32>
    %c28_i32_13 = arith.constant 28 : i32
    %56 = vector.broadcast %c28_i32_13 : i32 to vector<1x32xi32>
    %57 = arith.cmpi sge, %6, %56 : vector<1x32xi32>
    %c32_i32 = arith.constant 32 : i32
    %58 = vector.broadcast %c32_i32 : i32 to vector<1x32xi32>
    %59 = arith.cmpi slt, %6, %58 : vector<1x32xi32>
    %60 = arith.andi %57, %59 : vector<1x32xi1>
    %61 = arith.extui %60 : vector<1x32xi1> to vector<1x32xi32>
    %62 = arith.sitofp %61 : vector<1x32xi32> to vector<1x32xf32>
    %c0_14 = arith.constant 0 : index
    %c0_15 = arith.constant 0 : index
    %c0_16 = arith.constant 0 : index
    %63 = vector.load %arg2[%c0_14, %c0_15, %c0_16] : memref<1x1x3xf32, #tpu.memory_space<vmem>>, vector<1x1x3xf32>
    %64 = vector.shape_cast %63 : vector<1x1x3xf32> to vector<1x3xf32>
    %65 = arith.truncf %64 : vector<1x3xf32> to vector<1x3xbf16>
    %c0_17 = arith.constant 0 : index
    %c0_18 = arith.constant 0 : index
    %66 = vector.load %arg48[%c0_17, %c0_18] : memref<3x512xbf16, #tpu.memory_space<vmem>>, vector<3x512xbf16>
    %cst_19 = arith.constant dense<0.000000e+00> : vector<1x512xf32>
    %67 = tpu.matmul %65, %66, %cst_19 {dimension_numbers = #tpu.dot_dimension_numbers<[1], [0], [0], [1], [0, 0, 1, 1], [], []>} : vector<1x3xbf16>, vector<3x512xbf16>, vector<1x512xf32> -> vector<1x512xf32>
    %c0_20 = arith.constant 0 : index
    %c0_21 = arith.constant 0 : index
    %68 = vector.load %arg42[%c0_20, %c0_21] : memref<1x512xf32, #tpu.memory_space<vmem>>, vector<1x512xf32>
    %69 = arith.addf %67, %68 : vector<1x512xf32>
    %cst_22 = arith.constant dense<0.000000e+00> : vector<1xf32>
    %70 = vector.multi_reduction <add>, %69, %cst_22 [1] : vector<1x512xf32> to vector<1xf32>
    %71 = vector.shape_cast %70 : vector<1xf32> to vector<1x1xf32>
    %cst_23 = arith.constant 5.120000e+02 : f32
    %72 = vector.broadcast %cst_23 : f32 to vector<1x1xf32>
    %73 = arith.divf %71, %72 : vector<1x1xf32>
    %74 = vector.broadcast %73 : vector<1x1xf32> to vector<1x512xf32>
    %75 = arith.subf %69, %74 : vector<1x512xf32>
    %76 = arith.mulf %75, %75 : vector<1x512xf32>
    %cst_24 = arith.constant dense<0.000000e+00> : vector<1xf32>
    %77 = vector.multi_reduction <add>, %76, %cst_24 [1] : vector<1x512xf32> to vector<1xf32>
    %78 = vector.shape_cast %77 : vector<1xf32> to vector<1x1xf32>
    %cst_25 = arith.constant 5.120000e+02 : f32
    %79 = vector.broadcast %cst_25 : f32 to vector<1x1xf32>
    %80 = arith.divf %78, %79 : vector<1x1xf32>
    %cst_26 = arith.constant 9.99999974E-6 : f32
    %81 = vector.broadcast %cst_26 : f32 to vector<1x1xf32>
    %82 = arith.addf %80, %81 : vector<1x1xf32>
    %83 = math.rsqrt %82 : vector<1x1xf32>
    %84 = vector.broadcast %83 : vector<1x1xf32> to vector<1x512xf32>
    %85 = arith.mulf %75, %84 : vector<1x512xf32>
    %c0_27 = arith.constant 0 : index
    %c0_28 = arith.constant 0 : index
    %86 = vector.load %arg46[%c0_27, %c0_28] : memref<1x512xf32, #tpu.memory_space<vmem>>, vector<1x512xf32>
    %87 = arith.mulf %85, %86 : vector<1x512xf32>
    %c0_29 = arith.constant 0 : index
    %c0_30 = arith.constant 0 : index
    %88 = vector.load %arg44[%c0_29, %c0_30] : memref<1x512xf32, #tpu.memory_space<vmem>>, vector<1x512xf32>
    %89 = arith.addf %87, %88 : vector<1x512xf32>
    %cst_31 = arith.constant 0.000000e+00 : f32
    %90 = vector.broadcast %cst_31 : f32 to vector<1x512xf32>
    %91 = arith.maximumf %89, %90 : vector<1x512xf32>
    %92 = arith.truncf %91 : vector<1x512xf32> to vector<1x512xbf16>
    %c0_32 = arith.constant 0 : index
    %c0_33 = arith.constant 0 : index
    %93 = vector.load %arg49[%c0_32, %c0_33] : memref<512x64xbf16, #tpu.memory_space<vmem>>, vector<512x64xbf16>
    %cst_34 = arith.constant dense<0.000000e+00> : vector<1x64xf32>
    %94 = tpu.matmul %92, %93, %cst_34 {dimension_numbers = #tpu.dot_dimension_numbers<[1], [0], [0], [1], [0, 0, 1, 1], [], []>} : vector<1x512xbf16>, vector<512x64xbf16>, vector<1x64xf32> -> vector<1x64xf32>
    %c0_35 = arith.constant 0 : index
    %c0_36 = arith.constant 0 : index
    %95 = vector.load %arg43[%c0_35, %c0_36] : memref<1x64xf32, #tpu.memory_space<vmem>>, vector<1x64xf32>
    %96 = arith.addf %94, %95 : vector<1x64xf32>
    %cst_37 = arith.constant dense<0.000000e+00> : vector<1xf32>
    %97 = vector.multi_reduction <add>, %96, %cst_37 [1] : vector<1x64xf32> to vector<1xf32>
    %98 = vector.shape_cast %97 : vector<1xf32> to vector<1x1xf32>
    %cst_38 = arith.constant 6.400000e+01 : f32
    %99 = vector.broadcast %cst_38 : f32 to vector<1x1xf32>
    %100 = arith.divf %98, %99 : vector<1x1xf32>
    %101 = vector.broadcast %100 : vector<1x1xf32> to vector<1x64xf32>
    %102 = arith.subf %96, %101 : vector<1x64xf32>
    %103 = arith.mulf %102, %102 : vector<1x64xf32>
    %cst_39 = arith.constant dense<0.000000e+00> : vector<1xf32>
    %104 = vector.multi_reduction <add>, %103, %cst_39 [1] : vector<1x64xf32> to vector<1xf32>
    %105 = vector.shape_cast %104 : vector<1xf32> to vector<1x1xf32>
    %cst_40 = arith.constant 6.400000e+01 : f32
    %106 = vector.broadcast %cst_40 : f32 to vector<1x1xf32>
    %107 = arith.divf %105, %106 : vector<1x1xf32>
    %cst_41 = arith.constant 9.99999974E-6 : f32
    %108 = vector.broadcast %cst_41 : f32 to vector<1x1xf32>
    %109 = arith.addf %107, %108 : vector<1x1xf32>
    %110 = math.rsqrt %109 : vector<1x1xf32>
    %111 = vector.broadcast %110 : vector<1x1xf32> to vector<1x64xf32>
    %112 = arith.mulf %102, %111 : vector<1x64xf32>
    %c0_42 = arith.constant 0 : index
    %c0_43 = arith.constant 0 : index
    %113 = vector.load %arg47[%c0_42, %c0_43] : memref<1x64xf32, #tpu.memory_space<vmem>>, vector<1x64xf32>
    %114 = arith.mulf %112, %113 : vector<1x64xf32>
    %c0_44 = arith.constant 0 : index
    %c0_45 = arith.constant 0 : index
    %115 = vector.load %arg45[%c0_44, %c0_45] : memref<1x64xf32, #tpu.memory_space<vmem>>, vector<1x64xf32>
    %116 = arith.addf %114, %115 : vector<1x64xf32>
    %cst_46 = arith.constant 0.000000e+00 : f32
    %117 = vector.broadcast %cst_46 : f32 to vector<1x64xf32>
    %118 = arith.maximumf %116, %117 : vector<1x64xf32>
    %c0_47 = arith.constant 0 : index
    %c0_48 = arith.constant 0 : index
    %c0_49 = arith.constant 0 : index
    %119 = vector.load %arg1[%c0_47, %c0_48, %c0_49] : memref<1x8x24xf32, #tpu.memory_space<vmem>>, vector<1x8x24xf32>
    %120 = vector.shape_cast %119 : vector<1x8x24xf32> to vector<8x24xf32>
    %121 = arith.truncf %120 : vector<8x24xf32> to vector<8x24xbf16>
    %c0_50 = arith.constant 0 : index
    %c0_51 = arith.constant 0 : index
    %122 = vector.load %arg41[%c0_50, %c0_51] : memref<24x64xbf16, #tpu.memory_space<vmem>>, vector<24x64xbf16>
    %cst_52 = arith.constant dense<0.000000e+00> : vector<8x64xf32>
    %123 = tpu.matmul %121, %122, %cst_52 {dimension_numbers = #tpu.dot_dimension_numbers<[1], [0], [0], [1], [0, 0, 1, 1], [], []>} : vector<8x24xbf16>, vector<24x64xbf16>, vector<8x64xf32> -> vector<8x64xf32>
    %cst_53 = arith.constant 0.000000e+00 : f32
    %124 = vector.broadcast %cst_53 : f32 to vector<8x64xf32>
    %125 = arith.maximumf %123, %124 : vector<8x64xf32>
    %c8 = arith.constant 8 : index
    %c0_54 = arith.constant 0 : index
    %126 = vector.load %arg61[%c8, %c0_54] : memref<16x64xf32, #tpu.memory_space<vmem>>, vector<8x64xf32>
    tpu.vector_store %arg61[%c8, %c0_54], %125 {strides = array<i32>} : memref<16x64xf32, #tpu.memory_space<vmem>>, vector<8x64xf32>,
    %c7 = arith.constant 7 : index
    %c0_55 = arith.constant 0 : index
    %127 = vector.load %arg61[%c7, %c0_55] : memref<16x64xf32, #tpu.memory_space<vmem>>, vector<8x64xf32>
    %c8_56 = arith.constant 8 : index
    %c0_57 = arith.constant 0 : index
    %128 = vector.load %arg61[%c8_56, %c0_57] : memref<16x64xf32, #tpu.memory_space<vmem>>, vector<8x64xf32>
    tpu.vector_store %arg61[%c8_56, %c0_57], %125 {strides = array<i32>} : memref<16x64xf32, #tpu.memory_space<vmem>>, vector<8x64xf32>,
    %c6 = arith.constant 6 : index
    %c0_58 = arith.constant 0 : index
    %129 = vector.load %arg61[%c6, %c0_58] : memref<16x64xf32, #tpu.memory_space<vmem>>, vector<8x64xf32>
    %c0_59 = arith.constant 0 : index
    %c0_60 = arith.constant 0 : index
    %130 = vector.load %arg25[%c0_59, %c0_60] : memref<1x64xf32, #tpu.memory_space<vmem>>, vector<1x64xf32>
    %c2 = arith.constant 2 : index
    %c0_61 = arith.constant 0 : index
    %131 = vector.load %arg26[%c2, %c0_61] : memref<3x64xf32, #tpu.memory_space<vmem>>, vector<1x64xf32>
    %132 = vector.broadcast %131 : vector<1x64xf32> to vector<8x64xf32>
    %133 = arith.mulf %132, %125 : vector<8x64xf32>
    %134 = vector.broadcast %130 : vector<1x64xf32> to vector<8x64xf32>
    %135 = arith.addf %134, %133 : vector<8x64xf32>
    %c1 = arith.constant 1 : index
    %c0_62 = arith.constant 0 : index
    %136 = vector.load %arg26[%c1, %c0_62] : memref<3x64xf32, #tpu.memory_space<vmem>>, vector<1x64xf32>
    %137 = vector.broadcast %136 : vector<1x64xf32> to vector<8x64xf32>
    %138 = arith.mulf %137, %127 : vector<8x64xf32>
    %139 = arith.addf %135, %138 : vector<8x64xf32>
    %c0_63 = arith.constant 0 : index
    %c0_64 = arith.constant 0 : index
    %140 = vector.load %arg26[%c0_63, %c0_64] : memref<3x64xf32, #tpu.memory_space<vmem>>, vector<1x64xf32>
    %141 = vector.broadcast %140 : vector<1x64xf32> to vector<8x64xf32>
    %142 = arith.mulf %141, %129 : vector<8x64xf32>
    %143 = arith.addf %139, %142 : vector<8x64xf32>
    %cst_65 = arith.constant dense<0.000000e+00> : vector<8xf32>
    %144 = vector.multi_reduction <add>, %143, %cst_65 [1] : vector<8x64xf32> to vector<8xf32>
    %145 = vector.shape_cast %144 : vector<8xf32> to vector<8x1xf32>
    %cst_66 = arith.constant 6.400000e+01 : f32
    %146 = vector.broadcast %cst_66 : f32 to vector<8x1xf32>
    %147 = arith.divf %145, %146 : vector<8x1xf32>
    %148 = vector.broadcast %147 : vector<8x1xf32> to vector<8x64xf32>
    %149 = arith.subf %143, %148 : vector<8x64xf32>
    %150 = arith.mulf %149, %149 : vector<8x64xf32>
    %cst_67 = arith.constant dense<0.000000e+00> : vector<8xf32>
    %151 = vector.multi_reduction <add>, %150, %cst_67 [1] : vector<8x64xf32> to vector<8xf32>
    %152 = vector.shape_cast %151 : vector<8xf32> to vector<8x1xf32>
    %cst_68 = arith.constant 6.400000e+01 : f32
    %153 = vector.broadcast %cst_68 : f32 to vector<8x1xf32>
    %154 = arith.divf %152, %153 : vector<8x1xf32>
    %cst_69 = arith.constant 9.99999974E-6 : f32
    %155 = vector.broadcast %cst_69 : f32 to vector<8x1xf32>
    %156 = arith.addf %154, %155 : vector<8x1xf32>
    %157 = math.rsqrt %156 : vector<8x1xf32>
    %158 = vector.broadcast %157 : vector<8x1xf32> to vector<8x64xf32>
    %159 = arith.mulf %149, %158 : vector<8x64xf32>
    %c0_70 = arith.constant 0 : index
    %c0_71 = arith.constant 0 : index
    %160 = vector.load %arg28[%c0_70, %c0_71] : memref<1x64xf32, #tpu.memory_space<vmem>>, vector<1x64xf32>
    %161 = vector.broadcast %160 : vector<1x64xf32> to vector<8x64xf32>
    %162 = arith.mulf %159, %161 : vector<8x64xf32>
    %c0_72 = arith.constant 0 : index
    %c0_73 = arith.constant 0 : index
    %163 = vector.load %arg27[%c0_72, %c0_73] : memref<1x64xf32, #tpu.memory_space<vmem>>, vector<1x64xf32>
    %164 = vector.broadcast %163 : vector<1x64xf32> to vector<8x64xf32>
    %165 = arith.addf %162, %164 : vector<8x64xf32>
    %cst_74 = arith.constant 0.000000e+00 : f32
    %166 = vector.broadcast %cst_74 : f32 to vector<8x64xf32>
    %167 = arith.maximumf %165, %166 : vector<8x64xf32>
    %168 = arith.truncf %167 : vector<8x64xf32> to vector<8x64xbf16>
    %c0_75 = arith.constant 0 : index
    %c0_76 = arith.constant 0 : index
    %169 = vector.load %arg32[%c0_75, %c0_76] : memref<64x64xbf16, #tpu.memory_space<vmem>>, vector<64x64xbf16>
    %cst_77 = arith.constant dense<0.000000e+00> : vector<8x64xf32>
    %170 = tpu.matmul %168, %169, %cst_77 {dimension_numbers = #tpu.dot_dimension_numbers<[1], [0], [0], [1], [0, 0, 1, 1], [], []>} : vector<8x64xbf16>, vector<64x64xbf16>, vector<8x64xf32> -> vector<8x64xf32>
    %c0_78 = arith.constant 0 : index
    %c0_79 = arith.constant 0 : index
    %171 = vector.load %arg31[%c0_78, %c0_79] : memref<1x64xf32, #tpu.memory_space<vmem>>, vector<1x64xf32>
    %172 = vector.broadcast %171 : vector<1x64xf32> to vector<8x64xf32>
    %173 = arith.addf %170, %172 : vector<8x64xf32>
    %cst_80 = arith.constant dense<0.000000e+00> : vector<8xf32>
    %174 = vector.multi_reduction <add>, %173, %cst_80 [1] : vector<8x64xf32> to vector<8xf32>
    %175 = vector.shape_cast %174 : vector<8xf32> to vector<8x1xf32>
    %cst_81 = arith.constant 6.400000e+01 : f32
    %176 = vector.broadcast %cst_81 : f32 to vector<8x1xf32>
    %177 = arith.divf %175, %176 : vector<8x1xf32>
    %178 = vector.broadcast %177 : vector<8x1xf32> to vector<8x64xf32>
    %179 = arith.subf %173, %178 : vector<8x64xf32>
    %180 = arith.mulf %179, %179 : vector<8x64xf32>
    %cst_82 = arith.constant dense<0.000000e+00> : vector<8xf32>
    %181 = vector.multi_reduction <add>, %180, %cst_82 [1] : vector<8x64xf32> to vector<8xf32>
    %182 = vector.shape_cast %181 : vector<8xf32> to vector<8x1xf32>
    %cst_83 = arith.constant 6.400000e+01 : f32
    %183 = vector.broadcast %cst_83 : f32 to vector<8x1xf32>
    %184 = arith.divf %182, %183 : vector<8x1xf32>
    %cst_84 = arith.constant 9.99999974E-6 : f32
    %185 = vector.broadcast %cst_84 : f32 to vector<8x1xf32>
    %186 = arith.addf %184, %185 : vector<8x1xf32>
    %187 = math.rsqrt %186 : vector<8x1xf32>
    %188 = vector.broadcast %187 : vector<8x1xf32> to vector<8x64xf32>
    %189 = arith.mulf %179, %188 : vector<8x64xf32>
    %c0_85 = arith.constant 0 : index
    %c0_86 = arith.constant 0 : index
    %190 = vector.load %arg30[%c0_85, %c0_86] : memref<1x64xf32, #tpu.memory_space<vmem>>, vector<1x64xf32>
    %191 = vector.broadcast %190 : vector<1x64xf32> to vector<8x64xf32>
    %192 = arith.mulf %189, %191 : vector<8x64xf32>
    %c0_87 = arith.constant 0 : index
    %c0_88 = arith.constant 0 : index
    %193 = vector.load %arg29[%c0_87, %c0_88] : memref<1x64xf32, #tpu.memory_space<vmem>>, vector<1x64xf32>
    %194 = vector.broadcast %193 : vector<1x64xf32> to vector<8x64xf32>
    %195 = arith.addf %192, %194 : vector<8x64xf32>
    %cst_89 = arith.constant 0.000000e+00 : f32
    %196 = vector.broadcast %cst_89 : f32 to vector<8x64xf32>
    %197 = arith.maximumf %195, %196 : vector<8x64xf32>
    %198 = arith.addf %125, %197 : vector<8x64xf32>
    %c8_90 = arith.constant 8 : index
    %c0_91 = arith.constant 0 : index
    %199 = vector.load %arg61[%c8_90, %c0_91] : memref<16x64xf32, #tpu.memory_space<vmem>>, vector<8x64xf32>
    tpu.vector_store %arg61[%c8_90, %c0_91], %198 {strides = array<i32>} : memref<16x64xf32, #tpu.memory_space<vmem>>, vector<8x64xf32>,
    %c6_92 = arith.constant 6 : index
    %c0_93 = arith.constant 0 : index
    %200 = vector.load %arg61[%c6_92, %c0_93] : memref<16x64xf32, #tpu.memory_space<vmem>>, vector<8x64xf32>
    %c8_94 = arith.constant 8 : index
    %c0_95 = arith.constant 0 : index
    %201 = vector.load %arg61[%c8_94, %c0_95] : memref<16x64xf32, #tpu.memory_space<vmem>>, vector<8x64xf32>
    tpu.vector_store %arg61[%c8_94, %c0_95], %198 {strides = array<i32>} : memref<16x64xf32, #tpu.memory_space<vmem>>, vector<8x64xf32>,
    %c4 = arith.constant 4 : index
    %c0_96 = arith.constant 0 : index
    %202 = vector.load %arg61[%c4, %c0_96] : memref<16x64xf32, #tpu.memory_space<vmem>>, vector<8x64xf32>
    %c0_97 = arith.constant 0 : index
    %c0_98 = arith.constant 0 : index
    %203 = vector.load %arg33[%c0_97, %c0_98] : memref<1x64xf32, #tpu.memory_space<vmem>>, vector<1x64xf32>
    %c2_99 = arith.constant 2 : index
    %c0_100 = arith.constant 0 : index
    %204 = vector.load %arg34[%c2_99, %c0_100] : memref<3x64xf32, #tpu.memory_space<vmem>>, vector<1x64xf32>
    %205 = vector.broadcast %204 : vector<1x64xf32> to vector<8x64xf32>
    %206 = arith.mulf %205, %198 : vector<8x64xf32>
    %207 = vector.broadcast %203 : vector<1x64xf32> to vector<8x64xf32>
    %208 = arith.addf %207, %206 : vector<8x64xf32>
    %c1_101 = arith.constant 1 : index
    %c0_102 = arith.constant 0 : index
    %209 = vector.load %arg34[%c1_101, %c0_102] : memref<3x64xf32, #tpu.memory_space<vmem>>, vector<1x64xf32>
    %210 = vector.broadcast %209 : vector<1x64xf32> to vector<8x64xf32>
    %211 = arith.mulf %210, %200 : vector<8x64xf32>
    %212 = arith.addf %208, %211 : vector<8x64xf32>
    %c0_103 = arith.constant 0 : index
    %c0_104 = arith.constant 0 : index
    %213 = vector.load %arg34[%c0_103, %c0_104] : memref<3x64xf32, #tpu.memory_space<vmem>>, vector<1x64xf32>
    %214 = vector.broadcast %213 : vector<1x64xf32> to vector<8x64xf32>
    %215 = arith.mulf %214, %202 : vector<8x64xf32>
    %216 = arith.addf %212, %215 : vector<8x64xf32>
    %cst_105 = arith.constant dense<0.000000e+00> : vector<8xf32>
    %217 = vector.multi_reduction <add>, %216, %cst_105 [1] : vector<8x64xf32> to vector<8xf32>
    %218 = vector.shape_cast %217 : vector<8xf32> to vector<8x1xf32>
    %cst_106 = arith.constant 6.400000e+01 : f32
    %219 = vector.broadcast %cst_106 : f32 to vector<8x1xf32>
    %220 = arith.divf %218, %219 : vector<8x1xf32>
    %221 = vector.broadcast %220 : vector<8x1xf32> to vector<8x64xf32>
    %222 = arith.subf %216, %221 : vector<8x64xf32>
    %223 = arith.mulf %222, %222 : vector<8x64xf32>
    %cst_107 = arith.constant dense<0.000000e+00> : vector<8xf32>
    %224 = vector.multi_reduction <add>, %223, %cst_107 [1] : vector<8x64xf32> to vector<8xf32>
    %225 = vector.shape_cast %224 : vector<8xf32> to vector<8x1xf32>
    %cst_108 = arith.constant 6.400000e+01 : f32
    %226 = vector.broadcast %cst_108 : f32 to vector<8x1xf32>
    %227 = arith.divf %225, %226 : vector<8x1xf32>
    %cst_109 = arith.constant 9.99999974E-6 : f32
    %228 = vector.broadcast %cst_109 : f32 to vector<8x1xf32>
    %229 = arith.addf %227, %228 : vector<8x1xf32>
    %230 = math.rsqrt %229 : vector<8x1xf32>
    %231 = vector.broadcast %230 : vector<8x1xf32> to vector<8x64xf32>
    %232 = arith.mulf %222, %231 : vector<8x64xf32>
    %c0_110 = arith.constant 0 : index
    %c0_111 = arith.constant 0 : index
    %233 = vector.load %arg36[%c0_110, %c0_111] : memref<1x64xf32, #tpu.memory_space<vmem>>, vector<1x64xf32>
    %234 = vector.broadcast %233 : vector<1x64xf32> to vector<8x64xf32>
    %235 = arith.mulf %232, %234 : vector<8x64xf32>
    %c0_112 = arith.constant 0 : index
    %c0_113 = arith.constant 0 : index
    %236 = vector.load %arg35[%c0_112, %c0_113] : memref<1x64xf32, #tpu.memory_space<vmem>>, vector<1x64xf32>
    %237 = vector.broadcast %236 : vector<1x64xf32> to vector<8x64xf32>
    %238 = arith.addf %235, %237 : vector<8x64xf32>
    %cst_114 = arith.constant 0.000000e+00 : f32
    %239 = vector.broadcast %cst_114 : f32 to vector<8x64xf32>
    %240 = arith.maximumf %238, %239 : vector<8x64xf32>
    %241 = arith.truncf %240 : vector<8x64xf32> to vector<8x64xbf16>
    %c0_115 = arith.constant 0 : index
    %c0_116 = arith.constant 0 : index
    %242 = vector.load %arg40[%c0_115, %c0_116] : memref<64x64xbf16, #tpu.memory_space<vmem>>, vector<64x64xbf16>
    %cst_117 = arith.constant dense<0.000000e+00> : vector<8x64xf32>
    %243 = tpu.matmul %241, %242, %cst_117 {dimension_numbers = #tpu.dot_dimension_numbers<[1], [0], [0], [1], [0, 0, 1, 1], [], []>} : vector<8x64xbf16>, vector<64x64xbf16>, vector<8x64xf32> -> vector<8x64xf32>
    %c0_118 = arith.constant 0 : index
    %c0_119 = arith.constant 0 : index
    %244 = vector.load %arg39[%c0_118, %c0_119] : memref<1x64xf32, #tpu.memory_space<vmem>>, vector<1x64xf32>
    %245 = vector.broadcast %244 : vector<1x64xf32> to vector<8x64xf32>
    %246 = arith.addf %243, %245 : vector<8x64xf32>
    %cst_120 = arith.constant dense<0.000000e+00> : vector<8xf32>
    %247 = vector.multi_reduction <add>, %246, %cst_120 [1] : vector<8x64xf32> to vector<8xf32>
    %248 = vector.shape_cast %247 : vector<8xf32> to vector<8x1xf32>
    %cst_121 = arith.constant 6.400000e+01 : f32
    %249 = vector.broadcast %cst_121 : f32 to vector<8x1xf32>
    %250 = arith.divf %248, %249 : vector<8x1xf32>
    %251 = vector.broadcast %250 : vector<8x1xf32> to vector<8x64xf32>
    %252 = arith.subf %246, %251 : vector<8x64xf32>
    %253 = arith.mulf %252, %252 : vector<8x64xf32>
    %cst_122 = arith.constant dense<0.000000e+00> : vector<8xf32>
    %254 = vector.multi_reduction <add>, %253, %cst_122 [1] : vector<8x64xf32> to vector<8xf32>
    %255 = vector.shape_cast %254 : vector<8xf32> to vector<8x1xf32>
    %cst_123 = arith.constant 6.400000e+01 : f32
    %256 = vector.broadcast %cst_123 : f32 to vector<8x1xf32>
    %257 = arith.divf %255, %256 : vector<8x1xf32>
    %cst_124 = arith.constant 9.99999974E-6 : f32
    %258 = vector.broadcast %cst_124 : f32 to vector<8x1xf32>
    %259 = arith.addf %257, %258 : vector<8x1xf32>
    %260 = math.rsqrt %259 : vector<8x1xf32>
    %261 = vector.broadcast %260 : vector<8x1xf32> to vector<8x64xf32>
    %262 = arith.mulf %252, %261 : vector<8x64xf32>
    %c0_125 = arith.constant 0 : index
    %c0_126 = arith.constant 0 : index
    %263 = vector.load %arg38[%c0_125, %c0_126] : memref<1x64xf32, #tpu.memory_space<vmem>>, vector<1x64xf32>
    %264 = vector.broadcast %263 : vector<1x64xf32> to vector<8x64xf32>
    %265 = arith.mulf %262, %264 : vector<8x64xf32>
    %c0_127 = arith.constant 0 : index
    %c0_128 = arith.constant 0 : index
    %266 = vector.load %arg37[%c0_127, %c0_128] : memref<1x64xf32, #tpu.memory_space<vmem>>, vector<1x64xf32>
    %267 = vector.broadcast %266 : vector<1x64xf32> to vector<8x64xf32>
    %268 = arith.addf %265, %267 : vector<8x64xf32>
    %cst_129 = arith.constant 0.000000e+00 : f32
    %269 = vector.broadcast %cst_129 : f32 to vector<8x64xf32>
    %270 = arith.maximumf %268, %269 : vector<8x64xf32>
    %271 = arith.addf %198, %270 : vector<8x64xf32>
    %272 = vector.broadcast %118 : vector<1x64xf32> to vector<8x64xf32>
    %273 = arith.mulf %272, %271 : vector<8x64xf32>
    %274 = arith.truncf %271 : vector<8x64xf32> to vector<8x64xbf16>
    %c0_130 = arith.constant 0 : index
    %c0_131 = arith.constant 0 : index
    %275 = vector.load %arg54[%c0_130, %c0_131] : memref<64x32xbf16, #tpu.memory_space<vmem>>, vector<64x32xbf16>
    %cst_132 = arith.constant dense<0.000000e+00> : vector<8x32xf32>
    %276 = tpu.matmul %274, %275, %cst_132 {dimension_numbers = #tpu.dot_dimension_numbers<[1], [0], [0], [1], [0, 0, 1, 1], [], []>} : vector<8x64xbf16>, vector<64x32xbf16>, vector<8x32xf32> -> vector<8x32xf32>
    %c0_133 = arith.constant 0 : index
    %c0_134 = arith.constant 0 : index
    %277 = vector.load %arg53[%c0_133, %c0_134] : memref<1x32xf32, #tpu.memory_space<vmem>>, vector<1x32xf32>
    %278 = vector.broadcast %277 : vector<1x32xf32> to vector<8x32xf32>
    %279 = arith.addf %276, %278 : vector<8x32xf32>
    %cst_135 = arith.constant 0.000000e+00 : f32
    %280 = vector.broadcast %cst_135 : f32 to vector<8x32xf32>
    %281 = arith.maximumf %279, %280 : vector<8x32xf32>
    %282 = arith.truncf %273 : vector<8x64xf32> to vector<8x64xbf16>
    %c0_136 = arith.constant 0 : index
    %c0_137 = arith.constant 0 : index
    %283 = vector.load %arg56[%c0_136, %c0_137] : memref<64x32xbf16, #tpu.memory_space<vmem>>, vector<64x32xbf16>
    %cst_138 = arith.constant dense<0.000000e+00> : vector<8x32xf32>
    %284 = tpu.matmul %282, %283, %cst_138 {dimension_numbers = #tpu.dot_dimension_numbers<[1], [0], [0], [1], [0, 0, 1, 1], [], []>} : vector<8x64xbf16>, vector<64x32xbf16>, vector<8x32xf32> -> vector<8x32xf32>
    %c0_139 = arith.constant 0 : index
    %c0_140 = arith.constant 0 : index
    %285 = vector.load %arg55[%c0_139, %c0_140] : memref<1x32xf32, #tpu.memory_space<vmem>>, vector<1x32xf32>
    %286 = vector.broadcast %285 : vector<1x32xf32> to vector<8x32xf32>
    %287 = arith.addf %284, %286 : vector<8x32xf32>
    %cst_141 = arith.constant 0.000000e+00 : f32
    %288 = vector.broadcast %cst_141 : f32 to vector<8x32xf32>
    %289 = arith.maximumf %287, %288 : vector<8x32xf32>
    %c8_142 = arith.constant 8 : index
    %c0_143 = arith.constant 0 : index
    %290 = vector.load %arg58[%c8_142, %c0_143] : memref<16x32xf32, #tpu.memory_space<vmem>>, vector<8x32xf32>
    tpu.vector_store %arg58[%c8_142, %c0_143], %281 {strides = array<i32>} : memref<16x32xf32, #tpu.memory_space<vmem>>, vector<8x32xf32>,
    %c8_144 = arith.constant 8 : index
    %c0_145 = arith.constant 0 : index
    %291 = vector.load %arg59[%c8_144, %c0_145] : memref<16x32xf32, #tpu.memory_space<vmem>>, vector<8x32xf32>
    tpu.vector_store %arg59[%c8_144, %c0_145], %289 {strides = array<i32>} : memref<16x32xf32, #tpu.memory_space<vmem>>, vector<8x32xf32>,
    %c0_146 = arith.constant 0 : index
    %c0_147 = arith.constant 0 : index
    %292 = vector.load %arg59[%c0_146, %c0_147] : memref<16x32xf32, #tpu.memory_space<vmem>>, vector<12x32xf32>
    %c8_148 = arith.constant 8 : index
    %c0_149 = arith.constant 0 : index
    %293 = vector.load %arg59[%c8_148, %c0_149] : memref<16x32xf32, #tpu.memory_space<vmem>>, vector<4x32xf32>
    %c0_150 = arith.constant 0 : index
    %c0_151 = arith.constant 0 : index
    %294 = vector.load %arg58[%c0_150, %c0_151] : memref<16x32xf32, #tpu.memory_space<vmem>>, vector<12x32xf32>
    %295 = arith.truncf %293 : vector<4x32xf32> to vector<4x32xbf16>
    %c0_152 = arith.constant 0 : index
    %c0_153 = arith.constant 0 : index
    %296 = vector.load %arg24[%c0_152, %c0_153] : memref<32x32xbf16, #tpu.memory_space<vmem>>, vector<32x32xbf16>
    %cst_154 = arith.constant dense<0.000000e+00> : vector<4x32xf32>
    %297 = tpu.matmul %295, %296, %cst_154 {dimension_numbers = #tpu.dot_dimension_numbers<[1], [0], [0], [1], [0, 0, 1, 1], [], []>} : vector<4x32xbf16>, vector<32x32xbf16>, vector<4x32xf32> -> vector<4x32xf32>
    %c0_155 = arith.constant 0 : index
    %c0_156 = arith.constant 0 : index
    %298 = vector.load %arg21[%c0_155, %c0_156] : memref<1x32xf32, #tpu.memory_space<vmem>>, vector<1x32xf32>
    %299 = vector.broadcast %298 : vector<1x32xf32> to vector<4x32xf32>
    %300 = arith.addf %297, %299 : vector<4x32xf32>
    %301 = arith.truncf %292 : vector<12x32xf32> to vector<12x32xbf16>
    %c0_157 = arith.constant 0 : index
    %c0_158 = arith.constant 0 : index
    %302 = vector.load %arg22[%c0_157, %c0_158] : memref<32x64xbf16, #tpu.memory_space<vmem>>, vector<32x64xbf16>
    %cst_159 = arith.constant dense<0.000000e+00> : vector<12x64xf32>
    %303 = tpu.matmul %301, %302, %cst_159 {dimension_numbers = #tpu.dot_dimension_numbers<[1], [0], [0], [1], [0, 0, 1, 1], [], []>} : vector<12x32xbf16>, vector<32x64xbf16>, vector<12x64xf32> -> vector<12x64xf32>
    %c0_160 = arith.constant 0 : index
    %c0_161 = arith.constant 0 : index
    %304 = vector.load %arg19[%c0_160, %c0_161] : memref<1x64xf32, #tpu.memory_space<vmem>>, vector<1x64xf32>
    %305 = vector.broadcast %304 : vector<1x64xf32> to vector<12x64xf32>
    %306 = arith.addf %303, %305 : vector<12x64xf32>
    %307 = vector.extract_strided_slice %306 {offsets = [0, 0], sizes = [12, 32], strides = [1, 1]} : vector<12x64xf32> to vector<12x32xf32>
    %308 = vector.extract_strided_slice %306 {offsets = [0, 32], sizes = [12, 32], strides = [1, 1]} : vector<12x64xf32> to vector<12x32xf32>
    %cst_162 = arith.constant 5.000000e-01 : f32
    %309 = vector.broadcast %cst_162 : f32 to vector<4x32xf32>
    %310 = arith.mulf %300, %309 : vector<4x32xf32>
    %311 = arith.truncf %307 : vector<12x32xf32> to vector<12x32xbf16>
    %312 = arith.truncf %308 : vector<12x32xf32> to vector<12x32xbf16>
    %cst_163 = arith.constant 0.000000e+00 : f32
    %313 = vector.broadcast %cst_163 : f32 to vector<4x32xf32>
    %314 = vector.broadcast %13 : vector<1x32xf32> to vector<4x32xf32>
    %315 = arith.mulf %310, %314 : vector<4x32xf32>
    %316 = arith.truncf %315 : vector<4x32xf32> to vector<4x32xbf16>
    %cst_164 = arith.constant dense<0.000000e+00> : vector<4x12xf32>
    %317 = tpu.matmul %316, %311, %cst_164 {dimension_numbers = #tpu.dot_dimension_numbers<[1], [1], [0], [0], [0, 0, 1, 0], [], []>} : vector<4x32xbf16>, vector<12x32xbf16>, vector<4x12xf32> -> vector<4x12xf32>
    %cst_165 = arith.constant dense<0xFF800000> : vector<4xf32>
    %318 = vector.multi_reduction <maximumf>, %317, %cst_165 [1] : vector<4x12xf32> to vector<4xf32>
    %319 = vector.shape_cast %318 : vector<4xf32> to vector<4x1xf32>
    %320 = vector.broadcast %319 : vector<4x1xf32> to vector<4x12xf32>
    %321 = arith.subf %317, %320 : vector<4x12xf32>
    %322 = math.exp %321 : vector<4x12xf32>
    %cst_166 = arith.constant dense<0.000000e+00> : vector<4xf32>
    %323 = vector.multi_reduction <add>, %322, %cst_166 [1] : vector<4x12xf32> to vector<4xf32>
    %324 = vector.shape_cast %323 : vector<4xf32> to vector<4x1xf32>
    %325 = tpu.reciprocal %324 {approx = true} : vector<4x1xf32> -> vector<4x1xf32>
    %326 = vector.broadcast %325 : vector<4x1xf32> to vector<4x12xf32>
    %327 = arith.mulf %322, %326 : vector<4x12xf32>
    %328 = arith.truncf %327 : vector<4x12xf32> to vector<4x12xbf16>
    %cst_167 = arith.constant dense<0.000000e+00> : vector<4x32xf32>
    %329 = tpu.matmul %328, %312, %cst_167 {dimension_numbers = #tpu.dot_dimension_numbers<[1], [0], [0], [1], [0, 0, 1, 1], [], []>} : vector<4x12xbf16>, vector<12x32xbf16>, vector<4x32xf32> -> vector<4x32xf32>
    %330 = vector.broadcast %13 : vector<1x32xf32> to vector<4x32xf32>
    %331 = arith.mulf %330, %329 : vector<4x32xf32>
    %332 = arith.addf %313, %331 : vector<4x32xf32>
    %333 = vector.broadcast %20 : vector<1x32xf32> to vector<4x32xf32>
    %334 = arith.mulf %310, %333 : vector<4x32xf32>
    %335 = arith.truncf %334 : vector<4x32xf32> to vector<4x32xbf16>
    %cst_168 = arith.constant dense<0.000000e+00> : vector<4x12xf32>
    %336 = tpu.matmul %335, %311, %cst_168 {dimension_numbers = #tpu.dot_dimension_numbers<[1], [1], [0], [0], [0, 0, 1, 0], [], []>} : vector<4x32xbf16>, vector<12x32xbf16>, vector<4x12xf32> -> vector<4x12xf32>
    %cst_169 = arith.constant dense<0xFF800000> : vector<4xf32>
    %337 = vector.multi_reduction <maximumf>, %336, %cst_169 [1] : vector<4x12xf32> to vector<4xf32>
    %338 = vector.shape_cast %337 : vector<4xf32> to vector<4x1xf32>
    %339 = vector.broadcast %338 : vector<4x1xf32> to vector<4x12xf32>
    %340 = arith.subf %336, %339 : vector<4x12xf32>
    %341 = math.exp %340 : vector<4x12xf32>
    %cst_170 = arith.constant dense<0.000000e+00> : vector<4xf32>
    %342 = vector.multi_reduction <add>, %341, %cst_170 [1] : vector<4x12xf32> to vector<4xf32>
    %343 = vector.shape_cast %342 : vector<4xf32> to vector<4x1xf32>
    %344 = tpu.reciprocal %343 {approx = true} : vector<4x1xf32> -> vector<4x1xf32>
    %345 = vector.broadcast %344 : vector<4x1xf32> to vector<4x12xf32>
    %346 = arith.mulf %341, %345 : vector<4x12xf32>
    %347 = arith.truncf %346 : vector<4x12xf32> to vector<4x12xbf16>
    %cst_171 = arith.constant dense<0.000000e+00> : vector<4x32xf32>
    %348 = tpu.matmul %347, %312, %cst_171 {dimension_numbers = #tpu.dot_dimension_numbers<[1], [0], [0], [1], [0, 0, 1, 1], [], []>} : vector<4x12xbf16>, vector<12x32xbf16>, vector<4x32xf32> -> vector<4x32xf32>
    %349 = vector.broadcast %20 : vector<1x32xf32> to vector<4x32xf32>
    %350 = arith.mulf %349, %348 : vector<4x32xf32>
    %351 = arith.addf %332, %350 : vector<4x32xf32>
    %352 = vector.broadcast %27 : vector<1x32xf32> to vector<4x32xf32>
    %353 = arith.mulf %310, %352 : vector<4x32xf32>
    %354 = arith.truncf %353 : vector<4x32xf32> to vector<4x32xbf16>
    %cst_172 = arith.constant dense<0.000000e+00> : vector<4x12xf32>
    %355 = tpu.matmul %354, %311, %cst_172 {dimension_numbers = #tpu.dot_dimension_numbers<[1], [1], [0], [0], [0, 0, 1, 0], [], []>} : vector<4x32xbf16>, vector<12x32xbf16>, vector<4x12xf32> -> vector<4x12xf32>
    %cst_173 = arith.constant dense<0xFF800000> : vector<4xf32>
    %356 = vector.multi_reduction <maximumf>, %355, %cst_173 [1] : vector<4x12xf32> to vector<4xf32>
    %357 = vector.shape_cast %356 : vector<4xf32> to vector<4x1xf32>
    %358 = vector.broadcast %357 : vector<4x1xf32> to vector<4x12xf32>
    %359 = arith.subf %355, %358 : vector<4x12xf32>
    %360 = math.exp %359 : vector<4x12xf32>
    %cst_174 = arith.constant dense<0.000000e+00> : vector<4xf32>
    %361 = vector.multi_reduction <add>, %360, %cst_174 [1] : vector<4x12xf32> to vector<4xf32>
    %362 = vector.shape_cast %361 : vector<4xf32> to vector<4x1xf32>
    %363 = tpu.reciprocal %362 {approx = true} : vector<4x1xf32> -> vector<4x1xf32>
    %364 = vector.broadcast %363 : vector<4x1xf32> to vector<4x12xf32>
    %365 = arith.mulf %360, %364 : vector<4x12xf32>
    %366 = arith.truncf %365 : vector<4x12xf32> to vector<4x12xbf16>
    %cst_175 = arith.constant dense<0.000000e+00> : vector<4x32xf32>
    %367 = tpu.matmul %366, %312, %cst_175 {dimension_numbers = #tpu.dot_dimension_numbers<[1], [0], [0], [1], [0, 0, 1, 1], [], []>} : vector<4x12xbf16>, vector<12x32xbf16>, vector<4x32xf32> -> vector<4x32xf32>
    %368 = vector.broadcast %27 : vector<1x32xf32> to vector<4x32xf32>
    %369 = arith.mulf %368, %367 : vector<4x32xf32>
    %370 = arith.addf %351, %369 : vector<4x32xf32>
    %371 = vector.broadcast %34 : vector<1x32xf32> to vector<4x32xf32>
    %372 = arith.mulf %310, %371 : vector<4x32xf32>
    %373 = arith.truncf %372 : vector<4x32xf32> to vector<4x32xbf16>
    %cst_176 = arith.constant dense<0.000000e+00> : vector<4x12xf32>
    %374 = tpu.matmul %373, %311, %cst_176 {dimension_numbers = #tpu.dot_dimension_numbers<[1], [1], [0], [0], [0, 0, 1, 0], [], []>} : vector<4x32xbf16>, vector<12x32xbf16>, vector<4x12xf32> -> vector<4x12xf32>
    %cst_177 = arith.constant dense<0xFF800000> : vector<4xf32>
    %375 = vector.multi_reduction <maximumf>, %374, %cst_177 [1] : vector<4x12xf32> to vector<4xf32>
    %376 = vector.shape_cast %375 : vector<4xf32> to vector<4x1xf32>
    %377 = vector.broadcast %376 : vector<4x1xf32> to vector<4x12xf32>
    %378 = arith.subf %374, %377 : vector<4x12xf32>
    %379 = math.exp %378 : vector<4x12xf32>
    %cst_178 = arith.constant dense<0.000000e+00> : vector<4xf32>
    %380 = vector.multi_reduction <add>, %379, %cst_178 [1] : vector<4x12xf32> to vector<4xf32>
    %381 = vector.shape_cast %380 : vector<4xf32> to vector<4x1xf32>
    %382 = tpu.reciprocal %381 {approx = true} : vector<4x1xf32> -> vector<4x1xf32>
    %383 = vector.broadcast %382 : vector<4x1xf32> to vector<4x12xf32>
    %384 = arith.mulf %379, %383 : vector<4x12xf32>
    %385 = arith.truncf %384 : vector<4x12xf32> to vector<4x12xbf16>
    %cst_179 = arith.constant dense<0.000000e+00> : vector<4x32xf32>
    %386 = tpu.matmul %385, %312, %cst_179 {dimension_numbers = #tpu.dot_dimension_numbers<[1], [0], [0], [1], [0, 0, 1, 1], [], []>} : vector<4x12xbf16>, vector<12x32xbf16>, vector<4x32xf32> -> vector<4x32xf32>
    %387 = vector.broadcast %34 : vector<1x32xf32> to vector<4x32xf32>
    %388 = arith.mulf %387, %386 : vector<4x32xf32>
    %389 = arith.addf %370, %388 : vector<4x32xf32>
    %390 = vector.broadcast %41 : vector<1x32xf32> to vector<4x32xf32>
    %391 = arith.mulf %310, %390 : vector<4x32xf32>
    %392 = arith.truncf %391 : vector<4x32xf32> to vector<4x32xbf16>
    %cst_180 = arith.constant dense<0.000000e+00> : vector<4x12xf32>
    %393 = tpu.matmul %392, %311, %cst_180 {dimension_numbers = #tpu.dot_dimension_numbers<[1], [1], [0], [0], [0, 0, 1, 0], [], []>} : vector<4x32xbf16>, vector<12x32xbf16>, vector<4x12xf32> -> vector<4x12xf32>
    %cst_181 = arith.constant dense<0xFF800000> : vector<4xf32>
    %394 = vector.multi_reduction <maximumf>, %393, %cst_181 [1] : vector<4x12xf32> to vector<4xf32>
    %395 = vector.shape_cast %394 : vector<4xf32> to vector<4x1xf32>
    %396 = vector.broadcast %395 : vector<4x1xf32> to vector<4x12xf32>
    %397 = arith.subf %393, %396 : vector<4x12xf32>
    %398 = math.exp %397 : vector<4x12xf32>
    %cst_182 = arith.constant dense<0.000000e+00> : vector<4xf32>
    %399 = vector.multi_reduction <add>, %398, %cst_182 [1] : vector<4x12xf32> to vector<4xf32>
    %400 = vector.shape_cast %399 : vector<4xf32> to vector<4x1xf32>
    %401 = tpu.reciprocal %400 {approx = true} : vector<4x1xf32> -> vector<4x1xf32>
    %402 = vector.broadcast %401 : vector<4x1xf32> to vector<4x12xf32>
    %403 = arith.mulf %398, %402 : vector<4x12xf32>
    %404 = arith.truncf %403 : vector<4x12xf32> to vector<4x12xbf16>
    %cst_183 = arith.constant dense<0.000000e+00> : vector<4x32xf32>
    %405 = tpu.matmul %404, %312, %cst_183 {dimension_numbers = #tpu.dot_dimension_numbers<[1], [0], [0], [1], [0, 0, 1, 1], [], []>} : vector<4x12xbf16>, vector<12x32xbf16>, vector<4x32xf32> -> vector<4x32xf32>
    %406 = vector.broadcast %41 : vector<1x32xf32> to vector<4x32xf32>
    %407 = arith.mulf %406, %405 : vector<4x32xf32>
    %408 = arith.addf %389, %407 : vector<4x32xf32>
    %409 = vector.broadcast %48 : vector<1x32xf32> to vector<4x32xf32>
    %410 = arith.mulf %310, %409 : vector<4x32xf32>
    %411 = arith.truncf %410 : vector<4x32xf32> to vector<4x32xbf16>
    %cst_184 = arith.constant dense<0.000000e+00> : vector<4x12xf32>
    %412 = tpu.matmul %411, %311, %cst_184 {dimension_numbers = #tpu.dot_dimension_numbers<[1], [1], [0], [0], [0, 0, 1, 0], [], []>} : vector<4x32xbf16>, vector<12x32xbf16>, vector<4x12xf32> -> vector<4x12xf32>
    %cst_185 = arith.constant dense<0xFF800000> : vector<4xf32>
    %413 = vector.multi_reduction <maximumf>, %412, %cst_185 [1] : vector<4x12xf32> to vector<4xf32>
    %414 = vector.shape_cast %413 : vector<4xf32> to vector<4x1xf32>
    %415 = vector.broadcast %414 : vector<4x1xf32> to vector<4x12xf32>
    %416 = arith.subf %412, %415 : vector<4x12xf32>
    %417 = math.exp %416 : vector<4x12xf32>
    %cst_186 = arith.constant dense<0.000000e+00> : vector<4xf32>
    %418 = vector.multi_reduction <add>, %417, %cst_186 [1] : vector<4x12xf32> to vector<4xf32>
    %419 = vector.shape_cast %418 : vector<4xf32> to vector<4x1xf32>
    %420 = tpu.reciprocal %419 {approx = true} : vector<4x1xf32> -> vector<4x1xf32>
    %421 = vector.broadcast %420 : vector<4x1xf32> to vector<4x12xf32>
    %422 = arith.mulf %417, %421 : vector<4x12xf32>
    %423 = arith.truncf %422 : vector<4x12xf32> to vector<4x12xbf16>
    %cst_187 = arith.constant dense<0.000000e+00> : vector<4x32xf32>
    %424 = tpu.matmul %423, %312, %cst_187 {dimension_numbers = #tpu.dot_dimension_numbers<[1], [0], [0], [1], [0, 0, 1, 1], [], []>} : vector<4x12xbf16>, vector<12x32xbf16>, vector<4x32xf32> -> vector<4x32xf32>
    %425 = vector.broadcast %48 : vector<1x32xf32> to vector<4x32xf32>
    %426 = arith.mulf %425, %424 : vector<4x32xf32>
    %427 = arith.addf %408, %426 : vector<4x32xf32>
    %428 = vector.broadcast %55 : vector<1x32xf32> to vector<4x32xf32>
    %429 = arith.mulf %310, %428 : vector<4x32xf32>
    %430 = arith.truncf %429 : vector<4x32xf32> to vector<4x32xbf16>
    %cst_188 = arith.constant dense<0.000000e+00> : vector<4x12xf32>
    %431 = tpu.matmul %430, %311, %cst_188 {dimension_numbers = #tpu.dot_dimension_numbers<[1], [1], [0], [0], [0, 0, 1, 0], [], []>} : vector<4x32xbf16>, vector<12x32xbf16>, vector<4x12xf32> -> vector<4x12xf32>
    %cst_189 = arith.constant dense<0xFF800000> : vector<4xf32>
    %432 = vector.multi_reduction <maximumf>, %431, %cst_189 [1] : vector<4x12xf32> to vector<4xf32>
    %433 = vector.shape_cast %432 : vector<4xf32> to vector<4x1xf32>
    %434 = vector.broadcast %433 : vector<4x1xf32> to vector<4x12xf32>
    %435 = arith.subf %431, %434 : vector<4x12xf32>
    %436 = math.exp %435 : vector<4x12xf32>
    %cst_190 = arith.constant dense<0.000000e+00> : vector<4xf32>
    %437 = vector.multi_reduction <add>, %436, %cst_190 [1] : vector<4x12xf32> to vector<4xf32>
    %438 = vector.shape_cast %437 : vector<4xf32> to vector<4x1xf32>
    %439 = tpu.reciprocal %438 {approx = true} : vector<4x1xf32> -> vector<4x1xf32>
    %440 = vector.broadcast %439 : vector<4x1xf32> to vector<4x12xf32>
    %441 = arith.mulf %436, %440 : vector<4x12xf32>
    %442 = arith.truncf %441 : vector<4x12xf32> to vector<4x12xbf16>
    %cst_191 = arith.constant dense<0.000000e+00> : vector<4x32xf32>
    %443 = tpu.matmul %442, %312, %cst_191 {dimension_numbers = #tpu.dot_dimension_numbers<[1], [0], [0], [1], [0, 0, 1, 1], [], []>} : vector<4x12xbf16>, vector<12x32xbf16>, vector<4x32xf32> -> vector<4x32xf32>
    %444 = vector.broadcast %55 : vector<1x32xf32> to vector<4x32xf32>
    %445 = arith.mulf %444, %443 : vector<4x32xf32>
    %446 = arith.addf %427, %445 : vector<4x32xf32>
    %447 = vector.broadcast %62 : vector<1x32xf32> to vector<4x32xf32>
    %448 = arith.mulf %310, %447 : vector<4x32xf32>
    %449 = arith.truncf %448 : vector<4x32xf32> to vector<4x32xbf16>
    %cst_192 = arith.constant dense<0.000000e+00> : vector<4x12xf32>
    %450 = tpu.matmul %449, %311, %cst_192 {dimension_numbers = #tpu.dot_dimension_numbers<[1], [1], [0], [0], [0, 0, 1, 0], [], []>} : vector<4x32xbf16>, vector<12x32xbf16>, vector<4x12xf32> -> vector<4x12xf32>
    %cst_193 = arith.constant dense<0xFF800000> : vector<4xf32>
    %451 = vector.multi_reduction <maximumf>, %450, %cst_193 [1] : vector<4x12xf32> to vector<4xf32>
    %452 = vector.shape_cast %451 : vector<4xf32> to vector<4x1xf32>
    %453 = vector.broadcast %452 : vector<4x1xf32> to vector<4x12xf32>
    %454 = arith.subf %450, %453 : vector<4x12xf32>
    %455 = math.exp %454 : vector<4x12xf32>
    %cst_194 = arith.constant dense<0.000000e+00> : vector<4xf32>
    %456 = vector.multi_reduction <add>, %455, %cst_194 [1] : vector<4x12xf32> to vector<4xf32>
    %457 = vector.shape_cast %456 : vector<4xf32> to vector<4x1xf32>
    %458 = tpu.reciprocal %457 {approx = true} : vector<4x1xf32> -> vector<4x1xf32>
    %459 = vector.broadcast %458 : vector<4x1xf32> to vector<4x12xf32>
    %460 = arith.mulf %455, %459 : vector<4x12xf32>
    %461 = arith.truncf %460 : vector<4x12xf32> to vector<4x12xbf16>
    %cst_195 = arith.constant dense<0.000000e+00> : vector<4x32xf32>
    %462 = tpu.matmul %461, %312, %cst_195 {dimension_numbers = #tpu.dot_dimension_numbers<[1], [0], [0], [1], [0, 0, 1, 1], [], []>} : vector<4x12xbf16>, vector<12x32xbf16>, vector<4x32xf32> -> vector<4x32xf32>
    %463 = vector.broadcast %62 : vector<1x32xf32> to vector<4x32xf32>
    %464 = arith.mulf %463, %462 : vector<4x32xf32>
    %465 = arith.addf %446, %464 : vector<4x32xf32>
    %466 = arith.truncf %465 : vector<4x32xf32> to vector<4x32xbf16>
    %c0_196 = arith.constant 0 : index
    %c0_197 = arith.constant 0 : index
    %467 = vector.load %arg23[%c0_196, %c0_197] : memref<32x32xbf16, #tpu.memory_space<vmem>>, vector<32x32xbf16>
    %cst_198 = arith.constant dense<0.000000e+00> : vector<4x32xf32>
    %468 = tpu.matmul %466, %467, %cst_198 {dimension_numbers = #tpu.dot_dimension_numbers<[1], [0], [0], [1], [0, 0, 1, 1], [], []>} : vector<4x32xbf16>, vector<32x32xbf16>, vector<4x32xf32> -> vector<4x32xf32>
    %c0_199 = arith.constant 0 : index
    %c0_200 = arith.constant 0 : index
    %469 = vector.load %arg20[%c0_199, %c0_200] : memref<1x32xf32, #tpu.memory_space<vmem>>, vector<1x32xf32>
    %470 = vector.broadcast %469 : vector<1x32xf32> to vector<4x32xf32>
    %471 = arith.addf %468, %470 : vector<4x32xf32>
    %472 = arith.addf %293, %471 : vector<4x32xf32>
    %cst_201 = arith.constant dense<0.000000e+00> : vector<4xf32>
    %473 = vector.multi_reduction <add>, %472, %cst_201 [1] : vector<4x32xf32> to vector<4xf32>
    %474 = vector.shape_cast %473 : vector<4xf32> to vector<4x1xf32>
    %cst_202 = arith.constant 3.200000e+01 : f32
    %475 = vector.broadcast %cst_202 : f32 to vector<4x1xf32>
    %476 = arith.divf %474, %475 : vector<4x1xf32>
    %477 = vector.broadcast %476 : vector<4x1xf32> to vector<4x32xf32>
    %478 = arith.subf %472, %477 : vector<4x32xf32>
    %479 = arith.mulf %478, %478 : vector<4x32xf32>
    %cst_203 = arith.constant dense<0.000000e+00> : vector<4xf32>
    %480 = vector.multi_reduction <add>, %479, %cst_203 [1] : vector<4x32xf32> to vector<4xf32>
    %481 = vector.shape_cast %480 : vector<4xf32> to vector<4x1xf32>
    %cst_204 = arith.constant 3.200000e+01 : f32
    %482 = vector.broadcast %cst_204 : f32 to vector<4x1xf32>
    %483 = arith.divf %481, %482 : vector<4x1xf32>
    %cst_205 = arith.constant 9.99999974E-6 : f32
    %484 = vector.broadcast %cst_205 : f32 to vector<4x1xf32>
    %485 = arith.addf %483, %484 : vector<4x1xf32>
    %486 = math.rsqrt %485 : vector<4x1xf32>
    %487 = vector.broadcast %486 : vector<4x1xf32> to vector<4x32xf32>
    %488 = arith.mulf %478, %487 : vector<4x32xf32>
    %c0_206 = arith.constant 0 : index
    %c0_207 = arith.constant 0 : index
    %489 = vector.load %arg14[%c0_206, %c0_207] : memref<1x32xf32, #tpu.memory_space<vmem>>, vector<1x32xf32>
    %490 = vector.broadcast %489 : vector<1x32xf32> to vector<4x32xf32>
    %491 = arith.mulf %488, %490 : vector<4x32xf32>
    %c0_208 = arith.constant 0 : index
    %c0_209 = arith.constant 0 : index
    %492 = vector.load %arg13[%c0_208, %c0_209] : memref<1x32xf32, #tpu.memory_space<vmem>>, vector<1x32xf32>
    %493 = vector.broadcast %492 : vector<1x32xf32> to vector<4x32xf32>
    %494 = arith.addf %491, %493 : vector<4x32xf32>
    %495 = arith.truncf %494 : vector<4x32xf32> to vector<4x32xbf16>
    %c0_210 = arith.constant 0 : index
    %c0_211 = arith.constant 0 : index
    %496 = vector.load %arg8[%c0_210, %c0_211] : memref<32x32xbf16, #tpu.memory_space<vmem>>, vector<32x32xbf16>
    %cst_212 = arith.constant dense<0.000000e+00> : vector<4x32xf32>
    %497 = tpu.matmul %495, %496, %cst_212 {dimension_numbers = #tpu.dot_dimension_numbers<[1], [0], [0], [1], [0, 0, 1, 1], [], []>} : vector<4x32xbf16>, vector<32x32xbf16>, vector<4x32xf32> -> vector<4x32xf32>
    %c0_213 = arith.constant 0 : index
    %c0_214 = arith.constant 0 : index
    %498 = vector.load %arg5[%c0_213, %c0_214] : memref<1x32xf32, #tpu.memory_space<vmem>>, vector<1x32xf32>
    %499 = vector.broadcast %498 : vector<1x32xf32> to vector<4x32xf32>
    %500 = arith.addf %497, %499 : vector<4x32xf32>
    %501 = arith.truncf %294 : vector<12x32xf32> to vector<12x32xbf16>
    %c0_215 = arith.constant 0 : index
    %c0_216 = arith.constant 0 : index
    %502 = vector.load %arg6[%c0_215, %c0_216] : memref<32x64xbf16, #tpu.memory_space<vmem>>, vector<32x64xbf16>
    %cst_217 = arith.constant dense<0.000000e+00> : vector<12x64xf32>
    %503 = tpu.matmul %501, %502, %cst_217 {dimension_numbers = #tpu.dot_dimension_numbers<[1], [0], [0], [1], [0, 0, 1, 1], [], []>} : vector<12x32xbf16>, vector<32x64xbf16>, vector<12x64xf32> -> vector<12x64xf32>
    %c0_218 = arith.constant 0 : index
    %c0_219 = arith.constant 0 : index
    %504 = vector.load %arg3[%c0_218, %c0_219] : memref<1x64xf32, #tpu.memory_space<vmem>>, vector<1x64xf32>
    %505 = vector.broadcast %504 : vector<1x64xf32> to vector<12x64xf32>
    %506 = arith.addf %503, %505 : vector<12x64xf32>
    %507 = vector.extract_strided_slice %506 {offsets = [0, 0], sizes = [12, 32], strides = [1, 1]} : vector<12x64xf32> to vector<12x32xf32>
    %508 = vector.extract_strided_slice %506 {offsets = [0, 32], sizes = [12, 32], strides = [1, 1]} : vector<12x64xf32> to vector<12x32xf32>
    %cst_220 = arith.constant 5.000000e-01 : f32
    %509 = vector.broadcast %cst_220 : f32 to vector<4x32xf32>
    %510 = arith.mulf %500, %509 : vector<4x32xf32>
    %511 = arith.truncf %507 : vector<12x32xf32> to vector<12x32xbf16>
    %512 = arith.truncf %508 : vector<12x32xf32> to vector<12x32xbf16>
    %cst_221 = arith.constant 0.000000e+00 : f32
    %513 = vector.broadcast %cst_221 : f32 to vector<4x32xf32>
    %514 = vector.broadcast %13 : vector<1x32xf32> to vector<4x32xf32>
    %515 = arith.mulf %510, %514 : vector<4x32xf32>
    %516 = arith.truncf %515 : vector<4x32xf32> to vector<4x32xbf16>
    %cst_222 = arith.constant dense<0.000000e+00> : vector<4x12xf32>
    %517 = tpu.matmul %516, %511, %cst_222 {dimension_numbers = #tpu.dot_dimension_numbers<[1], [1], [0], [0], [0, 0, 1, 0], [], []>} : vector<4x32xbf16>, vector<12x32xbf16>, vector<4x12xf32> -> vector<4x12xf32>
    %cst_223 = arith.constant dense<0xFF800000> : vector<4xf32>
    %518 = vector.multi_reduction <maximumf>, %517, %cst_223 [1] : vector<4x12xf32> to vector<4xf32>
    %519 = vector.shape_cast %518 : vector<4xf32> to vector<4x1xf32>
    %520 = vector.broadcast %519 : vector<4x1xf32> to vector<4x12xf32>
    %521 = arith.subf %517, %520 : vector<4x12xf32>
    %522 = math.exp %521 : vector<4x12xf32>
    %cst_224 = arith.constant dense<0.000000e+00> : vector<4xf32>
    %523 = vector.multi_reduction <add>, %522, %cst_224 [1] : vector<4x12xf32> to vector<4xf32>
    %524 = vector.shape_cast %523 : vector<4xf32> to vector<4x1xf32>
    %525 = tpu.reciprocal %524 {approx = true} : vector<4x1xf32> -> vector<4x1xf32>
    %526 = vector.broadcast %525 : vector<4x1xf32> to vector<4x12xf32>
    %527 = arith.mulf %522, %526 : vector<4x12xf32>
    %528 = arith.truncf %527 : vector<4x12xf32> to vector<4x12xbf16>
    %cst_225 = arith.constant dense<0.000000e+00> : vector<4x32xf32>
    %529 = tpu.matmul %528, %512, %cst_225 {dimension_numbers = #tpu.dot_dimension_numbers<[1], [0], [0], [1], [0, 0, 1, 1], [], []>} : vector<4x12xbf16>, vector<12x32xbf16>, vector<4x32xf32> -> vector<4x32xf32>
    %530 = vector.broadcast %13 : vector<1x32xf32> to vector<4x32xf32>
    %531 = arith.mulf %530, %529 : vector<4x32xf32>
    %532 = arith.addf %513, %531 : vector<4x32xf32>
    %533 = vector.broadcast %20 : vector<1x32xf32> to vector<4x32xf32>
    %534 = arith.mulf %510, %533 : vector<4x32xf32>
    %535 = arith.truncf %534 : vector<4x32xf32> to vector<4x32xbf16>
    %cst_226 = arith.constant dense<0.000000e+00> : vector<4x12xf32>
    %536 = tpu.matmul %535, %511, %cst_226 {dimension_numbers = #tpu.dot_dimension_numbers<[1], [1], [0], [0], [0, 0, 1, 0], [], []>} : vector<4x32xbf16>, vector<12x32xbf16>, vector<4x12xf32> -> vector<4x12xf32>
    %cst_227 = arith.constant dense<0xFF800000> : vector<4xf32>
    %537 = vector.multi_reduction <maximumf>, %536, %cst_227 [1] : vector<4x12xf32> to vector<4xf32>
    %538 = vector.shape_cast %537 : vector<4xf32> to vector<4x1xf32>
    %539 = vector.broadcast %538 : vector<4x1xf32> to vector<4x12xf32>
    %540 = arith.subf %536, %539 : vector<4x12xf32>
    %541 = math.exp %540 : vector<4x12xf32>
    %cst_228 = arith.constant dense<0.000000e+00> : vector<4xf32>
    %542 = vector.multi_reduction <add>, %541, %cst_228 [1] : vector<4x12xf32> to vector<4xf32>
    %543 = vector.shape_cast %542 : vector<4xf32> to vector<4x1xf32>
    %544 = tpu.reciprocal %543 {approx = true} : vector<4x1xf32> -> vector<4x1xf32>
    %545 = vector.broadcast %544 : vector<4x1xf32> to vector<4x12xf32>
    %546 = arith.mulf %541, %545 : vector<4x12xf32>
    %547 = arith.truncf %546 : vector<4x12xf32> to vector<4x12xbf16>
    %cst_229 = arith.constant dense<0.000000e+00> : vector<4x32xf32>
    %548 = tpu.matmul %547, %512, %cst_229 {dimension_numbers = #tpu.dot_dimension_numbers<[1], [0], [0], [1], [0, 0, 1, 1], [], []>} : vector<4x12xbf16>, vector<12x32xbf16>, vector<4x32xf32> -> vector<4x32xf32>
    %549 = vector.broadcast %20 : vector<1x32xf32> to vector<4x32xf32>
    %550 = arith.mulf %549, %548 : vector<4x32xf32>
    %551 = arith.addf %532, %550 : vector<4x32xf32>
    %552 = vector.broadcast %27 : vector<1x32xf32> to vector<4x32xf32>
    %553 = arith.mulf %510, %552 : vector<4x32xf32>
    %554 = arith.truncf %553 : vector<4x32xf32> to vector<4x32xbf16>
    %cst_230 = arith.constant dense<0.000000e+00> : vector<4x12xf32>
    %555 = tpu.matmul %554, %511, %cst_230 {dimension_numbers = #tpu.dot_dimension_numbers<[1], [1], [0], [0], [0, 0, 1, 0], [], []>} : vector<4x32xbf16>, vector<12x32xbf16>, vector<4x12xf32> -> vector<4x12xf32>
    %cst_231 = arith.constant dense<0xFF800000> : vector<4xf32>
    %556 = vector.multi_reduction <maximumf>, %555, %cst_231 [1] : vector<4x12xf32> to vector<4xf32>
    %557 = vector.shape_cast %556 : vector<4xf32> to vector<4x1xf32>
    %558 = vector.broadcast %557 : vector<4x1xf32> to vector<4x12xf32>
    %559 = arith.subf %555, %558 : vector<4x12xf32>
    %560 = math.exp %559 : vector<4x12xf32>
    %cst_232 = arith.constant dense<0.000000e+00> : vector<4xf32>
    %561 = vector.multi_reduction <add>, %560, %cst_232 [1] : vector<4x12xf32> to vector<4xf32>
    %562 = vector.shape_cast %561 : vector<4xf32> to vector<4x1xf32>
    %563 = tpu.reciprocal %562 {approx = true} : vector<4x1xf32> -> vector<4x1xf32>
    %564 = vector.broadcast %563 : vector<4x1xf32> to vector<4x12xf32>
    %565 = arith.mulf %560, %564 : vector<4x12xf32>
    %566 = arith.truncf %565 : vector<4x12xf32> to vector<4x12xbf16>
    %cst_233 = arith.constant dense<0.000000e+00> : vector<4x32xf32>
    %567 = tpu.matmul %566, %512, %cst_233 {dimension_numbers = #tpu.dot_dimension_numbers<[1], [0], [0], [1], [0, 0, 1, 1], [], []>} : vector<4x12xbf16>, vector<12x32xbf16>, vector<4x32xf32> -> vector<4x32xf32>
    %568 = vector.broadcast %27 : vector<1x32xf32> to vector<4x32xf32>
    %569 = arith.mulf %568, %567 : vector<4x32xf32>
    %570 = arith.addf %551, %569 : vector<4x32xf32>
    %571 = vector.broadcast %34 : vector<1x32xf32> to vector<4x32xf32>
    %572 = arith.mulf %510, %571 : vector<4x32xf32>
    %573 = arith.truncf %572 : vector<4x32xf32> to vector<4x32xbf16>
    %cst_234 = arith.constant dense<0.000000e+00> : vector<4x12xf32>
    %574 = tpu.matmul %573, %511, %cst_234 {dimension_numbers = #tpu.dot_dimension_numbers<[1], [1], [0], [0], [0, 0, 1, 0], [], []>} : vector<4x32xbf16>, vector<12x32xbf16>, vector<4x12xf32> -> vector<4x12xf32>
    %cst_235 = arith.constant dense<0xFF800000> : vector<4xf32>
    %575 = vector.multi_reduction <maximumf>, %574, %cst_235 [1] : vector<4x12xf32> to vector<4xf32>
    %576 = vector.shape_cast %575 : vector<4xf32> to vector<4x1xf32>
    %577 = vector.broadcast %576 : vector<4x1xf32> to vector<4x12xf32>
    %578 = arith.subf %574, %577 : vector<4x12xf32>
    %579 = math.exp %578 : vector<4x12xf32>
    %cst_236 = arith.constant dense<0.000000e+00> : vector<4xf32>
    %580 = vector.multi_reduction <add>, %579, %cst_236 [1] : vector<4x12xf32> to vector<4xf32>
    %581 = vector.shape_cast %580 : vector<4xf32> to vector<4x1xf32>
    %582 = tpu.reciprocal %581 {approx = true} : vector<4x1xf32> -> vector<4x1xf32>
    %583 = vector.broadcast %582 : vector<4x1xf32> to vector<4x12xf32>
    %584 = arith.mulf %579, %583 : vector<4x12xf32>
    %585 = arith.truncf %584 : vector<4x12xf32> to vector<4x12xbf16>
    %cst_237 = arith.constant dense<0.000000e+00> : vector<4x32xf32>
    %586 = tpu.matmul %585, %512, %cst_237 {dimension_numbers = #tpu.dot_dimension_numbers<[1], [0], [0], [1], [0, 0, 1, 1], [], []>} : vector<4x12xbf16>, vector<12x32xbf16>, vector<4x32xf32> -> vector<4x32xf32>
    %587 = vector.broadcast %34 : vector<1x32xf32> to vector<4x32xf32>
    %588 = arith.mulf %587, %586 : vector<4x32xf32>
    %589 = arith.addf %570, %588 : vector<4x32xf32>
    %590 = vector.broadcast %41 : vector<1x32xf32> to vector<4x32xf32>
    %591 = arith.mulf %510, %590 : vector<4x32xf32>
    %592 = arith.truncf %591 : vector<4x32xf32> to vector<4x32xbf16>
    %cst_238 = arith.constant dense<0.000000e+00> : vector<4x12xf32>
    %593 = tpu.matmul %592, %511, %cst_238 {dimension_numbers = #tpu.dot_dimension_numbers<[1], [1], [0], [0], [0, 0, 1, 0], [], []>} : vector<4x32xbf16>, vector<12x32xbf16>, vector<4x12xf32> -> vector<4x12xf32>
    %cst_239 = arith.constant dense<0xFF800000> : vector<4xf32>
    %594 = vector.multi_reduction <maximumf>, %593, %cst_239 [1] : vector<4x12xf32> to vector<4xf32>
    %595 = vector.shape_cast %594 : vector<4xf32> to vector<4x1xf32>
    %596 = vector.broadcast %595 : vector<4x1xf32> to vector<4x12xf32>
    %597 = arith.subf %593, %596 : vector<4x12xf32>
    %598 = math.exp %597 : vector<4x12xf32>
    %cst_240 = arith.constant dense<0.000000e+00> : vector<4xf32>
    %599 = vector.multi_reduction <add>, %598, %cst_240 [1] : vector<4x12xf32> to vector<4xf32>
    %600 = vector.shape_cast %599 : vector<4xf32> to vector<4x1xf32>
    %601 = tpu.reciprocal %600 {approx = true} : vector<4x1xf32> -> vector<4x1xf32>
    %602 = vector.broadcast %601 : vector<4x1xf32> to vector<4x12xf32>
    %603 = arith.mulf %598, %602 : vector<4x12xf32>
    %604 = arith.truncf %603 : vector<4x12xf32> to vector<4x12xbf16>
    %cst_241 = arith.constant dense<0.000000e+00> : vector<4x32xf32>
    %605 = tpu.matmul %604, %512, %cst_241 {dimension_numbers = #tpu.dot_dimension_numbers<[1], [0], [0], [1], [0, 0, 1, 1], [], []>} : vector<4x12xbf16>, vector<12x32xbf16>, vector<4x32xf32> -> vector<4x32xf32>
    %606 = vector.broadcast %41 : vector<1x32xf32> to vector<4x32xf32>
    %607 = arith.mulf %606, %605 : vector<4x32xf32>
    %608 = arith.addf %589, %607 : vector<4x32xf32>
    %609 = vector.broadcast %48 : vector<1x32xf32> to vector<4x32xf32>
    %610 = arith.mulf %510, %609 : vector<4x32xf32>
    %611 = arith.truncf %610 : vector<4x32xf32> to vector<4x32xbf16>
    %cst_242 = arith.constant dense<0.000000e+00> : vector<4x12xf32>
    %612 = tpu.matmul %611, %511, %cst_242 {dimension_numbers = #tpu.dot_dimension_numbers<[1], [1], [0], [0], [0, 0, 1, 0], [], []>} : vector<4x32xbf16>, vector<12x32xbf16>, vector<4x12xf32> -> vector<4x12xf32>
    %cst_243 = arith.constant dense<0xFF800000> : vector<4xf32>
    %613 = vector.multi_reduction <maximumf>, %612, %cst_243 [1] : vector<4x12xf32> to vector<4xf32>
    %614 = vector.shape_cast %613 : vector<4xf32> to vector<4x1xf32>
    %615 = vector.broadcast %614 : vector<4x1xf32> to vector<4x12xf32>
    %616 = arith.subf %612, %615 : vector<4x12xf32>
    %617 = math.exp %616 : vector<4x12xf32>
    %cst_244 = arith.constant dense<0.000000e+00> : vector<4xf32>
    %618 = vector.multi_reduction <add>, %617, %cst_244 [1] : vector<4x12xf32> to vector<4xf32>
    %619 = vector.shape_cast %618 : vector<4xf32> to vector<4x1xf32>
    %620 = tpu.reciprocal %619 {approx = true} : vector<4x1xf32> -> vector<4x1xf32>
    %621 = vector.broadcast %620 : vector<4x1xf32> to vector<4x12xf32>
    %622 = arith.mulf %617, %621 : vector<4x12xf32>
    %623 = arith.truncf %622 : vector<4x12xf32> to vector<4x12xbf16>
    %cst_245 = arith.constant dense<0.000000e+00> : vector<4x32xf32>
    %624 = tpu.matmul %623, %512, %cst_245 {dimension_numbers = #tpu.dot_dimension_numbers<[1], [0], [0], [1], [0, 0, 1, 1], [], []>} : vector<4x12xbf16>, vector<12x32xbf16>, vector<4x32xf32> -> vector<4x32xf32>
    %625 = vector.broadcast %48 : vector<1x32xf32> to vector<4x32xf32>
    %626 = arith.mulf %625, %624 : vector<4x32xf32>
    %627 = arith.addf %608, %626 : vector<4x32xf32>
    %628 = vector.broadcast %55 : vector<1x32xf32> to vector<4x32xf32>
    %629 = arith.mulf %510, %628 : vector<4x32xf32>
    %630 = arith.truncf %629 : vector<4x32xf32> to vector<4x32xbf16>
    %cst_246 = arith.constant dense<0.000000e+00> : vector<4x12xf32>
    %631 = tpu.matmul %630, %511, %cst_246 {dimension_numbers = #tpu.dot_dimension_numbers<[1], [1], [0], [0], [0, 0, 1, 0], [], []>} : vector<4x32xbf16>, vector<12x32xbf16>, vector<4x12xf32> -> vector<4x12xf32>
    %cst_247 = arith.constant dense<0xFF800000> : vector<4xf32>
    %632 = vector.multi_reduction <maximumf>, %631, %cst_247 [1] : vector<4x12xf32> to vector<4xf32>
    %633 = vector.shape_cast %632 : vector<4xf32> to vector<4x1xf32>
    %634 = vector.broadcast %633 : vector<4x1xf32> to vector<4x12xf32>
    %635 = arith.subf %631, %634 : vector<4x12xf32>
    %636 = math.exp %635 : vector<4x12xf32>
    %cst_248 = arith.constant dense<0.000000e+00> : vector<4xf32>
    %637 = vector.multi_reduction <add>, %636, %cst_248 [1] : vector<4x12xf32> to vector<4xf32>
    %638 = vector.shape_cast %637 : vector<4xf32> to vector<4x1xf32>
    %639 = tpu.reciprocal %638 {approx = true} : vector<4x1xf32> -> vector<4x1xf32>
    %640 = vector.broadcast %639 : vector<4x1xf32> to vector<4x12xf32>
    %641 = arith.mulf %636, %640 : vector<4x12xf32>
    %642 = arith.truncf %641 : vector<4x12xf32> to vector<4x12xbf16>
    %cst_249 = arith.constant dense<0.000000e+00> : vector<4x32xf32>
    %643 = tpu.matmul %642, %512, %cst_249 {dimension_numbers = #tpu.dot_dimension_numbers<[1], [0], [0], [1], [0, 0, 1, 1], [], []>} : vector<4x12xbf16>, vector<12x32xbf16>, vector<4x32xf32> -> vector<4x32xf32>
    %644 = vector.broadcast %55 : vector<1x32xf32> to vector<4x32xf32>
    %645 = arith.mulf %644, %643 : vector<4x32xf32>
    %646 = arith.addf %627, %645 : vector<4x32xf32>
    %647 = vector.broadcast %62 : vector<1x32xf32> to vector<4x32xf32>
    %648 = arith.mulf %510, %647 : vector<4x32xf32>
    %649 = arith.truncf %648 : vector<4x32xf32> to vector<4x32xbf16>
    %cst_250 = arith.constant dense<0.000000e+00> : vector<4x12xf32>
    %650 = tpu.matmul %649, %511, %cst_250 {dimension_numbers = #tpu.dot_dimension_numbers<[1], [1], [0], [0], [0, 0, 1, 0], [], []>} : vector<4x32xbf16>, vector<12x32xbf16>, vector<4x12xf32> -> vector<4x12xf32>
    %cst_251 = arith.constant dense<0xFF800000> : vector<4xf32>
    %651 = vector.multi_reduction <maximumf>, %650, %cst_251 [1] : vector<4x12xf32> to vector<4xf32>
    %652 = vector.shape_cast %651 : vector<4xf32> to vector<4x1xf32>
    %653 = vector.broadcast %652 : vector<4x1xf32> to vector<4x12xf32>
    %654 = arith.subf %650, %653 : vector<4x12xf32>
    %655 = math.exp %654 : vector<4x12xf32>
    %cst_252 = arith.constant dense<0.000000e+00> : vector<4xf32>
    %656 = vector.multi_reduction <add>, %655, %cst_252 [1] : vector<4x12xf32> to vector<4xf32>
    %657 = vector.shape_cast %656 : vector<4xf32> to vector<4x1xf32>
    %658 = tpu.reciprocal %657 {approx = true} : vector<4x1xf32> -> vector<4x1xf32>
    %659 = vector.broadcast %658 : vector<4x1xf32> to vector<4x12xf32>
    %660 = arith.mulf %655, %659 : vector<4x12xf32>
    %661 = arith.truncf %660 : vector<4x12xf32> to vector<4x12xbf16>
    %cst_253 = arith.constant dense<0.000000e+00> : vector<4x32xf32>
    %662 = tpu.matmul %661, %512, %cst_253 {dimension_numbers = #tpu.dot_dimension_numbers<[1], [0], [0], [1], [0, 0, 1, 1], [], []>} : vector<4x12xbf16>, vector<12x32xbf16>, vector<4x32xf32> -> vector<4x32xf32>
    %663 = vector.broadcast %62 : vector<1x32xf32> to vector<4x32xf32>
    %664 = arith.mulf %663, %662 : vector<4x32xf32>
    %665 = arith.addf %646, %664 : vector<4x32xf32>
    %666 = arith.truncf %665 : vector<4x32xf32> to vector<4x32xbf16>
    %c0_254 = arith.constant 0 : index
    %c0_255 = arith.constant 0 : index
    %667 = vector.load %arg7[%c0_254, %c0_255] : memref<32x32xbf16, #tpu.memory_space<vmem>>, vector<32x32xbf16>
    %cst_256 = arith.constant dense<0.000000e+00> : vector<4x32xf32>
    %668 = tpu.matmul %666, %667, %cst_256 {dimension_numbers = #tpu.dot_dimension_numbers<[1], [0], [0], [1], [0, 0, 1, 1], [], []>} : vector<4x32xbf16>, vector<32x32xbf16>, vector<4x32xf32> -> vector<4x32xf32>
    %c0_257 = arith.constant 0 : index
    %c0_258 = arith.constant 0 : index
    %669 = vector.load %arg4[%c0_257, %c0_258] : memref<1x32xf32, #tpu.memory_space<vmem>>, vector<1x32xf32>
    %670 = vector.broadcast %669 : vector<1x32xf32> to vector<4x32xf32>
    %671 = arith.addf %668, %670 : vector<4x32xf32>
    %672 = arith.addf %494, %671 : vector<4x32xf32>
    %cst_259 = arith.constant dense<0.000000e+00> : vector<4xf32>
    %673 = vector.multi_reduction <add>, %672, %cst_259 [1] : vector<4x32xf32> to vector<4xf32>
    %674 = vector.shape_cast %673 : vector<4xf32> to vector<4x1xf32>
    %cst_260 = arith.constant 3.200000e+01 : f32
    %675 = vector.broadcast %cst_260 : f32 to vector<4x1xf32>
    %676 = arith.divf %674, %675 : vector<4x1xf32>
    %677 = vector.broadcast %676 : vector<4x1xf32> to vector<4x32xf32>
    %678 = arith.subf %672, %677 : vector<4x32xf32>
    %679 = arith.mulf %678, %678 : vector<4x32xf32>
    %cst_261 = arith.constant dense<0.000000e+00> : vector<4xf32>
    %680 = vector.multi_reduction <add>, %679, %cst_261 [1] : vector<4x32xf32> to vector<4xf32>
    %681 = vector.shape_cast %680 : vector<4xf32> to vector<4x1xf32>
    %cst_262 = arith.constant 3.200000e+01 : f32
    %682 = vector.broadcast %cst_262 : f32 to vector<4x1xf32>
    %683 = arith.divf %681, %682 : vector<4x1xf32>
    %cst_263 = arith.constant 9.99999974E-6 : f32
    %684 = vector.broadcast %cst_263 : f32 to vector<4x1xf32>
    %685 = arith.addf %683, %684 : vector<4x1xf32>
    %686 = math.rsqrt %685 : vector<4x1xf32>
    %687 = vector.broadcast %686 : vector<4x1xf32> to vector<4x32xf32>
    %688 = arith.mulf %678, %687 : vector<4x32xf32>
    %c0_264 = arith.constant 0 : index
    %c0_265 = arith.constant 0 : index
    %689 = vector.load %arg16[%c0_264, %c0_265] : memref<1x32xf32, #tpu.memory_space<vmem>>, vector<1x32xf32>
    %690 = vector.broadcast %689 : vector<1x32xf32> to vector<4x32xf32>
    %691 = arith.mulf %688, %690 : vector<4x32xf32>
    %c0_266 = arith.constant 0 : index
    %c0_267 = arith.constant 0 : index
    %692 = vector.load %arg15[%c0_266, %c0_267] : memref<1x32xf32, #tpu.memory_space<vmem>>, vector<1x32xf32>
    %693 = vector.broadcast %692 : vector<1x32xf32> to vector<4x32xf32>
    %694 = arith.addf %691, %693 : vector<4x32xf32>
    %695 = arith.truncf %694 : vector<4x32xf32> to vector<4x32xbf16>
    %c0_268 = arith.constant 0 : index
    %c0_269 = arith.constant 0 : index
    %696 = vector.load %arg11[%c0_268, %c0_269] : memref<32x64xbf16, #tpu.memory_space<vmem>>, vector<32x64xbf16>
    %cst_270 = arith.constant dense<0.000000e+00> : vector<4x64xf32>
    %697 = tpu.matmul %695, %696, %cst_270 {dimension_numbers = #tpu.dot_dimension_numbers<[1], [0], [0], [1], [0, 0, 1, 1], [], []>} : vector<4x32xbf16>, vector<32x64xbf16>, vector<4x64xf32> -> vector<4x64xf32>
    %c0_271 = arith.constant 0 : index
    %c0_272 = arith.constant 0 : index
    %698 = vector.load %arg9[%c0_271, %c0_272] : memref<1x64xf32, #tpu.memory_space<vmem>>, vector<1x64xf32>
    %699 = vector.broadcast %698 : vector<1x64xf32> to vector<4x64xf32>
    %700 = arith.addf %697, %699 : vector<4x64xf32>
    %cst_273 = arith.constant 0.000000e+00 : f32
    %701 = vector.broadcast %cst_273 : f32 to vector<4x64xf32>
    %702 = arith.maximumf %700, %701 : vector<4x64xf32>
    %703 = arith.truncf %702 : vector<4x64xf32> to vector<4x64xbf16>
    %c0_274 = arith.constant 0 : index
    %c0_275 = arith.constant 0 : index
    %704 = vector.load %arg12[%c0_274, %c0_275] : memref<64x32xbf16, #tpu.memory_space<vmem>>, vector<64x32xbf16>
    %cst_276 = arith.constant dense<0.000000e+00> : vector<4x32xf32>
    %705 = tpu.matmul %703, %704, %cst_276 {dimension_numbers = #tpu.dot_dimension_numbers<[1], [0], [0], [1], [0, 0, 1, 1], [], []>} : vector<4x64xbf16>, vector<64x32xbf16>, vector<4x32xf32> -> vector<4x32xf32>
    %c0_277 = arith.constant 0 : index
    %c0_278 = arith.constant 0 : index
    %706 = vector.load %arg10[%c0_277, %c0_278] : memref<1x32xf32, #tpu.memory_space<vmem>>, vector<1x32xf32>
    %707 = vector.broadcast %706 : vector<1x32xf32> to vector<4x32xf32>
    %708 = arith.addf %705, %707 : vector<4x32xf32>
    %709 = arith.addf %694, %708 : vector<4x32xf32>
    %cst_279 = arith.constant dense<0.000000e+00> : vector<4xf32>
    %710 = vector.multi_reduction <add>, %709, %cst_279 [1] : vector<4x32xf32> to vector<4xf32>
    %711 = vector.shape_cast %710 : vector<4xf32> to vector<4x1xf32>
    %cst_280 = arith.constant 3.200000e+01 : f32
    %712 = vector.broadcast %cst_280 : f32 to vector<4x1xf32>
    %713 = arith.divf %711, %712 : vector<4x1xf32>
    %714 = vector.broadcast %713 : vector<4x1xf32> to vector<4x32xf32>
    %715 = arith.subf %709, %714 : vector<4x32xf32>
    %716 = arith.mulf %715, %715 : vector<4x32xf32>
    %cst_281 = arith.constant dense<0.000000e+00> : vector<4xf32>
    %717 = vector.multi_reduction <add>, %716, %cst_281 [1] : vector<4x32xf32> to vector<4xf32>
    %718 = vector.shape_cast %717 : vector<4xf32> to vector<4x1xf32>
    %cst_282 = arith.constant 3.200000e+01 : f32
    %719 = vector.broadcast %cst_282 : f32 to vector<4x1xf32>
    %720 = arith.divf %718, %719 : vector<4x1xf32>
    %cst_283 = arith.constant 9.99999974E-6 : f32
    %721 = vector.broadcast %cst_283 : f32 to vector<4x1xf32>
    %722 = arith.addf %720, %721 : vector<4x1xf32>
    %723 = math.rsqrt %722 : vector<4x1xf32>
    %724 = vector.broadcast %723 : vector<4x1xf32> to vector<4x32xf32>
    %725 = arith.mulf %715, %724 : vector<4x32xf32>
    %c0_284 = arith.constant 0 : index
    %c0_285 = arith.constant 0 : index
    %726 = vector.load %arg18[%c0_284, %c0_285] : memref<1x32xf32, #tpu.memory_space<vmem>>, vector<1x32xf32>
    %727 = vector.broadcast %726 : vector<1x32xf32> to vector<4x32xf32>
    %728 = arith.mulf %725, %727 : vector<4x32xf32>
    %c0_286 = arith.constant 0 : index
    %c0_287 = arith.constant 0 : index
    %729 = vector.load %arg17[%c0_286, %c0_287] : memref<1x32xf32, #tpu.memory_space<vmem>>, vector<1x32xf32>
    %730 = vector.broadcast %729 : vector<1x32xf32> to vector<4x32xf32>
    %731 = arith.addf %728, %730 : vector<4x32xf32>
    %c0_288 = arith.constant 0 : index
    %c0_289 = arith.constant 0 : index
    %732 = vector.load %arg60[%c0_288, %c0_289] : memref<8x32xf32, #tpu.memory_space<vmem>>, vector<4x32xf32>
    tpu.vector_store %arg60[%c0_288, %c0_289], %731 {strides = array<i32>} : memref<8x32xf32, #tpu.memory_space<vmem>>, vector<4x32xf32>,
    %c4_290 = arith.constant 4 : index
    %c0_291 = arith.constant 0 : index
    %733 = vector.load %arg59[%c4_290, %c0_291] : memref<16x32xf32, #tpu.memory_space<vmem>>, vector<12x32xf32>
    %c12 = arith.constant 12 : index
    %c0_292 = arith.constant 0 : index
    %734 = vector.load %arg59[%c12, %c0_292] : memref<16x32xf32, #tpu.memory_space<vmem>>, vector<4x32xf32>
    %c4_293 = arith.constant 4 : index
    %c0_294 = arith.constant 0 : index
    %735 = vector.load %arg58[%c4_293, %c0_294] : memref<16x32xf32, #tpu.memory_space<vmem>>, vector<12x32xf32>
    %736 = arith.truncf %734 : vector<4x32xf32> to vector<4x32xbf16>
    %c0_295 = arith.constant 0 : index
    %c0_296 = arith.constant 0 : index
    %737 = vector.load %arg24[%c0_295, %c0_296] : memref<32x32xbf16, #tpu.memory_space<vmem>>, vector<32x32xbf16>
    %cst_297 = arith.constant dense<0.000000e+00> : vector<4x32xf32>
    %738 = tpu.matmul %736, %737, %cst_297 {dimension_numbers = #tpu.dot_dimension_numbers<[1], [0], [0], [1], [0, 0, 1, 1], [], []>} : vector<4x32xbf16>, vector<32x32xbf16>, vector<4x32xf32> -> vector<4x32xf32>
    %c0_298 = arith.constant 0 : index
    %c0_299 = arith.constant 0 : index
    %739 = vector.load %arg21[%c0_298, %c0_299] : memref<1x32xf32, #tpu.memory_space<vmem>>, vector<1x32xf32>
    %740 = vector.broadcast %739 : vector<1x32xf32> to vector<4x32xf32>
    %741 = arith.addf %738, %740 : vector<4x32xf32>
    %742 = arith.truncf %733 : vector<12x32xf32> to vector<12x32xbf16>
    %c0_300 = arith.constant 0 : index
    %c0_301 = arith.constant 0 : index
    %743 = vector.load %arg22[%c0_300, %c0_301] : memref<32x64xbf16, #tpu.memory_space<vmem>>, vector<32x64xbf16>
    %cst_302 = arith.constant dense<0.000000e+00> : vector<12x64xf32>
    %744 = tpu.matmul %742, %743, %cst_302 {dimension_numbers = #tpu.dot_dimension_numbers<[1], [0], [0], [1], [0, 0, 1, 1], [], []>} : vector<12x32xbf16>, vector<32x64xbf16>, vector<12x64xf32> -> vector<12x64xf32>
    %c0_303 = arith.constant 0 : index
    %c0_304 = arith.constant 0 : index
    %745 = vector.load %arg19[%c0_303, %c0_304] : memref<1x64xf32, #tpu.memory_space<vmem>>, vector<1x64xf32>
    %746 = vector.broadcast %745 : vector<1x64xf32> to vector<12x64xf32>
    %747 = arith.addf %744, %746 : vector<12x64xf32>
    %748 = vector.extract_strided_slice %747 {offsets = [0, 0], sizes = [12, 32], strides = [1, 1]} : vector<12x64xf32> to vector<12x32xf32>
    %749 = vector.extract_strided_slice %747 {offsets = [0, 32], sizes = [12, 32], strides = [1, 1]} : vector<12x64xf32> to vector<12x32xf32>
    %cst_305 = arith.constant 5.000000e-01 : f32
    %750 = vector.broadcast %cst_305 : f32 to vector<4x32xf32>
    %751 = arith.mulf %741, %750 : vector<4x32xf32>
    %752 = arith.truncf %748 : vector<12x32xf32> to vector<12x32xbf16>
    %753 = arith.truncf %749 : vector<12x32xf32> to vector<12x32xbf16>
    %cst_306 = arith.constant 0.000000e+00 : f32
    %754 = vector.broadcast %cst_306 : f32 to vector<4x32xf32>
    %755 = vector.broadcast %13 : vector<1x32xf32> to vector<4x32xf32>
    %756 = arith.mulf %751, %755 : vector<4x32xf32>
    %757 = arith.truncf %756 : vector<4x32xf32> to vector<4x32xbf16>
    %cst_307 = arith.constant dense<0.000000e+00> : vector<4x12xf32>
    %758 = tpu.matmul %757, %752, %cst_307 {dimension_numbers = #tpu.dot_dimension_numbers<[1], [1], [0], [0], [0, 0, 1, 0], [], []>} : vector<4x32xbf16>, vector<12x32xbf16>, vector<4x12xf32> -> vector<4x12xf32>
    %cst_308 = arith.constant dense<0xFF800000> : vector<4xf32>
    %759 = vector.multi_reduction <maximumf>, %758, %cst_308 [1] : vector<4x12xf32> to vector<4xf32>
    %760 = vector.shape_cast %759 : vector<4xf32> to vector<4x1xf32>
    %761 = vector.broadcast %760 : vector<4x1xf32> to vector<4x12xf32>
    %762 = arith.subf %758, %761 : vector<4x12xf32>
    %763 = math.exp %762 : vector<4x12xf32>
    %cst_309 = arith.constant dense<0.000000e+00> : vector<4xf32>
    %764 = vector.multi_reduction <add>, %763, %cst_309 [1] : vector<4x12xf32> to vector<4xf32>
    %765 = vector.shape_cast %764 : vector<4xf32> to vector<4x1xf32>
    %766 = tpu.reciprocal %765 {approx = true} : vector<4x1xf32> -> vector<4x1xf32>
    %767 = vector.broadcast %766 : vector<4x1xf32> to vector<4x12xf32>
    %768 = arith.mulf %763, %767 : vector<4x12xf32>
    %769 = arith.truncf %768 : vector<4x12xf32> to vector<4x12xbf16>
    %cst_310 = arith.constant dense<0.000000e+00> : vector<4x32xf32>
    %770 = tpu.matmul %769, %753, %cst_310 {dimension_numbers = #tpu.dot_dimension_numbers<[1], [0], [0], [1], [0, 0, 1, 1], [], []>} : vector<4x12xbf16>, vector<12x32xbf16>, vector<4x32xf32> -> vector<4x32xf32>
    %771 = vector.broadcast %13 : vector<1x32xf32> to vector<4x32xf32>
    %772 = arith.mulf %771, %770 : vector<4x32xf32>
    %773 = arith.addf %754, %772 : vector<4x32xf32>
    %774 = vector.broadcast %20 : vector<1x32xf32> to vector<4x32xf32>
    %775 = arith.mulf %751, %774 : vector<4x32xf32>
    %776 = arith.truncf %775 : vector<4x32xf32> to vector<4x32xbf16>
    %cst_311 = arith.constant dense<0.000000e+00> : vector<4x12xf32>
    %777 = tpu.matmul %776, %752, %cst_311 {dimension_numbers = #tpu.dot_dimension_numbers<[1], [1], [0], [0], [0, 0, 1, 0], [], []>} : vector<4x32xbf16>, vector<12x32xbf16>, vector<4x12xf32> -> vector<4x12xf32>
    %cst_312 = arith.constant dense<0xFF800000> : vector<4xf32>
    %778 = vector.multi_reduction <maximumf>, %777, %cst_312 [1] : vector<4x12xf32> to vector<4xf32>
    %779 = vector.shape_cast %778 : vector<4xf32> to vector<4x1xf32>
    %780 = vector.broadcast %779 : vector<4x1xf32> to vector<4x12xf32>
    %781 = arith.subf %777, %780 : vector<4x12xf32>
    %782 = math.exp %781 : vector<4x12xf32>
    %cst_313 = arith.constant dense<0.000000e+00> : vector<4xf32>
    %783 = vector.multi_reduction <add>, %782, %cst_313 [1] : vector<4x12xf32> to vector<4xf32>
    %784 = vector.shape_cast %783 : vector<4xf32> to vector<4x1xf32>
    %785 = tpu.reciprocal %784 {approx = true} : vector<4x1xf32> -> vector<4x1xf32>
    %786 = vector.broadcast %785 : vector<4x1xf32> to vector<4x12xf32>
    %787 = arith.mulf %782, %786 : vector<4x12xf32>
    %788 = arith.truncf %787 : vector<4x12xf32> to vector<4x12xbf16>
    %cst_314 = arith.constant dense<0.000000e+00> : vector<4x32xf32>
    %789 = tpu.matmul %788, %753, %cst_314 {dimension_numbers = #tpu.dot_dimension_numbers<[1], [0], [0], [1], [0, 0, 1, 1], [], []>} : vector<4x12xbf16>, vector<12x32xbf16>, vector<4x32xf32> -> vector<4x32xf32>
    %790 = vector.broadcast %20 : vector<1x32xf32> to vector<4x32xf32>
    %791 = arith.mulf %790, %789 : vector<4x32xf32>
    %792 = arith.addf %773, %791 : vector<4x32xf32>
    %793 = vector.broadcast %27 : vector<1x32xf32> to vector<4x32xf32>
    %794 = arith.mulf %751, %793 : vector<4x32xf32>
    %795 = arith.truncf %794 : vector<4x32xf32> to vector<4x32xbf16>
    %cst_315 = arith.constant dense<0.000000e+00> : vector<4x12xf32>
    %796 = tpu.matmul %795, %752, %cst_315 {dimension_numbers = #tpu.dot_dimension_numbers<[1], [1], [0], [0], [0, 0, 1, 0], [], []>} : vector<4x32xbf16>, vector<12x32xbf16>, vector<4x12xf32> -> vector<4x12xf32>
    %cst_316 = arith.constant dense<0xFF800000> : vector<4xf32>
    %797 = vector.multi_reduction <maximumf>, %796, %cst_316 [1] : vector<4x12xf32> to vector<4xf32>
    %798 = vector.shape_cast %797 : vector<4xf32> to vector<4x1xf32>
    %799 = vector.broadcast %798 : vector<4x1xf32> to vector<4x12xf32>
    %800 = arith.subf %796, %799 : vector<4x12xf32>
    %801 = math.exp %800 : vector<4x12xf32>
    %cst_317 = arith.constant dense<0.000000e+00> : vector<4xf32>
    %802 = vector.multi_reduction <add>, %801, %cst_317 [1] : vector<4x12xf32> to vector<4xf32>
    %803 = vector.shape_cast %802 : vector<4xf32> to vector<4x1xf32>
    %804 = tpu.reciprocal %803 {approx = true} : vector<4x1xf32> -> vector<4x1xf32>
    %805 = vector.broadcast %804 : vector<4x1xf32> to vector<4x12xf32>
    %806 = arith.mulf %801, %805 : vector<4x12xf32>
    %807 = arith.truncf %806 : vector<4x12xf32> to vector<4x12xbf16>
    %cst_318 = arith.constant dense<0.000000e+00> : vector<4x32xf32>
    %808 = tpu.matmul %807, %753, %cst_318 {dimension_numbers = #tpu.dot_dimension_numbers<[1], [0], [0], [1], [0, 0, 1, 1], [], []>} : vector<4x12xbf16>, vector<12x32xbf16>, vector<4x32xf32> -> vector<4x32xf32>
    %809 = vector.broadcast %27 : vector<1x32xf32> to vector<4x32xf32>
    %810 = arith.mulf %809, %808 : vector<4x32xf32>
    %811 = arith.addf %792, %810 : vector<4x32xf32>
    %812 = vector.broadcast %34 : vector<1x32xf32> to vector<4x32xf32>
    %813 = arith.mulf %751, %812 : vector<4x32xf32>
    %814 = arith.truncf %813 : vector<4x32xf32> to vector<4x32xbf16>
    %cst_319 = arith.constant dense<0.000000e+00> : vector<4x12xf32>
    %815 = tpu.matmul %814, %752, %cst_319 {dimension_numbers = #tpu.dot_dimension_numbers<[1], [1], [0], [0], [0, 0, 1, 0], [], []>} : vector<4x32xbf16>, vector<12x32xbf16>, vector<4x12xf32> -> vector<4x12xf32>
    %cst_320 = arith.constant dense<0xFF800000> : vector<4xf32>
    %816 = vector.multi_reduction <maximumf>, %815, %cst_320 [1] : vector<4x12xf32> to vector<4xf32>
    %817 = vector.shape_cast %816 : vector<4xf32> to vector<4x1xf32>
    %818 = vector.broadcast %817 : vector<4x1xf32> to vector<4x12xf32>
    %819 = arith.subf %815, %818 : vector<4x12xf32>
    %820 = math.exp %819 : vector<4x12xf32>
    %cst_321 = arith.constant dense<0.000000e+00> : vector<4xf32>
    %821 = vector.multi_reduction <add>, %820, %cst_321 [1] : vector<4x12xf32> to vector<4xf32>
    %822 = vector.shape_cast %821 : vector<4xf32> to vector<4x1xf32>
    %823 = tpu.reciprocal %822 {approx = true} : vector<4x1xf32> -> vector<4x1xf32>
    %824 = vector.broadcast %823 : vector<4x1xf32> to vector<4x12xf32>
    %825 = arith.mulf %820, %824 : vector<4x12xf32>
    %826 = arith.truncf %825 : vector<4x12xf32> to vector<4x12xbf16>
    %cst_322 = arith.constant dense<0.000000e+00> : vector<4x32xf32>
    %827 = tpu.matmul %826, %753, %cst_322 {dimension_numbers = #tpu.dot_dimension_numbers<[1], [0], [0], [1], [0, 0, 1, 1], [], []>} : vector<4x12xbf16>, vector<12x32xbf16>, vector<4x32xf32> -> vector<4x32xf32>
    %828 = vector.broadcast %34 : vector<1x32xf32> to vector<4x32xf32>
    %829 = arith.mulf %828, %827 : vector<4x32xf32>
    %830 = arith.addf %811, %829 : vector<4x32xf32>
    %831 = vector.broadcast %41 : vector<1x32xf32> to vector<4x32xf32>
    %832 = arith.mulf %751, %831 : vector<4x32xf32>
    %833 = arith.truncf %832 : vector<4x32xf32> to vector<4x32xbf16>
    %cst_323 = arith.constant dense<0.000000e+00> : vector<4x12xf32>
    %834 = tpu.matmul %833, %752, %cst_323 {dimension_numbers = #tpu.dot_dimension_numbers<[1], [1], [0], [0], [0, 0, 1, 0], [], []>} : vector<4x32xbf16>, vector<12x32xbf16>, vector<4x12xf32> -> vector<4x12xf32>
    %cst_324 = arith.constant dense<0xFF800000> : vector<4xf32>
    %835 = vector.multi_reduction <maximumf>, %834, %cst_324 [1] : vector<4x12xf32> to vector<4xf32>
    %836 = vector.shape_cast %835 : vector<4xf32> to vector<4x1xf32>
    %837 = vector.broadcast %836 : vector<4x1xf32> to vector<4x12xf32>
    %838 = arith.subf %834, %837 : vector<4x12xf32>
    %839 = math.exp %838 : vector<4x12xf32>
    %cst_325 = arith.constant dense<0.000000e+00> : vector<4xf32>
    %840 = vector.multi_reduction <add>, %839, %cst_325 [1] : vector<4x12xf32> to vector<4xf32>
    %841 = vector.shape_cast %840 : vector<4xf32> to vector<4x1xf32>
    %842 = tpu.reciprocal %841 {approx = true} : vector<4x1xf32> -> vector<4x1xf32>
    %843 = vector.broadcast %842 : vector<4x1xf32> to vector<4x12xf32>
    %844 = arith.mulf %839, %843 : vector<4x12xf32>
    %845 = arith.truncf %844 : vector<4x12xf32> to vector<4x12xbf16>
    %cst_326 = arith.constant dense<0.000000e+00> : vector<4x32xf32>
    %846 = tpu.matmul %845, %753, %cst_326 {dimension_numbers = #tpu.dot_dimension_numbers<[1], [0], [0], [1], [0, 0, 1, 1], [], []>} : vector<4x12xbf16>, vector<12x32xbf16>, vector<4x32xf32> -> vector<4x32xf32>
    %847 = vector.broadcast %41 : vector<1x32xf32> to vector<4x32xf32>
    %848 = arith.mulf %847, %846 : vector<4x32xf32>
    %849 = arith.addf %830, %848 : vector<4x32xf32>
    %850 = vector.broadcast %48 : vector<1x32xf32> to vector<4x32xf32>
    %851 = arith.mulf %751, %850 : vector<4x32xf32>
    %852 = arith.truncf %851 : vector<4x32xf32> to vector<4x32xbf16>
    %cst_327 = arith.constant dense<0.000000e+00> : vector<4x12xf32>
    %853 = tpu.matmul %852, %752, %cst_327 {dimension_numbers = #tpu.dot_dimension_numbers<[1], [1], [0], [0], [0, 0, 1, 0], [], []>} : vector<4x32xbf16>, vector<12x32xbf16>, vector<4x12xf32> -> vector<4x12xf32>
    %cst_328 = arith.constant dense<0xFF800000> : vector<4xf32>
    %854 = vector.multi_reduction <maximumf>, %853, %cst_328 [1] : vector<4x12xf32> to vector<4xf32>
    %855 = vector.shape_cast %854 : vector<4xf32> to vector<4x1xf32>
    %856 = vector.broadcast %855 : vector<4x1xf32> to vector<4x12xf32>
    %857 = arith.subf %853, %856 : vector<4x12xf32>
    %858 = math.exp %857 : vector<4x12xf32>
    %cst_329 = arith.constant dense<0.000000e+00> : vector<4xf32>
    %859 = vector.multi_reduction <add>, %858, %cst_329 [1] : vector<4x12xf32> to vector<4xf32>
    %860 = vector.shape_cast %859 : vector<4xf32> to vector<4x1xf32>
    %861 = tpu.reciprocal %860 {approx = true} : vector<4x1xf32> -> vector<4x1xf32>
    %862 = vector.broadcast %861 : vector<4x1xf32> to vector<4x12xf32>
    %863 = arith.mulf %858, %862 : vector<4x12xf32>
    %864 = arith.truncf %863 : vector<4x12xf32> to vector<4x12xbf16>
    %cst_330 = arith.constant dense<0.000000e+00> : vector<4x32xf32>
    %865 = tpu.matmul %864, %753, %cst_330 {dimension_numbers = #tpu.dot_dimension_numbers<[1], [0], [0], [1], [0, 0, 1, 1], [], []>} : vector<4x12xbf16>, vector<12x32xbf16>, vector<4x32xf32> -> vector<4x32xf32>
    %866 = vector.broadcast %48 : vector<1x32xf32> to vector<4x32xf32>
    %867 = arith.mulf %866, %865 : vector<4x32xf32>
    %868 = arith.addf %849, %867 : vector<4x32xf32>
    %869 = vector.broadcast %55 : vector<1x32xf32> to vector<4x32xf32>
    %870 = arith.mulf %751, %869 : vector<4x32xf32>
    %871 = arith.truncf %870 : vector<4x32xf32> to vector<4x32xbf16>
    %cst_331 = arith.constant dense<0.000000e+00> : vector<4x12xf32>
    %872 = tpu.matmul %871, %752, %cst_331 {dimension_numbers = #tpu.dot_dimension_numbers<[1], [1], [0], [0], [0, 0, 1, 0], [], []>} : vector<4x32xbf16>, vector<12x32xbf16>, vector<4x12xf32> -> vector<4x12xf32>
    %cst_332 = arith.constant dense<0xFF800000> : vector<4xf32>
    %873 = vector.multi_reduction <maximumf>, %872, %cst_332 [1] : vector<4x12xf32> to vector<4xf32>
    %874 = vector.shape_cast %873 : vector<4xf32> to vector<4x1xf32>
    %875 = vector.broadcast %874 : vector<4x1xf32> to vector<4x12xf32>
    %876 = arith.subf %872, %875 : vector<4x12xf32>
    %877 = math.exp %876 : vector<4x12xf32>
    %cst_333 = arith.constant dense<0.000000e+00> : vector<4xf32>
    %878 = vector.multi_reduction <add>, %877, %cst_333 [1] : vector<4x12xf32> to vector<4xf32>
    %879 = vector.shape_cast %878 : vector<4xf32> to vector<4x1xf32>
    %880 = tpu.reciprocal %879 {approx = true} : vector<4x1xf32> -> vector<4x1xf32>
    %881 = vector.broadcast %880 : vector<4x1xf32> to vector<4x12xf32>
    %882 = arith.mulf %877, %881 : vector<4x12xf32>
    %883 = arith.truncf %882 : vector<4x12xf32> to vector<4x12xbf16>
    %cst_334 = arith.constant dense<0.000000e+00> : vector<4x32xf32>
    %884 = tpu.matmul %883, %753, %cst_334 {dimension_numbers = #tpu.dot_dimension_numbers<[1], [0], [0], [1], [0, 0, 1, 1], [], []>} : vector<4x12xbf16>, vector<12x32xbf16>, vector<4x32xf32> -> vector<4x32xf32>
    %885 = vector.broadcast %55 : vector<1x32xf32> to vector<4x32xf32>
    %886 = arith.mulf %885, %884 : vector<4x32xf32>
    %887 = arith.addf %868, %886 : vector<4x32xf32>
    %888 = vector.broadcast %62 : vector<1x32xf32> to vector<4x32xf32>
    %889 = arith.mulf %751, %888 : vector<4x32xf32>
    %890 = arith.truncf %889 : vector<4x32xf32> to vector<4x32xbf16>
    %cst_335 = arith.constant dense<0.000000e+00> : vector<4x12xf32>
    %891 = tpu.matmul %890, %752, %cst_335 {dimension_numbers = #tpu.dot_dimension_numbers<[1], [1], [0], [0], [0, 0, 1, 0], [], []>} : vector<4x32xbf16>, vector<12x32xbf16>, vector<4x12xf32> -> vector<4x12xf32>
    %cst_336 = arith.constant dense<0xFF800000> : vector<4xf32>
    %892 = vector.multi_reduction <maximumf>, %891, %cst_336 [1] : vector<4x12xf32> to vector<4xf32>
    %893 = vector.shape_cast %892 : vector<4xf32> to vector<4x1xf32>
    %894 = vector.broadcast %893 : vector<4x1xf32> to vector<4x12xf32>
    %895 = arith.subf %891, %894 : vector<4x12xf32>
    %896 = math.exp %895 : vector<4x12xf32>
    %cst_337 = arith.constant dense<0.000000e+00> : vector<4xf32>
    %897 = vector.multi_reduction <add>, %896, %cst_337 [1] : vector<4x12xf32> to vector<4xf32>
    %898 = vector.shape_cast %897 : vector<4xf32> to vector<4x1xf32>
    %899 = tpu.reciprocal %898 {approx = true} : vector<4x1xf32> -> vector<4x1xf32>
    %900 = vector.broadcast %899 : vector<4x1xf32> to vector<4x12xf32>
    %901 = arith.mulf %896, %900 : vector<4x12xf32>
    %902 = arith.truncf %901 : vector<4x12xf32> to vector<4x12xbf16>
    %cst_338 = arith.constant dense<0.000000e+00> : vector<4x32xf32>
    %903 = tpu.matmul %902, %753, %cst_338 {dimension_numbers = #tpu.dot_dimension_numbers<[1], [0], [0], [1], [0, 0, 1, 1], [], []>} : vector<4x12xbf16>, vector<12x32xbf16>, vector<4x32xf32> -> vector<4x32xf32>
    %904 = vector.broadcast %62 : vector<1x32xf32> to vector<4x32xf32>
    %905 = arith.mulf %904, %903 : vector<4x32xf32>
    %906 = arith.addf %887, %905 : vector<4x32xf32>
    %907 = arith.truncf %906 : vector<4x32xf32> to vector<4x32xbf16>
    %c0_339 = arith.constant 0 : index
    %c0_340 = arith.constant 0 : index
    %908 = vector.load %arg23[%c0_339, %c0_340] : memref<32x32xbf16, #tpu.memory_space<vmem>>, vector<32x32xbf16>
    %cst_341 = arith.constant dense<0.000000e+00> : vector<4x32xf32>
    %909 = tpu.matmul %907, %908, %cst_341 {dimension_numbers = #tpu.dot_dimension_numbers<[1], [0], [0], [1], [0, 0, 1, 1], [], []>} : vector<4x32xbf16>, vector<32x32xbf16>, vector<4x32xf32> -> vector<4x32xf32>
    %c0_342 = arith.constant 0 : index
    %c0_343 = arith.constant 0 : index
    %910 = vector.load %arg20[%c0_342, %c0_343] : memref<1x32xf32, #tpu.memory_space<vmem>>, vector<1x32xf32>
    %911 = vector.broadcast %910 : vector<1x32xf32> to vector<4x32xf32>
    %912 = arith.addf %909, %911 : vector<4x32xf32>
    %913 = arith.addf %734, %912 : vector<4x32xf32>
    %cst_344 = arith.constant dense<0.000000e+00> : vector<4xf32>
    %914 = vector.multi_reduction <add>, %913, %cst_344 [1] : vector<4x32xf32> to vector<4xf32>
    %915 = vector.shape_cast %914 : vector<4xf32> to vector<4x1xf32>
    %cst_345 = arith.constant 3.200000e+01 : f32
    %916 = vector.broadcast %cst_345 : f32 to vector<4x1xf32>
    %917 = arith.divf %915, %916 : vector<4x1xf32>
    %918 = vector.broadcast %917 : vector<4x1xf32> to vector<4x32xf32>
    %919 = arith.subf %913, %918 : vector<4x32xf32>
    %920 = arith.mulf %919, %919 : vector<4x32xf32>
    %cst_346 = arith.constant dense<0.000000e+00> : vector<4xf32>
    %921 = vector.multi_reduction <add>, %920, %cst_346 [1] : vector<4x32xf32> to vector<4xf32>
    %922 = vector.shape_cast %921 : vector<4xf32> to vector<4x1xf32>
    %cst_347 = arith.constant 3.200000e+01 : f32
    %923 = vector.broadcast %cst_347 : f32 to vector<4x1xf32>
    %924 = arith.divf %922, %923 : vector<4x1xf32>
    %cst_348 = arith.constant 9.99999974E-6 : f32
    %925 = vector.broadcast %cst_348 : f32 to vector<4x1xf32>
    %926 = arith.addf %924, %925 : vector<4x1xf32>
    %927 = math.rsqrt %926 : vector<4x1xf32>
    %928 = vector.broadcast %927 : vector<4x1xf32> to vector<4x32xf32>
    %929 = arith.mulf %919, %928 : vector<4x32xf32>
    %c0_349 = arith.constant 0 : index
    %c0_350 = arith.constant 0 : index
    %930 = vector.load %arg14[%c0_349, %c0_350] : memref<1x32xf32, #tpu.memory_space<vmem>>, vector<1x32xf32>
    %931 = vector.broadcast %930 : vector<1x32xf32> to vector<4x32xf32>
    %932 = arith.mulf %929, %931 : vector<4x32xf32>
    %c0_351 = arith.constant 0 : index
    %c0_352 = arith.constant 0 : index
    %933 = vector.load %arg13[%c0_351, %c0_352] : memref<1x32xf32, #tpu.memory_space<vmem>>, vector<1x32xf32>
    %934 = vector.broadcast %933 : vector<1x32xf32> to vector<4x32xf32>
    %935 = arith.addf %932, %934 : vector<4x32xf32>
    %936 = arith.truncf %935 : vector<4x32xf32> to vector<4x32xbf16>
    %c0_353 = arith.constant 0 : index
    %c0_354 = arith.constant 0 : index
    %937 = vector.load %arg8[%c0_353, %c0_354] : memref<32x32xbf16, #tpu.memory_space<vmem>>, vector<32x32xbf16>
    %cst_355 = arith.constant dense<0.000000e+00> : vector<4x32xf32>
    %938 = tpu.matmul %936, %937, %cst_355 {dimension_numbers = #tpu.dot_dimension_numbers<[1], [0], [0], [1], [0, 0, 1, 1], [], []>} : vector<4x32xbf16>, vector<32x32xbf16>, vector<4x32xf32> -> vector<4x32xf32>
    %c0_356 = arith.constant 0 : index
    %c0_357 = arith.constant 0 : index
    %939 = vector.load %arg5[%c0_356, %c0_357] : memref<1x32xf32, #tpu.memory_space<vmem>>, vector<1x32xf32>
    %940 = vector.broadcast %939 : vector<1x32xf32> to vector<4x32xf32>
    %941 = arith.addf %938, %940 : vector<4x32xf32>
    %942 = arith.truncf %735 : vector<12x32xf32> to vector<12x32xbf16>
    %c0_358 = arith.constant 0 : index
    %c0_359 = arith.constant 0 : index
    %943 = vector.load %arg6[%c0_358, %c0_359] : memref<32x64xbf16, #tpu.memory_space<vmem>>, vector<32x64xbf16>
    %cst_360 = arith.constant dense<0.000000e+00> : vector<12x64xf32>
    %944 = tpu.matmul %942, %943, %cst_360 {dimension_numbers = #tpu.dot_dimension_numbers<[1], [0], [0], [1], [0, 0, 1, 1], [], []>} : vector<12x32xbf16>, vector<32x64xbf16>, vector<12x64xf32> -> vector<12x64xf32>
    %c0_361 = arith.constant 0 : index
    %c0_362 = arith.constant 0 : index
    %945 = vector.load %arg3[%c0_361, %c0_362] : memref<1x64xf32, #tpu.memory_space<vmem>>, vector<1x64xf32>
    %946 = vector.broadcast %945 : vector<1x64xf32> to vector<12x64xf32>
    %947 = arith.addf %944, %946 : vector<12x64xf32>
    %948 = vector.extract_strided_slice %947 {offsets = [0, 0], sizes = [12, 32], strides = [1, 1]} : vector<12x64xf32> to vector<12x32xf32>
    %949 = vector.extract_strided_slice %947 {offsets = [0, 32], sizes = [12, 32], strides = [1, 1]} : vector<12x64xf32> to vector<12x32xf32>
    %cst_363 = arith.constant 5.000000e-01 : f32
    %950 = vector.broadcast %cst_363 : f32 to vector<4x32xf32>
    %951 = arith.mulf %941, %950 : vector<4x32xf32>
    %952 = arith.truncf %948 : vector<12x32xf32> to vector<12x32xbf16>
    %953 = arith.truncf %949 : vector<12x32xf32> to vector<12x32xbf16>
    %cst_364 = arith.constant 0.000000e+00 : f32
    %954 = vector.broadcast %cst_364 : f32 to vector<4x32xf32>
    %955 = vector.broadcast %13 : vector<1x32xf32> to vector<4x32xf32>
    %956 = arith.mulf %951, %955 : vector<4x32xf32>
    %957 = arith.truncf %956 : vector<4x32xf32> to vector<4x32xbf16>
    %cst_365 = arith.constant dense<0.000000e+00> : vector<4x12xf32>
    %958 = tpu.matmul %957, %952, %cst_365 {dimension_numbers = #tpu.dot_dimension_numbers<[1], [1], [0], [0], [0, 0, 1, 0], [], []>} : vector<4x32xbf16>, vector<12x32xbf16>, vector<4x12xf32> -> vector<4x12xf32>
    %cst_366 = arith.constant dense<0xFF800000> : vector<4xf32>
    %959 = vector.multi_reduction <maximumf>, %958, %cst_366 [1] : vector<4x12xf32> to vector<4xf32>
    %960 = vector.shape_cast %959 : vector<4xf32> to vector<4x1xf32>
    %961 = vector.broadcast %960 : vector<4x1xf32> to vector<4x12xf32>
    %962 = arith.subf %958, %961 : vector<4x12xf32>
    %963 = math.exp %962 : vector<4x12xf32>
    %cst_367 = arith.constant dense<0.000000e+00> : vector<4xf32>
    %964 = vector.multi_reduction <add>, %963, %cst_367 [1] : vector<4x12xf32> to vector<4xf32>
    %965 = vector.shape_cast %964 : vector<4xf32> to vector<4x1xf32>
    %966 = tpu.reciprocal %965 {approx = true} : vector<4x1xf32> -> vector<4x1xf32>
    %967 = vector.broadcast %966 : vector<4x1xf32> to vector<4x12xf32>
    %968 = arith.mulf %963, %967 : vector<4x12xf32>
    %969 = arith.truncf %968 : vector<4x12xf32> to vector<4x12xbf16>
    %cst_368 = arith.constant dense<0.000000e+00> : vector<4x32xf32>
    %970 = tpu.matmul %969, %953, %cst_368 {dimension_numbers = #tpu.dot_dimension_numbers<[1], [0], [0], [1], [0, 0, 1, 1], [], []>} : vector<4x12xbf16>, vector<12x32xbf16>, vector<4x32xf32> -> vector<4x32xf32>
    %971 = vector.broadcast %13 : vector<1x32xf32> to vector<4x32xf32>
    %972 = arith.mulf %971, %970 : vector<4x32xf32>
    %973 = arith.addf %954, %972 : vector<4x32xf32>
    %974 = vector.broadcast %20 : vector<1x32xf32> to vector<4x32xf32>
    %975 = arith.mulf %951, %974 : vector<4x32xf32>
    %976 = arith.truncf %975 : vector<4x32xf32> to vector<4x32xbf16>
    %cst_369 = arith.constant dense<0.000000e+00> : vector<4x12xf32>
    %977 = tpu.matmul %976, %952, %cst_369 {dimension_numbers = #tpu.dot_dimension_numbers<[1], [1], [0], [0], [0, 0, 1, 0], [], []>} : vector<4x32xbf16>, vector<12x32xbf16>, vector<4x12xf32> -> vector<4x12xf32>
    %cst_370 = arith.constant dense<0xFF800000> : vector<4xf32>
    %978 = vector.multi_reduction <maximumf>, %977, %cst_370 [1] : vector<4x12xf32> to vector<4xf32>
    %979 = vector.shape_cast %978 : vector<4xf32> to vector<4x1xf32>
    %980 = vector.broadcast %979 : vector<4x1xf32> to vector<4x12xf32>
    %981 = arith.subf %977, %980 : vector<4x12xf32>
    %982 = math.exp %981 : vector<4x12xf32>
    %cst_371 = arith.constant dense<0.000000e+00> : vector<4xf32>
    %983 = vector.multi_reduction <add>, %982, %cst_371 [1] : vector<4x12xf32> to vector<4xf32>
    %984 = vector.shape_cast %983 : vector<4xf32> to vector<4x1xf32>
    %985 = tpu.reciprocal %984 {approx = true} : vector<4x1xf32> -> vector<4x1xf32>
    %986 = vector.broadcast %985 : vector<4x1xf32> to vector<4x12xf32>
    %987 = arith.mulf %982, %986 : vector<4x12xf32>
    %988 = arith.truncf %987 : vector<4x12xf32> to vector<4x12xbf16>
    %cst_372 = arith.constant dense<0.000000e+00> : vector<4x32xf32>
    %989 = tpu.matmul %988, %953, %cst_372 {dimension_numbers = #tpu.dot_dimension_numbers<[1], [0], [0], [1], [0, 0, 1, 1], [], []>} : vector<4x12xbf16>, vector<12x32xbf16>, vector<4x32xf32> -> vector<4x32xf32>
    %990 = vector.broadcast %20 : vector<1x32xf32> to vector<4x32xf32>
    %991 = arith.mulf %990, %989 : vector<4x32xf32>
    %992 = arith.addf %973, %991 : vector<4x32xf32>
    %993 = vector.broadcast %27 : vector<1x32xf32> to vector<4x32xf32>
    %994 = arith.mulf %951, %993 : vector<4x32xf32>
    %995 = arith.truncf %994 : vector<4x32xf32> to vector<4x32xbf16>
    %cst_373 = arith.constant dense<0.000000e+00> : vector<4x12xf32>
    %996 = tpu.matmul %995, %952, %cst_373 {dimension_numbers = #tpu.dot_dimension_numbers<[1], [1], [0], [0], [0, 0, 1, 0], [], []>} : vector<4x32xbf16>, vector<12x32xbf16>, vector<4x12xf32> -> vector<4x12xf32>
    %cst_374 = arith.constant dense<0xFF800000> : vector<4xf32>
    %997 = vector.multi_reduction <maximumf>, %996, %cst_374 [1] : vector<4x12xf32> to vector<4xf32>
    %998 = vector.shape_cast %997 : vector<4xf32> to vector<4x1xf32>
    %999 = vector.broadcast %998 : vector<4x1xf32> to vector<4x12xf32>
    %1000 = arith.subf %996, %999 : vector<4x12xf32>
    %1001 = math.exp %1000 : vector<4x12xf32>
    %cst_375 = arith.constant dense<0.000000e+00> : vector<4xf32>
    %1002 = vector.multi_reduction <add>, %1001, %cst_375 [1] : vector<4x12xf32> to vector<4xf32>
    %1003 = vector.shape_cast %1002 : vector<4xf32> to vector<4x1xf32>
    %1004 = tpu.reciprocal %1003 {approx = true} : vector<4x1xf32> -> vector<4x1xf32>
    %1005 = vector.broadcast %1004 : vector<4x1xf32> to vector<4x12xf32>
    %1006 = arith.mulf %1001, %1005 : vector<4x12xf32>
    %1007 = arith.truncf %1006 : vector<4x12xf32> to vector<4x12xbf16>
    %cst_376 = arith.constant dense<0.000000e+00> : vector<4x32xf32>
    %1008 = tpu.matmul %1007, %953, %cst_376 {dimension_numbers = #tpu.dot_dimension_numbers<[1], [0], [0], [1], [0, 0, 1, 1], [], []>} : vector<4x12xbf16>, vector<12x32xbf16>, vector<4x32xf32> -> vector<4x32xf32>
    %1009 = vector.broadcast %27 : vector<1x32xf32> to vector<4x32xf32>
    %1010 = arith.mulf %1009, %1008 : vector<4x32xf32>
    %1011 = arith.addf %992, %1010 : vector<4x32xf32>
    %1012 = vector.broadcast %34 : vector<1x32xf32> to vector<4x32xf32>
    %1013 = arith.mulf %951, %1012 : vector<4x32xf32>
    %1014 = arith.truncf %1013 : vector<4x32xf32> to vector<4x32xbf16>
    %cst_377 = arith.constant dense<0.000000e+00> : vector<4x12xf32>
    %1015 = tpu.matmul %1014, %952, %cst_377 {dimension_numbers = #tpu.dot_dimension_numbers<[1], [1], [0], [0], [0, 0, 1, 0], [], []>} : vector<4x32xbf16>, vector<12x32xbf16>, vector<4x12xf32> -> vector<4x12xf32>
    %cst_378 = arith.constant dense<0xFF800000> : vector<4xf32>
    %1016 = vector.multi_reduction <maximumf>, %1015, %cst_378 [1] : vector<4x12xf32> to vector<4xf32>
    %1017 = vector.shape_cast %1016 : vector<4xf32> to vector<4x1xf32>
    %1018 = vector.broadcast %1017 : vector<4x1xf32> to vector<4x12xf32>
    %1019 = arith.subf %1015, %1018 : vector<4x12xf32>
    %1020 = math.exp %1019 : vector<4x12xf32>
    %cst_379 = arith.constant dense<0.000000e+00> : vector<4xf32>
    %1021 = vector.multi_reduction <add>, %1020, %cst_379 [1] : vector<4x12xf32> to vector<4xf32>
    %1022 = vector.shape_cast %1021 : vector<4xf32> to vector<4x1xf32>
    %1023 = tpu.reciprocal %1022 {approx = true} : vector<4x1xf32> -> vector<4x1xf32>
    %1024 = vector.broadcast %1023 : vector<4x1xf32> to vector<4x12xf32>
    %1025 = arith.mulf %1020, %1024 : vector<4x12xf32>
    %1026 = arith.truncf %1025 : vector<4x12xf32> to vector<4x12xbf16>
    %cst_380 = arith.constant dense<0.000000e+00> : vector<4x32xf32>
    %1027 = tpu.matmul %1026, %953, %cst_380 {dimension_numbers = #tpu.dot_dimension_numbers<[1], [0], [0], [1], [0, 0, 1, 1], [], []>} : vector<4x12xbf16>, vector<12x32xbf16>, vector<4x32xf32> -> vector<4x32xf32>
    %1028 = vector.broadcast %34 : vector<1x32xf32> to vector<4x32xf32>
    %1029 = arith.mulf %1028, %1027 : vector<4x32xf32>
    %1030 = arith.addf %1011, %1029 : vector<4x32xf32>
    %1031 = vector.broadcast %41 : vector<1x32xf32> to vector<4x32xf32>
    %1032 = arith.mulf %951, %1031 : vector<4x32xf32>
    %1033 = arith.truncf %1032 : vector<4x32xf32> to vector<4x32xbf16>
    %cst_381 = arith.constant dense<0.000000e+00> : vector<4x12xf32>
    %1034 = tpu.matmul %1033, %952, %cst_381 {dimension_numbers = #tpu.dot_dimension_numbers<[1], [1], [0], [0], [0, 0, 1, 0], [], []>} : vector<4x32xbf16>, vector<12x32xbf16>, vector<4x12xf32> -> vector<4x12xf32>
    %cst_382 = arith.constant dense<0xFF800000> : vector<4xf32>
    %1035 = vector.multi_reduction <maximumf>, %1034, %cst_382 [1] : vector<4x12xf32> to vector<4xf32>
    %1036 = vector.shape_cast %1035 : vector<4xf32> to vector<4x1xf32>
    %1037 = vector.broadcast %1036 : vector<4x1xf32> to vector<4x12xf32>
    %1038 = arith.subf %1034, %1037 : vector<4x12xf32>
    %1039 = math.exp %1038 : vector<4x12xf32>
    %cst_383 = arith.constant dense<0.000000e+00> : vector<4xf32>
    %1040 = vector.multi_reduction <add>, %1039, %cst_383 [1] : vector<4x12xf32> to vector<4xf32>
    %1041 = vector.shape_cast %1040 : vector<4xf32> to vector<4x1xf32>
    %1042 = tpu.reciprocal %1041 {approx = true} : vector<4x1xf32> -> vector<4x1xf32>
    %1043 = vector.broadcast %1042 : vector<4x1xf32> to vector<4x12xf32>
    %1044 = arith.mulf %1039, %1043 : vector<4x12xf32>
    %1045 = arith.truncf %1044 : vector<4x12xf32> to vector<4x12xbf16>
    %cst_384 = arith.constant dense<0.000000e+00> : vector<4x32xf32>
    %1046 = tpu.matmul %1045, %953, %cst_384 {dimension_numbers = #tpu.dot_dimension_numbers<[1], [0], [0], [1], [0, 0, 1, 1], [], []>} : vector<4x12xbf16>, vector<12x32xbf16>, vector<4x32xf32> -> vector<4x32xf32>
    %1047 = vector.broadcast %41 : vector<1x32xf32> to vector<4x32xf32>
    %1048 = arith.mulf %1047, %1046 : vector<4x32xf32>
    %1049 = arith.addf %1030, %1048 : vector<4x32xf32>
    %1050 = vector.broadcast %48 : vector<1x32xf32> to vector<4x32xf32>
    %1051 = arith.mulf %951, %1050 : vector<4x32xf32>
    %1052 = arith.truncf %1051 : vector<4x32xf32> to vector<4x32xbf16>
    %cst_385 = arith.constant dense<0.000000e+00> : vector<4x12xf32>
    %1053 = tpu.matmul %1052, %952, %cst_385 {dimension_numbers = #tpu.dot_dimension_numbers<[1], [1], [0], [0], [0, 0, 1, 0], [], []>} : vector<4x32xbf16>, vector<12x32xbf16>, vector<4x12xf32> -> vector<4x12xf32>
    %cst_386 = arith.constant dense<0xFF800000> : vector<4xf32>
    %1054 = vector.multi_reduction <maximumf>, %1053, %cst_386 [1] : vector<4x12xf32> to vector<4xf32>
    %1055 = vector.shape_cast %1054 : vector<4xf32> to vector<4x1xf32>
    %1056 = vector.broadcast %1055 : vector<4x1xf32> to vector<4x12xf32>
    %1057 = arith.subf %1053, %1056 : vector<4x12xf32>
    %1058 = math.exp %1057 : vector<4x12xf32>
    %cst_387 = arith.constant dense<0.000000e+00> : vector<4xf32>
    %1059 = vector.multi_reduction <add>, %1058, %cst_387 [1] : vector<4x12xf32> to vector<4xf32>
    %1060 = vector.shape_cast %1059 : vector<4xf32> to vector<4x1xf32>
    %1061 = tpu.reciprocal %1060 {approx = true} : vector<4x1xf32> -> vector<4x1xf32>
    %1062 = vector.broadcast %1061 : vector<4x1xf32> to vector<4x12xf32>
    %1063 = arith.mulf %1058, %1062 : vector<4x12xf32>
    %1064 = arith.truncf %1063 : vector<4x12xf32> to vector<4x12xbf16>
    %cst_388 = arith.constant dense<0.000000e+00> : vector<4x32xf32>
    %1065 = tpu.matmul %1064, %953, %cst_388 {dimension_numbers = #tpu.dot_dimension_numbers<[1], [0], [0], [1], [0, 0, 1, 1], [], []>} : vector<4x12xbf16>, vector<12x32xbf16>, vector<4x32xf32> -> vector<4x32xf32>
    %1066 = vector.broadcast %48 : vector<1x32xf32> to vector<4x32xf32>
    %1067 = arith.mulf %1066, %1065 : vector<4x32xf32>
    %1068 = arith.addf %1049, %1067 : vector<4x32xf32>
    %1069 = vector.broadcast %55 : vector<1x32xf32> to vector<4x32xf32>
    %1070 = arith.mulf %951, %1069 : vector<4x32xf32>
    %1071 = arith.truncf %1070 : vector<4x32xf32> to vector<4x32xbf16>
    %cst_389 = arith.constant dense<0.000000e+00> : vector<4x12xf32>
    %1072 = tpu.matmul %1071, %952, %cst_389 {dimension_numbers = #tpu.dot_dimension_numbers<[1], [1], [0], [0], [0, 0, 1, 0], [], []>} : vector<4x32xbf16>, vector<12x32xbf16>, vector<4x12xf32> -> vector<4x12xf32>
    %cst_390 = arith.constant dense<0xFF800000> : vector<4xf32>
    %1073 = vector.multi_reduction <maximumf>, %1072, %cst_390 [1] : vector<4x12xf32> to vector<4xf32>
    %1074 = vector.shape_cast %1073 : vector<4xf32> to vector<4x1xf32>
    %1075 = vector.broadcast %1074 : vector<4x1xf32> to vector<4x12xf32>
    %1076 = arith.subf %1072, %1075 : vector<4x12xf32>
    %1077 = math.exp %1076 : vector<4x12xf32>
    %cst_391 = arith.constant dense<0.000000e+00> : vector<4xf32>
    %1078 = vector.multi_reduction <add>, %1077, %cst_391 [1] : vector<4x12xf32> to vector<4xf32>
    %1079 = vector.shape_cast %1078 : vector<4xf32> to vector<4x1xf32>
    %1080 = tpu.reciprocal %1079 {approx = true} : vector<4x1xf32> -> vector<4x1xf32>
    %1081 = vector.broadcast %1080 : vector<4x1xf32> to vector<4x12xf32>
    %1082 = arith.mulf %1077, %1081 : vector<4x12xf32>
    %1083 = arith.truncf %1082 : vector<4x12xf32> to vector<4x12xbf16>
    %cst_392 = arith.constant dense<0.000000e+00> : vector<4x32xf32>
    %1084 = tpu.matmul %1083, %953, %cst_392 {dimension_numbers = #tpu.dot_dimension_numbers<[1], [0], [0], [1], [0, 0, 1, 1], [], []>} : vector<4x12xbf16>, vector<12x32xbf16>, vector<4x32xf32> -> vector<4x32xf32>
    %1085 = vector.broadcast %55 : vector<1x32xf32> to vector<4x32xf32>
    %1086 = arith.mulf %1085, %1084 : vector<4x32xf32>
    %1087 = arith.addf %1068, %1086 : vector<4x32xf32>
    %1088 = vector.broadcast %62 : vector<1x32xf32> to vector<4x32xf32>
    %1089 = arith.mulf %951, %1088 : vector<4x32xf32>
    %1090 = arith.truncf %1089 : vector<4x32xf32> to vector<4x32xbf16>
    %cst_393 = arith.constant dense<0.000000e+00> : vector<4x12xf32>
    %1091 = tpu.matmul %1090, %952, %cst_393 {dimension_numbers = #tpu.dot_dimension_numbers<[1], [1], [0], [0], [0, 0, 1, 0], [], []>} : vector<4x32xbf16>, vector<12x32xbf16>, vector<4x12xf32> -> vector<4x12xf32>
    %cst_394 = arith.constant dense<0xFF800000> : vector<4xf32>
    %1092 = vector.multi_reduction <maximumf>, %1091, %cst_394 [1] : vector<4x12xf32> to vector<4xf32>
    %1093 = vector.shape_cast %1092 : vector<4xf32> to vector<4x1xf32>
    %1094 = vector.broadcast %1093 : vector<4x1xf32> to vector<4x12xf32>
    %1095 = arith.subf %1091, %1094 : vector<4x12xf32>
    %1096 = math.exp %1095 : vector<4x12xf32>
    %cst_395 = arith.constant dense<0.000000e+00> : vector<4xf32>
    %1097 = vector.multi_reduction <add>, %1096, %cst_395 [1] : vector<4x12xf32> to vector<4xf32>
    %1098 = vector.shape_cast %1097 : vector<4xf32> to vector<4x1xf32>
    %1099 = tpu.reciprocal %1098 {approx = true} : vector<4x1xf32> -> vector<4x1xf32>
    %1100 = vector.broadcast %1099 : vector<4x1xf32> to vector<4x12xf32>
    %1101 = arith.mulf %1096, %1100 : vector<4x12xf32>
    %1102 = arith.truncf %1101 : vector<4x12xf32> to vector<4x12xbf16>
    %cst_396 = arith.constant dense<0.000000e+00> : vector<4x32xf32>
    %1103 = tpu.matmul %1102, %953, %cst_396 {dimension_numbers = #tpu.dot_dimension_numbers<[1], [0], [0], [1], [0, 0, 1, 1], [], []>} : vector<4x12xbf16>, vector<12x32xbf16>, vector<4x32xf32> -> vector<4x32xf32>
    %1104 = vector.broadcast %62 : vector<1x32xf32> to vector<4x32xf32>
    %1105 = arith.mulf %1104, %1103 : vector<4x32xf32>
    %1106 = arith.addf %1087, %1105 : vector<4x32xf32>
    %1107 = arith.truncf %1106 : vector<4x32xf32> to vector<4x32xbf16>
    %c0_397 = arith.constant 0 : index
    %c0_398 = arith.constant 0 : index
    %1108 = vector.load %arg7[%c0_397, %c0_398] : memref<32x32xbf16, #tpu.memory_space<vmem>>, vector<32x32xbf16>
    %cst_399 = arith.constant dense<0.000000e+00> : vector<4x32xf32>
    %1109 = tpu.matmul %1107, %1108, %cst_399 {dimension_numbers = #tpu.dot_dimension_numbers<[1], [0], [0], [1], [0, 0, 1, 1], [], []>} : vector<4x32xbf16>, vector<32x32xbf16>, vector<4x32xf32> -> vector<4x32xf32>
    %c0_400 = arith.constant 0 : index
    %c0_401 = arith.constant 0 : index
    %1110 = vector.load %arg4[%c0_400, %c0_401] : memref<1x32xf32, #tpu.memory_space<vmem>>, vector<1x32xf32>
    %1111 = vector.broadcast %1110 : vector<1x32xf32> to vector<4x32xf32>
    %1112 = arith.addf %1109, %1111 : vector<4x32xf32>
    %1113 = arith.addf %935, %1112 : vector<4x32xf32>
    %cst_402 = arith.constant dense<0.000000e+00> : vector<4xf32>
    %1114 = vector.multi_reduction <add>, %1113, %cst_402 [1] : vector<4x32xf32> to vector<4xf32>
    %1115 = vector.shape_cast %1114 : vector<4xf32> to vector<4x1xf32>
    %cst_403 = arith.constant 3.200000e+01 : f32
    %1116 = vector.broadcast %cst_403 : f32 to vector<4x1xf32>
    %1117 = arith.divf %1115, %1116 : vector<4x1xf32>
    %1118 = vector.broadcast %1117 : vector<4x1xf32> to vector<4x32xf32>
    %1119 = arith.subf %1113, %1118 : vector<4x32xf32>
    %1120 = arith.mulf %1119, %1119 : vector<4x32xf32>
    %cst_404 = arith.constant dense<0.000000e+00> : vector<4xf32>
    %1121 = vector.multi_reduction <add>, %1120, %cst_404 [1] : vector<4x32xf32> to vector<4xf32>
    %1122 = vector.shape_cast %1121 : vector<4xf32> to vector<4x1xf32>
    %cst_405 = arith.constant 3.200000e+01 : f32
    %1123 = vector.broadcast %cst_405 : f32 to vector<4x1xf32>
    %1124 = arith.divf %1122, %1123 : vector<4x1xf32>
    %cst_406 = arith.constant 9.99999974E-6 : f32
    %1125 = vector.broadcast %cst_406 : f32 to vector<4x1xf32>
    %1126 = arith.addf %1124, %1125 : vector<4x1xf32>
    %1127 = math.rsqrt %1126 : vector<4x1xf32>
    %1128 = vector.broadcast %1127 : vector<4x1xf32> to vector<4x32xf32>
    %1129 = arith.mulf %1119, %1128 : vector<4x32xf32>
    %c0_407 = arith.constant 0 : index
    %c0_408 = arith.constant 0 : index
    %1130 = vector.load %arg16[%c0_407, %c0_408] : memref<1x32xf32, #tpu.memory_space<vmem>>, vector<1x32xf32>
    %1131 = vector.broadcast %1130 : vector<1x32xf32> to vector<4x32xf32>
    %1132 = arith.mulf %1129, %1131 : vector<4x32xf32>
    %c0_409 = arith.constant 0 : index
    %c0_410 = arith.constant 0 : index
    %1133 = vector.load %arg15[%c0_409, %c0_410] : memref<1x32xf32, #tpu.memory_space<vmem>>, vector<1x32xf32>
    %1134 = vector.broadcast %1133 : vector<1x32xf32> to vector<4x32xf32>
    %1135 = arith.addf %1132, %1134 : vector<4x32xf32>
    %1136 = arith.truncf %1135 : vector<4x32xf32> to vector<4x32xbf16>
    %c0_411 = arith.constant 0 : index
    %c0_412 = arith.constant 0 : index
    %1137 = vector.load %arg11[%c0_411, %c0_412] : memref<32x64xbf16, #tpu.memory_space<vmem>>, vector<32x64xbf16>
    %cst_413 = arith.constant dense<0.000000e+00> : vector<4x64xf32>
    %1138 = tpu.matmul %1136, %1137, %cst_413 {dimension_numbers = #tpu.dot_dimension_numbers<[1], [0], [0], [1], [0, 0, 1, 1], [], []>} : vector<4x32xbf16>, vector<32x64xbf16>, vector<4x64xf32> -> vector<4x64xf32>
    %c0_414 = arith.constant 0 : index
    %c0_415 = arith.constant 0 : index
    %1139 = vector.load %arg9[%c0_414, %c0_415] : memref<1x64xf32, #tpu.memory_space<vmem>>, vector<1x64xf32>
    %1140 = vector.broadcast %1139 : vector<1x64xf32> to vector<4x64xf32>
    %1141 = arith.addf %1138, %1140 : vector<4x64xf32>
    %cst_416 = arith.constant 0.000000e+00 : f32
    %1142 = vector.broadcast %cst_416 : f32 to vector<4x64xf32>
    %1143 = arith.maximumf %1141, %1142 : vector<4x64xf32>
    %1144 = arith.truncf %1143 : vector<4x64xf32> to vector<4x64xbf16>
    %c0_417 = arith.constant 0 : index
    %c0_418 = arith.constant 0 : index
    %1145 = vector.load %arg12[%c0_417, %c0_418] : memref<64x32xbf16, #tpu.memory_space<vmem>>, vector<64x32xbf16>
    %cst_419 = arith.constant dense<0.000000e+00> : vector<4x32xf32>
    %1146 = tpu.matmul %1144, %1145, %cst_419 {dimension_numbers = #tpu.dot_dimension_numbers<[1], [0], [0], [1], [0, 0, 1, 1], [], []>} : vector<4x64xbf16>, vector<64x32xbf16>, vector<4x32xf32> -> vector<4x32xf32>
    %c0_420 = arith.constant 0 : index
    %c0_421 = arith.constant 0 : index
    %1147 = vector.load %arg10[%c0_420, %c0_421] : memref<1x32xf32, #tpu.memory_space<vmem>>, vector<1x32xf32>
    %1148 = vector.broadcast %1147 : vector<1x32xf32> to vector<4x32xf32>
    %1149 = arith.addf %1146, %1148 : vector<4x32xf32>
    %1150 = arith.addf %1135, %1149 : vector<4x32xf32>
    %cst_422 = arith.constant dense<0.000000e+00> : vector<4xf32>
    %1151 = vector.multi_reduction <add>, %1150, %cst_422 [1] : vector<4x32xf32> to vector<4xf32>
    %1152 = vector.shape_cast %1151 : vector<4xf32> to vector<4x1xf32>
    %cst_423 = arith.constant 3.200000e+01 : f32
    %1153 = vector.broadcast %cst_423 : f32 to vector<4x1xf32>
    %1154 = arith.divf %1152, %1153 : vector<4x1xf32>
    %1155 = vector.broadcast %1154 : vector<4x1xf32> to vector<4x32xf32>
    %1156 = arith.subf %1150, %1155 : vector<4x32xf32>
    %1157 = arith.mulf %1156, %1156 : vector<4x32xf32>
    %cst_424 = arith.constant dense<0.000000e+00> : vector<4xf32>
    %1158 = vector.multi_reduction <add>, %1157, %cst_424 [1] : vector<4x32xf32> to vector<4xf32>
    %1159 = vector.shape_cast %1158 : vector<4xf32> to vector<4x1xf32>
    %cst_425 = arith.constant 3.200000e+01 : f32
    %1160 = vector.broadcast %cst_425 : f32 to vector<4x1xf32>
    %1161 = arith.divf %1159, %1160 : vector<4x1xf32>
    %cst_426 = arith.constant 9.99999974E-6 : f32
    %1162 = vector.broadcast %cst_426 : f32 to vector<4x1xf32>
    %1163 = arith.addf %1161, %1162 : vector<4x1xf32>
    %1164 = math.rsqrt %1163 : vector<4x1xf32>
    %1165 = vector.broadcast %1164 : vector<4x1xf32> to vector<4x32xf32>
    %1166 = arith.mulf %1156, %1165 : vector<4x32xf32>
    %c0_427 = arith.constant 0 : index
    %c0_428 = arith.constant 0 : index
    %1167 = vector.load %arg18[%c0_427, %c0_428] : memref<1x32xf32, #tpu.memory_space<vmem>>, vector<1x32xf32>
    %1168 = vector.broadcast %1167 : vector<1x32xf32> to vector<4x32xf32>
    %1169 = arith.mulf %1166, %1168 : vector<4x32xf32>
    %c0_429 = arith.constant 0 : index
    %c0_430 = arith.constant 0 : index
    %1170 = vector.load %arg17[%c0_429, %c0_430] : memref<1x32xf32, #tpu.memory_space<vmem>>, vector<1x32xf32>
    %1171 = vector.broadcast %1170 : vector<1x32xf32> to vector<4x32xf32>
    %1172 = arith.addf %1169, %1171 : vector<4x32xf32>
    %c4_431 = arith.constant 4 : index
    %c0_432 = arith.constant 0 : index
    %1173 = vector.load %arg60[%c4_431, %c0_432] : memref<8x32xf32, #tpu.memory_space<vmem>>, vector<4x32xf32>
    tpu.vector_store %arg60[%c4_431, %c0_432], %1172 {strides = array<i32>} : memref<8x32xf32, #tpu.memory_space<vmem>>, vector<4x32xf32>,
    %c0_433 = arith.constant 0 : index
    %c0_434 = arith.constant 0 : index
    %1174 = vector.load %arg60[%c0_433, %c0_434] : memref<8x32xf32, #tpu.memory_space<vmem>>, vector<8x32xf32>
    %1175 = arith.truncf %1174 : vector<8x32xf32> to vector<8x32xbf16>
    %c0_435 = arith.constant 0 : index
    %c0_436 = arith.constant 0 : index
    %1176 = vector.load %arg52[%c0_435, %c0_436] : memref<32x64xbf16, #tpu.memory_space<vmem>>, vector<32x64xbf16>
    %cst_437 = arith.constant dense<0.000000e+00> : vector<8x64xf32>
    %1177 = tpu.matmul %1175, %1176, %cst_437 {dimension_numbers = #tpu.dot_dimension_numbers<[1], [0], [0], [1], [0, 0, 1, 1], [], []>} : vector<8x32xbf16>, vector<32x64xbf16>, vector<8x64xf32> -> vector<8x64xf32>
    %c0_438 = arith.constant 0 : index
    %c0_439 = arith.constant 0 : index
    %1178 = vector.load %arg51[%c0_438, %c0_439] : memref<1x64xf32, #tpu.memory_space<vmem>>, vector<1x64xf32>
    %1179 = vector.broadcast %1178 : vector<1x64xf32> to vector<8x64xf32>
    %1180 = arith.addf %1177, %1179 : vector<8x64xf32>
    %cst_440 = arith.constant 0.000000e+00 : f32
    %1181 = vector.broadcast %cst_440 : f32 to vector<8x64xf32>
    %1182 = arith.maximumf %1180, %1181 : vector<8x64xf32>
    %1183 = arith.addf %273, %1182 : vector<8x64xf32>
    %1184 = arith.mulf %125, %1183 : vector<8x64xf32>
    %1185 = arith.truncf %1184 : vector<8x64xf32> to vector<8x64xbf16>
    %c2_441 = arith.constant 2 : index
    %c0_442 = arith.constant 0 : index
    %c0_443 = arith.constant 0 : index
    %1186 = vector.load %arg50[%c2_441, %c0_442, %c0_443] : memref<3x64x8xbf16, #tpu.memory_space<vmem>>, vector<1x64x8xbf16>
    %1187 = vector.shape_cast %1186 : vector<1x64x8xbf16> to vector<64x8xbf16>
    %cst_444 = arith.constant dense<0.000000e+00> : vector<8x8xf32>
    %1188 = tpu.matmul %1185, %1187, %cst_444 {dimension_numbers = #tpu.dot_dimension_numbers<[1], [0], [0], [1], [0, 0, 1, 1], [], []>} : vector<8x64xbf16>, vector<64x8xbf16>, vector<8x8xf32> -> vector<8x8xf32>
    %c8_445 = arith.constant 8 : index
    %c0_446 = arith.constant 0 : index
    %1189 = vector.load %arg61[%c8_445, %c0_446] : memref<16x64xf32, #tpu.memory_space<vmem>>, vector<8x64xf32>
    tpu.vector_store %arg61[%c8_445, %c0_446], %1184 {strides = array<i32>} : memref<16x64xf32, #tpu.memory_space<vmem>>, vector<8x64xf32>,
    %c6_447 = arith.constant 6 : index
    %c0_448 = arith.constant 0 : index
    %1190 = vector.load %arg61[%c6_447, %c0_448] : memref<16x64xf32, #tpu.memory_space<vmem>>, vector<8x64xf32>
    %1191 = arith.truncf %1190 : vector<8x64xf32> to vector<8x64xbf16>
    %c0_449 = arith.constant 0 : index
    %c0_450 = arith.constant 0 : index
    %c0_451 = arith.constant 0 : index
    %1192 = vector.load %arg50[%c0_449, %c0_450, %c0_451] : memref<3x64x8xbf16, #tpu.memory_space<vmem>>, vector<1x64x8xbf16>
    %1193 = vector.shape_cast %1192 : vector<1x64x8xbf16> to vector<64x8xbf16>
    %cst_452 = arith.constant dense<0.000000e+00> : vector<8x8xf32>
    %1194 = tpu.matmul %1191, %1193, %cst_452 {dimension_numbers = #tpu.dot_dimension_numbers<[1], [0], [0], [1], [0, 0, 1, 1], [], []>} : vector<8x64xbf16>, vector<64x8xbf16>, vector<8x8xf32> -> vector<8x8xf32>
    %1195 = arith.addf %1188, %1194 : vector<8x8xf32>
    %c8_453 = arith.constant 8 : index
    %c0_454 = arith.constant 0 : index
    %1196 = vector.load %arg61[%c8_453, %c0_454] : memref<16x64xf32, #tpu.memory_space<vmem>>, vector<8x64xf32>
    tpu.vector_store %arg61[%c8_453, %c0_454], %1184 {strides = array<i32>} : memref<16x64xf32, #tpu.memory_space<vmem>>, vector<8x64xf32>,
    %c7_455 = arith.constant 7 : index
    %c0_456 = arith.constant 0 : index
    %1197 = vector.load %arg61[%c7_455, %c0_456] : memref<16x64xf32, #tpu.memory_space<vmem>>, vector<8x64xf32>
    %1198 = arith.truncf %1197 : vector<8x64xf32> to vector<8x64xbf16>
    %c1_457 = arith.constant 1 : index
    %c0_458 = arith.constant 0 : index
    %c0_459 = arith.constant 0 : index
    %1199 = vector.load %arg50[%c1_457, %c0_458, %c0_459] : memref<3x64x8xbf16, #tpu.memory_space<vmem>>, vector<1x64x8xbf16>
    %1200 = vector.shape_cast %1199 : vector<1x64x8xbf16> to vector<64x8xbf16>
    %cst_460 = arith.constant dense<0.000000e+00> : vector<8x8xf32>
    %1201 = tpu.matmul %1198, %1200, %cst_460 {dimension_numbers = #tpu.dot_dimension_numbers<[1], [0], [0], [1], [0, 0, 1, 1], [], []>} : vector<8x64xbf16>, vector<64x8xbf16>, vector<8x8xf32> -> vector<8x8xf32>
    %1202 = arith.addf %1195, %1201 : vector<8x8xf32>
    %1203 = math.tanh %1202 : vector<8x8xf32>
    %c0_461 = arith.constant 0 : index
    %c0_462 = arith.constant 0 : index
    %c0_463 = arith.constant 0 : index
    %1204 = vector.load %arg57[%c0_461, %c0_462, %c0_463] : memref<1x8x8xf32, #tpu.memory_space<vmem>>, vector<1x8x8xf32>
    %1205 = vector.shape_cast %1204 : vector<1x8x8xf32> to vector<8x8xf32>
    %1206 = vector.shape_cast %1203 : vector<8x8xf32> to vector<1x8x8xf32>
    tpu.vector_store %arg57[%c0_461, %c0_462, %c0_463], %1206 {strides = array<i32>} : memref<1x8x8xf32, #tpu.memory_space<vmem>>, vector<1x8x8xf32>,
    return
  }
  func.func @transform_0(%arg0: i32) -> (i32, i32, i32) {
    %c0_i32 = arith.constant 0 : i32
    %c0_i32_0 = arith.constant 0 : i32
    %c0_i32_1 = arith.constant 0 : i32
    return %arg0, %c0_i32, %c0_i32_0 : i32, i32, i32
  }
  func.func @transform_1(%arg0: i32) -> (i32, i32, i32) {
    %c0_i32 = arith.constant 0 : i32
    %c0_i32_0 = arith.constant 0 : i32
    %c0_i32_1 = arith.constant 0 : i32
    return %arg0, %c0_i32, %c0_i32_0 : i32, i32, i32
  }
  func.func @transform_2(%arg0: i32) -> (i32, i32) {
    %c0_i32 = arith.constant 0 : i32
    %c0_i32_0 = arith.constant 0 : i32
    %c0_i32_1 = arith.constant 0 : i32
    return %c0_i32, %c0_i32_0 : i32, i32
  }
  func.func @transform_3(%arg0: i32) -> (i32, i32) {
    %c0_i32 = arith.constant 0 : i32
    %c0_i32_0 = arith.constant 0 : i32
    %c0_i32_1 = arith.constant 0 : i32
    return %c0_i32, %c0_i32_0 : i32, i32
  }
  func.func @transform_4(%arg0: i32) -> (i32, i32) {
    %c0_i32 = arith.constant 0 : i32
    %c0_i32_0 = arith.constant 0 : i32
    %c0_i32_1 = arith.constant 0 : i32
    return %c0_i32, %c0_i32_0 : i32, i32
  }
  func.func @transform_5(%arg0: i32) -> (i32, i32) {
    %c0_i32 = arith.constant 0 : i32
    %c0_i32_0 = arith.constant 0 : i32
    %c0_i32_1 = arith.constant 0 : i32
    return %c0_i32, %c0_i32_0 : i32, i32
  }
  func.func @transform_6(%arg0: i32) -> (i32, i32) {
    %c0_i32 = arith.constant 0 : i32
    %c0_i32_0 = arith.constant 0 : i32
    %c0_i32_1 = arith.constant 0 : i32
    return %c0_i32, %c0_i32_0 : i32, i32
  }
  func.func @transform_7(%arg0: i32) -> (i32, i32) {
    %c0_i32 = arith.constant 0 : i32
    %c0_i32_0 = arith.constant 0 : i32
    %c0_i32_1 = arith.constant 0 : i32
    return %c0_i32, %c0_i32_0 : i32, i32
  }
  func.func @transform_8(%arg0: i32) -> (i32, i32) {
    %c0_i32 = arith.constant 0 : i32
    %c0_i32_0 = arith.constant 0 : i32
    %c0_i32_1 = arith.constant 0 : i32
    return %c0_i32, %c0_i32_0 : i32, i32
  }
  func.func @transform_9(%arg0: i32) -> (i32, i32) {
    %c0_i32 = arith.constant 0 : i32
    %c0_i32_0 = arith.constant 0 : i32
    %c0_i32_1 = arith.constant 0 : i32
    return %c0_i32, %c0_i32_0 : i32, i32
  }
  func.func @transform_10(%arg0: i32) -> (i32, i32) {
    %c0_i32 = arith.constant 0 : i32
    %c0_i32_0 = arith.constant 0 : i32
    %c0_i32_1 = arith.constant 0 : i32
    return %c0_i32, %c0_i32_0 : i32, i32
  }
  func.func @transform_11(%arg0: i32) -> (i32, i32) {
    %c0_i32 = arith.constant 0 : i32
    %c0_i32_0 = arith.constant 0 : i32
    %c0_i32_1 = arith.constant 0 : i32
    return %c0_i32, %c0_i32_0 : i32, i32
  }
  func.func @transform_12(%arg0: i32) -> (i32, i32) {
    %c0_i32 = arith.constant 0 : i32
    %c0_i32_0 = arith.constant 0 : i32
    %c0_i32_1 = arith.constant 0 : i32
    return %c0_i32, %c0_i32_0 : i32, i32
  }
  func.func @transform_13(%arg0: i32) -> (i32, i32) {
    %c0_i32 = arith.constant 0 : i32
    %c0_i32_0 = arith.constant 0 : i32
    %c0_i32_1 = arith.constant 0 : i32
    return %c0_i32, %c0_i32_0 : i32, i32
  }
  func.func @transform_14(%arg0: i32) -> (i32, i32) {
    %c0_i32 = arith.constant 0 : i32
    %c0_i32_0 = arith.constant 0 : i32
    %c0_i32_1 = arith.constant 0 : i32
    return %c0_i32, %c0_i32_0 : i32, i32
  }
  func.func @transform_15(%arg0: i32) -> (i32, i32) {
    %c0_i32 = arith.constant 0 : i32
    %c0_i32_0 = arith.constant 0 : i32
    %c0_i32_1 = arith.constant 0 : i32
    return %c0_i32, %c0_i32_0 : i32, i32
  }
  func.func @transform_16(%arg0: i32) -> (i32, i32) {
    %c0_i32 = arith.constant 0 : i32
    %c0_i32_0 = arith.constant 0 : i32
    %c0_i32_1 = arith.constant 0 : i32
    return %c0_i32, %c0_i32_0 : i32, i32
  }
  func.func @transform_17(%arg0: i32) -> (i32, i32) {
    %c0_i32 = arith.constant 0 : i32
    %c0_i32_0 = arith.constant 0 : i32
    %c0_i32_1 = arith.constant 0 : i32
    return %c0_i32, %c0_i32_0 : i32, i32
  }
  func.func @transform_18(%arg0: i32) -> (i32, i32) {
    %c0_i32 = arith.constant 0 : i32
    %c0_i32_0 = arith.constant 0 : i32
    %c0_i32_1 = arith.constant 0 : i32
    return %c0_i32, %c0_i32_0 : i32, i32
  }
  func.func @transform_19(%arg0: i32) -> (i32, i32) {
    %c0_i32 = arith.constant 0 : i32
    %c0_i32_0 = arith.constant 0 : i32
    %c0_i32_1 = arith.constant 0 : i32
    return %c0_i32, %c0_i32_0 : i32, i32
  }
  func.func @transform_20(%arg0: i32) -> (i32, i32) {
    %c0_i32 = arith.constant 0 : i32
    %c0_i32_0 = arith.constant 0 : i32
    %c0_i32_1 = arith.constant 0 : i32
    return %c0_i32, %c0_i32_0 : i32, i32
  }
  func.func @transform_21(%arg0: i32) -> (i32, i32) {
    %c0_i32 = arith.constant 0 : i32
    %c0_i32_0 = arith.constant 0 : i32
    %c0_i32_1 = arith.constant 0 : i32
    return %c0_i32, %c0_i32_0 : i32, i32
  }
  func.func @transform_22(%arg0: i32) -> (i32, i32) {
    %c0_i32 = arith.constant 0 : i32
    %c0_i32_0 = arith.constant 0 : i32
    %c0_i32_1 = arith.constant 0 : i32
    return %c0_i32, %c0_i32_0 : i32, i32
  }
  func.func @transform_23(%arg0: i32) -> (i32, i32) {
    %c0_i32 = arith.constant 0 : i32
    %c0_i32_0 = arith.constant 0 : i32
    %c0_i32_1 = arith.constant 0 : i32
    return %c0_i32, %c0_i32_0 : i32, i32
  }
  func.func @transform_24(%arg0: i32) -> (i32, i32) {
    %c0_i32 = arith.constant 0 : i32
    %c0_i32_0 = arith.constant 0 : i32
    %c0_i32_1 = arith.constant 0 : i32
    return %c0_i32, %c0_i32_0 : i32, i32
  }
  func.func @transform_25(%arg0: i32) -> (i32, i32) {
    %c0_i32 = arith.constant 0 : i32
    %c0_i32_0 = arith.constant 0 : i32
    %c0_i32_1 = arith.constant 0 : i32
    return %c0_i32, %c0_i32_0 : i32, i32
  }
  func.func @transform_26(%arg0: i32) -> (i32, i32) {
    %c0_i32 = arith.constant 0 : i32
    %c0_i32_0 = arith.constant 0 : i32
    %c0_i32_1 = arith.constant 0 : i32
    return %c0_i32, %c0_i32_0 : i32, i32
  }
  func.func @transform_27(%arg0: i32) -> (i32, i32) {
    %c0_i32 = arith.constant 0 : i32
    %c0_i32_0 = arith.constant 0 : i32
    %c0_i32_1 = arith.constant 0 : i32
    return %c0_i32, %c0_i32_0 : i32, i32
  }
  func.func @transform_28(%arg0: i32) -> (i32, i32) {
    %c0_i32 = arith.constant 0 : i32
    %c0_i32_0 = arith.constant 0 : i32
    %c0_i32_1 = arith.constant 0 : i32
    return %c0_i32, %c0_i32_0 : i32, i32
  }
  func.func @transform_29(%arg0: i32) -> (i32, i32) {
    %c0_i32 = arith.constant 0 : i32
    %c0_i32_0 = arith.constant 0 : i32
    %c0_i32_1 = arith.constant 0 : i32
    return %c0_i32, %c0_i32_0 : i32, i32
  }
  func.func @transform_30(%arg0: i32) -> (i32, i32) {
    %c0_i32 = arith.constant 0 : i32
    %c0_i32_0 = arith.constant 0 : i32
    %c0_i32_1 = arith.constant 0 : i32
    return %c0_i32, %c0_i32_0 : i32, i32
  }
  func.func @transform_31(%arg0: i32) -> (i32, i32) {
    %c0_i32 = arith.constant 0 : i32
    %c0_i32_0 = arith.constant 0 : i32
    %c0_i32_1 = arith.constant 0 : i32
    return %c0_i32, %c0_i32_0 : i32, i32
  }
  func.func @transform_32(%arg0: i32) -> (i32, i32) {
    %c0_i32 = arith.constant 0 : i32
    %c0_i32_0 = arith.constant 0 : i32
    %c0_i32_1 = arith.constant 0 : i32
    return %c0_i32, %c0_i32_0 : i32, i32
  }
  func.func @transform_33(%arg0: i32) -> (i32, i32) {
    %c0_i32 = arith.constant 0 : i32
    %c0_i32_0 = arith.constant 0 : i32
    %c0_i32_1 = arith.constant 0 : i32
    return %c0_i32, %c0_i32_0 : i32, i32
  }
  func.func @transform_34(%arg0: i32) -> (i32, i32) {
    %c0_i32 = arith.constant 0 : i32
    %c0_i32_0 = arith.constant 0 : i32
    %c0_i32_1 = arith.constant 0 : i32
    return %c0_i32, %c0_i32_0 : i32, i32
  }
  func.func @transform_35(%arg0: i32) -> (i32, i32) {
    %c0_i32 = arith.constant 0 : i32
    %c0_i32_0 = arith.constant 0 : i32
    %c0_i32_1 = arith.constant 0 : i32
    return %c0_i32, %c0_i32_0 : i32, i32
  }
  func.func @transform_36(%arg0: i32) -> (i32, i32) {
    %c0_i32 = arith.constant 0 : i32
    %c0_i32_0 = arith.constant 0 : i32
    %c0_i32_1 = arith.constant 0 : i32
    return %c0_i32, %c0_i32_0 : i32, i32
  }
  func.func @transform_37(%arg0: i32) -> (i32, i32) {
    %c0_i32 = arith.constant 0 : i32
    %c0_i32_0 = arith.constant 0 : i32
    %c0_i32_1 = arith.constant 0 : i32
    return %c0_i32, %c0_i32_0 : i32, i32
  }
  func.func @transform_38(%arg0: i32) -> (i32, i32) {
    %c0_i32 = arith.constant 0 : i32
    %c0_i32_0 = arith.constant 0 : i32
    %c0_i32_1 = arith.constant 0 : i32
    return %c0_i32, %c0_i32_0 : i32, i32
  }
  func.func @transform_39(%arg0: i32) -> (i32, i32) {
    %c0_i32 = arith.constant 0 : i32
    %c0_i32_0 = arith.constant 0 : i32
    %c0_i32_1 = arith.constant 0 : i32
    return %c0_i32, %c0_i32_0 : i32, i32
  }
  func.func @transform_40(%arg0: i32) -> (i32, i32) {
    %c0_i32 = arith.constant 0 : i32
    %c0_i32_0 = arith.constant 0 : i32
    %c0_i32_1 = arith.constant 0 : i32
    return %c0_i32, %c0_i32_0 : i32, i32
  }
  func.func @transform_41(%arg0: i32) -> (i32, i32) {
    %c0_i32 = arith.constant 0 : i32
    %c0_i32_0 = arith.constant 0 : i32
    %c0_i32_1 = arith.constant 0 : i32
    return %c0_i32, %c0_i32_0 : i32, i32
  }
  func.func @transform_42(%arg0: i32) -> (i32, i32) {
    %c0_i32 = arith.constant 0 : i32
    %c0_i32_0 = arith.constant 0 : i32
    %c0_i32_1 = arith.constant 0 : i32
    return %c0_i32, %c0_i32_0 : i32, i32
  }
  func.func @transform_43(%arg0: i32) -> (i32, i32) {
    %c0_i32 = arith.constant 0 : i32
    %c0_i32_0 = arith.constant 0 : i32
    %c0_i32_1 = arith.constant 0 : i32
    return %c0_i32, %c0_i32_0 : i32, i32
  }
  func.func @transform_44(%arg0: i32) -> (i32, i32) {
    %c0_i32 = arith.constant 0 : i32
    %c0_i32_0 = arith.constant 0 : i32
    %c0_i32_1 = arith.constant 0 : i32
    return %c0_i32, %c0_i32_0 : i32, i32
  }
  func.func @transform_45(%arg0: i32) -> (i32, i32) {
    %c0_i32 = arith.constant 0 : i32
    %c0_i32_0 = arith.constant 0 : i32
    %c0_i32_1 = arith.constant 0 : i32
    return %c0_i32, %c0_i32_0 : i32, i32
  }
  func.func @transform_46(%arg0: i32) -> (i32, i32) {
    %c0_i32 = arith.constant 0 : i32
    %c0_i32_0 = arith.constant 0 : i32
    %c0_i32_1 = arith.constant 0 : i32
    return %c0_i32, %c0_i32_0 : i32, i32
  }
  func.func @transform_47(%arg0: i32) -> (i32, i32) {
    %c0_i32 = arith.constant 0 : i32
    %c0_i32_0 = arith.constant 0 : i32
    %c0_i32_1 = arith.constant 0 : i32
    return %c0_i32, %c0_i32_0 : i32, i32
  }
  func.func @transform_48(%arg0: i32) -> (i32, i32) {
    %c0_i32 = arith.constant 0 : i32
    %c0_i32_0 = arith.constant 0 : i32
    %c0_i32_1 = arith.constant 0 : i32
    return %c0_i32, %c0_i32_0 : i32, i32
  }
  func.func @transform_49(%arg0: i32) -> (i32, i32, i32) {
    %c0_i32 = arith.constant 0 : i32
    %c0_i32_0 = arith.constant 0 : i32
    %c0_i32_1 = arith.constant 0 : i32
    %c0_i32_2 = arith.constant 0 : i32
    return %c0_i32, %c0_i32_0, %c0_i32_1 : i32, i32, i32
  }
  func.func @transform_50(%arg0: i32) -> (i32, i32) {
    %c0_i32 = arith.constant 0 : i32
    %c0_i32_0 = arith.constant 0 : i32
    %c0_i32_1 = arith.constant 0 : i32
    return %c0_i32, %c0_i32_0 : i32, i32
  }
  func.func @transform_51(%arg0: i32) -> (i32, i32) {
    %c0_i32 = arith.constant 0 : i32
    %c0_i32_0 = arith.constant 0 : i32
    %c0_i32_1 = arith.constant 0 : i32
    return %c0_i32, %c0_i32_0 : i32, i32
  }
  func.func @transform_52(%arg0: i32) -> (i32, i32) {
    %c0_i32 = arith.constant 0 : i32
    %c0_i32_0 = arith.constant 0 : i32
    %c0_i32_1 = arith.constant 0 : i32
    return %c0_i32, %c0_i32_0 : i32, i32
  }
  func.func @transform_53(%arg0: i32) -> (i32, i32) {
    %c0_i32 = arith.constant 0 : i32
    %c0_i32_0 = arith.constant 0 : i32
    %c0_i32_1 = arith.constant 0 : i32
    return %c0_i32, %c0_i32_0 : i32, i32
  }
  func.func @transform_54(%arg0: i32) -> (i32, i32) {
    %c0_i32 = arith.constant 0 : i32
    %c0_i32_0 = arith.constant 0 : i32
    %c0_i32_1 = arith.constant 0 : i32
    return %c0_i32, %c0_i32_0 : i32, i32
  }
  func.func @transform_55(%arg0: i32) -> (i32, i32) {
    %c0_i32 = arith.constant 0 : i32
    %c0_i32_0 = arith.constant 0 : i32
    %c0_i32_1 = arith.constant 0 : i32
    return %c0_i32, %c0_i32_0 : i32, i32
  }
  func.func @transform_56(%arg0: i32) -> (i32, i32, i32) {
    %c0_i32 = arith.constant 0 : i32
    %c0_i32_0 = arith.constant 0 : i32
    %c0_i32_1 = arith.constant 0 : i32
    return %arg0, %c0_i32, %c0_i32_0 : i32, i32, i32
  }
}

</mosaic_0001>

<bundles_post_ra>
// kernel: squeeze.1
= control target key start
LH: loop header
LB: loop body
LE: loop exit
PB: predicated region body
PF: predicated region fallthrough
CT: control target
= control target key end

     0   :  { %s82_s8 = smov 104   ;;  %vm7_vm0 = vcmask 64512   ;;  %s83_s11 = smov 112   ;;  %s143_s0 = inlined_call_operand.vmem [shape: f32[2,80], index: 0, kind: input, shape index: {}]   ;;  %s144_s1 = inlined_call_operand.vmem [shape: f32[2,10,8], index: 1, kind: output, shape index: {}]  }
   0x1   :  { %v4_v0 = vld [vmem:[%s143_s0] sm:$0x3]  ;;  %s81_s0 = smov 120   ;;  %s84_s12 = smov 96  }
   0x2   :  { %5 = vst [vmem:[#allocation0] sm:$0x3] %v4_v0  ;;  %s85_s13 = smov 88   ;;  %s86_s14 = smov 80  }
   0x3   :  { %s87_s15 = smov 72   ;;  %s88_s16 = smov 64  }
   0x4   :  { %s89_s17 = smov 56  }
   0x9   :  { %v9_v1 = vld [vmem:[#allocation0] sm:$0x3]  }
   0xa   :  { %v21_v2 = vld [vmem:[#allocation0] sm:$0x3]   ;;  %10 = vrot.lane.b32.xlu0 %v9_v1, %s81_s0 }
   0xb   :  { %22 = vrot.lane.b32.xlu1 %v21_v2, %s82_s8  ;;  %v15_v3 = vld [vmem:[#allocation0] sm:$0x3]  }
   0xc   :  { %v27_v4 = vld [vmem:[#allocation0] sm:$0x3]  }
   0xd   :  { %v6_v5 = vld [vmem:[#allocation0] sm:$0x3]  }
   0xe   :  { %8 = vst.msk [vmem:[%s144_s1] ss:$16 sm:$0x3] %vm7_vm0, %v6_v5   ;;  %16 = vrot.lane.b32.xlu0 %v15_v3, %s83_s11  ;;  %v33_v6 = vld [vmem:[#allocation0] sm:$0x3]  }
   0xf   :  { %28 = vrot.lane.b32.xlu1 %v27_v4, %s84_s12  ;;  %v39_v7 = vld [vmem:[#allocation0] sm:$0x3]  }
  0x10   :  { %v45_v8 = vld [vmem:[#allocation0] sm:$0x3]  }
  0x11   :  { %v51_v9 = vld [vmem:[#allocation0] sm:$0x3]  }
  0x12   :  { %34 = vrot.lane.b32.xlu0 %v33_v6, %s85_s13  ;;  %v57_v10 = vld [vmem:[#allocation0] sm:$0x3]  }
  0x13   :  { %40 = vrot.lane.b32.xlu1 %v39_v7, %s86_s14 }
  0x16   :  { %46 = vrot.lane.b32.xlu0 %v45_v8, %s87_s15 }
  0x17   :  { %52 = vrot.lane.b32.xlu1 %v51_v9, %s88_s16 }
  0x1a   :  { %58 = vrot.lane.b32.xlu0 %v57_v10, %s89_s17 }
  0x7c   :  { %v11_v11 = vpop.permute.xlu0 %10  }
  0x7d   :  { %v23_v12 = vpop.permute.xlu1 %22   ;;  %63 = vst.msk [vmem:[%s144_s1 + $0x1] ss:$16 sm:$0x3] %vm7_vm0, %v11_v11  }
  0x7e   :  { %65 = vst.msk [vmem:[%s144_s1 + $0x3] ss:$16 sm:$0x3] %vm7_vm0, %v23_v12  }
  0x80   :  { %v17_v13 = vpop.permute.xlu0 %16  }
  0x81   :  { %v29_v14 = vpop.permute.xlu1 %28   ;;  %64 = vst.msk [vmem:[%s144_s1 + $0x2] ss:$16 sm:$0x3] %vm7_vm0, %v17_v13  }
  0x82   :  { %66 = vst.msk [vmem:[%s144_s1 + $0x4] ss:$16 sm:$0x3] %vm7_vm0, %v29_v14  }
  0x84   :  { %v35_v15 = vpop.permute.xlu0 %34  }
  0x85   :  { %v41_v16 = vpop.permute.xlu1 %40   ;;  %67 = vst.msk [vmem:[%s144_s1 + $0x5] ss:$16 sm:$0x3] %vm7_vm0, %v35_v15  }
  0x86   :  { %68 = vst.msk [vmem:[%s144_s1 + $0x6] ss:$16 sm:$0x3] %vm7_vm0, %v41_v16  }
  0x88   :  { %v47_v17 = vpop.permute.xlu0 %46  }
  0x89   :  { %v53_v18 = vpop.permute.xlu1 %52   ;;  %69 = vst.msk [vmem:[%s144_s1 + $0x7] ss:$16 sm:$0x3] %vm7_vm0, %v47_v17  }
  0x8a   :  { %70 = vst.msk [vmem:[%s144_s1 + $0x8] ss:$16 sm:$0x3] %vm7_vm0, %v53_v18  }
  0x8c   :  { %v59_v19 = vpop.permute.xlu0 %58  }
  0x8d   :  { %71 = vst.msk [vmem:[%s144_s1 + $0x9] ss:$16 sm:$0x3] %vm7_vm0, %v59_v19  }

// kernel: net_forward.1
= control target key start
LH: loop header
LB: loop body
LE: loop exit
PB: predicated region body
PF: predicated region fallthrough
CT: control target
= control target key end

     0   :  { %s10152_s6 = smov 1   ;;  %s10153_s10 = smov 2   ;;  %s11703_s0 = inlined_call_operand.smem [shape: u32[57], index: -1, kind: input, shape index: {}] }
   0x1   :  { %s10233_s5 = sld [smem:[%s11703_s0]]   ;;  %s10154_s14 = smov 3  }
   0x2   :  { %s10238_s9 = sld [smem:[%s11703_s0 + %s10152_s6]]   ;;  %s10155_s18 = smov 4  }
   0x3   :  { %s10243_s13 = sld [smem:[%s11703_s0 + %s10153_s10]]   ;;  %s10156_s22 = smov 5  }
   0x4   :  { %s10248_s17 = sld [smem:[%s11703_s0 + %s10154_s14]]   ;;  %s10157_s26 = smov 6  }
   0x5   :  { %s10253_s21 = sld [smem:[%s11703_s0 + %s10155_s18]]   ;;  %s10158_s30 = smov 7  }
   0x6   :  { %s10258_s25 = sld [smem:[%s11703_s0 + %s10156_s22]]   ;;  %s10159_s4 = smov 8  }
   0x7   :  { %11752 = sst [smem:[#allocation29_spill]] %s10233_s5  ;;  %s10160_s10 = smov 9  }
   0x8   :  { %11753 = sst [smem:[#allocation30_spill]] %s10238_s9  ;;  %s10161_s15 = smov 10  }
   0x9   :  { %11754 = sst [smem:[#allocation31_spill]] %s10243_s13  ;;  %s10162_s20 = smov 11  }
   0xa   :  { %11755 = sst [smem:[#allocation32_spill]] %s10248_s17  ;;  %s10164_s1 = smov 13  }
   0xb   :  { %11756 = sst [smem:[#allocation33_spill]] %s10253_s21  ;;  %s10165_s7 = smov 14  }
   0xc   :  { %11757 = sst [smem:[#allocation34_spill]] %s10258_s25  ;;  %s10167_s22 = smov 16  }
   0xd   :  { %s10263_s29 = sld [smem:[%s11703_s0 + %s10157_s26]]   ;;  %s10163_s26 = smov 12  }
   0xe   :  { %s10268_s3 = sld [smem:[%s11703_s0 + %s10158_s30]]   ;;  %s10168_s28 = smov 17  }
   0xf   :  { %s10273_s8 = sld [smem:[%s11703_s0 + %s10159_s4]]  }
  0x10   :  { %s10278_s14 = sld [smem:[%s11703_s0 + %s10160_s10]]  }
  0x11   :  { %s10283_s19 = sld [smem:[%s11703_s0 + %s10161_s15]]   ;;  %s10166_s15 = smov 15  }
  0x12   :  { %s10288_s24 = sld [smem:[%s11703_s0 + %s10162_s20]]  }
  0x13   :  { %11758 = sst [smem:[#allocation35_spill]] %s10263_s29 }
  0x14   :  { %11759 = sst [smem:[#allocation36_spill]] %s10268_s3 }
  0x15   :  { %11760 = sst [smem:[#allocation37_spill]] %s10273_s8 }
  0x16   :  { %11761 = sst [smem:[#allocation38_spill]] %s10278_s14 }
  0x17   :  { %11762 = sst [smem:[#allocation39_spill]] %s10283_s19 }
  0x18   :  { %11763 = sst [smem:[#allocation40_spill]] %s10288_s24 }
  0x19   :  { %s10293_s30 = sld [smem:[%s11703_s0 + %s10163_s26]]  }
  0x1a   :  { %s10298_s6 = sld [smem:[%s11703_s0 + %s10164_s1]]  }
  0x1b   :  { %s10303_s12 = sld [smem:[%s11703_s0 + %s10165_s7]]   ;;  %s10169_s7 = smov 18  }
  0x1c   :  { %s10308_s20 = sld [smem:[%s11703_s0 + %s10166_s15]]   ;;  %s10170_s15 = smov 19  }
  0x1d   :  { %s10313_s27 = sld [smem:[%s11703_s0 + %s10167_s22]]   ;;  %s10171_s22 = smov 20  }
  0x1e   :  { %s10318_s4 = sld [smem:[%s11703_s0 + %s10168_s28]]   ;;  %s10172_s28 = smov 21  }
  0x1f   :  { %11764 = sst [smem:[#allocation41_spill]] %s10293_s30 }
  0x20   :  { %11765 = sst [smem:[#allocation42_spill]] %s10298_s6 }
  0x21   :  { %11766 = sst [smem:[#allocation43_spill]] %s10303_s12 }
  0x22   :  { %11767 = sst [smem:[#allocation44_spill]] %s10308_s20 }
  0x23   :  { %11768 = sst [smem:[#allocation45_spill]] %s10313_s27 }
  0x24   :  { %11769 = sst [smem:[#allocation46_spill]] %s10318_s4 }
  0x25   :  { %s10323_s14 = sld [smem:[%s11703_s0 + %s10169_s7]]   ;;  %s10173_s7 = smov 22  }
  0x26   :  { %s10328_s8 = sld [smem:[%s11703_s0 + %s10170_s15]]   ;;  %s10174_s15 = smov 23  }
  0x27   :  { %s10333_s27 = sld [smem:[%s11703_s0 + %s10171_s22]]   ;;  %s10175_s22 = smov 24  }
  0x28   :  { %s10338_s4 = sld [smem:[%s11703_s0 + %s10172_s28]]   ;;  %s10176_s28 = smov 25  }
  0x29   :  { %s10343_s12 = sld [smem:[%s11703_s0 + %s10173_s7]]   ;;  %s10177_s7 = smov 26  }
  0x2a   :  { %s10348_s20 = sld [smem:[%s11703_s0 + %s10174_s15]]   ;;  %s10178_s15 = smov 27  }
  0x2b   :  { %11770 = sst [smem:[#allocation47_spill]] %s10323_s14 }
  0x2c   :  { %11771 = sst [smem:[#allocation48_spill]] %s10328_s8 }
  0x2d   :  { %11772 = sst [smem:[#allocation49_spill]] %s10333_s27 }
  0x2e   :  { %11773 = sst [smem:[#allocation50_spill]] %s10338_s4 }
  0x2f   :  { %11774 = sst [smem:[#allocation51_spill]] %s10343_s12 }
  0x30   :  { %11775 = sst [smem:[#allocation52_spill]] %s10348_s20 }
  0x31   :  { %s10353_s24 = sld [smem:[%s11703_s0 + %s10175_s22]]   ;;  %s10179_s22 = smov 28  }
  0x32   :  { %s10358_s19 = sld [smem:[%s11703_s0 + %s10176_s28]]   ;;  %s10180_s28 = smov 29  }
  0x33   :  { %s10363_s17 = sld [smem:[%s11703_s0 + %s10177_s7]]   ;;  %s10181_s7 = smov 30  }
  0x34   :  { %s10368_s29 = sld [smem:[%s11703_s0 + %s10178_s15]]   ;;  %s10182_s15 = smov 31  }
  0x35   :  { %s10373_s21 = sld [smem:[%s11703_s0 + %s10179_s22]]   ;;  %s10183_s22 = smov 32  }
  0x36   :  { %s10378_s30 = sld [smem:[%s11703_s0 + %s10180_s28]]   ;;  %s10184_s28 = smov 33  }
  0x37   :  { %11776 = sst [smem:[#allocation53_spill]] %s10353_s24 }
  0x38   :  { %11777 = sst [smem:[#allocation54_spill]] %s10358_s19 }
  0x39   :  { %11778 = sst [smem:[#allocation55_spill]] %s10363_s17 }
  0x3a   :  { %11779 = sst [smem:[#allocation56_spill]] %s10368_s29 }
  0x3b   :  { %11780 = sst [smem:[#allocation57_spill]] %s10373_s21 }
  0x3c   :  { %11781 = sst [smem:[#allocation58_spill]] %s10378_s30 }
  0x3d   :  { %s10383_s6 = sld [smem:[%s11703_s0 + %s10181_s7]]   ;;  %s10185_s7 = smov 34  }
  0x3e   :  { %s10388_s3 = sld [smem:[%s11703_s0 + %s10182_s15]]   ;;  %s10186_s15 = smov 35  }
  0x3f   :  { %s10393_s13 = sld [smem:[%s11703_s0 + %s10183_s22]]   ;;  %s10187_s22 = smov 36  }
  0x40   :  { %s10398_s8 = sld [smem:[%s11703_s0 + %s10184_s28]]   ;;  %s10188_s28 = smov 37  }
  0x41   :  { %s10403_s25 = sld [smem:[%s11703_s0 + %s10185_s7]]   ;;  %s10189_s7 = smov 38  }
  0x42   :  { %s10408_s12 = sld [smem:[%s11703_s0 + %s10186_s15]]   ;;  %s10190_s15 = smov 39  }
  0x43   :  { %11782 = sst [smem:[#allocation59_spill]] %s10383_s6 }
  0x44   :  { %11783 = sst [smem:[#allocation60_spill]] %s10388_s3 }
  0x45   :  { %11784 = sst [smem:[#allocation61_spill]] %s10393_s13 }
  0x46   :  { %11785 = sst [smem:[#allocation62_spill]] %s10398_s8 }
  0x47   :  { %s10413_s14 = sld [smem:[%s11703_s0 + %s10187_s22]]   ;;  %s10191_s22 = smov 40  }
  0x48   :  { %11786 = sst [smem:[#allocation63_spill]] %s10408_s12 }
  0x49   :  { %s10418_s27 = sld [smem:[%s11703_s0 + %s10188_s28]]   ;;  %s10192_s28 = smov 41  }
  0x4a   :  { %s10423_s4 = sld [smem:[%s11703_s0 + %s10189_s7]]   ;;  %s10193_s7 = smov 42  }
  0x4b   :  { %s10428_s20 = sld [smem:[%s11703_s0 + %s10190_s15]]   ;;  %s10194_s15 = smov 43  }
  0x4c   :  { %s10433_s13 = sld [smem:[%s11703_s0 + %s10191_s22]]   ;;  %s10195_s22 = smov 44  }
  0x4d   :  { %11787 = sst [smem:[#allocation64_spill]] %s10413_s14 }
  0x4e   :  { %s10438_s8 = sld [smem:[%s11703_s0 + %s10192_s28]]   ;;  %s10196_s28 = smov 45  }
  0x4f   :  { %s10443_s21 = sld [smem:[%s11703_s0 + %s10193_s7]]   ;;  %s10197_s7 = smov 46  }
  0x50   :  { %11788 = sst [smem:[#allocation65_spill]] %s10423_s4 }
  0x51   :  { %11789 = sst [smem:[#allocation66_spill]] %s10428_s20 }
  0x52   :  { %11790 = sst [smem:[#allocation67_spill]] %s10433_s13 }
  0x53   :  { %s10448_s20 = sld [smem:[%s11703_s0 + %s10194_s15]]   ;;  %s10198_s15 = smov 47  }
  0x54   :  { %11791 = sst [smem:[#allocation68_spill]] %s10438_s8 }
  0x55   :  { %s10453_s30 = sld [smem:[%s11703_s0 + %s10195_s22]]   ;;  %s10199_s22 = smov 48  }
  0x56   :  { %s10458_s6 = sld [smem:[%s11703_s0 + %s10196_s28]]   ;;  %s10200_s28 = smov 49  }
  0x57   :  { %s10463_s17 = sld [smem:[%s11703_s0 + %s10197_s7]]   ;;  %s10201_s7 = smov 50  }
  0x58   :  { %s10468_s29 = sld [smem:[%s11703_s0 + %s10198_s15]]   ;;  %s10202_s15 = smov 51  }
  0x59   :  { %11792 = sst [smem:[#allocation69_spill]] %s10448_s20 }
  0x5a   :  { %s10473_s3 = sld [smem:[%s11703_s0 + %s10199_s22]]   ;;  %s10203_s22 = smov 52  }
  0x5b   :  { %s10478_s20 = sld [smem:[%s11703_s0 + %s10200_s28]]   ;;  %s10204_s28 = smov 53  }
  0x5c   :  { %11793 = sst [smem:[#allocation70_spill]] %s10458_s6 }
  0x5d   :  { %11794 = sst [smem:[#allocation71_spill]] %s10463_s17 }
  0x5e   :  { %s10483_s6 = sld [smem:[%s11703_s0 + %s10201_s7]]   ;;  %s10205_s7 = smov 54  }
  0x5f   :  { %s10488_s24 = sld [smem:[%s11703_s0 + %s10202_s15]]   ;;  %s10206_s15 = smov 55  }
  0x60   :  { %11795 = sst [smem:[#allocation72_spill]] %s10473_s3 }
  0x61   :  { %11796 = sst [smem:[#allocation73_spill]] %s10478_s20 }
  0x62   :  { %s10493_s3 = sld [smem:[%s11703_s0 + %s10203_s22]]   ;;  %s10207_s22 = smov 56  }
  0x63   :  { %s10498_s20 = sld [smem:[%s11703_s0 + %s10204_s28]]  }
  0x64   :  { %11797 = sst [smem:[#allocation74_spill]] %s10483_s6 }
  0x65   :  { %11798 = sst [smem:[#allocation75_spill]] %s10488_s24 }
  0x66   :  { %s10503_s19 = sld [smem:[%s11703_s0 + %s10205_s7]]  }
  0x67   :  { %s10508_s24 = sld [smem:[%s11703_s0 + %s10206_s15]]  }
  0x68   :  { %11799 = sst [smem:[#allocation76_spill]] %s10493_s3 }
  0x69   :  { %s10513_s8 = sld [smem:[%s11703_s0 + %s10207_s22]]  }
  0x6c   :  { %11800 = sst [smem:[#allocation77_spill]] %s10503_s19 }
  0x6d   :  { %118 = vsyncpa [#allocation7], 0 }
  0x6e   :  { %119 = vsyncpa [#allocation9], 0 }
  0x6f   :  { %120 = vsyncpa [#allocation12], 0 }
  0x70   :  { %121 = vsyncpa [#allocation15], 0 }
  0x71   :  { %122 = vsyncpa [#allocation18], 0 }
  0x72   :  { %123 = vsyncpa [#allocation21], 0  ;;  %s10515_s28 = smov 0  }
  0x73 LB: > { %s11801_s19 = sld [smem:[#allocation77_spill]]  ;;  %s11802_s17 = sld [smem:[#allocation71_spill]]  ;;  %s10150_s28 = sphi %s10515_s28, %s129_s28  }
  0x74   : > { %s11803_s14 = sld [smem:[#allocation64_spill]]  ;;  %s11804_s13 = sld [smem:[#allocation67_spill]] }
  0x75   : > { %s11805_s12 = sld [smem:[#allocation63_spill]]  ;;  %s11806_s6 = sld [smem:[#allocation74_spill]] }
  0x76   : > { %s11807_s4 = sld [smem:[#allocation65_spill]]  ;;  %s11808_s3 = sld [smem:[#allocation76_spill]] }
  0x77   : > { %s10208_s1 = smov [#allocation8]   ;;  %s10521_s0 = sadd.s32 4294967295, %s10150_s28  }
  0x78   : > { %s1466_s2 = sshll.u32 %s10208_s1, 4  ;;  %p8190_p0 = scmp.ge.s32.totalorder %s10150_s28, 1  ;;  %s10526_s2 = int_to_ptr.vmem [resolvable:$true] %s1466_s2 }
  0x79   : > { %p1346_p1 = scmp.lt.s32.totalorder %s10150_s28, 3  ;;  %p11731_p2 = scmp.eq.s32.totalorder %s10521_s0, 0 }
  0x7a   : > { %s10209_s10 = smov [#allocation11]   ;;  %s10210_s15 = smov [#allocation14]  }
  0x7b   : > { %p10528_p3 = pnand %p8190_p0, %p1346_p1  ;;  %s1488_s11 = sshll.u32 %s10209_s10, 4  ;;  %s10534_s11 = int_to_ptr.vmem [resolvable:$true] %s1488_s11 }
  0x7c   : > { %s1519_s16 = sshll.u32 %s10210_s15, 4  ;;  %s10211_s22 = smov [#allocation17]   ;;  %s10542_s16 = int_to_ptr.vmem [resolvable:$true] %s1519_s16 }
  0x7d   : > { %s11809_s7 = scalar_select %p10528_p3, 1, 0 }
  0x7e   : > { %p9420_p4 = pneg %p10528_p3  ;;  %s1547_s23 = sshll.u32 %s10211_s22, 4  ;;  %s10544_s23 = int_to_ptr.vmem [resolvable:$true] %s1547_s23 }
  0x7f   : > { %s9812_s26 = scalar_lea.hbm %s11805_s12, 16 }
  0x80   : > { %p10538_p5 = pnand %p11731_p2, %p9420_p4  ;;  %p9813_p6 = scmp.ne.s32.totalorder %s11805_s12, %s9812_s26 }
  0x81   : > { %p9819_p10 = scmp.lt.u32.totalorder %s9812_s26, %s11805_s12 }
  0x82   : > { %p10550_p7 = pneg %p10538_p5 }
  0x84   : > { %p9815_p8 = pnand %p10550_p7, %p9813_p6 }
  0x86   : > { %p9816_p9 = pneg %p9815_p8 }
  0x88   : > { %p9821_p11 = pnand %p9819_p10, %p9816_p9 }
  0x8a   : > { %9824 = shalt.err (!%p9821_p11)
}
  0x8b   : > { %s9825_s10 = scalar_lea.vmem %s10526_s2, 16  ;;  %s9832_s15 = scalar_lea.vmem %s10526_s2, 32 }
  0x8c   : > { %p9826_p12 = scmp.ne.s32.totalorder %s10526_s2, %s9825_s10  ;;  %p9833_p1 = scmp.lt.s32.totalorder %s10526_s2, %s10526_s2 }
  0x8d   : > { %p9834_p4 = scmp.lt.s32.totalorder %s9832_s15, %s9825_s10 }
  0x8e   : > { %p9828_p13 = pnand %p9826_p12, %p10550_p7 }
  0x8f   : > { %p9835_p2 = por %p9834_p4, %p9833_p1 }
  0x90   : > { %p9829_p0 = pneg %p9828_p13 }
  0x92   : > { %p9836_p6 = pnand %p9835_p2, %p9829_p0 }
  0x94   : > { %9839 = shalt.err (!%p9836_p6)
}
  0x95   : > { %9426 = dma.hbm_to_vmem [thread:$0]  (!%p10538_p5), %s11805_s12, 16, %s10526_s2, [#allocation9]  }
  0x96   : > { %s9840_s22 = scalar_lea.hbm %s10418_s27, 16 }
  0x97   : > { %p9841_p8 = scmp.ne.s32.totalorder %s10418_s27, %s9840_s22  ;;  %p9847_p11 = scmp.lt.u32.totalorder %s9840_s22, %s10418_s27 }
  0x99   : > { %p9843_p9 = pnand %p9841_p8, %p10550_p7 }
  0x9b   : > { %p9844_p10 = pneg %p9843_p9 }
  0x9d   : > { %p9849_p12 = pnand %p9847_p11, %p9844_p10 }
  0x9f   : > { %9852 = shalt.err (!%p9849_p12)
}
  0xa0   : > { %s9853_s26 = scalar_lea.vmem %s10534_s11, 16  ;;  %s9860_s10 = scalar_lea.vmem %s10534_s11, 32 }
  0xa1   : > { %p9854_p2 = scmp.ne.s32.totalorder %s10534_s11, %s9853_s26  ;;  %p9861_p1 = scmp.lt.s32.totalorder %s10534_s11, %s10534_s11 }
  0xa2   : > { %p9862_p4 = scmp.lt.s32.totalorder %s9860_s10, %s9853_s26 }
  0xa3   : > { %p9856_p13 = pnand %p9854_p2, %p10550_p7 }
  0xa4   : > { %p9863_p6 = por %p9862_p4, %p9861_p1 }
  0xa5   : > { %p9857_p0 = pneg %p9856_p13 }
  0xa7   : > { %p9864_p8 = pnand %p9863_p6, %p9857_p0 }
  0xa9   : > { %9867 = shalt.err (!%p9864_p8)
}
  0xaa   : > { %9432 = dma.hbm_to_vmem [thread:$0]  (!%p10538_p5), %s10418_s27, 16, %s10534_s11, [#allocation12]  }
  0xab   : > { %s9868_s2 = scalar_lea.hbm %s10443_s21, 16 }
  0xac   : > { %p9869_p9 = scmp.ne.s32.totalorder %s10443_s21, %s9868_s2  ;;  %p9875_p12 = scmp.lt.u32.totalorder %s9868_s2, %s10443_s21 }
  0xae   : > { %p9871_p10 = pnand %p9869_p9, %p10550_p7 }
  0xb0   : > { %p9872_p11 = pneg %p9871_p10 }
  0xb2   : > { %p9877_p2 = pnand %p9875_p12, %p9872_p11 }
  0xb4   : > { %9880 = shalt.err (!%p9877_p2)
}
  0xb5   : > { %s9881_s15 = scalar_lea.vmem %s10542_s16, 16  ;;  %s9888_s22 = scalar_lea.vmem %s10542_s16, 32 }
  0xb6   : > { %p9882_p13 = scmp.ne.s32.totalorder %s10542_s16, %s9881_s15  ;;  %p9889_p4 = scmp.lt.s32.totalorder %s10542_s16, %s10542_s16 }
  0xb7   : > { %p9890_p6 = scmp.lt.s32.totalorder %s9888_s22, %s9881_s15 }
  0xb8   : > { %p9884_p0 = pnand %p9882_p13, %p10550_p7 }
  0xb9   : > { %p9891_p8 = por %p9890_p6, %p9889_p4 }
  0xba   : > { %p9885_p1 = pneg %p9884_p0 }
  0xbc   : > { %p9892_p9 = pnand %p9891_p8, %p9885_p1 }
  0xbe   : > { %9895 = shalt.err (!%p9892_p9)
}
  0xbf   : > { %9438 = dma.hbm_to_vmem [thread:$0]  (!%p10538_p5), %s10443_s21, 16, %s10542_s16, [#allocation15]  }
  0xc0   : > { %s9896_s11 = scalar_lea.hbm %s11802_s17, 16 }
  0xc1   : > { %p9897_p10 = scmp.ne.s32.totalorder %s11802_s17, %s9896_s11  ;;  %p9903_p2 = scmp.lt.u32.totalorder %s9896_s11, %s11802_s17 }
  0xc3   : > { %p9899_p11 = pnand %p9897_p10, %p10550_p7 }
  0xc5   : > { %p9900_p12 = pneg %p9899_p11 }
  0xc7   : > { %p9905_p13 = pnand %p9903_p2, %p9900_p12 }
  0xc9   : > { %9908 = shalt.err (!%p9905_p13)
}
  0xca   : > { %s9909_s26 = scalar_lea.vmem %s10544_s23, 16  ;;  %s9916_s10 = scalar_lea.vmem %s10544_s23, 32 }
  0xcb   : > { %p9910_p0 = scmp.ne.s32.totalorder %s10544_s23, %s9909_s26  ;;  %p9917_p6 = scmp.lt.s32.totalorder %s10544_s23, %s10544_s23 }
  0xcc   : > { %p9918_p8 = scmp.lt.s32.totalorder %s9916_s10, %s9909_s26 }
  0xcd   : > { %p9912_p1 = pnand %p9910_p0, %p10550_p7 }
  0xce   : > { %p9919_p9 = por %p9918_p8, %p9917_p6 }
  0xcf   : > { %p9913_p4 = pneg %p9912_p1 }
  0xd1   : > { %p9920_p10 = pnand %p9919_p9, %p9913_p4 }
  0xd3   : > { %9923 = shalt.err (!%p9920_p10)
}
  0xd4   : > { %9444 = dma.hbm_to_vmem [thread:$0]  (!%p10538_p5), %s11802_s17, 16, %s10544_s23, [#allocation18]  }
  0xd5   : > { %s10212_s16 = smov [#allocation20]   ;;  %s10213_s15 = smov [#allocation6]  }
  0xd6   : > { %s1581_s2 = sshll.u32 %s10212_s16, 4  ;;  %s1455_s22 = sshll.u32 %s10213_s15, 4  ;;  %s1582_s2 = int_to_ptr.vmem [resolvable:$true] %s1581_s2  ;;  %s1456_s22 = int_to_ptr.vmem [resolvable:$true] %s1455_s22 }
  0xd7   : > { %s9924_s11 = scalar_lea.hbm %s11808_s3, 16 }
  0xd8   : > { %p9925_p11 = scmp.ne.s32.totalorder %s11808_s3, %s9924_s11  ;;  %p9931_p13 = scmp.lt.u32.totalorder %s9924_s11, %s11808_s3 }
  0xda   : > { %p9927_p12 = pnand %p9925_p11, %p10550_p7 }
  0xdc   : > { %p9928_p2 = pneg %p9927_p12 }
  0xde   : > { %p9933_p0 = pnand %p9931_p13, %p9928_p2 }
  0xe0   : > { %9936 = shalt.err (!%p9933_p0)
}
  0xe1   : > { %s9937_s26 = scalar_lea.vmem %s1582_s2, 16  ;;  %s9944_s23 = scalar_lea.vmem %s1582_s2, 32 }
  0xe2   : > { %p9938_p1 = scmp.ne.s32.totalorder %s1582_s2, %s9937_s26  ;;  %p9945_p8 = scmp.lt.s32.totalorder %s1582_s2, %s1582_s2 }
  0xe3   : > { %p9946_p9 = scmp.lt.s32.totalorder %s9944_s23, %s9937_s26 }
  0xe4   : > { %p9940_p4 = pnand %p9938_p1, %p10550_p7 }
  0xe5   : > { %p9947_p10 = por %p9946_p9, %p9945_p8 }
  0xe6   : > { %p9941_p6 = pneg %p9940_p4 }
  0xe8   : > { %p9948_p3 = pnand %p9947_p10, %p9941_p6 }
  0xea   : > { %9951 = shalt.err (!%p9948_p3)
}
  0xeb   : > { %9450 = dma.hbm_to_vmem [thread:$0]  (!%p10538_p5), %s11808_s3, 16, %s1582_s2, [#allocation21]  }
  0xec   : > { %s9952_s10 = scalar_lea.hbm %s10403_s25, 16 }
  0xed   : > { %p9953_p11 = scmp.ne.s32.totalorder %s10403_s25, %s9952_s10  ;;  %p9959_p13 = scmp.lt.u32.totalorder %s9952_s10, %s10403_s25 }
  0xef   : > { %p9955_p12 = pnand %p9953_p11, %p10550_p7 }
  0xf1   : > { %p9956_p2 = pneg %p9955_p12 }
  0xf3   : > { %p9961_p0 = pnand %p9959_p13, %p9956_p2 }
  0xf5   : > { %9964 = shalt.err (!%p9961_p0)
}
  0xf6   : > { %s9965_s16 = scalar_lea.vmem %s1456_s22, 16  ;;  %s9972_s15 = scalar_lea.vmem %s1456_s22, 32 }
  0xf7   : > { %p9966_p3 = scmp.ne.s32.totalorder %s1456_s22, %s9965_s16  ;;  %p9973_p6 = scmp.lt.s32.totalorder %s1456_s22, %s1456_s22 }
  0xf8   : > { %p9974_p8 = scmp.lt.s32.totalorder %s9972_s15, %s9965_s16 }
  0xf9   : > { %p9968_p1 = pnand %p9966_p3, %p10550_p7 }
  0xfa   : > { %p9975_p9 = por %p9974_p8, %p9973_p6 }
  0xfb   : > { %p9969_p4 = pneg %p9968_p1 }
  0xfd   : > { %p9976_p10 = pnand %p9975_p9, %p9969_p4 }
  0xff   : > { %9979 = shalt.err (!%p9976_p10)
}
 0x100   : > { %9423 = dma.hbm_to_vmem [thread:$0]  (!%p10538_p5), %s10403_s25, 16, %s1456_s22, [#allocation7]  }
 0x101   : > { %s10214_s2 = smov [#allocation10]   ;;  %s10215_s26 = smov [#allocation13]  }
 0x102   : > { %s1477_s11 = sshll.u32 %s10214_s2, 4  ;;  %s1499_s23 = sshll.u32 %s10215_s26, 4  ;;  %s1478_s11 = int_to_ptr.vmem [resolvable:$true] %s1477_s11  ;;  %s1500_s23 = int_to_ptr.vmem [resolvable:$true] %s1499_s23 }
 0x103   : > { %s9980_s10 = scalar_lea.hbm %s11803_s14, 16 }
 0x104   : > { %p9981_p11 = scmp.ne.s32.totalorder %s11803_s14, %s9980_s10  ;;  %p9987_p13 = scmp.lt.u32.totalorder %s9980_s10, %s11803_s14 }
 0x106   : > { %p9983_p12 = pnand %p9981_p11, %p10550_p7 }
 0x108   : > { %p9984_p2 = pneg %p9983_p12 }
 0x10a   : > { %p9989_p0 = pnand %p9987_p13, %p9984_p2 }
 0x10c   : > { %9992 = shalt.err (!%p9989_p0)
}
 0x10d   : > { %s9993_s16 = scalar_lea.vmem %s1478_s11, 16  ;;  %s10000_s22 = scalar_lea.vmem %s1478_s11, 32 }
 0x10e   : > { %p9994_p3 = scmp.ne.s32.totalorder %s1478_s11, %s9993_s16  ;;  %p10001_p6 = scmp.lt.s32.totalorder %s1478_s11, %s1478_s11 }
 0x10f   : > { %p10002_p8 = scmp.lt.s32.totalorder %s10000_s22, %s9993_s16 }
 0x110   : > { %p9996_p1 = pnand %p9994_p3, %p10550_p7 }
 0x111   : > { %p10003_p9 = por %p10002_p8, %p10001_p6 }
 0x112   : > { %p9997_p4 = pneg %p9996_p1 }
 0x114   : > { %p10004_p10 = pnand %p10003_p9, %p9997_p4 }
 0x116   : > { %10007 = shalt.err (!%p10004_p10)
}
 0x117   : > { %9429 = dma.hbm_to_vmem [thread:$0]  (!%p10538_p5), %s11803_s14, 16, %s1478_s11, [#allocation9]  }
 0x118   : > { %s10008_s15 = scalar_lea.hbm %s11807_s4, 16 }
 0x119   : > { %p10009_p11 = scmp.ne.s32.totalorder %s11807_s4, %s10008_s15  ;;  %p10015_p13 = scmp.lt.u32.totalorder %s10008_s15, %s11807_s4 }
 0x11b   : > { %p10011_p12 = pnand %p10009_p11, %p10550_p7 }
 0x11d   : > { %p10012_p2 = pneg %p10011_p12 }
 0x11f   : > { %p10017_p0 = pnand %p10015_p13, %p10012_p2 }
 0x121   : > { %10020 = shalt.err (!%p10017_p0)
}
 0x122   : > { %s10021_s2 = scalar_lea.vmem %s1500_s23, 16  ;;  %s10028_s26 = scalar_lea.vmem %s1500_s23, 32 }
 0x123   : > { %p10022_p3 = scmp.ne.s32.totalorder %s1500_s23, %s10021_s2  ;;  %p10029_p6 = scmp.lt.s32.totalorder %s1500_s23, %s1500_s23 }
 0x124   : > { %p10030_p8 = scmp.lt.s32.totalorder %s10028_s26, %s10021_s2 }
 0x125   : > { %p10024_p1 = pnand %p10022_p3, %p10550_p7 }
 0x126   : > { %p10031_p9 = por %p10030_p8, %p10029_p6 }
 0x127   : > { %p10025_p4 = pneg %p10024_p1 }
 0x129   : > { %p10032_p10 = pnand %p10031_p9, %p10025_p4 }
 0x12b   : > { %10035 = shalt.err (!%p10032_p10)
}
 0x12c   : > { %9435 = dma.hbm_to_vmem [thread:$0]  (!%p10538_p5), %s11807_s4, 16, %s1500_s23, [#allocation12]  }
 0x12d   : > { %s10216_s11 = smov [#allocation16]   ;;  %s10217_s16 = smov [#allocation19]  }
 0x12e   : > { %s1533_s10 = sshll.u32 %s10216_s11, 4  ;;  %s1567_s22 = sshll.u32 %s10217_s16, 4  ;;  %s1534_s10 = int_to_ptr.vmem [resolvable:$true] %s1533_s10  ;;  %s1568_s22 = int_to_ptr.vmem [resolvable:$true] %s1567_s22 }
 0x12f   : > { %s10036_s15 = scalar_lea.hbm %s10453_s30, 16 }
 0x130   : > { %p10037_p11 = scmp.ne.s32.totalorder %s10453_s30, %s10036_s15  ;;  %p10043_p13 = scmp.lt.u32.totalorder %s10036_s15, %s10453_s30 }
 0x132   : > { %p10039_p12 = pnand %p10037_p11, %p10550_p7 }
 0x134   : > { %p10040_p2 = pneg %p10039_p12 }
 0x136   : > { %p10045_p0 = pnand %p10043_p13, %p10040_p2 }
 0x138   : > { %10048 = shalt.err (!%p10045_p0)
}
 0x139   : > { %s10049_s2 = scalar_lea.vmem %s1534_s10, 16  ;;  %s10056_s23 = scalar_lea.vmem %s1534_s10, 32 }
 0x13a   : > { %p10050_p3 = scmp.ne.s32.totalorder %s1534_s10, %s10049_s2  ;;  %p10057_p6 = scmp.lt.s32.totalorder %s1534_s10, %s1534_s10 }
 0x13b   : > { %p10058_p8 = scmp.lt.s32.totalorder %s10056_s23, %s10049_s2 }
 0x13c   : > { %p10052_p1 = pnand %p10050_p3, %p10550_p7 }
 0x13d   : > { %p10059_p9 = por %p10058_p8, %p10057_p6 }
 0x13e   : > { %p10053_p4 = pneg %p10052_p1 }
 0x140   : > { %p10060_p10 = pnand %p10059_p9, %p10053_p4 }
 0x142   : > { %10063 = shalt.err (!%p10060_p10)
}
 0x143   : > { %9441 = dma.hbm_to_vmem [thread:$0]  (!%p10538_p5), %s10453_s30, 16, %s1534_s10, [#allocation15]  }
 0x144   : > { %s10064_s26 = scalar_lea.hbm %s11806_s6, 16 }
 0x145   : > { %p10065_p11 = scmp.ne.s32.totalorder %s11806_s6, %s10064_s26  ;;  %p10071_p13 = scmp.lt.u32.totalorder %s10064_s26, %s11806_s6 }
 0x147   : > { %p10067_p12 = pnand %p10065_p11, %p10550_p7 }
 0x149   : > { %p10068_p2 = pneg %p10067_p12 }
 0x14b   : > { %p10073_p0 = pnand %p10071_p13, %p10068_p2 }
 0x14d   : > { %10076 = shalt.err (!%p10073_p0)
}
 0x14e   : > { %s10077_s11 = scalar_lea.vmem %s1568_s22, 16  ;;  %s10084_s16 = scalar_lea.vmem %s1568_s22, 32 }
 0x14f   : > { %p10078_p3 = scmp.ne.s32.totalorder %s1568_s22, %s10077_s11  ;;  %p10085_p6 = scmp.lt.s32.totalorder %s1568_s22, %s1568_s22 }
 0x150   : > { %p10086_p8 = scmp.lt.s32.totalorder %s10084_s16, %s10077_s11 }
 0x151   : > { %p10080_p1 = pnand %p10078_p3, %p10550_p7 }
 0x152   : > { %p10087_p9 = por %p10086_p8, %p10085_p6 }
 0x153   : > { %p10081_p4 = pneg %p10080_p1 }
 0x155   : > { %p10088_p10 = pnand %p10087_p9, %p10081_p4 }
 0x157   : > { %10091 = shalt.err (!%p10088_p10)
}
 0x158   : > { %9447 = dma.hbm_to_vmem [thread:$0]  (!%p10538_p5), %s11806_s6, 16, %s1568_s22, [#allocation18]  }
 0x159   : > { %s10218_s10 = smov [#allocation22]   ;;  %s10092_s2 = scalar_lea.hbm %s11801_s19, 16 }
 0x15a   : > { %s1595_s15 = sshll.u32 %s10218_s10, 4  ;;  %p10093_p11 = scmp.ne.s32.totalorder %s11801_s19, %s10092_s2  ;;  %s1596_s15 = int_to_ptr.vmem [resolvable:$true] %s1595_s15 }
 0x15b   : > { %p10099_p13 = scmp.lt.u32.totalorder %s10092_s2, %s11801_s19 }
 0x15c   : > { %p10095_p12 = pnand %p10093_p11, %p10550_p7 }
 0x15e   : > { %p10096_p2 = pneg %p10095_p12 }
 0x160   : > { %p10101_p0 = pnand %p10099_p13, %p10096_p2 }
 0x162   : > { %10104 = shalt.err (!%p10101_p0)
}
 0x163   : > { %s10105_s23 = scalar_lea.vmem %s1596_s15, 16  ;;  %s10112_s26 = scalar_lea.vmem %s1596_s15, 32 }
 0x164   : > { %p10106_p3 = scmp.ne.s32.totalorder %s1596_s15, %s10105_s23  ;;  %p10113_p6 = scmp.lt.s32.totalorder %s1596_s15, %s1596_s15 }
 0x165   : > { %p10114_p8 = scmp.lt.s32.totalorder %s10112_s26, %s10105_s23 }
 0x166   : > { %p10108_p1 = pnand %p10106_p3, %p10550_p7 }
 0x167   : > { %p10115_p9 = por %p10114_p8, %p10113_p6 }
 0x168   : > { %p10109_p4 = pneg %p10108_p1 }
 0x16a   : > { %p10116_p10 = pnand %p10115_p9, %p10109_p4 }
 0x16c   : > { %10119 = shalt.err (!%p10116_p10)
}
 0x16d   : > { %9453 = dma.hbm_to_vmem [thread:$0]  (!%p10538_p5), %s11801_s19, 16, %s1596_s15, [#allocation21]  }
 0x16e   : > { %p11812_p11 = scmp.ne.s32.totalorder %s11809_s7, 0 }
 0x16f   : > { %p11813_p12 = scmp.eq.s32.totalorder (!%p11812_p11), %s10521_s0, 0 }
 0x170   : > { %1624 = sbr.rel (%p11812_p11) target bundleno = 10158 (0x27ae), region = 244 }
 0x177   : > { %10125 = dma.done.wait (%p11813_p12), [#allocation7], 16   ;;  %p11814_p2 = pmov %p11813_p12 }
 0x179   : > { %10127 = vsyncadd (%p11814_p2), [#allocation7], 4294967280  ;;  %p11815_p7 = pmov %p11814_p2 }
 0x17a   : > { %p11816_p13 = pmov %p11814_p2 }
 0x17b   : > { %10129 = dma.done.wait (%p11815_p7), [#allocation9], 32  }
 0x17c   : > { %10131 = vsyncadd (%p11816_p13), [#allocation9], 4294967264  ;;  %p11817_p0 = pmov %p11814_p2 }
 0x17e   : > { %10133 = dma.done.wait (%p11817_p0), [#allocation12], 32   ;;  %p11818_p5 = pmov %p11817_p0 }
 0x17f   : > { %p11819_p3 = pmov %p11817_p0 }
 0x180   : > { %10135 = vsyncadd (%p11818_p5), [#allocation12], 4294967264 }
 0x181   : > { %10137 = dma.done.wait (%p11819_p3), [#allocation15], 32   ;;  %p11820_p1 = pmov %p11817_p0 }
 0x182   : > { %p11821_p4 = pmov %p11817_p0 }
 0x183   : > { %10139 = vsyncadd (%p11820_p1), [#allocation15], 4294967264 }
 0x184   : > { %10141 = dma.done.wait (%p11821_p4), [#allocation18], 32   ;;  %p11822_p6 = pmov %p11817_p0 }
 0x185   : > { %p11823_p8 = pmov %p11817_p0 }
 0x186   : > { %10143 = vsyncadd (%p11822_p6), [#allocation18], 4294967264 }
 0x187   : > { %10145 = dma.done.wait (%p11823_p8), [#allocation21], 32   ;;  %p11824_p9 = pmov %p11817_p0 }
 0x188   : > { %s11825_s9 = sld [smem:[#allocation30_spill]]  ;;  %v1812_v0 = vlaneseq  ;;  %v10219_v1 = vmov 1983009808   ;;  %p1795_p10 = scmp.lt.s32.totalorder %s10521_s0, 1  ;;  %vm1901_vm0 = vcmask 1040384   ;;  %v10220_v4 = vmov 0  }
 0x189   : > { %10147 = vsyncadd (%p11824_p9), [#allocation21], 4294967264  ;;  %v1861_v2 = vunpack.c.l.s4 %v10219_v1  ;;  %1949 = vmatprep.mubr.bf16.mxu0 %v10220_v4  ;;  %1990 = vmatprep.mubr.bf16.mxu1 %v10220_v4  ;;  %vm1902_vm1 = vcmask 1041408   ;;  %v10221_v7 = vmov 65535   ;;  %v1856_v9 = vld [vmem:[%s10468_s29] sm:$0xff]  ;;  %vm1897_vm2 = vcmask 23552  }
 0x18a   : > { %v1864_v3 = vshrl.u32 %v1812_v0, 7  ;;  %s11869_s0 = smov (!%p1795_p10, %s10521_s0), 1  ;;  %v1903_v8 = vsel %vm1901_vm0, 4294967295, %v10221_v7  ;;  %v1859_v12 = vcombine.high %v1856_v9, %v1856_v9  ;;  %s11826_s5 = sld [smem:[#allocation29_spill]]  ;;  %vm2469_vm3 = vcmask 1043456   ;;  %v9558_v22 = vld [vmem:[%s11804_s13] sm:$0xff]  }
 0x18b   : > { %v1862_v5 = vunpack.c.0.s8 %v1861_v2  ;;  %v1904_v11 = vsel %vm1902_vm1, %v1903_v8, 0  ;;  %v9559_v14 = vld [vmem:[%s11804_s13 + $0x8] ss:$0 sps:$4 sm:$0xff]   ;;  %s11733_s18 = sshll.u32 %s11869_s0, 3  ;;  %vm2465_vm4 = vcmask 195584   ;;  %v10222_v25 = vmov 0.0  }
 0x18c   : > { %v2471_v18 = vsel %vm2469_vm3, %v9559_v14, 0  ;;  %s11827_s22 = sld [smem:[#allocation68_spill]]  ;;  %vm10223_vm5 = vmmov 0   ;;  %vm1807_vm6 = vcmask 523264   ;;  %v10738_v28 = vsub.s32 0, %v1864_v3  ;;  %s11828_s11 = sld [smem:[#allocation54_spill]] }
 0x18d   : > { %v1865_v6 = vsub.s32 %v1862_v5, %v1864_v3  ;;  %1808 = vst.msk [vmem:[#allocation5] sm:$0xff] %vm1807_vm6, %v10222_v25  ;;  %v10741_v30 = vsub.s32 1, %v1864_v3  ;;  %v10743_v31 = vsub.s32 2, %v1864_v3  ;;  %v10745_v32 = vsub.s32 3, %v1864_v3  ;;  %s11829_s16 = sld [smem:[#allocation53_spill]]  ;;  %s11830_s10 = sld [smem:[#allocation72_spill]] }
 0x18e   : > { %s1801_s7 = scalar_lea.vmem %s11825_s9, %s11869_s0  ;;  %s11831_s15 = sld [smem:[#allocation70_spill]]  ;;  %vm2431_vm7 = vcmask 516096   ;;  %vm1809_vm8 = vcmask 261120  }
 0x18f   : > { %v1866_v10 = vrot.slane %v1856_v9, %v1865_v6  ;;  %v1854_v13 = vld [vmem:[%s1801_s7] sm:$0x1]  ;;  %v1873_v16 = vrot.slane %v1859_v12, %v1865_v6  ;;  %s11832_s2 = sld [smem:[#allocation69_spill]]  ;;  %s11833_s23 = sld [smem:[#allocation60_spill]]  ;;  %1810 = vst.msk [vmem:[#allocation2] sm:$0xff] %vm1809_vm8, %v10222_v25  ;;  %1811 = vst.msk [vmem:[#allocation3] sm:$0xff] %vm1809_vm8, %v10222_v25 }
 0x190   : > { %v1855_v24 = vpack.c.bf16 %v1854_v13, %v1854_v13  ;;  %s1798_s1 = scalar_lea.vmem %s11826_s5, %s11733_s18  ;;  %s11834_s26 = sld [smem:[#allocation56_spill]] }
 0x191   : > { %v1874_v15 = vcombine.high %v1866_v10, %v1866_v10  ;;  %v1906_v17 = vand.u32 %v1904_v11, %v1866_v10  ;;  %v1875_v20 = vcombine.high %v1873_v16, %v1873_v16  ;;  %v1912_v21 = vand.u32 %v1904_v11, %v1873_v16  ;;  %v2451_v26 = vld [vmem:[%s1798_s1] sm:$0xff]  ;;  %s11835_s7 = sld [smem:[#allocation55_spill]]  ;;  %s11836_s1 = sld [smem:[#allocation59_spill]] }
 0x192   : > { %v2452_v27 = vpack.c.bf16 %v2451_v26, %v2451_v26  ;;  %v1857_v29 = vld [vmem:[%s11827_s22] sm:$0xf]  ;;  %s11837_s22 = sld [smem:[#allocation58_spill]]  ;;  %s11846_s18 = sld [smem:[#allocation51_spill]] }
 0x193   : > { %v1909_v19 = vand.u32 %v1904_v11, %v1874_v15  ;;  %v1915_v23 = vand.u32 %v1904_v11, %v1875_v20  ;;  %v1880_v33 = vrot.slane %v1857_v29, %v10738_v28  ;;  %v1884_v34 = vrot.slane %v1857_v29, %v10741_v30  ;;  %v8262_v61 = vld [vmem:[%s11828_s11 + $0x2] ss:$0 sm:$0xff]  ;;  %v8263_v1 = vld [vmem:[%s11829_s16] ss:$0 sm:$0xff]  ;;  %v8264_v2 = vld [vmem:[%s11828_s11 + $0x1] ss:$0 sm:$0xff] }
 0x194   : > { %v1888_v35 = vrot.slane %v1857_v29, %v10743_v31  ;;  %v1892_v37 = vrot.slane %v1857_v29, %v10745_v32  ;;  %v8265_v5 = vld [vmem:[%s11828_s11] ss:$0 sm:$0xff]  ;;  %v9562_v13 = vld [vmem:[%s11830_s10 + $0x48] sm:$0xff]   ;;  %s11838_s16 = sld [smem:[#allocation57_spill]]  ;;  %s11848_s3 = sld [smem:[#allocation48_spill]] }
 0x195   : > { %1917 = vmatprep.subr.bf16.mxu0 %v1909_v19  ;;  %1958 = vmatprep.subr.bf16.mxu1 %v1915_v23  ;;  %v9560_v11 = vld [vmem:[%s11830_s10 + $0x40] sm:$0xff]   ;;  %v9563_v14 = vld [vmem:[%s11830_s10 + $0x8] sm:$0xff]   ;;  %s11849_s4 = sld [smem:[#allocation31_spill]]  ;;  %s11850_s5 = sld [smem:[#allocation36_spill]] }
 0x196   : > { %1918 = vmatpush1.bf16.msra.mxu0 %v1906_v17  ;;  %1959 = vmatpush1.bf16.msra.mxu1 %v1912_v21  ;;  %v9561_v12 = vld [vmem:[%s11830_s10] sm:$0xff]   ;;  %s11851_s6 = sld [smem:[#allocation42_spill]]  ;;  %s11852_s9 = sld [smem:[#allocation41_spill]] }
 0x197   : > { %8748 = vmatprep.subr.bf16.mxu0 %v10222_v25  ;;  %8483 = vmatprep.subr.bf16.mxu1 %v9560_v11  ;;  %s11854_s11 = smov 96   ;;  %s11855_s12 = sld [smem:[#allocation35_spill]] }
 0x198   : > { %s11856_s13 = sld [smem:[#allocation32_spill]]  ;;  %s11857_s14 = sld [smem:[#allocation39_spill]] }
 0x199   : > { %8225 = vmatmul.mubr.msk.bf16.vlgmr.msra.gmra.mrb[0].mxu0 %vm1897_vm2, %v1855_v24  ;;  %8226 = vmatmul.mubr.msk.bf16.vlgmr.msra.gmra.mrb[0].mxu1 %vm1897_vm2, %v1855_v24  ;;  %s11859_s17 = sld [smem:[#allocation44_spill]]  ;;  %s11860_s19 = sld [smem:[#allocation43_spill]] }
 0x19a   : > { %8749 = vmatpush3.bf16.msra.mxu0 %v9558_v22  ;;  %8752 = vmatprep.mubr.msk.bf16.mxu0 %vm10223_vm5, %v10222_v25 }
 0x19b   : > { %8750 = vmatprep.subr.bf16.mxu0 %v10222_v25  ;;  %8484 = vmatpush3.bf16.msra.mxu1 %v9561_v12 }
 0x19c   : > { %8485 = vmatprep.subr.bf16.mxu1 %v9562_v13 }
 0x19e   : > { %8751 = vmatpush3.bf16.msra.mxu0 %v2471_v18 }
 0x19f   : > { %8768 = vmatprep.subr.bf16.mxu0 %v10222_v25  ;;  %8486 = vmatpush3.bf16.msra.mxu1 %v9563_v14 }
 0x1a1   : > { %8753 = vmatmul.mubr.msk.bf16.vlgmr.msra.gmra.mrb[4].mxu0 %vm2465_vm4, %v2452_v27 }
 0x1a2   : > { %8776 = vmatprep.mubr.msk.bf16.mxu0 %vm10223_vm5, %v10222_v25 }
 0x26c   : > { %v1951_v36 = vpop.f32.mrb[0].mxu0  ;;  %v1992_v42 = vpop.f32.mrb[0].mxu1 }
 0x26d   : > { %v1952_v38 = vadd.f32 %v1951_v36, %v1880_v33  ;;  %v1953_v39 = vpop.f32.mrb[1].mxu0  ;;  %v1993_v44 = vadd.f32 %v1992_v42, %v1888_v35  ;;  %v1994_v46 = vpop.f32.mrb[1].mxu1 }
 0x26e   : > { %v1954_v40 = vadd.f32 %v1953_v39, %v1884_v34  ;;  %v1955_v41 = vpop.f32.mrb[2].mxu0  ;;  %v1995_v48 = vadd.f32 %v1994_v46, %v1892_v37  ;;  %v1996_v49 = vpop.f32.mrb[2].mxu1  ;;  %v9568_v46 = vld [vmem:[%s11830_s10 + $0x60] sm:$0xff]  }
 0x26f   : > { %v1999_v43 = vsel %vm1901_vm0, %v1952_v38, 0.0  ;;  %v1956_v45 = vpop.f32.mrb[3].mxu0  ;;  %v2002_v51 = vsel %vm1901_vm0, %v1993_v44, 0.0  ;;  %v1997_v52 = vpop.f32.mrb[3].mxu1  ;;  %v9564_v41 = vld [vmem:[%s11830_s10 + $0x50] sm:$0xff]   ;;  %v9571_v49 = vld [vmem:[%s11830_s10 + $0x28] sm:$0xff]  }
 0x270   : > { %v2000_v47 = vsel %vm1901_vm0, %v1954_v40, 0.0  ;;  %v2004_v55 = vsel %vm1901_vm0, %v1995_v48, 0.0  ;;  %8487 = vmatprep.subr.bf16.mxu1 %v9564_v41  ;;  %v9567_v45 = vld [vmem:[%s11830_s10 + $0x18] sm:$0xff]   ;;  %v9588_v41 = vld [vmem:[%s11830_s10 + $0xf0] sm:$0xff]  }
 0x271   : > { %v2001_v50 = vadd.f32 %v2000_v47, %v1999_v43  ;;  %v9565_v43 = vld [vmem:[%s11830_s10 + $0x10] sm:$0xff]   ;;  %v9569_v47 = vld [vmem:[%s11830_s10 + $0x20] sm:$0xff]   ;;  %v9574_v52 = vld [vmem:[%s11830_s10 + $0x78] sm:$0xff]  }
 0x272   : > { %8488 = vmatpush3.bf16.msra.mxu1 %v9565_v43 }
 0x273   : > { %v2003_v53 = vadd.f32 %v2002_v51, %v2001_v50  ;;  %v9572_v50 = vld [vmem:[%s11830_s10 + $0x70] sm:$0xff]  }
 0x274   : > { %v2507_v54 = vpop.f32.mrb[4].mxu0  ;;  %v9573_v51 = vld [vmem:[%s11830_s10 + $0x30] sm:$0xff]  }
 0x275   : > { %v10755_v56 = vmax.f32 %v2507_v54, 0.0  ;;  %v2005_v57 = vadd.f32 %v2004_v55, %v2003_v53  ;;  %v8754_v58 = vpop.f32.mrb[5].mxu0  ;;  %v9575_v53 = vld [vmem:[%s11830_s10 + $0x38] sm:$0xff]   ;;  %v9576_v54 = vld [vmem:[%s11830_s10 + $0xc0] sm:$0xff]  }
 0x276   : > { %v2510_v59 = vpop.f32.mrb[6].mxu0 }
 0x277   : > { %2514 = vst.msk [vmem:[#allocation5 + $0x8] sm:$0xff] %vm1807_vm6, %v10755_v56  ;;  %2006 = vadd.xlane.f32.xlu0 %v2005_v57  ;;  %v8755_v60 = vpop.f32.mrb[7].mxu0  ;;  %v2524_v62 = vmul.f32 %v8262_v61, %v10755_v56  ;;  %v2034_v59 = vld [vmem:[%s11831_s15] sm:$0xf]  ;;  %s11839_s15 = sld [smem:[#allocation62_spill]] }
 0x278   : > { %v2060_v60 = vld [vmem:[%s11832_s2] sm:$0xf]  ;;  %v2043_v61 = vrot.slane %v2034_v59, %v10741_v30  ;;  %s11840_s2 = sld [smem:[#allocation61_spill]] }
 0x279   : > { %v2531_v3 = vadd.f32 %v8263_v1, %v2524_v62  ;;  %v2039_v62 = vrot.slane %v2034_v59, %v10738_v28  ;;  %v2073_v43 = vrot.slane %v2060_v60, %v10743_v31 }
 0x27e   : > { %v2515_v63 = vld [vmem:[#allocation5 + $0x7] sm:$0xff] }
 0x27f   : > { %2516 = vst.msk [vmem:[#allocation5 + $0x8] sm:$0xff] %vm1807_vm6, %v10755_v56  ;;  %v2537_v4 = vmul.f32 %v8264_v2, %v2515_v63  ;;  %v2051_v63 = vrot.slane %v2034_v59, %v10745_v32  ;;  %v2069_v2 = vrot.slane %v2060_v60, %v10741_v30 }
 0x281   : > { %v2538_v6 = vadd.f32 %v2537_v4, %v2531_v3  ;;  %v2065_v3 = vrot.slane %v2060_v60, %v10738_v28 }
 0x286   : > { %v2517_v7 = vld [vmem:[#allocation5 + $0x6] sm:$0xff] }
 0x287   : > { %v2544_v8 = vmul.f32 %v8265_v5, %v2517_v7  ;;  %v2077_v7 = vrot.slane %v2060_v60, %v10745_v32 }
 0x289   : > { %v2545_v9 = vadd.f32 %v2544_v8, %v2538_v6 }
 0x28b   : > { %v2546_v10 = vsel %vm1807_vm6, %v2545_v9, 0.0 }
 0x28c   : > { %2547 = vadd.xlane.f32.xlu0 %v2546_v10 }
 0x304   : > { %v2007_v15 = vpop.xlane.xlu0 %2006 }
 0x305   : > { %v2009_v16 = vmul.f32 0.001953125, %v2007_v15 }
 0x307   : > { %v2010_v17 = vsub.f32 %v1952_v38, %v2009_v16  ;;  %v2011_v18 = vsub.f32 %v1954_v40, %v2009_v16  ;;  %v10771_v19 = vsub.f32 %v1993_v44, %v2009_v16  ;;  %v2013_v20 = vsub.f32 %v1995_v48, %v2009_v16  ;;  %v9566_v44 = vld [vmem:[%s11830_s10 + $0x58] sm:$0xff]   ;;  %v9570_v48 = vld [vmem:[%s11830_s10 + $0x68] sm:$0xff]  }
 0x308   : > { %8489 = vmatprep.subr.bf16.mxu1 %v9566_v44  ;;  %v9589_v44 = vld [vmem:[%s11830_s10 + $0xb0] sm:$0xff]  }
 0x309   : > { %v2014_v21 = vmul.f32 %v2010_v17, %v2010_v17  ;;  %v2015_v22 = vmul.f32 %v2011_v18, %v2011_v18  ;;  %v2016_v23 = vmul.f32 %v10771_v19, %v10771_v19  ;;  %v2017_v24 = vmul.f32 %v2013_v20, %v2013_v20  ;;  %8490 = vmatpush3.bf16.msra.mxu1 %v9567_v45  ;;  %v9590_v45 = vld [vmem:[%s11830_s10 + $0xf8] sm:$0xff]  }
 0x30a   : > { %8491 = vmatprep.subr.bf16.mxu1 %v9568_v46 }
 0x30b   : > { %v2018_v26 = vsel %vm1901_vm0, %v2014_v21, 0.0  ;;  %v2019_v27 = vsel %vm1901_vm0, %v2015_v22, 0.0  ;;  %v2021_v33 = vsel %vm1901_vm0, %v2016_v23, 0.0  ;;  %v2023_v35 = vsel %vm1901_vm0, %v2017_v24, 0.0  ;;  %v9577_v21 = vld [vmem:[%s11830_s10 + $0x80] sm:$0xff]   ;;  %v9580_v22 = vld [vmem:[%s11830_s10 + $0xd0] sm:$0xff]  }
 0x30c   : > { %v2020_v29 = vadd.f32 %v2019_v27, %v2018_v26  ;;  %v9581_v23 = vld [vmem:[%s11830_s10 + $0x90] sm:$0xff]   ;;  %v9582_v26 = vld [vmem:[%s11830_s10 + $0xd8] sm:$0xff]  }
 0x30d   : > { %8492 = vmatpush3.bf16.msra.mxu1 %v9569_v47  ;;  %v9591_v47 = vld [vmem:[%s11830_s10 + $0xb8] sm:$0xff]  }
 0x30e   : > { %v2022_v34 = vadd.f32 %v2021_v33, %v2020_v29  ;;  %8493 = vmatprep.subr.bf16.mxu1 %v9570_v48  ;;  %v9583_v29 = vld [vmem:[%s11830_s10 + $0x98] sm:$0xff]   ;;  %v9584_v33 = vld [vmem:[%s11830_s10 + $0xe0] sm:$0xff]  }
 0x310   : > { %v2024_v36 = vadd.f32 %v2023_v35, %v2022_v34  ;;  %v9585_v35 = vld [vmem:[%s11830_s10 + $0xa0] sm:$0xff]  }
 0x311   : > { %8494 = vmatpush3.bf16.msra.mxu1 %v9571_v49  ;;  %v9592_v49 = vld [vmem:[%s11833_s23] sm:$0xff]  }
 0x312   : > { %2025 = vadd.xlane.f32.xlu1 %v2024_v36  ;;  %8495 = vmatprep.subr.bf16.mxu1 %v9572_v50  ;;  %v2047_v36 = vrot.slane %v2034_v59, %v10743_v31 }
 0x315   : > { %8496 = vmatpush3.bf16.msra.mxu1 %v9573_v51  ;;  %v8266_v51 = vld [vmem:[%s11834_s26] ss:$0 sm:$0xff]  ;;  %s11841_s26 = sld [smem:[#allocation66_spill]] }
 0x316   : > { %8497 = vmatprep.subr.bf16.mxu1 %v9574_v52  ;;  %v9593_v52 = vld [vmem:[%s11833_s23 + $0x8] sm:$0xff]  }
 0x319   : > { %v2548_v37 = vpop.xlane.xlu0 %2547  ;;  %8498 = vmatpush3.bf16.msra.mxu1 %v9575_v53 }
 0x31a   : > { %v2549_v38 = vmul.f32 0.015625, %v2548_v37  ;;  %8505 = vmatprep.subr.bf16.mxu1 %v9576_v54  ;;  %v9586_v37 = vld [vmem:[%s11830_s10 + $0xe8] sm:$0xff]   ;;  %v8267_v54 = vld [vmem:[%s11835_s7] ss:$0 sm:$0xff]  ;;  %s11842_s7 = sld [smem:[#allocation52_spill]] }
 0x31c   : > { %v10779_v39 = vsub.f32 %v2545_v9, %v2549_v38 }
 0x31e   : > { %v2551_v40 = vmul.f32 %v10779_v39, %v10779_v39 }
 0x320   : > { %v2552_v42 = vsel %vm1807_vm6, %v2551_v40, 0.0  ;;  %v9587_v40 = vld [vmem:[%s11830_s10 + $0xa8] sm:$0xff]  }
 0x321   : > { %2553 = vadd.xlane.f32.xlu1 %v2552_v42 }
 0x39f   : > { %v2026_v55 = vpop.xlane.xlu1 %2025 }
 0x3a0   : > { %v2027_v57 = vmul.f32 0.001953125, %v2026_v55  ;;  %v9594_v55 = vld [vmem:[%s11833_s23 + $0x10] sm:$0xff]  }
 0x3a2   : > { %v2028_v58 = vadd.f32 1e-05, %v2027_v57  ;;  %v9595_v57 = vld [vmem:[%s11833_s23 + $0x18] sm:$0xff]  }
 0x3a4   : > { %9658 = vrsqrt.f32 %v2028_v58 }
 0x3ae   : > { %v9659_v1 = vpop.eup %9658  ;;  %v2554_v24 = vpop.xlane.xlu1 %2553 }
 0x3af   : > { %v2031_v4 = vmul.f32 %v9659_v1, %v2011_v18  ;;  %v2030_v5 = vmul.f32 %v9659_v1, %v2010_v17  ;;  %v2033_v6 = vmul.f32 %v9659_v1, %v2013_v20  ;;  %v9578_v17 = vld [vmem:[%s11830_s10 + $0xc8] sm:$0xff]   ;;  %v2555_v27 = vmul.f32 0.015625, %v2554_v24 }
 0x3b0   : > { %v9579_v20 = vld [vmem:[%s11830_s10 + $0x88] sm:$0xff]   ;;  %v2032_v38 = vmul.f32 %v9659_v1, %v10771_v19  ;;  %s11853_s10 = sld [smem:[#allocation33_spill]] }
 0x3b1   : > { %v2057_v8 = vmul.f32 %v2043_v61, %v2031_v4  ;;  %v2056_v9 = vmul.f32 %v2039_v62, %v2030_v5  ;;  %v2059_v10 = vmul.f32 %v2051_v63, %v2033_v6  ;;  %v2556_v34 = vadd.f32 1e-05, %v2555_v27 }
 0x3b2   : > { %v2058_v42 = vmul.f32 %v2047_v36, %v2032_v38  ;;  %v8276_v38 = vld [vmem:[%s11839_s15 + $0x2] ss:$0 sm:$0xff] }
 0x3b3   : > { %v2083_v11 = vadd.f32 %v2069_v2, %v2057_v8  ;;  %v2082_v12 = vadd.f32 %v2065_v3, %v2056_v9  ;;  %v2085_v13 = vadd.f32 %v2077_v7, %v2059_v10  ;;  %9660 = vrsqrt.f32 %v2556_v34  ;;  %v2158_v2 = vld [vmem:[#allocation14] sm:$0x1]  ;;  %v8268_v10 = vld [vmem:[%s11836_s1] ss:$0 sm:$0xff]  ;;  %s11843_s1 = sld [smem:[#allocation50_spill]] }
 0x3b4   : > { %v2084_v46 = vadd.f32 %v2073_v43, %v2058_v42  ;;  %v8277_v42 = vld [vmem:[%s11840_s2] ss:$0 sm:$0xff]  ;;  %s11734_s2 = smov 96  }
 0x3b5   : > { %v2087_v14 = vmax.f32 %v2083_v11, 0.0  ;;  %v2086_v30 = vmax.f32 %v2082_v12, 0.0  ;;  %v2089_v15 = vmax.f32 %v2085_v13, 0.0 }
 0x3b6   : > { %v2088_v19 = vmax.f32 %v2084_v46, 0.0 }
 0x3b7   : > { %v2091_v16 = vpack.c.bf16 %v2087_v14, %v2087_v14  ;;  %v2090_v18 = vpack.c.bf16 %v2086_v30, %v2086_v30  ;;  %v2093_v32 = vpack.c.bf16 %v2089_v15, %v2089_v15 }
 0x3b8   : > { %v2092_v31 = vpack.c.bf16 %v2088_v19, %v2088_v19 }
 0x3b9   : > { %2383 = vmatprep.mubr.bf16.mxu1 %v2091_v16 }
 0x3ba   : > { %2384 = vmatmul.mubr.bf16.vlgmr.msra.gmra.mrb[4].mxu1 %v2090_v18 }
 0x3bb   : > { %8506 = vmatpush3.bf16.msra.mxu1 %v9577_v21  ;;  %2423 = vmatprep.mubr.bf16.mxu1 %v2093_v32 }
 0x3bc   : > { %8507 = vmatprep.subr.bf16.mxu1 %v9578_v17 }
 0x3bd   : > { %v9661_v48 = vpop.eup %9660 }
 0x3be   : > { %v2558_v50 = vmul.f32 %v9661_v48, %v10779_v39 }
 0x3bf   : > { %8508 = vmatpush3.bf16.msra.mxu1 %v9579_v20 }
 0x3c0   : > { %8509 = vmatprep.subr.bf16.mxu1 %v9580_v22  ;;  %v2566_v53 = vmul.f32 %v8266_v51, %v2558_v50 }
 0x3c2   : > { %v2574_v39 = vadd.f32 %v8267_v54, %v2566_v53 }
 0x3c3   : > { %8510 = vmatpush3.bf16.msra.mxu1 %v9581_v23 }
 0x3c4   : > { %8511 = vmatprep.subr.bf16.mxu1 %v9582_v26  ;;  %v2575_v58 = vmax.f32 %v2574_v39, 0.0  ;;  %v8274_v26 = vld [vmem:[%s11837_s22] ss:$0 sm:$0xff]  ;;  %s11844_s22 = sld [smem:[#allocation49_spill]] }
 0x3c6   : > { %v2576_v59 = vpack.c.bf16 %v2575_v58, %v2575_v58 }
 0x3c7   : > { %8512 = vmatpush3.bf16.msra.mxu1 %v9583_v29  ;;  %v8275_v29 = vld [vmem:[%s11838_s16] ss:$0 sm:$0xff]  ;;  %s11845_s16 = sld [smem:[#allocation47_spill]] }
 0x3c8   : > { %8513 = vmatprep.subr.bf16.mxu1 %v9584_v33 }
 0x3cb   : > { %8514 = vmatpush3.bf16.msra.mxu1 %v9585_v35 }
 0x3cc   : > { %8515 = vmatprep.subr.bf16.mxu1 %v9586_v37 }
 0x3cf   : > { %8516 = vmatpush3.bf16.msra.mxu1 %v9587_v40  ;;  %v8278_v40 = vld [vmem:[%s11839_s15 + $0x1] ss:$0 sm:$0xff] }
 0x3d0   : > { %8517 = vmatprep.subr.bf16.mxu1 %v9588_v41 }
 0x3d3   : > { %8518 = vmatpush3.bf16.msra.mxu1 %v9589_v44  ;;  %v8279_v44 = vld [vmem:[%s11839_s15] ss:$0 sm:$0xff]  ;;  %s11858_s15 = sld [smem:[#allocation40_spill]] }
 0x3d4   : > { %8519 = vmatprep.subr.bf16.mxu1 %v9590_v45 }
 0x3d7   : > { %8520 = vmatpush3.bf16.msra.mxu1 %v9591_v47 }
 0x3d8   : > { %8756 = vmatprep.subr.bf16.mxu1 %v10222_v25 }
 0x3da   : > { %2424 = vmatmul.mubr.bf16.vlgmr.msra.gmra.mrb[8].mxu1 %v2092_v31 }
 0x3db   : > { %8757 = vmatpush3.bf16.msra.mxu1 %v9592_v49  ;;  %8764 = vmatprep.mubr.msk.bf16.mxu1 %vm10223_vm5, %v10222_v25 }
 0x3dc   : > { %8758 = vmatprep.subr.bf16.mxu1 %v10222_v25 }
 0x3df   : > { %8759 = vmatpush3.bf16.msra.mxu1 %v9593_v52 }
 0x3e0   : > { %8760 = vmatprep.subr.bf16.mxu1 %v10222_v25 }
 0x3e3   : > { %8761 = vmatpush3.bf16.msra.mxu1 %v9594_v55 }
 0x3e4   : > { %8762 = vmatprep.subr.bf16.mxu1 %v10222_v25 }
 0x3e7   : > { %8763 = vmatpush3.bf16.msra.mxu1 %v9595_v57 }
 0x3e8   : > { %8780 = vmatprep.subr.bf16.mxu1 %v10222_v25 }
 0x3ea   : > { %8765 = vmatmul.mubr.msk.bf16.vlgmr.msra.gmra.mrb[12].mxu1 %vm1807_vm6, %v2576_v59 }
 0x3eb   : > { %8788 = vmatprep.mubr.msk.bf16.mxu1 %vm10223_vm5, %v10222_v25 }
 0x48d   : > { %v8499_v60 = vpop.f32.mrb[4].mxu1 }
 0x48e   : > { %v8500_v61 = vpop.f32.mrb[5].mxu1 }
 0x48f   : > { %v8501_v62 = vadd.f32 %v8500_v61, %v8499_v60  ;;  %v8502_v63 = vpop.f32.mrb[6].mxu1  ;;  %v9596_v60 = vld [vmem:[%s11841_s26] sm:$0xff]   ;;  %v9597_v61 = vld [vmem:[%s11841_s26 + $0x8] sm:$0xff]  }
 0x490   : > { %v8503_v1 = vpop.f32.mrb[7].mxu1  ;;  %8769 = vmatpush3.bf16.msra.mxu0 %v9596_v60  ;;  %v9599_v63 = vld [vmem:[%s11841_s26 + $0x18] sm:$0xff]  }
 0x491   : > { %v2386_v5 = vadd.f32 %v8501_v62, %v2158_v2  ;;  %8770 = vmatprep.subr.bf16.mxu0 %v10222_v25  ;;  %v9598_v62 = vld [vmem:[%s11841_s26 + $0x10] sm:$0xff]  }
 0x494   : > { %8771 = vmatpush3.bf16.msra.mxu0 %v9597_v61  ;;  %v9608_v61 = vld [vmem:[%s11842_s7] sm:$0xff]  }
 0x495   : > { %8772 = vmatprep.subr.bf16.mxu0 %v10222_v25 }
 0x498   : > { %8773 = vmatpush3.bf16.msra.mxu0 %v9598_v62 }
 0x499   : > { %8774 = vmatprep.subr.bf16.mxu0 %v10222_v25 }
 0x49c   : > { %8775 = vmatpush3.bf16.msra.mxu0 %v9599_v63  ;;  %v8296_v63 = vld [vmem:[#allocation22] ss:$0 sm:$0xff] }
 0x49d   : > { %8792 = vmatprep.subr.bf16.mxu0 %v10222_v25 }
 0x4ad   : > { %v8521_v3 = vpop.f32.mrb[8].mxu1 }
 0x4ae   : > { %v8522_v4 = vpop.f32.mrb[9].mxu1 }
 0x4af   : > { %v8523_v6 = vadd.f32 %v8522_v4, %v8521_v3  ;;  %v8524_v7 = vpop.f32.mrb[10].mxu1 }
 0x4b0   : > { %v8525_v8 = vpop.f32.mrb[11].mxu1  ;;  %v8281_v7 = vld [vmem:[#allocation6] ss:$0 sm:$0xff] }
 0x4b1   : > { %v2426_v9 = vadd.f32 %v8523_v6, %v2386_v5  ;;  %v8280_v5 = vld [vmem:[#allocation8] ss:$0 sm:$0xff] }
 0x4b3   : > { %v2432_v50 = vsel %vm2431_vm7, %v2426_v9, 0.0 }
 0x4bd   : > { %v2653_v11 = vpop.f32.mrb[12].mxu1 }
 0x4be   : > { %v2654_v12 = vadd.f32 %v8268_v10, %v2653_v11  ;;  %v8766_v13 = vpop.f32.mrb[13].mxu1 }
 0x4bf   : > { %v2656_v14 = vpop.f32.mrb[14].mxu1 }
 0x4c0   : > { %v8767_v30 = vpop.f32.mrb[15].mxu1  ;;  %v2659_v15 = vsel %vm1807_vm6, %v2654_v12, 0.0 }
 0x4c1   : > { %2660 = vadd.xlane.f32.xlu0 %v2659_v15 }
 0x54e   : > { %v2661_v16 = vpop.xlane.xlu0 %2660 }
 0x54f   : > { %v2662_v18 = vmul.f32 0.015625, %v2661_v16 }
 0x551   : > { %v2663_v21 = vsub.f32 %v2654_v12, %v2662_v18  ;;  %v8282_v12 = vld [vmem:[#allocation13] ss:$0 sm:$0xff] }
 0x553   : > { %v2664_v17 = vmul.f32 %v2663_v21, %v2663_v21 }
 0x555   : > { %v2665_v32 = vsel %vm1807_vm6, %v2664_v17, 0.0 }
 0x556   : > { %2666 = vadd.xlane.f32.xlu1 %v2665_v32 }
 0x5e3   : > { %v2667_v20 = vpop.xlane.xlu1 %2666 }
 0x5e4   : > { %v2668_v22 = vmul.f32 0.015625, %v2667_v20 }
 0x5e6   : > { %v2669_v23 = vadd.f32 1e-05, %v2668_v22 }
 0x5e8   : > { %9662 = vrsqrt.f32 %v2669_v23  ;;  %v9600_v23 = vld [vmem:[%s10498_s20] sm:$0xff]  }
 0x5e9   : > { %8781 = vmatpush3.bf16.msra.mxu1 %v9600_v23  ;;  %v8306_v23 = vld [vmem:[%s11845_s16] ss:$0 sm:$0xff] }
 0x5ea   : > { %8782 = vmatprep.subr.bf16.mxu1 %v10222_v25 }
 0x5f2   : > { %v9663_v24 = vpop.eup %9662 }
 0x5f3   : > { %v2671_v27 = vmul.f32 %v9663_v24, %v2663_v21  ;;  %v9601_v24 = vld [vmem:[%s10508_s24] sm:$0xff]  }
 0x5f5   : > { %v2679_v33 = vmul.f32 %v8274_v26, %v2671_v27  ;;  %v9602_v26 = vld [vmem:[%s10498_s20 + $0x8] sm:$0xff]  }
 0x5f6   : > { %8783 = vmatpush3.bf16.msra.mxu1 %v9602_v26  ;;  %v9603_v27 = vld [vmem:[%s10508_s24 + $0x8] sm:$0xff]  }
 0x5f7   : > { %v2687_v34 = vadd.f32 %v8275_v29, %v2679_v33  ;;  %8784 = vmatprep.subr.bf16.mxu1 %v10222_v25  ;;  %v9604_v29 = vld [vmem:[%s10498_s20 + $0x10] sm:$0xff]  }
 0x5f8   : > { %v9605_v33 = vld [vmem:[%s10508_s24 + $0x10] sm:$0xff]  }
 0x5f9   : > { %v2688_v35 = vmax.f32 %v2687_v34, 0.0  ;;  %v9606_v34 = vld [vmem:[%s10498_s20 + $0x18] sm:$0xff]  }
 0x5fa   : > { %8785 = vmatpush3.bf16.msra.mxu1 %v9604_v29 }
 0x5fb   : > { %v10846_v36 = vadd.f32 %v2688_v35, %v10755_v56  ;;  %8786 = vmatprep.subr.bf16.mxu1 %v10222_v25  ;;  %v9607_v35 = vld [vmem:[%s10508_s24 + $0x18] sm:$0xff]  }
 0x5fd   : > { %2690 = vst.msk [vmem:[#allocation5 + $0x8] sm:$0xff] %vm1807_vm6, %v10846_v36  ;;  %v2700_v41 = vmul.f32 %v8276_v38, %v10846_v36 }
 0x5fe   : > { %8787 = vmatpush3.bf16.msra.mxu1 %v9606_v34 }
 0x5ff   : > { %v2707_v45 = vadd.f32 %v8277_v42, %v2700_v41  ;;  %8820 = vmatprep.subr.bf16.mxu1 %v10222_v25 }
 0x604   : > { %v2691_v37 = vld [vmem:[#allocation5 + $0x6] sm:$0xff] }
 0x605   : > { %2692 = vst.msk [vmem:[#allocation5 + $0x8] sm:$0xff] %vm1807_vm6, %v10846_v36  ;;  %v2713_v43 = vmul.f32 %v8278_v40, %v2691_v37 }
 0x607   : > { %v2714_v47 = vadd.f32 %v2713_v43, %v2707_v45 }
 0x60c   : > { %v2693_v46 = vld [vmem:[#allocation5 + $0x4] sm:$0xff] }
 0x60d   : > { %v2720_v19 = vmul.f32 %v8279_v44, %v2693_v46  ;;  %v2446_v46 = vld [vmem:[#allocation17] sm:$0x1] }
 0x60f   : > { %v2721_v48 = vadd.f32 %v2720_v19, %v2714_v47  ;;  %v2448_v19 = vld [vmem:[#allocation16] sm:$0x1] }
 0x611   : > { %v2722_v49 = vsel %vm1807_vm6, %v2721_v48, 0.0 }
 0x612   : > { %2723 = vadd.xlane.f32.xlu0 %v2722_v49  ;;  %v8288_v49 = vld [vmem:[#allocation11] ss:$0 sm:$0xff] }
 0x616   : > { %2433 = vadd.xlane.f32.xlu0 %v2432_v50 }
 0x69f   : > { %v2724_v31 = vpop.xlane.xlu0 %2723 }
 0x6a0   : > { %v2725_v51 = vmul.f32 0.015625, %v2724_v31 }
 0x6a2   : > { %v2726_v52 = vsub.f32 %v2721_v48, %v2725_v51  ;;  %v8289_v51 = vld [vmem:[#allocation10] ss:$0 sm:$0xff] }
 0x6a3   : > { %v2434_v53 = vpop.xlane.xlu0 %2433 }
 0x6a4   : > { %v2436_v54 = vmul.f32 0.015625, %v2434_v53  ;;  %v2727_v55 = vmul.f32 %v2726_v52, %v2726_v52 }
 0x6a6   : > { %v10858_v39 = vsub.f32 %v2426_v9, %v2436_v54  ;;  %v2728_v57 = vsel %vm1807_vm6, %v2727_v55, 0.0 }
 0x6a7   : > { %2729 = vadd.xlane.f32.xlu1 %v2728_v57 }
 0x6a8   : > { %v2438_v58 = vmul.f32 %v10858_v39, %v10858_v39 }
 0x6aa   : > { %v2439_v59 = vsel %vm2431_vm7, %v2438_v58, 0.0 }
 0x6ab   : > { %2440 = vadd.xlane.f32.xlu0 %v2439_v59 }
 0x734   : > { %v2730_v1 = vpop.xlane.xlu1 %2729 }
 0x735   : > { %v2731_v2 = vmul.f32 0.015625, %v2730_v1 }
 0x737   : > { %v2732_v3 = vadd.f32 1e-05, %v2731_v2 }
 0x738   : > { %v2441_v37 = vpop.xlane.xlu0 %2440 }
 0x739   : > { %9664 = vrsqrt.f32 %v2732_v3  ;;  %v2442_v38 = vmul.f32 0.015625, %v2441_v37 }
 0x73b   : > { %v2443_v40 = vadd.f32 1e-05, %v2442_v38 }
 0x73d   : > { %9666 = vrsqrt.f32 %v2443_v40 }
 0x743   : > { %v9665_v4 = vpop.eup %9664 }
 0x744   : > { %v2734_v6 = vmul.f32 %v9665_v4, %v2726_v52 }
 0x746   : > { %v2742_v8 = vmul.f32 %v8280_v5, %v2734_v6 }
 0x747   : > { %v9667_v44 = vpop.eup %9666 }
 0x748   : > { %v2750_v9 = vadd.f32 %v8281_v7, %v2742_v8  ;;  %v2445_v45 = vmul.f32 %v9667_v44, %v10858_v39 }
 0x74a   : > { %v2751_v10 = vmax.f32 %v2750_v9, 0.0  ;;  %v2447_v47 = vmul.f32 %v2446_v46, %v2445_v45 }
 0x74c   : > { %v2752_v11 = vpack.c.bf16 %v2751_v10, %v2751_v10  ;;  %v2449_v50 = vadd.f32 %v2448_v19, %v2447_v47 }
 0x74e   : > { %8777 = vmatmul.mubr.msk.bf16.vlgmr.msra.gmra.mrb[8].mxu0 %vm1807_vm6, %v2752_v11  ;;  %v2450_v53 = vmax.f32 %v2449_v50, 0.0 }
 0x74f   : > { %8800 = vmatprep.mubr.msk.bf16.mxu0 %vm10223_vm5, %v10222_v25  ;;  %8793 = vmatpush3.bf16.msra.mxu0 %v9601_v24 }
 0x750   : > { %8794 = vmatprep.subr.bf16.mxu0 %v10222_v25  ;;  %v2869_v58 = vrot.slane %v2450_v53, %v10738_v28  ;;  %v8290_v28 = vld [vmem:[#allocation20] ss:$0 sm:$0xff] }
 0x753   : > { %8795 = vmatpush3.bf16.msra.mxu0 %v9603_v27 }
 0x754   : > { %8796 = vmatprep.subr.bf16.mxu0 %v10222_v25 }
 0x757   : > { %8797 = vmatpush3.bf16.msra.mxu0 %v9605_v33 }
 0x758   : > { %8798 = vmatprep.subr.bf16.mxu0 %v10222_v25 }
 0x75b   : > { %8799 = vmatpush3.bf16.msra.mxu0 %v9607_v35 }
 0x75c   : > { %8804 = vmatprep.subr.bf16.mxu0 %v10222_v25 }
 0x821   : > { %v2829_v13 = vpop.f32.mrb[8].mxu0 }
 0x822   : > { %v2830_v14 = vadd.f32 %v8282_v12, %v2829_v13  ;;  %v8778_v30 = vpop.f32.mrb[9].mxu0  ;;  %v9610_v13 = vld [vmem:[%s11843_s1] sm:$0xff]  }
 0x823   : > { %v2832_v15 = vpop.f32.mrb[10].mxu0  ;;  %v9611_v30 = vld [vmem:[%s11843_s1 + $0x8] sm:$0xff]  }
 0x824   : > { %v8779_v16 = vpop.f32.mrb[11].mxu0  ;;  %v2835_v18 = vsel %vm1807_vm6, %v2830_v14, 0.0  ;;  %v3041_v15 = vld [vmem:[#allocation3] sm:$0xff] }
 0x825   : > { %2836 = vadd.xlane.f32.xlu1 %v2835_v18 }
 0x8b2   : > { %v2837_v21 = vpop.xlane.xlu1 %2836 }
 0x8b3   : > { %v2838_v17 = vmul.f32 0.015625, %v2837_v21 }
 0x8b5   : > { %v2839_v32 = vsub.f32 %v2830_v14, %v2838_v17 }
 0x8b7   : > { %v2840_v20 = vmul.f32 %v2839_v32, %v2839_v32 }
 0x8b9   : > { %v2841_v22 = vsel %vm1807_vm6, %v2840_v20, 0.0  ;;  %v8302_v20 = vld [vmem:[%s11844_s22] ss:$0 sm:$0xff] }
 0x8ba   : > { %2842 = vadd.xlane.f32.xlu1 %v2841_v22  ;;  %v10932_v22 = vand.u32 127, %v1812_v0 }
 0x8bc   : > { %vm1815_vm9 = vcmp.lt.s32.totalorder %v10932_v22, 4  ;;  %vm1819_vm10 = vcmp.ge.s32.totalorder %v10932_v22, 4  ;;  %vm1820_vm11 = vcmp.lt.s32.totalorder %v10932_v22, 8  ;;  %vm1824_vm13 = vcmp.ge.s32.totalorder %v10932_v22, 8 }
 0x8bd   : > { %v10941_v40 = vsel %vm1815_vm9, 1.0, %v10222_v25  ;;  %vm1821_vm12 = vmand %vm1819_vm10, %vm1820_vm11  ;;  %vm1825_vm14 = vcmp.lt.s32.totalorder %v10932_v22, 12  ;;  %vm1829_vm0 = vcmp.ge.s32.totalorder %v10932_v22, 12  ;;  %vm1830_vm1 = vcmp.lt.s32.totalorder %v10932_v22, 16 }
 0x8be   : > { %vm1826_vm15 = vmand %vm1824_vm13, %vm1825_vm14  ;;  %vm1834_vm3 = vcmp.ge.s32.totalorder %v10932_v22, 16  ;;  %vm1835_vm4 = vcmp.lt.s32.totalorder %v10932_v22, 20  ;;  %vm1839_vm9 = vcmp.ge.s32.totalorder %v10932_v22, 20  ;;  %vm1840_vm10 = vcmp.lt.s32.totalorder %v10932_v22, 24 }
 0x8bf   : > { %v10966_v46 = vsel %vm1826_vm15, 1.0, %v10222_v25  ;;  %vm1831_vm2 = vmand %vm1829_vm0, %vm1830_vm1  ;;  %vm1845_vm13 = vcmp.lt.s32.totalorder %v10932_v22, 28  ;;  %vm1849_vm15 = vcmp.ge.s32.totalorder %v10932_v22, 28  ;;  %vm1850_vm0 = vcmp.lt.s32.totalorder %v10932_v22, 32 }
 0x8c0   : > { %vm1836_vm7 = vmand %vm1834_vm3, %vm1835_vm4  ;;  %vm3250_vm3 = vcmask 1045504   ;;  %vm3246_vm4 = vcmask 97280  }
 0x8c1   : > { %vm1841_vm11 = vmand %vm1839_vm9, %vm1840_vm10 }
 0x8c2   : > { %v11002_v53 = vsel %vm1841_vm11, 1.0, %v10222_v25  ;;  %vm1851_vm1 = vmand %vm1849_vm15, %vm1850_vm0 }
 0x947   : > { %v2843_v41 = vpop.xlane.xlu1 %2842 }
 0x948   : > { %v2844_v42 = vmul.f32 0.015625, %v2843_v41 }
 0x94a   : > { %v2845_v43 = vadd.f32 1e-05, %v2844_v42 }
 0x94c   : > { %9668 = vrsqrt.f32 %v2845_v43  ;;  %v10954_v43 = vsel %vm1821_vm12, 1.0, %v10222_v25  ;;  %vm1844_vm12 = vcmp.ge.s32.totalorder %v10932_v22, 24 }
 0x94d   : > { %vm1846_vm14 = vmand %vm1844_vm12, %vm1845_vm13 }
 0x956   : > { %v9669_v48 = vpop.eup %9668 }
 0x957   : > { %v2847_v31 = vmul.f32 %v9669_v48, %v2839_v32  ;;  %v10978_v48 = vsel %vm1831_vm2, 1.0, %v10222_v25  ;;  %vm3230_vm2 = vcmask 93184  }
 0x959   : > { %v2855_v52 = vmul.f32 %v8288_v49, %v2847_v31  ;;  %v10990_v31 = vsel %vm1836_vm7, 1.0, %v10222_v25  ;;  %vm4078_vm7 = vcmask 257024  }
 0x95b   : > { %v2863_v54 = vadd.f32 %v8289_v51, %v2855_v52 }
 0x95d   : > { %v2864_v55 = vmax.f32 %v2863_v54, 0.0 }
 0x95f   : > { %v2865_v57 = vadd.f32 %v2864_v55, %v10846_v36  ;;  %v9609_v36 = vld [vmem:[%s11842_s7 + $0x8] sm:$0xff]  }
 0x961   : > { %v2871_v59 = vpack.c.bf16 %v2865_v57, %v2865_v57  ;;  %v10899_v39 = vmul.f32 %v2869_v58, %v2865_v57  ;;  %v11014_v57 = vsel %vm1846_vm14, 1.0, %v10222_v25 }
 0x963   : > { %8789 = vmatmul.mubr.msk.bf16.vlgmr.msra.gmra.mrb[16].mxu1 %vm1807_vm6, %v2871_v59  ;;  %v2955_v60 = vpack.c.bf16 %v10899_v39, %v10899_v39 }
 0x964   : > { %8822 = vmatprep.mubr.msk.bf16.mxu1 %vm10223_vm5, %v10222_v25 }
 0x965   : > { %8801 = vmatmul.mubr.msk.bf16.vlgmr.msra.gmra.mrb[12].mxu0 %vm1807_vm6, %v2955_v60  ;;  %v11026_v60 = vsel %vm1851_vm1, 1.0, %v10222_v25 }
 0x966   : > { %8808 = vmatprep.mubr.msk.bf16.mxu0 %vm10223_vm5, %v10222_v25  ;;  %8805 = vmatpush3.bf16.msra.mxu0 %v9608_v61 }
 0x967   : > { %8806 = vmatprep.subr.bf16.mxu0 %v10222_v25 }
 0x96a   : > { %8807 = vmatpush3.bf16.msra.mxu0 %v9609_v36 }
 0x96b   : > { %8812 = vmatprep.subr.bf16.mxu0 %v10222_v25 }
 0xa36   : > { %v2948_v62 = vpop.f32.mrb[16].mxu1 }
 0xa37   : > { %v2949_v1 = vadd.f32 %v8290_v28, %v2948_v62  ;;  %v8790_v2 = vpop.f32.mrb[17].mxu1 }
 0xa38   : > { %v2951_v3 = vpop.f32.mrb[18].mxu1  ;;  %v3032_v4 = vpop.f32.mrb[12].mxu0 }
 0xa39   : > { %v2954_v5 = vmax.f32 %v2949_v1, 0.0  ;;  %v3033_v6 = vadd.f32 %v8296_v63, %v3032_v4  ;;  %v8791_v7 = vpop.f32.mrb[19].mxu1  ;;  %v8802_v8 = vpop.f32.mrb[13].mxu0 }
 0xa3a   : > { %v3035_v9 = vpop.f32.mrb[14].mxu0 }
 0xa3b   : > { %3039 = vst.msk [vmem:[#allocation2 + $0x8] sm:$0xff] %vm1809_vm8, %v2954_v5  ;;  %v3038_v10 = vmax.f32 %v3033_v6, 0.0  ;;  %v8803_v11 = vpop.f32.mrb[15].mxu0 }
 0xa3d   : > { %3040 = vst.msk [vmem:[#allocation3 + $0x8] sm:$0xff] %vm1809_vm8, %v3038_v10 }
 0xa44   : > { %v10915_v12 = vld [vmem:[#allocation3 + $0x8] sm:$0xf] }
 0xa45   : > { %v3045_v14 = vpack.c.bf16 %v10915_v12, %v10915_v12  ;;  %v3112_v16 = vpack.c.bf16 %v10915_v12, %v3041_v15 }
 0xa47   : > { %8809 = vmatmul.mubr.msk.bf16.vlgmr.msra.gmra.mrb[16].mxu0 %vm1809_vm8, %v3045_v14 }
 0xa48   : > { %8813 = vmatpush3.bf16.msra.mxu0 %v9610_v13  ;;  %8816 = vmatprep.mubr.msk.bf16.mxu0 %vm10223_vm5, %v10222_v25 }
 0xa49   : > { %8814 = vmatprep.subr.bf16.mxu0 %v10222_v25 }
 0xa4c   : > { %8815 = vmatpush3.bf16.msra.mxu0 %v9611_v30 }
 0xa4d   : > { %8826 = vmatprep.subr.bf16.mxu0 %v10222_v25 }
 0xa4f   : > { %8817 = vmatmul.mubr.msk.bf16.vlgmr.msra.gmra.mrb[20].mxu0 %vm1809_vm8, %v3112_v16 }
 0xa50   : > { %8828 = vmatprep.mubr.msk.bf16.mxu0 %vm10223_vm5, %v10222_v25 }
 0xb1a   : > { %v3106_v18 = vpop.f32.mrb[16].mxu0 }
 0xb1b   : > { %v8810_v21 = vpop.f32.mrb[17].mxu0  ;;  %v3107_v26 = vadd.f32 %v8302_v20, %v3106_v18 }
 0xb1c   : > { %v3109_v17 = vpop.f32.mrb[18].mxu0 }
 0xb1d   : > { %v8811_v32 = vpop.f32.mrb[19].mxu0  ;;  %v10936_v37 = vmul.f32 0.5, %v3107_v26 }
 0xb1f   : > { %v3182_v41 = vmul.f32 %v10941_v40, %v10936_v37  ;;  %v3296_v44 = vmul.f32 %v10954_v43, %v10936_v37  ;;  %v3398_v47 = vmul.f32 %v10966_v46, %v10936_v37  ;;  %v3500_v49 = vmul.f32 %v10978_v48, %v10936_v37 }
 0xb20   : > { %v3602_v51 = vmul.f32 %v10990_v31, %v10936_v37  ;;  %v3704_v54 = vmul.f32 %v11002_v53, %v10936_v37  ;;  %v3806_v58 = vmul.f32 %v11014_v57, %v10936_v37  ;;  %v3908_v61 = vmul.f32 %v11026_v60, %v10936_v37 }
 0xb21   : > { %v3183_v42 = vpack.c.bf16 %v3182_v41, %v3182_v41  ;;  %v3297_v45 = vpack.c.bf16 %v3296_v44, %v3296_v44  ;;  %v3399_v19 = vpack.c.bf16 %v3398_v47, %v3398_v47  ;;  %v3501_v50 = vpack.c.bf16 %v3500_v49, %v3500_v49 }
 0xb22   : > { %v3173_v24 = vpop.f32.mrb[20].mxu0  ;;  %v3603_v52 = vpack.c.bf16 %v3602_v51, %v3602_v51  ;;  %v3705_v55 = vpack.c.bf16 %v3704_v54, %v3704_v54  ;;  %v3807_v59 = vpack.c.bf16 %v3806_v58, %v3806_v58  ;;  %v3909_v36 = vpack.c.bf16 %v3908_v61, %v3908_v61 }
 0xb23   : > { %v8818_v27 = vpop.f32.mrb[21].mxu0  ;;  %v3174_v33 = vadd.f32 %v8306_v23, %v3173_v24 }
 0xb24   : > { %v3176_v29 = vpop.f32.mrb[22].mxu0 }
 0xb25   : > { %v3177_v34 = vadd.f32 %v8306_v23, %v3176_v29  ;;  %v8819_v35 = vpop.f32.mrb[23].mxu0 }
 0xb27   : > { %v10938_v38 = vpack.c.bf16 %v3177_v34, %v3174_v33 }
 0xb29   : > { %v10945_v0 = vsel %vm1809_vm8, %v10938_v38, 0 }
 0xb2a   : > { %8821 = vmatpush3.bf16.xpose.msra.mxu1 %v10945_v0 }
 0xb2b   : > { %8832 = vmatprep.subr.bf16.mxu1 %v10222_v25 }
 0xb31   : > { %8823 = vmatmul.mubr.msk.bf16.vlgmr.msra.gmra.mrb[20].mxu1 %vm1809_vm8, %v3183_v42 }
 0xb32   : > { %8833 = vmatpush3.bf16.xpose.msra.mxu1 %v10945_v0  ;;  %8834 = vmatprep.mubr.msk.bf16.mxu1 %vm10223_vm5, %v10222_v25 }
 0xb33   : > { %8844 = vmatprep.subr.bf16.mxu1 %v10222_v25 }
 0xb39   : > { %8835 = vmatmul.mubr.msk.bf16.vlgmr.msra.gmra.mrb[24].mxu1 %vm1809_vm8, %v3297_v45 }
 0xb3a   : > { %8845 = vmatpush3.bf16.xpose.msra.mxu1 %v10945_v0  ;;  %8846 = vmatprep.mubr.msk.bf16.mxu1 %vm10223_vm5, %v10222_v25 }
 0xb3b   : > { %8856 = vmatprep.subr.bf16.mxu1 %v10222_v25 }
 0xb41   : > { %8847 = vmatmul.mubr.msk.bf16.vlgmr.msra.gmra.mrb[28].mxu1 %vm1809_vm8, %v3399_v19 }
 0xb42   : > { %8857 = vmatpush3.bf16.xpose.msra.mxu1 %v10945_v0  ;;  %8858 = vmatprep.mubr.msk.bf16.mxu1 %vm10223_vm5, %v10222_v25 }
 0xb43   : > { %8868 = vmatprep.subr.bf16.mxu1 %v10222_v25 }
 0xb49   : > { %8859 = vmatmul.mubr.msk.bf16.vlgmr.msra.gmra.mrb[32].mxu1 %vm1809_vm8, %v3501_v50 }
 0xb4a   : > { %8869 = vmatpush3.bf16.xpose.msra.mxu1 %v10945_v0  ;;  %8870 = vmatprep.mubr.msk.bf16.mxu1 %vm10223_vm5, %v10222_v25 }
 0xb4b   : > { %8880 = vmatprep.subr.bf16.mxu1 %v10222_v25 }
 0xb51   : > { %8871 = vmatmul.mubr.msk.bf16.vlgmr.msra.gmra.mrb[36].mxu1 %vm1809_vm8, %v3603_v52 }
 0xb52   : > { %8881 = vmatpush3.bf16.xpose.msra.mxu1 %v10945_v0  ;;  %8882 = vmatprep.mubr.msk.bf16.mxu1 %vm10223_vm5, %v10222_v25 }
 0xb53   : > { %8892 = vmatprep.subr.bf16.mxu1 %v10222_v25 }
 0xb59   : > { %8883 = vmatmul.mubr.msk.bf16.vlgmr.msra.gmra.mrb[40].mxu1 %vm1809_vm8, %v3705_v55 }
 0xb5a   : > { %8893 = vmatpush3.bf16.xpose.msra.mxu1 %v10945_v0  ;;  %8894 = vmatprep.mubr.msk.bf16.mxu1 %vm10223_vm5, %v10222_v25 }
 0xb5b   : > { %8904 = vmatprep.subr.bf16.mxu1 %v10222_v25 }
 0xb61   : > { %8895 = vmatmul.mubr.msk.bf16.vlgmr.msra.gmra.mrb[44].mxu1 %vm1809_vm8, %v3807_v59 }
 0xb62   : > { %8905 = vmatpush3.bf16.xpose.msra.mxu1 %v10945_v0  ;;  %8906 = vmatprep.mubr.msk.bf16.mxu1 %vm10223_vm5, %v10222_v25 }
 0xb63   : > { %8916 = vmatprep.subr.bf16.mxu1 %v10222_v25 }
 0xb69   : > { %8907 = vmatmul.mubr.msk.bf16.vlgmr.msra.gmra.mrb[48].mxu1 %vm1809_vm8, %v3909_v36 }
 0xb6a   : > { %8920 = vmatprep.mubr.msk.bf16.mxu1 %vm10223_vm5, %v10222_v25 }
 0xc04   : > { %v3224_v28 = vpop.f32.mrb[20].mxu1 }
 0xc05   : > { %v8824_v62 = vpop.f32.mrb[21].mxu1  ;;  %v3231_v63 = vsel %vm3230_vm2, %v3224_v28, -inf }
 0xc06   : > { %3232 = vmax.xlane.f32.xlu0 %v3231_v63  ;;  %v3227_v1 = vpop.f32.mrb[22].mxu1 }
 0xc07   : > { %v8825_v2 = vpop.f32.mrb[23].mxu1 }
 0xc0c   : > { %v3335_v3 = vpop.f32.mrb[24].mxu1 }
 0xc0d   : > { %v8836_v4 = vpop.f32.mrb[25].mxu1  ;;  %v3341_v5 = vsel %vm3230_vm2, %v3335_v3, -inf }
 0xc0e   : > { %3342 = vmax.xlane.f32.xlu1 %v3341_v5  ;;  %v3338_v6 = vpop.f32.mrb[26].mxu1 }
 0xc0f   : > { %v8837_v7 = vpop.f32.mrb[27].mxu1 }
 0xc14   : > { %v3437_v8 = vpop.f32.mrb[28].mxu1 }
 0xc15   : > { %v8848_v9 = vpop.f32.mrb[29].mxu1  ;;  %v3443_v10 = vsel %vm3230_vm2, %v3437_v8, -inf }
 0xc16   : > { %3444 = vmax.xlane.f32.xlu0 %v3443_v10  ;;  %v3440_v11 = vpop.f32.mrb[30].mxu1 }
 0xc17   : > { %v8849_v13 = vpop.f32.mrb[31].mxu1 }
 0xc1c   : > { %v3539_v14 = vpop.f32.mrb[32].mxu1 }
 0xc1d   : > { %v8860_v30 = vpop.f32.mrb[33].mxu1  ;;  %v3545_v15 = vsel %vm3230_vm2, %v3539_v14, -inf }
 0xc1e   : > { %3546 = vmax.xlane.f32.xlu1 %v3545_v15  ;;  %v3542_v16 = vpop.f32.mrb[34].mxu1 }
 0xc1f   : > { %v8861_v18 = vpop.f32.mrb[35].mxu1 }
 0xc24   : > { %v3641_v21 = vpop.f32.mrb[36].mxu1 }
 0xc25   : > { %v8872_v17 = vpop.f32.mrb[37].mxu1  ;;  %v3647_v32 = vsel %vm3230_vm2, %v3641_v21, -inf }
 0xc26   : > { %3648 = vmax.xlane.f32.xlu0 %v3647_v32  ;;  %v3644_v20 = vpop.f32.mrb[38].mxu1 }
 0xc27   : > { %v8873_v22 = vpop.f32.mrb[39].mxu1 }
 0xc2c   : > { %v3743_v23 = vpop.f32.mrb[40].mxu1 }
 0xc2d   : > { %v8884_v24 = vpop.f32.mrb[41].mxu1  ;;  %v3749_v26 = vsel %vm3230_vm2, %v3743_v23, -inf }
 0xc2e   : > { %3750 = vmax.xlane.f32.xlu1 %v3749_v26  ;;  %v3746_v27 = vpop.f32.mrb[42].mxu1 }
 0xc2f   : > { %v8885_v29 = vpop.f32.mrb[43].mxu1 }
 0xc34   : > { %v3845_v33 = vpop.f32.mrb[44].mxu1 }
 0xc35   : > { %v8896_v34 = vpop.f32.mrb[45].mxu1  ;;  %v3851_v35 = vsel %vm3230_vm2, %v3845_v33, -inf }
 0xc36   : > { %3852 = vmax.xlane.f32.xlu0 %v3851_v35  ;;  %v3848_v37 = vpop.f32.mrb[46].mxu1 }
 0xc37   : > { %v8897_v0 = vpop.f32.mrb[47].mxu1 }
 0xc3c   : > { %v3947_v41 = vpop.f32.mrb[48].mxu1 }
 0xc3d   : > { %v8908_v42 = vpop.f32.mrb[49].mxu1  ;;  %v3953_v44 = vsel %vm3230_vm2, %v3947_v41, -inf }
 0xc3e   : > { %3954 = vmax.xlane.f32.xlu1 %v3953_v44  ;;  %v3950_v45 = vpop.f32.mrb[50].mxu1 }
 0xc3f   : > { %v8909_v47 = vpop.f32.mrb[51].mxu1 }
 0xc93   : > { %v3233_v19 = vpop.xlane.xlu0 %3232 }
 0xc94   : > { %v3234_v49 = vsub.f32 %v3224_v28, %v3233_v19 }
 0xc96   : > { %v3235_v50 = vmul.f32 1.442695, %v3234_v49 }
 0xc98   : > { %9670 = vpow2.f32 %v3235_v50 }
 0xc9b   : > { %v3343_v51 = vpop.xlane.xlu1 %3342 }
 0xc9c   : > { %v3344_v52 = vsub.f32 %v3335_v3, %v3343_v51 }
 0xc9e   : > { %v3345_v54 = vmul.f32 1.442695, %v3344_v52 }
 0xca0   : > { %9672 = vpow2.f32 %v3345_v54 }
 0xca2   : > { %v9671_v55 = vpop.eup %9670 }
 0xca3   : > { %v3445_v58 = vpop.xlane.xlu0 %3444  ;;  %v3237_v59 = vsel %vm3230_vm2, %v9671_v55, 0.0 }
 0xca4   : > { %v3446_v61 = vsub.f32 %v3437_v8, %v3445_v58  ;;  %3238 = vadd.xlane.f32.xlu0 %v3237_v59 }
 0xca6   : > { %v3447_v36 = vmul.f32 1.442695, %v3446_v61 }
 0xca8   : > { %9674 = vpow2.f32 %v3447_v36 }
 0xcaa   : > { %v9673_v62 = vpop.eup %9672 }
 0xcab   : > { %v3547_v63 = vpop.xlane.xlu1 %3546  ;;  %v3347_v1 = vsel %vm3230_vm2, %v9673_v62, 0.0 }
 0xcac   : > { %v3548_v2 = vsub.f32 %v3539_v14, %v3547_v63  ;;  %3348 = vadd.xlane.f32.xlu1 %v3347_v1 }
 0xcae   : > { %v3549_v28 = vmul.f32 1.442695, %v3548_v2 }
 0xcb0   : > { %9676 = vpow2.f32 %v3549_v28 }
 0xcb2   : > { %v11048_v4 = vpop.eup %9674 }
 0xcb3   : > { %v3649_v3 = vpop.xlane.xlu0 %3648  ;;  %v3449_v5 = vsel %vm3230_vm2, %v11048_v4, 0.0 }
 0xcb4   : > { %v3650_v6 = vsub.f32 %v3641_v21, %v3649_v3  ;;  %3450 = vadd.xlane.f32.xlu0 %v3449_v5 }
 0xcb6   : > { %v3651_v7 = vmul.f32 1.442695, %v3650_v6 }
 0xcb8   : > { %9678 = vpow2.f32 %v3651_v7 }
 0xcba   : > { %v11052_v8 = vpop.eup %9676 }
 0xcbb   : > { %v3751_v9 = vpop.xlane.xlu1 %3750  ;;  %v3551_v10 = vsel %vm3230_vm2, %v11052_v8, 0.0 }
 0xcbc   : > { %v3752_v11 = vsub.f32 %v3743_v23, %v3751_v9  ;;  %3552 = vadd.xlane.f32.xlu1 %v3551_v10  ;;  %v9612_v9 = vld [vmem:[%s11846_s18] sm:$0xff]   ;;  %v9613_v10 = vld [vmem:[%s11846_s18 + $0x8] sm:$0xff]  }
 0xcbd   : > { %8917 = vmatpush3.bf16.msra.mxu1 %v9612_v9  ;;  %v3043_v9 = vld [vmem:[#allocation2] sm:$0xff] }
 0xcbe   : > { %v3753_v13 = vmul.f32 1.442695, %v3752_v11  ;;  %8918 = vmatprep.subr.bf16.mxu1 %v10222_v25 }
 0xcc0   : > { %9680 = vpow2.f32 %v3753_v13 }
 0xcc1   : > { %8919 = vmatpush3.bf16.msra.mxu1 %v9613_v10  ;;  %v3044_v10 = vld [vmem:[#allocation2 + $0x8] sm:$0xf] }
 0xcc2   : > { %v11056_v14 = vpop.eup %9678  ;;  %8932 = vmatprep.subr.bf16.mxu1 %v10222_v25 }
 0xcc3   : > { %v3853_v30 = vpop.xlane.xlu0 %3852  ;;  %v3653_v15 = vsel %vm3230_vm2, %v11056_v14, 0.0 }
 0xcc4   : > { %v3854_v16 = vsub.f32 %v3845_v33, %v3853_v30  ;;  %3654 = vadd.xlane.f32.xlu1 %v3653_v15 }
 0xcc6   : > { %v3855_v18 = vmul.f32 1.442695, %v3854_v16 }
 0xcc8   : > { %9682 = vpow2.f32 %v3855_v18 }
 0xcca   : > { %v11060_v21 = vpop.eup %9680  ;;  %3244 = vrot.lane.b32.xlu0 %v10938_v38, %s11734_s2  ;;  %s11847_s2 = sld [smem:[#allocation34_spill]] }
 0xccb   : > { %v3955_v17 = vpop.xlane.xlu1 %3954  ;;  %v3755_v32 = vsel %vm3230_vm2, %v11060_v21, 0.0 }
 0xccc   : > { %v3956_v20 = vsub.f32 %v3947_v41, %v3955_v17  ;;  %3756 = vadd.xlane.f32.xlu1 %v3755_v32 }
 0xcce   : > { %v3957_v22 = vmul.f32 1.442695, %v3956_v20 }
 0xcd0   : > { %9684 = vpow2.f32 %v3957_v22 }
 0xcd2   : > { %v11066_v23 = vpop.eup %9682 }
 0xcd3   : > { %v3857_v24 = vsel %vm3230_vm2, %v11066_v23, 0.0 }
 0xcd4   : > { %3858 = vadd.xlane.f32.xlu1 %v3857_v24 }
 0xcda   : > { %v11070_v26 = vpop.eup %9684 }
 0xcdb   : > { %v3959_v27 = vsel %vm3230_vm2, %v11070_v26, 0.0 }
 0xcdc   : > { %3960 = vadd.xlane.f32.xlu1 %v3959_v27 }
 0xd31   : > { %v3239_v38 = vpop.xlane.xlu0 %3238 }
 0xd32   : > { %9686 = vrcp.f32 %v3239_v38 }
 0xd39   : > { %v3349_v29 = vpop.xlane.xlu1 %3348 }
 0xd3a   : > { %9688 = vrcp.f32 %v3349_v29 }
 0xd3c   : > { %v9687_v33 = vpop.eup %9686 }
 0xd3d   : > { %v3241_v35 = vmul.f32 %v9687_v33, %v9671_v55 }
 0xd3f   : > { %v3242_v41 = vpack.c.bf16 %v3241_v35, %v3241_v35 }
 0xd41   : > { %v3451_v34 = vpop.xlane.xlu0 %3450 }
 0xd42   : > { %9690 = vrcp.f32 %v3451_v34 }
 0xd44   : > { %v9689_v42 = vpop.eup %9688 }
 0xd45   : > { %v3245_v37 = vpop.permute.xlu0 %3244  ;;  %v3351_v44 = vmul.f32 %v9689_v42, %v9673_v62 }
 0xd46   : > { %v3252_v0 = vsel %vm3250_vm3, %v3245_v37, 0 }
 0xd47   : > { %8827 = vmatpush3.bf16.msra.mxu0 %v3252_v0  ;;  %v3352_v47 = vpack.c.bf16 %v3351_v44, %v3351_v44 }
 0xd48   : > { %8838 = vmatprep.subr.bf16.mxu0 %v10222_v25 }
 0xd49   : > { %v3553_v45 = vpop.xlane.xlu1 %3552 }
 0xd4a   : > { %8829 = vmatmul.mubr.msk.bf16.vlgmr.msra.gmra.mrb[24].mxu0 %vm3246_vm4, %v3242_v41  ;;  %9692 = vrcp.f32 %v3553_v45 }
 0xd4b   : > { %8839 = vmatpush3.bf16.msra.mxu0 %v3252_v0  ;;  %8840 = vmatprep.mubr.msk.bf16.mxu0 %vm10223_vm5, %v10222_v25 }
 0xd4c   : > { %8850 = vmatprep.subr.bf16.mxu0 %v10222_v25  ;;  %v9691_v19 = vpop.eup %9690 }
 0xd4d   : > { %v3453_v49 = vmul.f32 %v9691_v19, %v11048_v4 }
 0xd4f   : > { %v3454_v51 = vpack.c.bf16 %v3453_v49, %v3453_v49 }
 0xd51   : > { %v3655_v50 = vpop.xlane.xlu1 %3654 }
 0xd52   : > { %8841 = vmatmul.mubr.msk.bf16.vlgmr.msra.gmra.mrb[28].mxu0 %vm3246_vm4, %v3352_v47  ;;  %9694 = vrcp.f32 %v3655_v50 }
 0xd53   : > { %8851 = vmatpush3.bf16.msra.mxu0 %v3252_v0  ;;  %8852 = vmatprep.mubr.msk.bf16.mxu0 %vm10223_vm5, %v10222_v25 }
 0xd54   : > { %8862 = vmatprep.subr.bf16.mxu0 %v10222_v25  ;;  %v9693_v52 = vpop.eup %9692 }
 0xd55   : > { %v3555_v54 = vmul.f32 %v9693_v52, %v11052_v8 }
 0xd57   : > { %v3556_v58 = vpack.c.bf16 %v3555_v54, %v3555_v54 }
 0xd59   : > { %v3757_v55 = vpop.xlane.xlu1 %3756 }
 0xd5a   : > { %8853 = vmatmul.mubr.msk.bf16.vlgmr.msra.gmra.mrb[32].mxu0 %vm3246_vm4, %v3454_v51  ;;  %9696 = vrcp.f32 %v3757_v55 }
 0xd5b   : > { %8863 = vmatpush3.bf16.msra.mxu0 %v3252_v0  ;;  %8864 = vmatprep.mubr.msk.bf16.mxu0 %vm10223_vm5, %v10222_v25 }
 0xd5c   : > { %8874 = vmatprep.subr.bf16.mxu0 %v10222_v25  ;;  %v9695_v59 = vpop.eup %9694 }
 0xd5d   : > { %v3657_v61 = vmul.f32 %v9695_v59, %v11056_v14 }
 0xd5f   : > { %v3658_v62 = vpack.c.bf16 %v3657_v61, %v3657_v61 }
 0xd61   : > { %v3859_v36 = vpop.xlane.xlu1 %3858 }
 0xd62   : > { %8865 = vmatmul.mubr.msk.bf16.vlgmr.msra.gmra.mrb[36].mxu0 %vm3246_vm4, %v3556_v58  ;;  %9698 = vrcp.f32 %v3859_v36 }
 0xd63   : > { %8875 = vmatpush3.bf16.msra.mxu0 %v3252_v0  ;;  %8876 = vmatprep.mubr.msk.bf16.mxu0 %vm10223_vm5, %v10222_v25 }
 0xd64   : > { %8886 = vmatprep.subr.bf16.mxu0 %v10222_v25  ;;  %v9697_v63 = vpop.eup %9696 }
 0xd65   : > { %v3759_v1 = vmul.f32 %v9697_v63, %v11060_v21 }
 0xd67   : > { %v3760_v28 = vpack.c.bf16 %v3759_v1, %v3759_v1 }
 0xd69   : > { %v3961_v2 = vpop.xlane.xlu1 %3960 }
 0xd6a   : > { %8877 = vmatmul.mubr.msk.bf16.vlgmr.msra.gmra.mrb[40].mxu0 %vm3246_vm4, %v3658_v62  ;;  %9700 = vrcp.f32 %v3961_v2 }
 0xd6b   : > { %8887 = vmatpush3.bf16.msra.mxu0 %v3252_v0  ;;  %8888 = vmatprep.mubr.msk.bf16.mxu0 %vm10223_vm5, %v10222_v25 }
 0xd6c   : > { %8898 = vmatprep.subr.bf16.mxu0 %v10222_v25  ;;  %v9699_v4 = vpop.eup %9698 }
 0xd6d   : > { %v3861_v3 = vmul.f32 %v9699_v4, %v11066_v23 }
 0xd6f   : > { %v3862_v5 = vpack.c.bf16 %v3861_v3, %v3861_v3 }
 0xd72   : > { %8889 = vmatmul.mubr.msk.bf16.vlgmr.msra.gmra.mrb[44].mxu0 %vm3246_vm4, %v3760_v28 }
 0xd73   : > { %8899 = vmatpush3.bf16.msra.mxu0 %v3252_v0  ;;  %8900 = vmatprep.mubr.msk.bf16.mxu0 %vm10223_vm5, %v10222_v25 }
 0xd74   : > { %8910 = vmatprep.subr.bf16.mxu0 %v10222_v25  ;;  %v9701_v6 = vpop.eup %9700 }
 0xd75   : > { %v3963_v7 = vmul.f32 %v9701_v6, %v11070_v26  ;;  %v9614_v6 = vld [vmem:[%s11847_s2] sm:$0xff]  }
 0xd77   : > { %v3964_v8 = vpack.c.bf16 %v3963_v7, %v3963_v7 }
 0xd7a   : > { %8901 = vmatmul.mubr.msk.bf16.vlgmr.msra.gmra.mrb[48].mxu0 %vm3246_vm4, %v3862_v5 }
 0xd7b   : > { %8911 = vmatpush3.bf16.msra.mxu0 %v3252_v0  ;;  %8912 = vmatprep.mubr.msk.bf16.mxu0 %vm10223_vm5, %v10222_v25 }
 0xd7c   : > { %8924 = vmatprep.subr.bf16.mxu0 %v10222_v25 }
 0xd82   : > { %8913 = vmatmul.mubr.msk.bf16.vlgmr.msra.gmra.mrb[52].mxu0 %vm3246_vm4, %v3964_v8  ;;  %v9615_v8 = vld [vmem:[%s11847_s2 + $0x8] sm:$0xff]  }
 0xd83   : > { %8928 = vmatprep.mubr.msk.bf16.mxu0 %vm10223_vm5, %v10222_v25 }
 0xe1d   : > { %v3288_v11 = vpop.f32.mrb[24].mxu0 }
 0xe1e   : > { %v8830_v13 = vpop.f32.mrb[25].mxu0  ;;  %v3294_v16 = vmul.f32 %v10941_v40, %v3288_v11  ;;  %v4176_v11 = vpack.c.bf16 %v3044_v10, %v3043_v9 }
 0xe1f   : > { %v3291_v14 = vpop.f32.mrb[26].mxu0  ;;  %v8326_v13 = vld [vmem:[%s11848_s3] ss:$0 sm:$0xff] }
 0xe20   : > { %v8831_v30 = vpop.f32.mrb[27].mxu0 }
 0xe25   : > { %v3390_v15 = vpop.f32.mrb[28].mxu0 }
 0xe26   : > { %v3396_v18 = vmul.f32 %v10954_v43, %v3390_v15  ;;  %v8842_v21 = vpop.f32.mrb[29].mxu0 }
 0xe27   : > { %v3393_v17 = vpop.f32.mrb[30].mxu0 }
 0xe28   : > { %v3397_v32 = vadd.f32 %v3396_v18, %v3294_v16  ;;  %v8843_v20 = vpop.f32.mrb[31].mxu0 }
 0xe2d   : > { %v3492_v22 = vpop.f32.mrb[32].mxu0 }
 0xe2e   : > { %v3498_v23 = vmul.f32 %v10966_v46, %v3492_v22  ;;  %v8854_v24 = vpop.f32.mrb[33].mxu0 }
 0xe2f   : > { %v3495_v26 = vpop.f32.mrb[34].mxu0 }
 0xe30   : > { %v3499_v27 = vadd.f32 %v3498_v23, %v3397_v32  ;;  %v8855_v38 = vpop.f32.mrb[35].mxu0  ;;  %v8336_v32 = vld [vmem:[%s11849_s4] ss:$0 sm:$0xff] }
 0xe35   : > { %v3594_v29 = vpop.f32.mrb[36].mxu0 }
 0xe36   : > { %v3600_v33 = vmul.f32 %v10978_v48, %v3594_v29  ;;  %v8866_v34 = vpop.f32.mrb[37].mxu0 }
 0xe37   : > { %v3597_v35 = vpop.f32.mrb[38].mxu0 }
 0xe38   : > { %v3601_v37 = vadd.f32 %v3600_v33, %v3499_v27  ;;  %v8867_v0 = vpop.f32.mrb[39].mxu0 }
 0xe39   : > { %v9617_v0 = vld [vmem:[%s11850_s5 + $0x8] sm:$0xff]  }
 0xe3d   : > { %v3696_v41 = vpop.f32.mrb[40].mxu0 }
 0xe3e   : > { %v3702_v42 = vmul.f32 %v10990_v31, %v3696_v41  ;;  %v8878_v44 = vpop.f32.mrb[41].mxu0 }
 0xe3f   : > { %v3699_v45 = vpop.f32.mrb[42].mxu0 }
 0xe40   : > { %v3703_v47 = vadd.f32 %v3702_v42, %v3601_v37  ;;  %v8879_v19 = vpop.f32.mrb[43].mxu0  ;;  %v9616_v37 = vld [vmem:[%s11850_s5] sm:$0xff]  }
 0xe41   : > { %8925 = vmatpush3.bf16.msra.mxu0 %v9616_v37 }
 0xe42   : > { %8926 = vmatprep.subr.bf16.mxu0 %v10222_v25 }
 0xe45   : > { %v3798_v49 = vpop.f32.mrb[44].mxu0  ;;  %8927 = vmatpush3.bf16.msra.mxu0 %v9617_v0 }
 0xe46   : > { %v3804_v50 = vmul.f32 %v11002_v53, %v3798_v49  ;;  %v8890_v51 = vpop.f32.mrb[45].mxu0  ;;  %8940 = vmatprep.subr.bf16.mxu0 %v10222_v25  ;;  %v8331_v49 = vld [vmem:[%s11852_s9] ss:$0 sm:$0xff] }
 0xe47   : > { %v3801_v52 = vpop.f32.mrb[46].mxu0 }
 0xe48   : > { %v3805_v54 = vadd.f32 %v3804_v50, %v3703_v47  ;;  %v8891_v55 = vpop.f32.mrb[47].mxu0  ;;  %v8330_v47 = vld [vmem:[%s11851_s6] ss:$0 sm:$0xff] }
 0xe49   : > { %v8332_v55 = vld [vmem:[%s11853_s10] ss:$0 sm:$0xff] }
 0xe4d   : > { %v3900_v58 = vpop.f32.mrb[48].mxu0 }
 0xe4e   : > { %v3906_v59 = vmul.f32 %v11014_v57, %v3900_v58  ;;  %v8902_v61 = vpop.f32.mrb[49].mxu0 }
 0xe4f   : > { %v3903_v36 = vpop.f32.mrb[50].mxu0 }
 0xe50   : > { %v3907_v62 = vadd.f32 %v3906_v59, %v3805_v54  ;;  %v8903_v63 = vpop.f32.mrb[51].mxu0 }
 0xe55   : > { %v4002_v1 = vpop.f32.mrb[52].mxu0 }
 0xe56   : > { %v4008_v2 = vmul.f32 %v11026_v60, %v4002_v1  ;;  %v8914_v28 = vpop.f32.mrb[53].mxu0 }
 0xe57   : > { %v4005_v4 = vpop.f32.mrb[54].mxu0 }
 0xe58   : > { %v4009_v3 = vadd.f32 %v4008_v2, %v3907_v62  ;;  %v8915_v5 = vpop.f32.mrb[55].mxu0 }
 0xe5a   : > { %v4010_v7 = vpack.c.bf16 %v4009_v3, %v4009_v3 }
 0xe5c   : > { %8921 = vmatmul.mubr.msk.bf16.vlgmr.msra.gmra.mrb[52].mxu1 %vm1809_vm8, %v4010_v7 }
 0xe5d   : > { %8933 = vmatpush3.bf16.msra.mxu1 %v9614_v6  ;;  %8936 = vmatprep.mubr.msk.bf16.mxu1 %vm10223_vm5, %v10222_v25 }
 0xe5e   : > { %8934 = vmatprep.subr.bf16.mxu1 %v10222_v25 }
 0xe61   : > { %8935 = vmatpush3.bf16.msra.mxu1 %v9615_v8 }
 0xe62   : > { %8946 = vmatprep.subr.bf16.mxu1 %v10222_v25 }
 0xe64   : > { %8937 = vmatmul.mubr.msk.bf16.vlgmr.msra.gmra.mrb[56].mxu1 %vm1809_vm8, %v4176_v11 }
 0xe65   : > { %8948 = vmatprep.mubr.msk.bf16.mxu1 %vm10223_vm5, %v10222_v25 }
 0xf2f   : > { %v4071_v14 = vpop.f32.mrb[52].mxu1 }
 0xf30   : > { %v4072_v30 = vadd.f32 %v8326_v13, %v4071_v14  ;;  %v8922_v15 = vpop.f32.mrb[53].mxu1 }
 0xf31   : > { %v4074_v16 = vpop.f32.mrb[54].mxu1 }
 0xf32   : > { %v8923_v18 = vpop.f32.mrb[55].mxu1  ;;  %v4077_v21 = vadd.f32 %v4072_v30, %v10915_v12 }
 0xf34   : > { %v4079_v17 = vsel %vm4078_vm7, %v4077_v21, 0.0 }
 0xf35   : > { %4080 = vadd.xlane.f32.xlu1 %v4079_v17 }
 0xf37   : > { %v4237_v20 = vpop.f32.mrb[56].mxu1 }
 0xf38   : > { %v8938_v22 = vpop.f32.mrb[57].mxu1  ;;  %v4238_v24 = vadd.f32 %v8336_v32, %v4237_v20 }
 0xf39   : > { %v4240_v23 = vpop.f32.mrb[58].mxu1 }
 0xf3a   : > { %v4241_v26 = vadd.f32 %v8336_v32, %v4240_v23  ;;  %v8939_v27 = vpop.f32.mrb[59].mxu1 }
 0xf3c   : > { %v11139_v38 = vpack.c.bf16 %v4241_v26, %v4238_v24 }
 0xf3e   : > { %v4252_v54 = vsel %vm1809_vm8, %v11139_v38, 0 }
 0xfc2   : > { %v4081_v29 = vpop.xlane.xlu1 %4080 }
 0xfc3   : > { %v4083_v33 = vmul.f32 0.03125, %v4081_v29 }
 0xfc5   : > { %v4084_v34 = vsub.f32 %v4077_v21, %v4083_v33 }
 0xfc7   : > { %v4085_v35 = vmul.f32 %v4084_v34, %v4084_v34 }
 0xfc9   : > { %v4086_v12 = vsel %vm4078_vm7, %v4085_v35, 0.0 }
 0xfca   : > { %4087 = vadd.xlane.f32.xlu1 %v4086_v12 }
0x1057   : > { %v4088_v41 = vpop.xlane.xlu1 %4087 }
0x1058   : > { %v4089_v42 = vmul.f32 0.03125, %v4088_v41 }
0x105a   : > { %v4090_v44 = vadd.f32 1e-05, %v4089_v42 }
0x105c   : > { %9702 = vrsqrt.f32 %v4090_v44 }
0x1066   : > { %v9703_v45 = vpop.eup %9702 }
0x1067   : > { %v4092_v19 = vmul.f32 %v9703_v45, %v4084_v34 }
0x1069   : > { %v4100_v50 = vmul.f32 %v8330_v47, %v4092_v19 }
0x106b   : > { %v11148_v51 = vadd.f32 %v8331_v49, %v4100_v50 }
0x106d   : > { %v4109_v52 = vpack.c.bf16 %v11148_v51, %v11148_v51 }
0x106f   : > { %8929 = vmatmul.mubr.msk.bf16.vlgmr.msra.gmra.mrb[56].mxu0 %vm1809_vm8, %v4109_v52 }
0x1070   : > { %8941 = vmatpush3.bf16.xpose.msra.mxu0 %v4252_v54  ;;  %8942 = vmatprep.mubr.msk.bf16.mxu0 %vm10223_vm5, %v10222_v25 }
0x1071   : > { %8952 = vmatprep.subr.bf16.mxu0 %v10222_v25 }
0x1142   : > { %v4170_v58 = vpop.f32.mrb[56].mxu0 }
0x1143   : > { %v4171_v59 = vadd.f32 %v8332_v55, %v4170_v58  ;;  %v8930_v61 = vpop.f32.mrb[57].mxu0 }
0x1144   : > { %v4173_v36 = vpop.f32.mrb[58].mxu0 }
0x1145   : > { %v4244_v62 = vmul.f32 0.5, %v4171_v59  ;;  %v8931_v63 = vpop.f32.mrb[59].mxu0 }
0x1147   : > { %v4246_v1 = vmul.f32 %v10941_v40, %v4244_v62  ;;  %v4357_v28 = vmul.f32 %v10954_v43, %v4244_v62  ;;  %v4459_v3 = vmul.f32 %v10966_v46, %v4244_v62  ;;  %v4561_v6 = vmul.f32 %v10978_v48, %v4244_v62 }
0x1148   : > { %v4663_v8 = vmul.f32 %v10990_v31, %v4244_v62  ;;  %v4765_v10 = vmul.f32 %v11002_v53, %v4244_v62  ;;  %v4867_v13 = vmul.f32 %v11014_v57, %v4244_v62  ;;  %v4969_v30 = vmul.f32 %v11026_v60, %v4244_v62 }
0x1149   : > { %v4247_v2 = vpack.c.bf16 %v4246_v1, %v4246_v1  ;;  %v4358_v4 = vpack.c.bf16 %v4357_v28, %v4357_v28  ;;  %v4460_v5 = vpack.c.bf16 %v4459_v3, %v4459_v3  ;;  %v4562_v7 = vpack.c.bf16 %v4561_v6, %v4561_v6 }
0x114a   : > { %v4664_v9 = vpack.c.bf16 %v4663_v8, %v4663_v8  ;;  %v4766_v11 = vpack.c.bf16 %v4765_v10, %v4765_v10  ;;  %v4868_v14 = vpack.c.bf16 %v4867_v13, %v4867_v13  ;;  %v4970_v15 = vpack.c.bf16 %v4969_v30, %v4969_v30 }
0x114b   : > { %8943 = vmatmul.mubr.msk.bf16.vlgmr.msra.gmra.mrb[60].mxu0 %vm1809_vm8, %v4247_v2 }
0x114c   : > { %8953 = vmatpush3.bf16.xpose.msra.mxu0 %v4252_v54  ;;  %8954 = vmatprep.mubr.msk.bf16.mxu0 %vm10223_vm5, %v10222_v25 }
0x114d   : > { %8964 = vmatprep.subr.bf16.mxu0 %v10222_v25 }
0x1153   : > { %8955 = vmatmul.mubr.msk.bf16.vlgmr.msra.gmra.mrb[64].mxu0 %vm1809_vm8, %v4358_v4 }
0x1154   : > { %8965 = vmatpush3.bf16.xpose.msra.mxu0 %v4252_v54  ;;  %8966 = vmatprep.mubr.msk.bf16.mxu0 %vm10223_vm5, %v10222_v25 }
0x1155   : > { %8976 = vmatprep.subr.bf16.mxu0 %v10222_v25 }
0x115b   : > { %8967 = vmatmul.mubr.msk.bf16.vlgmr.msra.gmra.mrb[68].mxu0 %vm1809_vm8, %v4460_v5 }
0x115c   : > { %8977 = vmatpush3.bf16.xpose.msra.mxu0 %v4252_v54  ;;  %8978 = vmatprep.mubr.msk.bf16.mxu0 %vm10223_vm5, %v10222_v25 }
0x115d   : > { %8988 = vmatprep.subr.bf16.mxu0 %v10222_v25 }
0x1163   : > { %8979 = vmatmul.mubr.msk.bf16.vlgmr.msra.gmra.mrb[72].mxu0 %vm1809_vm8, %v4562_v7 }
0x1164   : > { %8989 = vmatpush3.bf16.xpose.msra.mxu0 %v4252_v54  ;;  %8990 = vmatprep.mubr.msk.bf16.mxu0 %vm10223_vm5, %v10222_v25 }
0x1165   : > { %9000 = vmatprep.subr.bf16.mxu0 %v10222_v25 }
0x116b   : > { %8991 = vmatmul.mubr.msk.bf16.vlgmr.msra.gmra.mrb[76].mxu0 %vm1809_vm8, %v4664_v9 }
0x116c   : > { %9001 = vmatpush3.bf16.xpose.msra.mxu0 %v4252_v54  ;;  %9002 = vmatprep.mubr.msk.bf16.mxu0 %vm10223_vm5, %v10222_v25 }
0x116d   : > { %9012 = vmatprep.subr.bf16.mxu0 %v10222_v25 }
0x1173   : > { %9003 = vmatmul.mubr.msk.bf16.vlgmr.msra.gmra.mrb[80].mxu0 %vm1809_vm8, %v4766_v11 }
0x1174   : > { %9013 = vmatpush3.bf16.xpose.msra.mxu0 %v4252_v54  ;;  %9014 = vmatprep.mubr.msk.bf16.mxu0 %vm10223_vm5, %v10222_v25 }
0x1175   : > { %9024 = vmatprep.subr.bf16.mxu0 %v10222_v25 }
0x117b   : > { %9015 = vmatmul.mubr.msk.bf16.vlgmr.msra.gmra.mrb[84].mxu0 %vm1809_vm8, %v4868_v14 }
0x117c   : > { %9025 = vmatpush3.bf16.xpose.msra.mxu0 %v4252_v54  ;;  %9026 = vmatprep.mubr.msk.bf16.mxu0 %vm10223_vm5, %v10222_v25 }
0x117d   : > { %9036 = vmatprep.subr.bf16.mxu0 %v10222_v25 }
0x1183   : > { %9027 = vmatmul.mubr.msk.bf16.vlgmr.msra.gmra.mrb[88].mxu0 %vm1809_vm8, %v4970_v15 }
0x1184   : > { %9040 = vmatprep.mubr.msk.bf16.mxu0 %vm10223_vm5, %v10222_v25 }
0x121e   : > { %v4288_v16 = vpop.f32.mrb[60].mxu0 }
0x121f   : > { %v8944_v18 = vpop.f32.mrb[61].mxu0  ;;  %v4294_v21 = vsel %vm3230_vm2, %v4288_v16, -inf }
0x1220   : > { %4295 = vmax.xlane.f32.xlu0 %v4294_v21  ;;  %v4291_v17 = vpop.f32.mrb[62].mxu0 }
0x1221   : > { %v8945_v32 = vpop.f32.mrb[63].mxu0 }
0x1226   : > { %v4396_v20 = vpop.f32.mrb[64].mxu0 }
0x1227   : > { %v8956_v22 = vpop.f32.mrb[65].mxu0  ;;  %v4402_v23 = vsel %vm3230_vm2, %v4396_v20, -inf }
0x1228   : > { %4403 = vmax.xlane.f32.xlu1 %v4402_v23  ;;  %v4399_v24 = vpop.f32.mrb[66].mxu0 }
0x1229   : > { %v8957_v26 = vpop.f32.mrb[67].mxu0 }
0x122e   : > { %v4498_v27 = vpop.f32.mrb[68].mxu0 }
0x122f   : > { %v8968_v29 = vpop.f32.mrb[69].mxu0  ;;  %v4504_v33 = vsel %vm3230_vm2, %v4498_v27, -inf }
0x1230   : > { %4505 = vmax.xlane.f32.xlu1 %v4504_v33  ;;  %v4501_v34 = vpop.f32.mrb[70].mxu0 }
0x1231   : > { %v8969_v35 = vpop.f32.mrb[71].mxu0 }
0x1236   : > { %v4600_v12 = vpop.f32.mrb[72].mxu0 }
0x1237   : > { %v8980_v37 = vpop.f32.mrb[73].mxu0  ;;  %v4606_v0 = vsel %vm3230_vm2, %v4600_v12, -inf }
0x1238   : > { %4607 = vmax.xlane.f32.xlu1 %v4606_v0  ;;  %v4603_v41 = vpop.f32.mrb[74].mxu0 }
0x1239   : > { %v8981_v42 = vpop.f32.mrb[75].mxu0 }
0x123e   : > { %v4702_v44 = vpop.f32.mrb[76].mxu0 }
0x123f   : > { %v8992_v45 = vpop.f32.mrb[77].mxu0  ;;  %v4708_v47 = vsel %vm3230_vm2, %v4702_v44, -inf }
0x1240   : > { %4709 = vmax.xlane.f32.xlu1 %v4708_v47  ;;  %v4705_v19 = vpop.f32.mrb[78].mxu0 }
0x1241   : > { %v8993_v49 = vpop.f32.mrb[79].mxu0 }
0x1246   : > { %v4804_v50 = vpop.f32.mrb[80].mxu0 }
0x1247   : > { %v9004_v52 = vpop.f32.mrb[81].mxu0  ;;  %v4810_v54 = vsel %vm3230_vm2, %v4804_v50, -inf }
0x1248   : > { %4811 = vmax.xlane.f32.xlu1 %v4810_v54  ;;  %v4807_v55 = vpop.f32.mrb[82].mxu0 }
0x1249   : > { %v9005_v58 = vpop.f32.mrb[83].mxu0 }
0x124e   : > { %v4906_v59 = vpop.f32.mrb[84].mxu0 }
0x124f   : > { %v9016_v61 = vpop.f32.mrb[85].mxu0  ;;  %v4912_v36 = vsel %vm3230_vm2, %v4906_v59, -inf }
0x1250   : > { %4913 = vmax.xlane.f32.xlu1 %v4912_v36  ;;  %v4909_v62 = vpop.f32.mrb[86].mxu0 }
0x1251   : > { %v9017_v63 = vpop.f32.mrb[87].mxu0 }
0x1256   : > { %v5008_v1 = vpop.f32.mrb[88].mxu0 }
0x1257   : > { %v9028_v2 = vpop.f32.mrb[89].mxu0  ;;  %v5014_v28 = vsel %vm3230_vm2, %v5008_v1, -inf }
0x1258   : > { %5015 = vmax.xlane.f32.xlu1 %v5014_v28  ;;  %v5011_v4 = vpop.f32.mrb[90].mxu0 }
0x1259   : > { %v9029_v3 = vpop.f32.mrb[91].mxu0 }
0x12ad   : > { %v4296_v5 = vpop.xlane.xlu0 %4295 }
0x12ae   : > { %v4297_v6 = vsub.f32 %v4288_v16, %v4296_v5 }
0x12b0   : > { %v4298_v7 = vmul.f32 1.442695, %v4297_v6 }
0x12b2   : > { %9704 = vpow2.f32 %v4298_v7 }
0x12b5   : > { %v4404_v8 = vpop.xlane.xlu1 %4403 }
0x12b6   : > { %v4405_v9 = vsub.f32 %v4396_v20, %v4404_v8 }
0x12b8   : > { %v4406_v10 = vmul.f32 1.442695, %v4405_v9 }
0x12ba   : > { %9706 = vpow2.f32 %v4406_v10 }
0x12bc   : > { %v9705_v11 = vpop.eup %9704 }
0x12bd   : > { %v4506_v13 = vpop.xlane.xlu1 %4505  ;;  %v4300_v14 = vsel %vm3230_vm2, %v9705_v11, 0.0 }
0x12be   : > { %v4507_v30 = vsub.f32 %v4498_v27, %v4506_v13  ;;  %4301 = vadd.xlane.f32.xlu1 %v4300_v14 }
0x12c0   : > { %v4508_v15 = vmul.f32 1.442695, %v4507_v30 }
0x12c2   : > { %9708 = vpow2.f32 %v4508_v15 }
0x12c4   : > { %v9707_v18 = vpop.eup %9706 }
0x12c5   : > { %v4608_v21 = vpop.xlane.xlu1 %4607  ;;  %v4408_v17 = vsel %vm3230_vm2, %v9707_v18, 0.0 }
0x12c6   : > { %v4609_v32 = vsub.f32 %v4600_v12, %v4608_v21  ;;  %4409 = vadd.xlane.f32.xlu0 %v4408_v17 }
0x12c8   : > { %v4610_v16 = vmul.f32 1.442695, %v4609_v32 }
0x12ca   : > { %9710 = vpow2.f32 %v4610_v16 }
0x12cc   : > { %v9709_v22 = vpop.eup %9708 }
0x12cd   : > { %v4710_v20 = vpop.xlane.xlu1 %4709  ;;  %v4510_v23 = vsel %vm3230_vm2, %v9709_v22, 0.0 }
0x12ce   : > { %v4711_v24 = vsub.f32 %v4702_v44, %v4710_v20  ;;  %4511 = vadd.xlane.f32.xlu1 %v4510_v23 }
0x12d0   : > { %v4712_v26 = vmul.f32 1.442695, %v4711_v24 }
0x12d2   : > { %9712 = vpow2.f32 %v4712_v26 }
0x12d4   : > { %v11209_v27 = vpop.eup %9710 }
0x12d5   : > { %v4812_v29 = vpop.xlane.xlu1 %4811  ;;  %v4612_v33 = vsel %vm3230_vm2, %v11209_v27, 0.0 }
0x12d6   : > { %v4813_v34 = vsub.f32 %v4804_v50, %v4812_v29  ;;  %4613 = vadd.xlane.f32.xlu0 %v4612_v33  ;;  %v9618_v29 = vld [vmem:[%s11855_s12] sm:$0xff]   ;;  %v9619_v33 = vld [vmem:[%s11855_s12 + $0x8] sm:$0xff]  }
0x12d7   : > { %9037 = vmatpush3.bf16.msra.mxu0 %v9618_v29 }
0x12d8   : > { %v4814_v35 = vmul.f32 1.442695, %v4813_v34  ;;  %9038 = vmatprep.subr.bf16.mxu0 %v10222_v25 }
0x12da   : > { %9714 = vpow2.f32 %v4814_v35 }
0x12db   : > { %9039 = vmatpush3.bf16.msra.mxu0 %v9619_v33 }
0x12dc   : > { %v11213_v12 = vpop.eup %9712  ;;  %9052 = vmatprep.subr.bf16.mxu0 %v10222_v25 }
0x12dd   : > { %v4914_v37 = vpop.xlane.xlu1 %4913  ;;  %v4714_v0 = vsel %vm3230_vm2, %v11213_v12, 0.0 }
0x12de   : > { %v4915_v41 = vsub.f32 %v4906_v59, %v4914_v37  ;;  %4715 = vadd.xlane.f32.xlu0 %v4714_v0 }
0x12df   : > { %4307 = vrot.lane.b32.xlu1 %v11139_v38, %s11854_s11 }
0x12e0   : > { %v4916_v42 = vmul.f32 1.442695, %v4915_v41 }
0x12e2   : > { %9716 = vpow2.f32 %v4916_v42 }
0x12e4   : > { %v11219_v44 = vpop.eup %9714 }
0x12e5   : > { %v5016_v45 = vpop.xlane.xlu1 %5015  ;;  %v4816_v47 = vsel %vm3230_vm2, %v11219_v44, 0.0 }
0x12e6   : > { %v5017_v19 = vsub.f32 %v5008_v1, %v5016_v45  ;;  %4817 = vadd.xlane.f32.xlu0 %v4816_v47 }
0x12e8   : > { %v5018_v49 = vmul.f32 1.442695, %v5017_v19 }
0x12ea   : > { %9718 = vpow2.f32 %v5018_v49 }
0x12ec   : > { %v11223_v50 = vpop.eup %9716 }
0x12ed   : > { %v4918_v52 = vsel %vm3230_vm2, %v11223_v50, 0.0 }
0x12ee   : > { %4919 = vadd.xlane.f32.xlu0 %v4918_v52 }
0x12f4   : > { %v11227_v54 = vpop.eup %9718 }
0x12f5   : > { %v5020_v38 = vsel %vm3230_vm2, %v11227_v54, 0.0 }
0x12f6   : > { %5021 = vadd.xlane.f32.xlu0 %v5020_v38 }
0x134b   : > { %v4302_v55 = vpop.xlane.xlu1 %4301 }
0x134c   : > { %9720 = vrcp.f32 %v4302_v55 }
0x1353   : > { %v4410_v58 = vpop.xlane.xlu0 %4409 }
0x1354   : > { %9722 = vrcp.f32 %v4410_v58 }
0x1356   : > { %v9721_v59 = vpop.eup %9720 }
0x1357   : > { %v4304_v36 = vmul.f32 %v9721_v59, %v9705_v11 }
0x1359   : > { %v4305_v1 = vpack.c.bf16 %v4304_v36, %v4304_v36 }
0x135b   : > { %v4512_v61 = vpop.xlane.xlu1 %4511 }
0x135c   : > { %9724 = vrcp.f32 %v4512_v61 }
0x135e   : > { %v9723_v2 = vpop.eup %9722 }
0x135f   : > { %v4308_v62 = vpop.permute.xlu1 %4307  ;;  %v4412_v28 = vmul.f32 %v9723_v2, %v9707_v18 }
0x1360   : > { %v4313_v63 = vsel %vm3250_vm3, %v4308_v62, 0 }
0x1361   : > { %8947 = vmatpush3.bf16.msra.mxu1 %v4313_v63  ;;  %v4413_v3 = vpack.c.bf16 %v4412_v28, %v4412_v28 }
0x1362   : > { %8958 = vmatprep.subr.bf16.mxu1 %v10222_v25 }
0x1363   : > { %v4614_v4 = vpop.xlane.xlu0 %4613 }
0x1364   : > { %8949 = vmatmul.mubr.msk.bf16.vlgmr.msra.gmra.mrb[60].mxu1 %vm3246_vm4, %v4305_v1  ;;  %9726 = vrcp.f32 %v4614_v4 }
0x1365   : > { %8959 = vmatpush3.bf16.msra.mxu1 %v4313_v63  ;;  %8960 = vmatprep.mubr.msk.bf16.mxu1 %vm10223_vm5, %v10222_v25 }
0x1366   : > { %8970 = vmatprep.subr.bf16.mxu1 %v10222_v25  ;;  %v9725_v5 = vpop.eup %9724 }
0x1367   : > { %v4514_v6 = vmul.f32 %v9725_v5, %v9709_v22 }
0x1369   : > { %v4515_v8 = vpack.c.bf16 %v4514_v6, %v4514_v6 }
0x136b   : > { %v4716_v7 = vpop.xlane.xlu0 %4715 }
0x136c   : > { %8961 = vmatmul.mubr.msk.bf16.vlgmr.msra.gmra.mrb[64].mxu1 %vm3246_vm4, %v4413_v3  ;;  %9728 = vrcp.f32 %v4716_v7 }
0x136d   : > { %8971 = vmatpush3.bf16.msra.mxu1 %v4313_v63  ;;  %8972 = vmatprep.mubr.msk.bf16.mxu1 %vm10223_vm5, %v10222_v25 }
0x136e   : > { %8982 = vmatprep.subr.bf16.mxu1 %v10222_v25  ;;  %v9727_v9 = vpop.eup %9726 }
0x136f   : > { %v4616_v10 = vmul.f32 %v9727_v9, %v11209_v27 }
0x1371   : > { %v4617_v13 = vpack.c.bf16 %v4616_v10, %v4616_v10 }
0x1373   : > { %v4818_v11 = vpop.xlane.xlu0 %4817 }
0x1374   : > { %8973 = vmatmul.mubr.msk.bf16.vlgmr.msra.gmra.mrb[68].mxu1 %vm3246_vm4, %v4515_v8  ;;  %9730 = vrcp.f32 %v4818_v11 }
0x1375   : > { %8983 = vmatpush3.bf16.msra.mxu1 %v4313_v63  ;;  %8984 = vmatprep.mubr.msk.bf16.mxu1 %vm10223_vm5, %v10222_v25 }
0x1376   : > { %8994 = vmatprep.subr.bf16.mxu1 %v10222_v25  ;;  %v9729_v14 = vpop.eup %9728 }
0x1377   : > { %v4718_v30 = vmul.f32 %v9729_v14, %v11213_v12 }
0x1379   : > { %v4719_v18 = vpack.c.bf16 %v4718_v30, %v4718_v30 }
0x137b   : > { %v4920_v15 = vpop.xlane.xlu0 %4919 }
0x137c   : > { %8985 = vmatmul.mubr.msk.bf16.vlgmr.msra.gmra.mrb[72].mxu1 %vm3246_vm4, %v4617_v13  ;;  %9732 = vrcp.f32 %v4920_v15 }
0x137d   : > { %8995 = vmatpush3.bf16.msra.mxu1 %v4313_v63  ;;  %8996 = vmatprep.mubr.msk.bf16.mxu1 %vm10223_vm5, %v10222_v25 }
0x137e   : > { %9006 = vmatprep.subr.bf16.mxu1 %v10222_v25  ;;  %v9731_v21 = vpop.eup %9730 }
0x137f   : > { %v4820_v17 = vmul.f32 %v9731_v21, %v11219_v44 }
0x1381   : > { %v4821_v16 = vpack.c.bf16 %v4820_v17, %v4820_v17 }
0x1383   : > { %v5022_v32 = vpop.xlane.xlu0 %5021 }
0x1384   : > { %8997 = vmatmul.mubr.msk.bf16.vlgmr.msra.gmra.mrb[76].mxu1 %vm3246_vm4, %v4719_v18  ;;  %9734 = vrcp.f32 %v5022_v32 }
0x1385   : > { %9007 = vmatpush3.bf16.msra.mxu1 %v4313_v63  ;;  %9008 = vmatprep.mubr.msk.bf16.mxu1 %vm10223_vm5, %v10222_v25 }
0x1386   : > { %9018 = vmatprep.subr.bf16.mxu1 %v10222_v25  ;;  %v9733_v22 = vpop.eup %9732 }
0x1387   : > { %v4922_v20 = vmul.f32 %v9733_v22, %v11223_v50 }
0x1389   : > { %v4923_v23 = vpack.c.bf16 %v4922_v20, %v4922_v20 }
0x138c   : > { %9009 = vmatmul.mubr.msk.bf16.vlgmr.msra.gmra.mrb[80].mxu1 %vm3246_vm4, %v4821_v16 }
0x138d   : > { %9019 = vmatpush3.bf16.msra.mxu1 %v4313_v63  ;;  %9020 = vmatprep.mubr.msk.bf16.mxu1 %vm10223_vm5, %v10222_v25 }
0x138e   : > { %9030 = vmatprep.subr.bf16.mxu1 %v10222_v25  ;;  %v9735_v24 = vpop.eup %9734 }
0x138f   : > { %v5024_v26 = vmul.f32 %v9735_v24, %v11227_v54 }
0x1391   : > { %v5025_v27 = vpack.c.bf16 %v5024_v26, %v5024_v26  ;;  %v8356_v26 = vld [vmem:[%s11856_s13] ss:$0 sm:$0xff] }
0x1394   : > { %9021 = vmatmul.mubr.msk.bf16.vlgmr.msra.gmra.mrb[84].mxu1 %vm3246_vm4, %v4923_v23 }
0x1395   : > { %9031 = vmatpush3.bf16.msra.mxu1 %v4313_v63  ;;  %9032 = vmatprep.mubr.msk.bf16.mxu1 %vm10223_vm5, %v10222_v25 }
0x1396   : > { %9044 = vmatprep.subr.bf16.mxu1 %v10222_v25 }
0x139c   : > { %9033 = vmatmul.mubr.msk.bf16.vlgmr.msra.gmra.mrb[88].mxu1 %vm3246_vm4, %v5025_v27 }
0x139d   : > { %9048 = vmatprep.mubr.msk.bf16.mxu1 %vm10223_vm5, %v10222_v25 }
0x1437   : > { %v4349_v34 = vpop.f32.mrb[60].mxu1 }
0x1438   : > { %v8950_v35 = vpop.f32.mrb[61].mxu1  ;;  %v4355_v41 = vmul.f32 %v10941_v40, %v4349_v34 }
0x1439   : > { %v4352_v12 = vpop.f32.mrb[62].mxu1 }
0x143a   : > { %v8951_v37 = vpop.f32.mrb[63].mxu1 }
0x143f   : > { %v4451_v0 = vpop.f32.mrb[64].mxu1 }
0x1440   : > { %v4457_v42 = vmul.f32 %v10954_v43, %v4451_v0  ;;  %v8962_v44 = vpop.f32.mrb[65].mxu1 }
0x1441   : > { %v4454_v45 = vpop.f32.mrb[66].mxu1 }
0x1442   : > { %v4458_v47 = vadd.f32 %v4457_v42, %v4355_v41  ;;  %v8963_v19 = vpop.f32.mrb[67].mxu1 }
0x1443   : > { %v9621_v19 = vld [vmem:[%s11857_s14 + $0x8] sm:$0xff]  }
0x1447   : > { %v4553_v49 = vpop.f32.mrb[68].mxu1 }
0x1448   : > { %v4559_v50 = vmul.f32 %v10966_v46, %v4553_v49  ;;  %v8974_v52 = vpop.f32.mrb[69].mxu1  ;;  %v9627_v49 = vld [vmem:[%s11858_s15 + $0x8] sm:$0xff]  }
0x1449   : > { %v4556_v54 = vpop.f32.mrb[70].mxu1 }
0x144a   : > { %v4560_v38 = vadd.f32 %v4559_v50, %v4458_v47  ;;  %v8975_v55 = vpop.f32.mrb[71].mxu1  ;;  %v9620_v47 = vld [vmem:[%s11857_s14] sm:$0xff]  }
0x144b   : > { %9045 = vmatpush3.bf16.msra.mxu1 %v9620_v47  ;;  %v8360_v55 = vld [vmem:[%s11859_s17] ss:$0 sm:$0xff] }
0x144c   : > { %9046 = vmatprep.subr.bf16.mxu1 %v10222_v25 }
0x144f   : > { %v4655_v58 = vpop.f32.mrb[72].mxu1  ;;  %9047 = vmatpush3.bf16.msra.mxu1 %v9621_v19 }
0x1450   : > { %v4661_v59 = vmul.f32 %v10978_v48, %v4655_v58  ;;  %v8986_v61 = vpop.f32.mrb[73].mxu1  ;;  %9064 = vmatprep.subr.bf16.mxu1 %v10222_v25 }
0x1451   : > { %v4658_v36 = vpop.f32.mrb[74].mxu1 }
0x1452   : > { %v4662_v62 = vadd.f32 %v4661_v59, %v4560_v38  ;;  %v8987_v63 = vpop.f32.mrb[75].mxu1  ;;  %v8361_v59 = vld [vmem:[%s11860_s19] ss:$0 sm:$0xff] }
0x1457   : > { %v4757_v1 = vpop.f32.mrb[76].mxu1 }
0x1458   : > { %v4763_v2 = vmul.f32 %v10990_v31, %v4757_v1  ;;  %v8998_v28 = vpop.f32.mrb[77].mxu1  ;;  %v9623_v1 = vld [vmem:[%s11842_s7 + $0x8] sm:$0xff]  }
0x1459   : > { %v4760_v4 = vpop.f32.mrb[78].mxu1  ;;  %v9624_v28 = vld [vmem:[%s11843_s1] sm:$0xff]  }
0x145a   : > { %v4764_v3 = vadd.f32 %v4763_v2, %v4662_v62  ;;  %v8999_v5 = vpop.f32.mrb[79].mxu1  ;;  %v9622_v62 = vld [vmem:[%s11842_s7] sm:$0xff]   ;;  %v11308_v2 = vld [vmem:[#allocation3 + $0xc] sm:$0xf]  ;;  %s11861_s7 = sld [smem:[#allocation37_spill]] }
0x145b   : > { %v5354_v4 = vpack.c.bf16 %v11308_v2, %v11308_v2  ;;  %v5350_v5 = vld [vmem:[#allocation3 + $0x4] sm:$0xff] }
0x145f   : > { %v4859_v6 = vpop.f32.mrb[80].mxu1 }
0x1460   : > { %v4865_v7 = vmul.f32 %v11002_v53, %v4859_v6  ;;  %v9010_v8 = vpop.f32.mrb[81].mxu1  ;;  %v5421_v6 = vpack.c.bf16 %v11308_v2, %v5350_v5 }
0x1461   : > { %v4862_v9 = vpop.f32.mrb[82].mxu1  ;;  %v9629_v8 = vld [vmem:[%s11858_s15 + $0x18] sm:$0xff]  }
0x1462   : > { %v4866_v10 = vadd.f32 %v4865_v7, %v4764_v3  ;;  %v9011_v11 = vpop.f32.mrb[83].mxu1  ;;  %v9625_v3 = vld [vmem:[%s11843_s1 + $0x8] sm:$0xff]   ;;  %v9628_v7 = vld [vmem:[%s11858_s15 + $0x10] sm:$0xff]   ;;  %v8362_v9 = vld [vmem:[%s11861_s7] ss:$0 sm:$0xff]  ;;  %s11863_s1 = sld [smem:[#allocation46_spill]] }
0x1467   : > { %v4961_v13 = vpop.f32.mrb[84].mxu1 }
0x1468   : > { %v4967_v14 = vmul.f32 %v11014_v57, %v4961_v13  ;;  %v9022_v30 = vpop.f32.mrb[85].mxu1 }
0x1469   : > { %v4964_v15 = vpop.f32.mrb[86].mxu1 }
0x146a   : > { %v4968_v18 = vadd.f32 %v4967_v14, %v4866_v10  ;;  %v9023_v21 = vpop.f32.mrb[87].mxu1 }
0x146f   : > { %v5063_v17 = vpop.f32.mrb[88].mxu1 }
0x1470   : > { %v5069_v32 = vmul.f32 %v11026_v60, %v5063_v17  ;;  %v9034_v16 = vpop.f32.mrb[89].mxu1 }
0x1471   : > { %v5066_v22 = vpop.f32.mrb[90].mxu1 }
0x1472   : > { %v5070_v20 = vadd.f32 %v5069_v32, %v4968_v18  ;;  %v9035_v23 = vpop.f32.mrb[91].mxu1  ;;  %v8374_v22 = vld [vmem:[%s11844_s22] ss:$0 sm:$0xff] }
0x1474   : > { %v5071_v24 = vpack.c.bf16 %v5070_v20, %v5070_v20  ;;  %v8378_v20 = vld [vmem:[%s11845_s16] ss:$0 sm:$0xff] }
0x1476   : > { %9041 = vmatmul.mubr.msk.bf16.vlgmr.msra.gmra.mrb[92].mxu0 %vm1809_vm8, %v5071_v24 }
0x1477   : > { %9060 = vmatprep.mubr.msk.bf16.mxu0 %vm10223_vm5, %v10222_v25 }
0x1549   : > { %v5132_v27 = vpop.f32.mrb[92].mxu0 }
0x154a   : > { %v5133_v29 = vadd.f32 %v8356_v26, %v5132_v27  ;;  %v9042_v33 = vpop.f32.mrb[93].mxu0 }
0x154b   : > { %v5135_v34 = vpop.f32.mrb[94].mxu0 }
0x154c   : > { %v9043_v35 = vpop.f32.mrb[95].mxu0  ;;  %v5138_v12 = vadd.f32 %v5133_v29, %v11148_v51  ;;  %v9626_v51 = vld [vmem:[%s11858_s15] sm:$0xff]  }
0x154d   : > { %9053 = vmatpush3.bf16.msra.mxu0 %v9626_v51 }
0x154e   : > { %v5139_v37 = vsel %vm4078_vm7, %v5138_v12, 0.0  ;;  %9054 = vmatprep.subr.bf16.mxu0 %v10222_v25 }
0x154f   : > { %5140 = vadd.xlane.f32.xlu0 %v5139_v37 }
0x1551   : > { %9055 = vmatpush3.bf16.msra.mxu0 %v9627_v49 }
0x1552   : > { %9056 = vmatprep.subr.bf16.mxu0 %v10222_v25 }
0x1555   : > { %9057 = vmatpush3.bf16.msra.mxu0 %v9628_v7 }
0x1556   : > { %9058 = vmatprep.subr.bf16.mxu0 %v10222_v25 }
0x1559   : > { %9059 = vmatpush3.bf16.msra.mxu0 %v9629_v8 }
0x155a   : > { %9080 = vmatprep.subr.bf16.mxu0 %v10222_v25 }
0x15dc   : > { %v5141_v0 = vpop.xlane.xlu0 %5140 }
0x15dd   : > { %v5142_v41 = vmul.f32 0.03125, %v5141_v0 }
0x15df   : > { %v5143_v42 = vsub.f32 %v5138_v12, %v5142_v41 }
0x15e1   : > { %v5144_v44 = vmul.f32 %v5143_v42, %v5143_v42 }
0x15e3   : > { %v5145_v45 = vsel %vm4078_vm7, %v5144_v44, 0.0 }
0x15e4   : > { %5146 = vadd.xlane.f32.xlu1 %v5145_v45 }
0x1671   : > { %v5147_v50 = vpop.xlane.xlu1 %5146 }
0x1672   : > { %v5148_v52 = vmul.f32 0.03125, %v5147_v50 }
0x1674   : > { %v5149_v54 = vadd.f32 1e-05, %v5148_v52 }
0x1676   : > { %9736 = vrsqrt.f32 %v5149_v54 }
0x1680   : > { %v9737_v38 = vpop.eup %9736 }
0x1681   : > { %v5151_v58 = vmul.f32 %v9737_v38, %v5143_v42 }
0x1683   : > { %v5159_v61 = vmul.f32 %v8360_v55, %v5151_v58 }
0x1685   : > { %v11298_v36 = vadd.f32 %v8361_v59, %v5159_v61 }
0x1687   : > { %v5168_v63 = vpack.c.bf16 %v11298_v36, %v11298_v36 }
0x1689   : > { %9049 = vmatmul.mubr.msk.bf16.vlgmr.msra.gmra.mrb[92].mxu1 %vm1809_vm8, %v5168_v63 }
0x168a   : > { %9065 = vmatpush3.bf16.msra.mxu1 %v9622_v62  ;;  %9068 = vmatprep.mubr.msk.bf16.mxu1 %vm10223_vm5, %v10222_v25 }
0x168b   : > { %9066 = vmatprep.subr.bf16.mxu1 %v10222_v25 }
0x168e   : > { %9067 = vmatpush3.bf16.msra.mxu1 %v9623_v1 }
0x168f   : > { %9072 = vmatprep.subr.bf16.mxu1 %v10222_v25 }
0x1691   : > { %9069 = vmatmul.mubr.msk.bf16.vlgmr.msra.gmra.mrb[96].mxu1 %vm1809_vm8, %v5354_v4 }
0x1692   : > { %9073 = vmatpush3.bf16.msra.mxu1 %v9624_v28  ;;  %9076 = vmatprep.mubr.msk.bf16.mxu1 %vm10223_vm5, %v10222_v25 }
0x1693   : > { %9074 = vmatprep.subr.bf16.mxu1 %v10222_v25 }
0x1696   : > { %9075 = vmatpush3.bf16.msra.mxu1 %v9625_v3 }
0x1697   : > { %9086 = vmatprep.subr.bf16.mxu1 %v10222_v25 }
0x1699   : > { %9077 = vmatmul.mubr.msk.bf16.vlgmr.msra.gmra.mrb[100].mxu1 %vm1809_vm8, %v5421_v6 }
0x169a   : > { %9088 = vmatprep.mubr.msk.bf16.mxu1 %vm10223_vm5, %v10222_v25 }
0x175c   : > { %v5229_v10 = vpop.f32.mrb[92].mxu1 }
0x175d   : > { %v5230_v11 = vadd.f32 %v8362_v9, %v5229_v10  ;;  %v9050_v13 = vpop.f32.mrb[93].mxu1 }
0x175e   : > { %v5232_v14 = vpop.f32.mrb[94].mxu1 }
0x175f   : > { %v5235_v30 = vmax.f32 %v5230_v11, 0.0  ;;  %v9051_v15 = vpop.f32.mrb[95].mxu1 }
0x1761   : > { %v5236_v18 = vpack.c.bf16 %v5235_v30, %v5235_v30 }
0x1763   : > { %9061 = vmatmul.mubr.msk.bf16.vlgmr.msra.gmra.mrb[96].mxu0 %vm1807_vm6, %v5236_v18 }
0x1764   : > { %v5415_v21 = vpop.f32.mrb[96].mxu1  ;;  %9082 = vmatprep.mubr.msk.bf16.mxu0 %vm10223_vm5, %v10222_v25 }
0x1765   : > { %v9070_v17 = vpop.f32.mrb[97].mxu1  ;;  %v5416_v24 = vadd.f32 %v8374_v22, %v5415_v21 }
0x1766   : > { %v5418_v32 = vpop.f32.mrb[98].mxu1 }
0x1767   : > { %v9071_v16 = vpop.f32.mrb[99].mxu1  ;;  %v5489_v35 = vmul.f32 0.5, %v5416_v24 }
0x1769   : > { %v5491_v0 = vmul.f32 %v10941_v40, %v5489_v35  ;;  %v5602_v42 = vmul.f32 %v10954_v43, %v5489_v35  ;;  %v5704_v45 = vmul.f32 %v10966_v46, %v5489_v35  ;;  %v5806_v19 = vmul.f32 %v10978_v48, %v5489_v35 }
0x176a   : > { %v5908_v49 = vmul.f32 %v10990_v31, %v5489_v35  ;;  %v6010_v52 = vmul.f32 %v11002_v53, %v5489_v35  ;;  %v6112_v38 = vmul.f32 %v11014_v57, %v5489_v35  ;;  %v6214_v58 = vmul.f32 %v11026_v60, %v5489_v35 }
0x176b   : > { %v5492_v41 = vpack.c.bf16 %v5491_v0, %v5491_v0  ;;  %v5603_v44 = vpack.c.bf16 %v5602_v42, %v5602_v42  ;;  %v5705_v47 = vpack.c.bf16 %v5704_v45, %v5704_v45  ;;  %v5807_v51 = vpack.c.bf16 %v5806_v19, %v5806_v19 }
0x176c   : > { %v5482_v23 = vpop.f32.mrb[100].mxu1  ;;  %v5909_v50 = vpack.c.bf16 %v5908_v49, %v5908_v49  ;;  %v6011_v54 = vpack.c.bf16 %v6010_v52, %v6010_v52  ;;  %v6113_v55 = vpack.c.bf16 %v6112_v38, %v6112_v38  ;;  %v6215_v59 = vpack.c.bf16 %v6214_v58, %v6214_v58 }
0x176d   : > { %v9078_v26 = vpop.f32.mrb[101].mxu1  ;;  %v5483_v29 = vadd.f32 %v8378_v20, %v5482_v23 }
0x176e   : > { %v5485_v27 = vpop.f32.mrb[102].mxu1 }
0x176f   : > { %v5486_v33 = vadd.f32 %v8378_v20, %v5485_v27  ;;  %v9079_v34 = vpop.f32.mrb[103].mxu1 }
0x1771   : > { %v11334_v12 = vpack.c.bf16 %v5486_v33, %v5483_v29 }
0x1773   : > { %v5497_v37 = vsel %vm1809_vm8, %v11334_v12, 0 }
0x1774   : > { %9081 = vmatpush3.bf16.xpose.msra.mxu0 %v5497_v37 }
0x1775   : > { %9092 = vmatprep.subr.bf16.mxu0 %v10222_v25 }
0x177b   : > { %9083 = vmatmul.mubr.msk.bf16.vlgmr.msra.gmra.mrb[100].mxu0 %vm1809_vm8, %v5492_v41 }
0x177c   : > { %9093 = vmatpush3.bf16.xpose.msra.mxu0 %v5497_v37  ;;  %9094 = vmatprep.mubr.msk.bf16.mxu0 %vm10223_vm5, %v10222_v25 }
0x177d   : > { %9104 = vmatprep.subr.bf16.mxu0 %v10222_v25 }
0x1783   : > { %9095 = vmatmul.mubr.msk.bf16.vlgmr.msra.gmra.mrb[104].mxu0 %vm1809_vm8, %v5603_v44 }
0x1784   : > { %9105 = vmatpush3.bf16.xpose.msra.mxu0 %v5497_v37  ;;  %9106 = vmatprep.mubr.msk.bf16.mxu0 %vm10223_vm5, %v10222_v25 }
0x1785   : > { %9116 = vmatprep.subr.bf16.mxu0 %v10222_v25 }
0x178b   : > { %9107 = vmatmul.mubr.msk.bf16.vlgmr.msra.gmra.mrb[108].mxu0 %vm1809_vm8, %v5705_v47 }
0x178c   : > { %9117 = vmatpush3.bf16.xpose.msra.mxu0 %v5497_v37  ;;  %9118 = vmatprep.mubr.msk.bf16.mxu0 %vm10223_vm5, %v10222_v25 }
0x178d   : > { %9128 = vmatprep.subr.bf16.mxu0 %v10222_v25 }
0x1793   : > { %9119 = vmatmul.mubr.msk.bf16.vlgmr.msra.gmra.mrb[112].mxu0 %vm1809_vm8, %v5807_v51 }
0x1794   : > { %9129 = vmatpush3.bf16.xpose.msra.mxu0 %v5497_v37  ;;  %9130 = vmatprep.mubr.msk.bf16.mxu0 %vm10223_vm5, %v10222_v25 }
0x1795   : > { %9140 = vmatprep.subr.bf16.mxu0 %v10222_v25 }
0x179b   : > { %9131 = vmatmul.mubr.msk.bf16.vlgmr.msra.gmra.mrb[116].mxu0 %vm1809_vm8, %v5909_v50 }
0x179c   : > { %9141 = vmatpush3.bf16.xpose.msra.mxu0 %v5497_v37  ;;  %9142 = vmatprep.mubr.msk.bf16.mxu0 %vm10223_vm5, %v10222_v25 }
0x179d   : > { %9152 = vmatprep.subr.bf16.mxu0 %v10222_v25 }
0x17a3   : > { %9143 = vmatmul.mubr.msk.bf16.vlgmr.msra.gmra.mrb[120].mxu0 %vm1809_vm8, %v6011_v54 }
0x17a4   : > { %9153 = vmatpush3.bf16.xpose.msra.mxu0 %v5497_v37  ;;  %9154 = vmatprep.mubr.msk.bf16.mxu0 %vm10223_vm5, %v10222_v25 }
0x17a5   : > { %9164 = vmatprep.subr.bf16.mxu0 %v10222_v25 }
0x17ab   : > { %9155 = vmatmul.mubr.msk.bf16.vlgmr.msra.gmra.mrb[124].mxu0 %vm1809_vm8, %v6113_v55 }
0x17ac   : > { %9165 = vmatpush3.bf16.xpose.msra.mxu0 %v5497_v37  ;;  %9166 = vmatprep.mubr.msk.bf16.mxu0 %vm10223_vm5, %v10222_v25 }
0x17ad   : > { %9176 = vmatprep.subr.bf16.mxu0 %v10222_v25 }
0x17b3   : > { %9167 = vmatmul.mubr.msk.bf16.vlgmr.msra.gmra.mrb[128].mxu0 %vm1809_vm8, %v6215_v59 }
0x17b4   : > { %9180 = vmatprep.mubr.msk.bf16.mxu0 %vm10223_vm5, %v10222_v25 }
0x1836   : > { %v11378_v61 = vpop.f32.mrb[96].mxu0 }
0x1837   : > { %v9062_v62 = vpop.f32.mrb[97].mxu0 }
0x1838   : > { %v5316_v63 = vpop.f32.mrb[98].mxu0 }
0x1839   : > { %v9063_v1 = vpop.f32.mrb[99].mxu0 }
0x184e   : > { %v5533_v28 = vpop.f32.mrb[100].mxu0 }
0x184f   : > { %v9084_v4 = vpop.f32.mrb[101].mxu0  ;;  %v5539_v3 = vsel %vm3230_vm2, %v5533_v28, -inf }
0x1850   : > { %5540 = vmax.xlane.f32.xlu0 %v5539_v3  ;;  %v5536_v5 = vpop.f32.mrb[102].mxu0 }
0x1851   : > { %v9085_v6 = vpop.f32.mrb[103].mxu0 }
0x1856   : > { %v5641_v7 = vpop.f32.mrb[104].mxu0 }
0x1857   : > { %v9096_v8 = vpop.f32.mrb[105].mxu0  ;;  %v5647_v9 = vsel %vm3230_vm2, %v5641_v7, -inf }
0x1858   : > { %5648 = vmax.xlane.f32.xlu0 %v5647_v9  ;;  %v5644_v10 = vpop.f32.mrb[106].mxu0 }
0x1859   : > { %v9097_v11 = vpop.f32.mrb[107].mxu0 }
0x185e   : > { %v5743_v13 = vpop.f32.mrb[108].mxu0 }
0x185f   : > { %v9108_v14 = vpop.f32.mrb[109].mxu0  ;;  %v5749_v30 = vsel %vm3230_vm2, %v5743_v13, -inf }
0x1860   : > { %5750 = vmax.xlane.f32.xlu0 %v5749_v30  ;;  %v5746_v15 = vpop.f32.mrb[110].mxu0 }
0x1861   : > { %v9109_v18 = vpop.f32.mrb[111].mxu0 }
0x1866   : > { %v5845_v21 = vpop.f32.mrb[112].mxu0 }
0x1867   : > { %v9120_v17 = vpop.f32.mrb[113].mxu0  ;;  %v5851_v32 = vsel %vm3230_vm2, %v5845_v21, -inf }
0x1868   : > { %5852 = vmax.xlane.f32.xlu0 %v5851_v32  ;;  %v5848_v16 = vpop.f32.mrb[114].mxu0 }
0x1869   : > { %v9121_v22 = vpop.f32.mrb[115].mxu0 }
0x186e   : > { %v5947_v20 = vpop.f32.mrb[116].mxu0 }
0x186f   : > { %v9132_v23 = vpop.f32.mrb[117].mxu0  ;;  %v5953_v24 = vsel %vm3230_vm2, %v5947_v20, -inf }
0x1870   : > { %5954 = vmax.xlane.f32.xlu0 %v5953_v24  ;;  %v5950_v26 = vpop.f32.mrb[118].mxu0 }
0x1871   : > { %v9133_v27 = vpop.f32.mrb[119].mxu0 }
0x1876   : > { %v6049_v29 = vpop.f32.mrb[120].mxu0 }
0x1877   : > { %v9144_v33 = vpop.f32.mrb[121].mxu0  ;;  %v6055_v34 = vsel %vm3230_vm2, %v6049_v29, -inf }
0x1878   : > { %6056 = vmax.xlane.f32.xlu0 %v6055_v34  ;;  %v6052_v35 = vpop.f32.mrb[122].mxu0 }
0x1879   : > { %v9145_v37 = vpop.f32.mrb[123].mxu0 }
0x187e   : > { %v6151_v0 = vpop.f32.mrb[124].mxu0 }
0x187f   : > { %v9156_v41 = vpop.f32.mrb[125].mxu0  ;;  %v6157_v42 = vsel %vm3230_vm2, %v6151_v0, -inf }
0x1880   : > { %6158 = vmax.xlane.f32.xlu0 %v6157_v42  ;;  %v6154_v44 = vpop.f32.mrb[126].mxu0 }
0x1881   : > { %v9157_v45 = vpop.f32.mrb[127].mxu0 }
0x1886   : > { %v6253_v47 = vpop.f32.mrb[128].mxu0 }
0x1887   : > { %v9168_v19 = vpop.f32.mrb[129].mxu0  ;;  %v6259_v51 = vsel %vm3230_vm2, %v6253_v47, -inf }
0x1888   : > { %6260 = vmax.xlane.f32.xlu0 %v6259_v51  ;;  %v6256_v49 = vpop.f32.mrb[130].mxu0 }
0x1889   : > { %v9169_v50 = vpop.f32.mrb[131].mxu0 }
0x18dd   : > { %v5541_v52 = vpop.xlane.xlu0 %5540 }
0x18de   : > { %v5542_v54 = vsub.f32 %v5533_v28, %v5541_v52 }
0x18e0   : > { %v5543_v38 = vmul.f32 1.442695, %v5542_v54 }
0x18e2   : > { %9738 = vpow2.f32 %v5543_v38 }
0x18e5   : > { %v5649_v55 = vpop.xlane.xlu0 %5648 }
0x18e6   : > { %v5650_v58 = vsub.f32 %v5641_v7, %v5649_v55 }
0x18e8   : > { %v5651_v59 = vmul.f32 1.442695, %v5650_v58 }
0x18ea   : > { %9740 = vpow2.f32 %v5651_v59 }
0x18ec   : > { %v9739_v62 = vpop.eup %9738 }
0x18ed   : > { %v5751_v63 = vpop.xlane.xlu0 %5750  ;;  %v5545_v1 = vsel %vm3230_vm2, %v9739_v62, 0.0 }
0x18ee   : > { %v5752_v4 = vsub.f32 %v5743_v13, %v5751_v63  ;;  %5546 = vadd.xlane.f32.xlu0 %v5545_v1 }
0x18f0   : > { %v5753_v3 = vmul.f32 1.442695, %v5752_v4 }
0x18f2   : > { %9742 = vpow2.f32 %v5753_v3 }
0x18f4   : > { %v9741_v5 = vpop.eup %9740 }
0x18f5   : > { %v5853_v6 = vpop.xlane.xlu0 %5852  ;;  %v5653_v8 = vsel %vm3230_vm2, %v9741_v5, 0.0 }
0x18f6   : > { %v5854_v9 = vsub.f32 %v5845_v21, %v5853_v6  ;;  %5654 = vadd.xlane.f32.xlu1 %v5653_v8 }
0x18f8   : > { %v5855_v28 = vmul.f32 1.442695, %v5854_v9 }
0x18fa   : > { %9744 = vpow2.f32 %v5855_v28 }
0x18fc   : > { %v9743_v10 = vpop.eup %9742 }
0x18fd   : > { %v5955_v7 = vpop.xlane.xlu0 %5954  ;;  %v5755_v11 = vsel %vm3230_vm2, %v9743_v10, 0.0 }
0x18fe   : > { %v5956_v14 = vsub.f32 %v5947_v20, %v5955_v7  ;;  %5756 = vadd.xlane.f32.xlu0 %v5755_v11 }
0x1900   : > { %v5957_v30 = vmul.f32 1.442695, %v5956_v14 }
0x1902   : > { %9746 = vpow2.f32 %v5957_v30 }
0x1904   : > { %v11391_v13 = vpop.eup %9744 }
0x1905   : > { %v6057_v15 = vpop.xlane.xlu0 %6056  ;;  %v5857_v18 = vsel %vm3230_vm2, %v11391_v13, 0.0 }
0x1906   : > { %v6058_v17 = vsub.f32 %v6049_v29, %v6057_v15  ;;  %5858 = vadd.xlane.f32.xlu1 %v5857_v18 }
0x1908   : > { %v6059_v21 = vmul.f32 1.442695, %v6058_v17  ;;  %v9630_v17 = vld [vmem:[%s11846_s18] sm:$0xff]  }
0x1909   : > { %9177 = vmatpush3.bf16.msra.mxu0 %v9630_v17 }
0x190a   : > { %9748 = vpow2.f32 %v6059_v21  ;;  %9178 = vmatprep.subr.bf16.mxu0 %v10222_v25  ;;  %v9631_v21 = vld [vmem:[%s11846_s18 + $0x8] sm:$0xff]  }
0x190c   : > { %v11395_v32 = vpop.eup %9746 }
0x190d   : > { %v6159_v16 = vpop.xlane.xlu0 %6158  ;;  %v5959_v22 = vsel %vm3230_vm2, %v11395_v32, 0.0  ;;  %9179 = vmatpush3.bf16.msra.mxu0 %v9631_v21  ;;  %v9633_v21 = vld [vmem:[%s11847_s2 + $0x8] sm:$0xff]  }
0x190e   : > { %v6160_v20 = vsub.f32 %v6151_v0, %v6159_v16  ;;  %5960 = vadd.xlane.f32.xlu1 %v5959_v22  ;;  %9192 = vmatprep.subr.bf16.mxu0 %v10222_v25 }
0x1910   : > { %v6161_v23 = vmul.f32 1.442695, %v6160_v20 }
0x1912   : > { %9750 = vpow2.f32 %v6161_v23 }
0x1914   : > { %v11399_v24 = vpop.eup %9748  ;;  %5552 = vrot.lane.b32.xlu0 %v11334_v12, %s11854_s11 }
0x1915   : > { %v6261_v26 = vpop.xlane.xlu0 %6260  ;;  %v6061_v27 = vsel %vm3230_vm2, %v11399_v24, 0.0 }
0x1916   : > { %v6262_v29 = vsub.f32 %v6253_v47, %v6261_v26  ;;  %6062 = vadd.xlane.f32.xlu1 %v6061_v27 }
0x1918   : > { %v6263_v33 = vmul.f32 1.442695, %v6262_v29 }
0x191a   : > { %9752 = vpow2.f32 %v6263_v33 }
0x191c   : > { %v11405_v34 = vpop.eup %9750 }
0x191d   : > { %v6163_v35 = vsel %vm3230_vm2, %v11405_v34, 0.0 }
0x191e   : > { %6164 = vadd.xlane.f32.xlu1 %v6163_v35 }
0x1924   : > { %v11409_v37 = vpop.eup %9752 }
0x1925   : > { %v6265_v0 = vsel %vm3230_vm2, %v11409_v37, 0.0 }
0x1926   : > { %6266 = vadd.xlane.f32.xlu1 %v6265_v0 }
0x197b   : > { %v5547_v12 = vpop.xlane.xlu0 %5546 }
0x197c   : > { %9754 = vrcp.f32 %v5547_v12 }
0x1983   : > { %v5655_v41 = vpop.xlane.xlu1 %5654 }
0x1984   : > { %9756 = vrcp.f32 %v5655_v41 }
0x1986   : > { %v9755_v42 = vpop.eup %9754 }
0x1987   : > { %v5549_v45 = vmul.f32 %v9755_v42, %v9739_v62 }
0x1989   : > { %v5550_v51 = vpack.c.bf16 %v5549_v45, %v5549_v45 }
0x198b   : > { %v5757_v44 = vpop.xlane.xlu0 %5756 }
0x198c   : > { %9758 = vrcp.f32 %v5757_v44 }
0x198e   : > { %v9757_v49 = vpop.eup %9756 }
0x198f   : > { %v5553_v47 = vpop.permute.xlu0 %5552  ;;  %v5657_v50 = vmul.f32 %v9757_v49, %v9741_v5 }
0x1990   : > { %v5558_v19 = vsel %vm3250_vm3, %v5553_v47, 0 }
0x1991   : > { %9087 = vmatpush3.bf16.msra.mxu1 %v5558_v19  ;;  %v5658_v54 = vpack.c.bf16 %v5657_v50, %v5657_v50 }
0x1992   : > { %9098 = vmatprep.subr.bf16.mxu1 %v10222_v25 }
0x1993   : > { %v5859_v52 = vpop.xlane.xlu1 %5858 }
0x1994   : > { %9089 = vmatmul.mubr.msk.bf16.vlgmr.msra.gmra.mrb[104].mxu1 %vm3246_vm4, %v5550_v51  ;;  %9760 = vrcp.f32 %v5859_v52 }
0x1995   : > { %9099 = vmatpush3.bf16.msra.mxu1 %v5558_v19  ;;  %9100 = vmatprep.mubr.msk.bf16.mxu1 %vm10223_vm5, %v10222_v25 }
0x1996   : > { %9110 = vmatprep.subr.bf16.mxu1 %v10222_v25  ;;  %v9759_v38 = vpop.eup %9758 }
0x1997   : > { %v5759_v55 = vmul.f32 %v9759_v38, %v9743_v10 }
0x1999   : > { %v5760_v59 = vpack.c.bf16 %v5759_v55, %v5759_v55 }
0x199b   : > { %v5961_v58 = vpop.xlane.xlu1 %5960 }
0x199c   : > { %9101 = vmatmul.mubr.msk.bf16.vlgmr.msra.gmra.mrb[108].mxu1 %vm3246_vm4, %v5658_v54  ;;  %9762 = vrcp.f32 %v5961_v58 }
0x199d   : > { %9111 = vmatpush3.bf16.msra.mxu1 %v5558_v19  ;;  %9112 = vmatprep.mubr.msk.bf16.mxu1 %vm10223_vm5, %v10222_v25 }
0x199e   : > { %9122 = vmatprep.subr.bf16.mxu1 %v10222_v25  ;;  %v9761_v62 = vpop.eup %9760 }
0x199f   : > { %v5861_v63 = vmul.f32 %v9761_v62, %v11391_v13 }
0x19a1   : > { %v5862_v4 = vpack.c.bf16 %v5861_v63, %v5861_v63 }
0x19a3   : > { %v6063_v1 = vpop.xlane.xlu1 %6062 }
0x19a4   : > { %9113 = vmatmul.mubr.msk.bf16.vlgmr.msra.gmra.mrb[112].mxu1 %vm3246_vm4, %v5760_v59  ;;  %9764 = vrcp.f32 %v6063_v1 }
0x19a5   : > { %9123 = vmatpush3.bf16.msra.mxu1 %v5558_v19  ;;  %9124 = vmatprep.mubr.msk.bf16.mxu1 %vm10223_vm5, %v10222_v25 }
0x19a6   : > { %9134 = vmatprep.subr.bf16.mxu1 %v10222_v25  ;;  %v9763_v3 = vpop.eup %9762 }
0x19a7   : > { %v5963_v5 = vmul.f32 %v9763_v3, %v11395_v32 }
0x19a9   : > { %v5964_v8 = vpack.c.bf16 %v5963_v5, %v5963_v5 }
0x19ab   : > { %v6165_v6 = vpop.xlane.xlu1 %6164 }
0x19ac   : > { %9125 = vmatmul.mubr.msk.bf16.vlgmr.msra.gmra.mrb[116].mxu1 %vm3246_vm4, %v5862_v4  ;;  %9766 = vrcp.f32 %v6165_v6 }
0x19ad   : > { %9135 = vmatpush3.bf16.msra.mxu1 %v5558_v19  ;;  %9136 = vmatprep.mubr.msk.bf16.mxu1 %vm10223_vm5, %v10222_v25 }
0x19ae   : > { %9146 = vmatprep.subr.bf16.mxu1 %v10222_v25  ;;  %v9765_v9 = vpop.eup %9764 }
0x19af   : > { %v6065_v28 = vmul.f32 %v9765_v9, %v11399_v24 }
0x19b1   : > { %v6066_v7 = vpack.c.bf16 %v6065_v28, %v6065_v28 }
0x19b3   : > { %v6267_v10 = vpop.xlane.xlu1 %6266 }
0x19b4   : > { %9137 = vmatmul.mubr.msk.bf16.vlgmr.msra.gmra.mrb[120].mxu1 %vm3246_vm4, %v5964_v8  ;;  %9768 = vrcp.f32 %v6267_v10 }
0x19b5   : > { %9147 = vmatpush3.bf16.msra.mxu1 %v5558_v19  ;;  %9148 = vmatprep.mubr.msk.bf16.mxu1 %vm10223_vm5, %v10222_v25 }
0x19b6   : > { %9158 = vmatprep.subr.bf16.mxu1 %v10222_v25  ;;  %v9767_v11 = vpop.eup %9766 }
0x19b7   : > { %v6167_v14 = vmul.f32 %v9767_v11, %v11405_v34 }
0x19b9   : > { %v6168_v30 = vpack.c.bf16 %v6167_v14, %v6167_v14 }
0x19bc   : > { %9149 = vmatmul.mubr.msk.bf16.vlgmr.msra.gmra.mrb[124].mxu1 %vm3246_vm4, %v6066_v7 }
0x19bd   : > { %9159 = vmatpush3.bf16.msra.mxu1 %v5558_v19  ;;  %9160 = vmatprep.mubr.msk.bf16.mxu1 %vm10223_vm5, %v10222_v25 }
0x19be   : > { %9170 = vmatprep.subr.bf16.mxu1 %v10222_v25  ;;  %v9769_v13 = vpop.eup %9768 }
0x19bf   : > { %v6269_v15 = vmul.f32 %v9769_v13, %v11409_v37 }
0x19c1   : > { %v6270_v18 = vpack.c.bf16 %v6269_v15, %v6269_v15 }
0x19c4   : > { %9161 = vmatmul.mubr.msk.bf16.vlgmr.msra.gmra.mrb[128].mxu1 %vm3246_vm4, %v6168_v30 }
0x19c5   : > { %9171 = vmatpush3.bf16.msra.mxu1 %v5558_v19  ;;  %9172 = vmatprep.mubr.msk.bf16.mxu1 %vm10223_vm5, %v10222_v25 }
0x19c6   : > { %9184 = vmatprep.subr.bf16.mxu1 %v10222_v25 }
0x19cc   : > { %9173 = vmatmul.mubr.msk.bf16.vlgmr.msra.gmra.mrb[132].mxu1 %vm3246_vm4, %v6270_v18  ;;  %v9632_v18 = vld [vmem:[%s11847_s2] sm:$0xff]   ;;  %s11864_s2 = sld [smem:[#allocation45_spill]] }
0x19cd   : > { %9188 = vmatprep.mubr.msk.bf16.mxu1 %vm10223_vm5, %v10222_v25 }
0x1a67   : > { %v5594_v32 = vpop.f32.mrb[104].mxu1 }
0x1a68   : > { %v9090_v16 = vpop.f32.mrb[105].mxu1  ;;  %v5600_v24 = vmul.f32 %v10941_v40, %v5594_v32  ;;  %v5352_v32 = vld [vmem:[#allocation2 + $0x4] sm:$0xff] }
0x1a69   : > { %v5597_v22 = vpop.f32.mrb[106].mxu1  ;;  %v5353_v16 = vld [vmem:[#allocation2 + $0xc] sm:$0xf] }
0x1a6a   : > { %v9091_v20 = vpop.f32.mrb[107].mxu1  ;;  %v6480_v22 = vpack.c.bf16 %v5353_v16, %v5352_v32 }
0x1a6b   : > { %v8398_v20 = vld [vmem:[%s11848_s3] ss:$0 sm:$0xff]  ;;  %s11865_s3 = sld [smem:[#allocation75_spill]] }
0x1a6f   : > { %v5696_v23 = vpop.f32.mrb[108].mxu1 }
0x1a70   : > { %v5702_v26 = vmul.f32 %v10954_v43, %v5696_v23  ;;  %v9102_v27 = vpop.f32.mrb[109].mxu1 }
0x1a71   : > { %v5699_v29 = vpop.f32.mrb[110].mxu1 }
0x1a72   : > { %v5703_v33 = vadd.f32 %v5702_v26, %v5600_v24  ;;  %v9103_v34 = vpop.f32.mrb[111].mxu1 }
0x1a77   : > { %v5798_v35 = vpop.f32.mrb[112].mxu1 }
0x1a78   : > { %v5804_v37 = vmul.f32 %v10966_v46, %v5798_v35  ;;  %v9114_v0 = vpop.f32.mrb[113].mxu1  ;;  %v8408_v35 = vld [vmem:[%s11849_s4] ss:$0 sm:$0xff]  ;;  %s11866_s4 = sld [smem:[#allocation73_spill]] }
0x1a79   : > { %v5801_v12 = vpop.f32.mrb[114].mxu1 }
0x1a7a   : > { %v5805_v41 = vadd.f32 %v5804_v37, %v5703_v33  ;;  %v9115_v42 = vpop.f32.mrb[115].mxu1 }
0x1a7f   : > { %v5900_v44 = vpop.f32.mrb[116].mxu1 }
0x1a80   : > { %v5906_v45 = vmul.f32 %v10978_v48, %v5900_v44  ;;  %v9126_v47 = vpop.f32.mrb[117].mxu1 }
0x1a81   : > { %v5903_v19 = vpop.f32.mrb[118].mxu1 }
0x1a82   : > { %v5907_v51 = vadd.f32 %v5906_v45, %v5805_v41  ;;  %v9127_v49 = vpop.f32.mrb[119].mxu1 }
0x1a87   : > { %v6002_v50 = vpop.f32.mrb[120].mxu1 }
0x1a88   : > { %v6008_v52 = vmul.f32 %v10990_v31, %v6002_v50  ;;  %v9138_v54 = vpop.f32.mrb[121].mxu1  ;;  %v9634_v50 = vld [vmem:[%s11850_s5] sm:$0xff]  }
0x1a89   : > { %v6005_v38 = vpop.f32.mrb[122].mxu1  ;;  %9185 = vmatpush3.bf16.msra.mxu1 %v9634_v50 }
0x1a8a   : > { %v6009_v55 = vadd.f32 %v6008_v52, %v5907_v51  ;;  %v9139_v58 = vpop.f32.mrb[123].mxu1  ;;  %9186 = vmatprep.subr.bf16.mxu1 %v10222_v25  ;;  %v9635_v52 = vld [vmem:[%s11850_s5 + $0x8] sm:$0xff]  }
0x1a8d   : > { %9187 = vmatpush3.bf16.msra.mxu1 %v9635_v52 }
0x1a8e   : > { %9200 = vmatprep.subr.bf16.mxu1 %v10222_v25 }
0x1a8f   : > { %v6104_v59 = vpop.f32.mrb[124].mxu1 }
0x1a90   : > { %v6110_v62 = vmul.f32 %v11002_v53, %v6104_v59  ;;  %v9150_v63 = vpop.f32.mrb[125].mxu1  ;;  %v8402_v59 = vld [vmem:[%s11851_s6] ss:$0 sm:$0xff] }
0x1a91   : > { %v6107_v1 = vpop.f32.mrb[126].mxu1  ;;  %v8403_v63 = vld [vmem:[%s11852_s9] ss:$0 sm:$0xff] }
0x1a92   : > { %v6111_v4 = vadd.f32 %v6110_v62, %v6009_v55  ;;  %v9151_v3 = vpop.f32.mrb[127].mxu1 }
0x1a97   : > { %v6206_v5 = vpop.f32.mrb[128].mxu1 }
0x1a98   : > { %v6212_v6 = vmul.f32 %v11014_v57, %v6206_v5  ;;  %v9162_v8 = vpop.f32.mrb[129].mxu1 }
0x1a99   : > { %v6209_v9 = vpop.f32.mrb[130].mxu1 }
0x1a9a   : > { %v6213_v28 = vadd.f32 %v6212_v6, %v6111_v4  ;;  %v9163_v10 = vpop.f32.mrb[131].mxu1  ;;  %v8404_v6 = vld [vmem:[%s11853_s10] ss:$0 sm:$0xff] }
0x1a9f   : > { %v6308_v7 = vpop.f32.mrb[132].mxu1 }
0x1aa0   : > { %v6314_v11 = vmul.f32 %v11026_v60, %v6308_v7  ;;  %v9174_v14 = vpop.f32.mrb[133].mxu1 }
0x1aa1   : > { %v6311_v30 = vpop.f32.mrb[134].mxu1 }
0x1aa2   : > { %v6315_v13 = vadd.f32 %v6314_v11, %v6213_v28  ;;  %v9175_v15 = vpop.f32.mrb[135].mxu1 }
0x1aa4   : > { %v6316_v17 = vpack.c.bf16 %v6315_v13, %v6315_v13 }
0x1aa6   : > { %9181 = vmatmul.mubr.msk.bf16.vlgmr.msra.gmra.mrb[132].mxu0 %vm1809_vm8, %v6316_v17 }
0x1aa7   : > { %9193 = vmatpush3.bf16.msra.mxu0 %v9632_v18  ;;  %9196 = vmatprep.mubr.msk.bf16.mxu0 %vm10223_vm5, %v10222_v25 }
0x1aa8   : > { %9194 = vmatprep.subr.bf16.mxu0 %v10222_v25 }
0x1aab   : > { %9195 = vmatpush3.bf16.msra.mxu0 %v9633_v21 }
0x1aac   : > { %9206 = vmatprep.subr.bf16.mxu0 %v10222_v25 }
0x1aae   : > { %9197 = vmatmul.mubr.msk.bf16.vlgmr.msra.gmra.mrb[136].mxu0 %vm1809_vm8, %v6480_v22 }
0x1aaf   : > { %9208 = vmatprep.mubr.msk.bf16.mxu0 %vm10223_vm5, %v10222_v25 }
0x1b79   : > { %v6377_v23 = vpop.f32.mrb[132].mxu0 }
0x1b7a   : > { %v6378_v24 = vadd.f32 %v8398_v20, %v6377_v23  ;;  %v9182_v26 = vpop.f32.mrb[133].mxu0 }
0x1b7b   : > { %v6380_v27 = vpop.f32.mrb[134].mxu0 }
0x1b7c   : > { %v9183_v29 = vpop.f32.mrb[135].mxu0  ;;  %v6383_v33 = vadd.f32 %v6378_v24, %v11308_v2 }
0x1b7e   : > { %v6384_v34 = vsel %vm4078_vm7, %v6383_v33, 0.0 }
0x1b7f   : > { %6385 = vadd.xlane.f32.xlu1 %v6384_v34 }
0x1b81   : > { %v6541_v37 = vpop.f32.mrb[136].mxu0 }
0x1b82   : > { %v9198_v0 = vpop.f32.mrb[137].mxu0  ;;  %v6542_v41 = vadd.f32 %v8408_v35, %v6541_v37 }
0x1b83   : > { %v6544_v12 = vpop.f32.mrb[138].mxu0 }
0x1b84   : > { %v6545_v42 = vadd.f32 %v8408_v35, %v6544_v12  ;;  %v9199_v44 = vpop.f32.mrb[139].mxu0 }
0x1b86   : > { %v11477_v45 = vpack.c.bf16 %v6545_v42, %v6542_v41 }
0x1b88   : > { %v6556_v5 = vsel %vm1809_vm8, %v11477_v45, 0 }
0x1c0c   : > { %v6386_v47 = vpop.xlane.xlu1 %6385 }
0x1c0d   : > { %v6387_v19 = vmul.f32 0.03125, %v6386_v47 }
0x1c0f   : > { %v6388_v51 = vsub.f32 %v6383_v33, %v6387_v19 }
0x1c11   : > { %v6389_v49 = vmul.f32 %v6388_v51, %v6388_v51 }
0x1c13   : > { %v6390_v2 = vsel %vm4078_vm7, %v6389_v49, 0.0 }
0x1c14   : > { %6391 = vadd.xlane.f32.xlu1 %v6390_v2 }
0x1ca1   : > { %v6392_v54 = vpop.xlane.xlu1 %6391 }
0x1ca2   : > { %v6393_v38 = vmul.f32 0.03125, %v6392_v54 }
0x1ca4   : > { %v6394_v55 = vadd.f32 1e-05, %v6393_v38 }
0x1ca6   : > { %9770 = vrsqrt.f32 %v6394_v55 }
0x1cb0   : > { %v9771_v58 = vpop.eup %9770 }
0x1cb1   : > { %v6396_v62 = vmul.f32 %v9771_v58, %v6388_v51 }
0x1cb3   : > { %v6404_v1 = vmul.f32 %v8402_v59, %v6396_v62 }
0x1cb5   : > { %v11486_v4 = vadd.f32 %v8403_v63, %v6404_v1 }
0x1cb7   : > { %v6413_v3 = vpack.c.bf16 %v11486_v4, %v11486_v4 }
0x1cb9   : > { %9189 = vmatmul.mubr.msk.bf16.vlgmr.msra.gmra.mrb[136].mxu1 %vm1809_vm8, %v6413_v3 }
0x1cba   : > { %9201 = vmatpush3.bf16.xpose.msra.mxu1 %v6556_v5  ;;  %9202 = vmatprep.mubr.msk.bf16.mxu1 %vm10223_vm5, %v10222_v25 }
0x1cbb   : > { %9212 = vmatprep.subr.bf16.mxu1 %v10222_v25 }
0x1d8c   : > { %v6474_v8 = vpop.f32.mrb[136].mxu1 }
0x1d8d   : > { %v6475_v9 = vadd.f32 %v8404_v6, %v6474_v8  ;;  %v9190_v28 = vpop.f32.mrb[137].mxu1 }
0x1d8e   : > { %v6477_v10 = vpop.f32.mrb[138].mxu1 }
0x1d8f   : > { %v6548_v7 = vmul.f32 0.5, %v6475_v9  ;;  %v9191_v11 = vpop.f32.mrb[139].mxu1 }
0x1d91   : > { %v6550_v14 = vmul.f32 %v10941_v40, %v6548_v7  ;;  %v6661_v13 = vmul.f32 %v10954_v43, %v6548_v7  ;;  %v6763_v18 = vmul.f32 %v10966_v46, %v6548_v7  ;;  %v6865_v21 = vmul.f32 %v10978_v48, %v6548_v7 }
0x1d92   : > { %v6967_v16 = vmul.f32 %v10990_v31, %v6548_v7  ;;  %v7069_v20 = vmul.f32 %v11002_v53, %v6548_v7  ;;  %v7171_v24 = vmul.f32 %v11014_v57, %v6548_v7  ;;  %v7273_v27 = vmul.f32 %v11026_v60, %v6548_v7 }
0x1d93   : > { %v6551_v30 = vpack.c.bf16 %v6550_v14, %v6550_v14  ;;  %v6662_v15 = vpack.c.bf16 %v6661_v13, %v6661_v13  ;;  %v6764_v17 = vpack.c.bf16 %v6763_v18, %v6763_v18  ;;  %v6866_v32 = vpack.c.bf16 %v6865_v21, %v6865_v21 }
0x1d94   : > { %v6968_v22 = vpack.c.bf16 %v6967_v16, %v6967_v16  ;;  %v7070_v23 = vpack.c.bf16 %v7069_v20, %v7069_v20  ;;  %v7172_v26 = vpack.c.bf16 %v7171_v24, %v7171_v24  ;;  %v7274_v29 = vpack.c.bf16 %v7273_v27, %v7273_v27 }
0x1d95   : > { %9203 = vmatmul.mubr.msk.bf16.vlgmr.msra.gmra.mrb[140].mxu1 %vm1809_vm8, %v6551_v30 }
0x1d96   : > { %9213 = vmatpush3.bf16.xpose.msra.mxu1 %v6556_v5  ;;  %9214 = vmatprep.mubr.msk.bf16.mxu1 %vm10223_vm5, %v10222_v25 }
0x1d97   : > { %9224 = vmatprep.subr.bf16.mxu1 %v10222_v25 }
0x1d9d   : > { %9215 = vmatmul.mubr.msk.bf16.vlgmr.msra.gmra.mrb[144].mxu1 %vm1809_vm8, %v6662_v15 }
0x1d9e   : > { %9225 = vmatpush3.bf16.xpose.msra.mxu1 %v6556_v5  ;;  %9226 = vmatprep.mubr.msk.bf16.mxu1 %vm10223_vm5, %v10222_v25 }
0x1d9f   : > { %9236 = vmatprep.subr.bf16.mxu1 %v10222_v25 }
0x1da5   : > { %9227 = vmatmul.mubr.msk.bf16.vlgmr.msra.gmra.mrb[148].mxu1 %vm1809_vm8, %v6764_v17 }
0x1da6   : > { %9237 = vmatpush3.bf16.xpose.msra.mxu1 %v6556_v5  ;;  %9238 = vmatprep.mubr.msk.bf16.mxu1 %vm10223_vm5, %v10222_v25 }
0x1da7   : > { %9248 = vmatprep.subr.bf16.mxu1 %v10222_v25 }
0x1dad   : > { %9239 = vmatmul.mubr.msk.bf16.vlgmr.msra.gmra.mrb[152].mxu1 %vm1809_vm8, %v6866_v32 }
0x1dae   : > { %9249 = vmatpush3.bf16.xpose.msra.mxu1 %v6556_v5  ;;  %9250 = vmatprep.mubr.msk.bf16.mxu1 %vm10223_vm5, %v10222_v25 }
0x1daf   : > { %9260 = vmatprep.subr.bf16.mxu1 %v10222_v25 }
0x1db5   : > { %9251 = vmatmul.mubr.msk.bf16.vlgmr.msra.gmra.mrb[156].mxu1 %vm1809_vm8, %v6968_v22 }
0x1db6   : > { %9261 = vmatpush3.bf16.xpose.msra.mxu1 %v6556_v5  ;;  %9262 = vmatprep.mubr.msk.bf16.mxu1 %vm10223_vm5, %v10222_v25 }
0x1db7   : > { %9272 = vmatprep.subr.bf16.mxu1 %v10222_v25 }
0x1dbd   : > { %9263 = vmatmul.mubr.msk.bf16.vlgmr.msra.gmra.mrb[160].mxu1 %vm1809_vm8, %v7070_v23 }
0x1dbe   : > { %9273 = vmatpush3.bf16.xpose.msra.mxu1 %v6556_v5  ;;  %9274 = vmatprep.mubr.msk.bf16.mxu1 %vm10223_vm5, %v10222_v25 }
0x1dbf   : > { %9284 = vmatprep.subr.bf16.mxu1 %v10222_v25 }
0x1dc5   : > { %9275 = vmatmul.mubr.msk.bf16.vlgmr.msra.gmra.mrb[164].mxu1 %vm1809_vm8, %v7172_v26 }
0x1dc6   : > { %9285 = vmatpush3.bf16.xpose.msra.mxu1 %v6556_v5  ;;  %9286 = vmatprep.mubr.msk.bf16.mxu1 %vm10223_vm5, %v10222_v25 }
0x1dc7   : > { %9296 = vmatprep.subr.bf16.mxu1 %v10222_v25 }
0x1dcd   : > { %9287 = vmatmul.mubr.msk.bf16.vlgmr.msra.gmra.mrb[168].mxu1 %vm1809_vm8, %v7274_v29 }
0x1dce   : > { %9300 = vmatprep.mubr.msk.bf16.mxu1 %vm10223_vm5, %v10222_v25 }
0x1e68   : > { %v6592_v33 = vpop.f32.mrb[140].mxu1 }
0x1e69   : > { %v9204_v34 = vpop.f32.mrb[141].mxu1  ;;  %v6598_v35 = vsel %vm3230_vm2, %v6592_v33, -inf }
0x1e6a   : > { %6599 = vmax.xlane.f32.xlu0 %v6598_v35  ;;  %v6595_v37 = vpop.f32.mrb[142].mxu1 }
0x1e6b   : > { %v9205_v0 = vpop.f32.mrb[143].mxu1 }
0x1e70   : > { %v6700_v12 = vpop.f32.mrb[144].mxu1 }
0x1e71   : > { %v9216_v41 = vpop.f32.mrb[145].mxu1  ;;  %v6706_v42 = vsel %vm3230_vm2, %v6700_v12, -inf }
0x1e72   : > { %6707 = vmax.xlane.f32.xlu1 %v6706_v42  ;;  %v6703_v44 = vpop.f32.mrb[146].mxu1 }
0x1e73   : > { %v9217_v47 = vpop.f32.mrb[147].mxu1 }
0x1e78   : > { %v6802_v19 = vpop.f32.mrb[148].mxu1 }
0x1e79   : > { %v9228_v51 = vpop.f32.mrb[149].mxu1  ;;  %v6808_v49 = vsel %vm3230_vm2, %v6802_v19, -inf }
0x1e7a   : > { %6809 = vmax.xlane.f32.xlu1 %v6808_v49  ;;  %v6805_v2 = vpop.f32.mrb[150].mxu1 }
0x1e7b   : > { %v9229_v50 = vpop.f32.mrb[151].mxu1 }
0x1e80   : > { %v6904_v52 = vpop.f32.mrb[152].mxu1 }
0x1e81   : > { %v9240_v54 = vpop.f32.mrb[153].mxu1  ;;  %v6910_v38 = vsel %vm3230_vm2, %v6904_v52, -inf }
0x1e82   : > { %6911 = vmax.xlane.f32.xlu1 %v6910_v38  ;;  %v6907_v55 = vpop.f32.mrb[154].mxu1 }
0x1e83   : > { %v9241_v58 = vpop.f32.mrb[155].mxu1 }
0x1e88   : > { %v7006_v59 = vpop.f32.mrb[156].mxu1 }
0x1e89   : > { %v9252_v62 = vpop.f32.mrb[157].mxu1  ;;  %v7012_v63 = vsel %vm3230_vm2, %v7006_v59, -inf }
0x1e8a   : > { %7013 = vmax.xlane.f32.xlu1 %v7012_v63  ;;  %v7009_v1 = vpop.f32.mrb[158].mxu1 }
0x1e8b   : > { %v9253_v3 = vpop.f32.mrb[159].mxu1 }
0x1e90   : > { %v7108_v5 = vpop.f32.mrb[160].mxu1 }
0x1e91   : > { %v9264_v6 = vpop.f32.mrb[161].mxu1  ;;  %v7114_v8 = vsel %vm3230_vm2, %v7108_v5, -inf }
0x1e92   : > { %7115 = vmax.xlane.f32.xlu1 %v7114_v8  ;;  %v7111_v9 = vpop.f32.mrb[162].mxu1 }
0x1e93   : > { %v9265_v28 = vpop.f32.mrb[163].mxu1 }
0x1e98   : > { %v7210_v10 = vpop.f32.mrb[164].mxu1 }
0x1e99   : > { %v9276_v7 = vpop.f32.mrb[165].mxu1  ;;  %v7216_v11 = vsel %vm3230_vm2, %v7210_v10, -inf }
0x1e9a   : > { %7217 = vmax.xlane.f32.xlu1 %v7216_v11  ;;  %v7213_v14 = vpop.f32.mrb[166].mxu1 }
0x1e9b   : > { %v9277_v30 = vpop.f32.mrb[167].mxu1 }
0x1ea0   : > { %v7312_v13 = vpop.f32.mrb[168].mxu1 }
0x1ea1   : > { %v9288_v15 = vpop.f32.mrb[169].mxu1  ;;  %v7318_v18 = vsel %vm3230_vm2, %v7312_v13, -inf }
0x1ea2   : > { %7319 = vmax.xlane.f32.xlu1 %v7318_v18  ;;  %v7315_v17 = vpop.f32.mrb[170].mxu1 }
0x1ea3   : > { %v9289_v21 = vpop.f32.mrb[171].mxu1 }
0x1ef7   : > { %v6600_v32 = vpop.xlane.xlu0 %6599 }
0x1ef8   : > { %v6601_v16 = vsub.f32 %v6592_v33, %v6600_v32 }
0x1efa   : > { %v6602_v22 = vmul.f32 1.442695, %v6601_v16 }
0x1efc   : > { %9772 = vpow2.f32 %v6602_v22 }
0x1eff   : > { %v6708_v20 = vpop.xlane.xlu1 %6707 }
0x1f00   : > { %v6709_v23 = vsub.f32 %v6700_v12, %v6708_v20 }
0x1f02   : > { %v6710_v24 = vmul.f32 1.442695, %v6709_v23 }
0x1f04   : > { %9774 = vpow2.f32 %v6710_v24 }
0x1f06   : > { %v9773_v26 = vpop.eup %9772 }
0x1f07   : > { %v6810_v27 = vpop.xlane.xlu1 %6809  ;;  %v6604_v29 = vsel %vm3230_vm2, %v9773_v26, 0.0 }
0x1f08   : > { %v6811_v34 = vsub.f32 %v6802_v19, %v6810_v27  ;;  %6605 = vadd.xlane.f32.xlu1 %v6604_v29 }
0x1f0a   : > { %v6812_v35 = vmul.f32 1.442695, %v6811_v34 }
0x1f0c   : > { %9776 = vpow2.f32 %v6812_v35 }
0x1f0e   : > { %v9775_v37 = vpop.eup %9774 }
0x1f0f   : > { %v6912_v0 = vpop.xlane.xlu1 %6911  ;;  %v6712_v41 = vsel %vm3230_vm2, %v9775_v37, 0.0 }
0x1f10   : > { %v6913_v42 = vsub.f32 %v6904_v52, %v6912_v0  ;;  %6713 = vadd.xlane.f32.xlu0 %v6712_v41 }
0x1f12   : > { %v6914_v33 = vmul.f32 1.442695, %v6913_v42 }
0x1f14   : > { %9778 = vpow2.f32 %v6914_v33 }
0x1f16   : > { %v9777_v44 = vpop.eup %9776 }
0x1f17   : > { %v7014_v12 = vpop.xlane.xlu1 %7013  ;;  %v6814_v47 = vsel %vm3230_vm2, %v9777_v44, 0.0 }
0x1f18   : > { %v7015_v51 = vsub.f32 %v7006_v59, %v7014_v12  ;;  %6815 = vadd.xlane.f32.xlu1 %v6814_v47 }
0x1f1a   : > { %v7016_v49 = vmul.f32 1.442695, %v7015_v51 }
0x1f1c   : > { %9780 = vpow2.f32 %v7016_v49 }
0x1f1e   : > { %v11547_v19 = vpop.eup %9778 }
0x1f1f   : > { %v7116_v2 = vpop.xlane.xlu1 %7115  ;;  %v6916_v50 = vsel %vm3230_vm2, %v11547_v19, 0.0 }
0x1f20   : > { %v7117_v54 = vsub.f32 %v7108_v5, %v7116_v2  ;;  %6917 = vadd.xlane.f32.xlu0 %v6916_v50 }
0x1f22   : > { %v7118_v52 = vmul.f32 1.442695, %v7117_v54  ;;  %v9636_v54 = vld [vmem:[%s11855_s12] sm:$0xff]  }
0x1f23   : > { %9297 = vmatpush3.bf16.msra.mxu1 %v9636_v54 }
0x1f24   : > { %9782 = vpow2.f32 %v7118_v52  ;;  %9298 = vmatprep.subr.bf16.mxu1 %v10222_v25  ;;  %v9637_v52 = vld [vmem:[%s11855_s12 + $0x8] sm:$0xff]  }
0x1f26   : > { %v11551_v38 = vpop.eup %9780 }
0x1f27   : > { %v7218_v55 = vpop.xlane.xlu1 %7217  ;;  %v7018_v58 = vsel %vm3230_vm2, %v11551_v38, 0.0  ;;  %9299 = vmatpush3.bf16.msra.mxu1 %v9637_v52 }
0x1f28   : > { %v7219_v59 = vsub.f32 %v7210_v10, %v7218_v55  ;;  %7019 = vadd.xlane.f32.xlu0 %v7018_v58  ;;  %9312 = vmatprep.subr.bf16.mxu1 %v10222_v25 }
0x1f29   : > { %6611 = vrot.lane.b32.xlu1 %v11477_v45, %s11854_s11  ;;  %s11862_s11 = sld [smem:[#allocation38_spill]] }
0x1f2a   : > { %v7220_v62 = vmul.f32 1.442695, %v7219_v59 }
0x1f2c   : > { %9784 = vpow2.f32 %v7220_v62 }
0x1f2e   : > { %v11557_v63 = vpop.eup %9782 }
0x1f2f   : > { %v7320_v1 = vpop.xlane.xlu1 %7319  ;;  %v7120_v3 = vsel %vm3230_vm2, %v11557_v63, 0.0 }
0x1f30   : > { %v7321_v5 = vsub.f32 %v7312_v13, %v7320_v1  ;;  %7121 = vadd.xlane.f32.xlu0 %v7120_v3 }
0x1f32   : > { %v7322_v6 = vmul.f32 1.442695, %v7321_v5 }
0x1f34   : > { %9786 = vpow2.f32 %v7322_v6 }
0x1f36   : > { %v11561_v8 = vpop.eup %9784 }
0x1f37   : > { %v7222_v9 = vsel %vm3230_vm2, %v11561_v8, 0.0 }
0x1f38   : > { %7223 = vadd.xlane.f32.xlu0 %v7222_v9 }
0x1f3e   : > { %v11565_v28 = vpop.eup %9786 }
0x1f3f   : > { %v7324_v45 = vsel %vm3230_vm2, %v11565_v28, 0.0 }
0x1f40   : > { %7325 = vadd.xlane.f32.xlu0 %v7324_v45 }
0x1f95   : > { %v6606_v10 = vpop.xlane.xlu1 %6605 }
0x1f96   : > { %9788 = vrcp.f32 %v6606_v10 }
0x1f9d   : > { %v6714_v7 = vpop.xlane.xlu0 %6713 }
0x1f9e   : > { %9790 = vrcp.f32 %v6714_v7 }
0x1fa0   : > { %v9789_v11 = vpop.eup %9788 }
0x1fa1   : > { %v6608_v30 = vmul.f32 %v9789_v11, %v9773_v26 }
0x1fa3   : > { %v6609_v18 = vpack.c.bf16 %v6608_v30, %v6608_v30 }
0x1fa5   : > { %v6816_v14 = vpop.xlane.xlu1 %6815 }
0x1fa6   : > { %9792 = vrcp.f32 %v6816_v14 }
0x1fa8   : > { %v9791_v17 = vpop.eup %9790 }
0x1fa9   : > { %v6612_v13 = vpop.permute.xlu1 %6611  ;;  %v6716_v21 = vmul.f32 %v9791_v17, %v9775_v37 }
0x1faa   : > { %v6617_v15 = vsel %vm3250_vm3, %v6612_v13, 0 }
0x1fab   : > { %9207 = vmatpush3.bf16.msra.mxu0 %v6617_v15  ;;  %v6717_v16 = vpack.c.bf16 %v6716_v21, %v6716_v21 }
0x1fac   : > { %9218 = vmatprep.subr.bf16.mxu0 %v10222_v25 }
0x1fad   : > { %v6918_v32 = vpop.xlane.xlu0 %6917 }
0x1fae   : > { %9209 = vmatmul.mubr.msk.bf16.vlgmr.msra.gmra.mrb[140].mxu0 %vm3246_vm4, %v6609_v18  ;;  %9794 = vrcp.f32 %v6918_v32 }
0x1faf   : > { %9219 = vmatpush3.bf16.msra.mxu0 %v6617_v15  ;;  %9220 = vmatprep.mubr.msk.bf16.mxu0 %vm10223_vm5, %v10222_v25 }
0x1fb0   : > { %9230 = vmatprep.subr.bf16.mxu0 %v10222_v25  ;;  %v9793_v22 = vpop.eup %9792 }
0x1fb1   : > { %v6818_v20 = vmul.f32 %v9793_v22, %v9777_v44 }
0x1fb3   : > { %v6819_v24 = vpack.c.bf16 %v6818_v20, %v6818_v20 }
0x1fb5   : > { %v7020_v23 = vpop.xlane.xlu0 %7019 }
0x1fb6   : > { %9221 = vmatmul.mubr.msk.bf16.vlgmr.msra.gmra.mrb[144].mxu0 %vm3246_vm4, %v6717_v16  ;;  %9796 = vrcp.f32 %v7020_v23 }
0x1fb7   : > { %9231 = vmatpush3.bf16.msra.mxu0 %v6617_v15  ;;  %9232 = vmatprep.mubr.msk.bf16.mxu0 %vm10223_vm5, %v10222_v25 }
0x1fb8   : > { %9242 = vmatprep.subr.bf16.mxu0 %v10222_v25  ;;  %v9795_v26 = vpop.eup %9794 }
0x1fb9   : > { %v6920_v27 = vmul.f32 %v9795_v26, %v11547_v19 }
0x1fbb   : > { %v6921_v34 = vpack.c.bf16 %v6920_v27, %v6920_v27 }
0x1fbd   : > { %v7122_v29 = vpop.xlane.xlu0 %7121 }
0x1fbe   : > { %9233 = vmatmul.mubr.msk.bf16.vlgmr.msra.gmra.mrb[148].mxu0 %vm3246_vm4, %v6819_v24  ;;  %9798 = vrcp.f32 %v7122_v29 }
0x1fbf   : > { %9243 = vmatpush3.bf16.msra.mxu0 %v6617_v15  ;;  %9244 = vmatprep.mubr.msk.bf16.mxu0 %vm10223_vm5, %v10222_v25 }
0x1fc0   : > { %9254 = vmatprep.subr.bf16.mxu0 %v10222_v25  ;;  %v9797_v35 = vpop.eup %9796 }
0x1fc1   : > { %v7022_v37 = vmul.f32 %v9797_v35, %v11551_v38 }
0x1fc3   : > { %v7023_v41 = vpack.c.bf16 %v7022_v37, %v7022_v37 }
0x1fc5   : > { %v7224_v0 = vpop.xlane.xlu0 %7223 }
0x1fc6   : > { %9245 = vmatmul.mubr.msk.bf16.vlgmr.msra.gmra.mrb[152].mxu0 %vm3246_vm4, %v6921_v34  ;;  %9800 = vrcp.f32 %v7224_v0 }
0x1fc7   : > { %9255 = vmatpush3.bf16.msra.mxu0 %v6617_v15  ;;  %9256 = vmatprep.mubr.msk.bf16.mxu0 %vm10223_vm5, %v10222_v25 }
0x1fc8   : > { %9266 = vmatprep.subr.bf16.mxu0 %v10222_v25  ;;  %v9799_v42 = vpop.eup %9798 }
0x1fc9   : > { %v7124_v33 = vmul.f32 %v9799_v42, %v11557_v63 }
0x1fcb   : > { %v7125_v12 = vpack.c.bf16 %v7124_v33, %v7124_v33 }
0x1fcd   : > { %v7326_v44 = vpop.xlane.xlu0 %7325 }
0x1fce   : > { %9257 = vmatmul.mubr.msk.bf16.vlgmr.msra.gmra.mrb[156].mxu0 %vm3246_vm4, %v7023_v41  ;;  %9802 = vrcp.f32 %v7326_v44 }
0x1fcf   : > { %9267 = vmatpush3.bf16.msra.mxu0 %v6617_v15  ;;  %9268 = vmatprep.mubr.msk.bf16.mxu0 %vm10223_vm5, %v10222_v25 }
0x1fd0   : > { %9278 = vmatprep.subr.bf16.mxu0 %v10222_v25  ;;  %v9801_v47 = vpop.eup %9800 }
0x1fd1   : > { %v7226_v51 = vmul.f32 %v9801_v47, %v11561_v8  ;;  %v8366_v47 = vld [vmem:[%s11862_s11] ss:$0 sm:$0xff] }
0x1fd3   : > { %v7227_v49 = vpack.c.bf16 %v7226_v51, %v7226_v51  ;;  %v8428_v51 = vld [vmem:[%s11856_s13] ss:$0 sm:$0xff] }
0x1fd6   : > { %9269 = vmatmul.mubr.msk.bf16.vlgmr.msra.gmra.mrb[160].mxu0 %vm3246_vm4, %v7125_v12 }
0x1fd7   : > { %9279 = vmatpush3.bf16.msra.mxu0 %v6617_v15  ;;  %9280 = vmatprep.mubr.msk.bf16.mxu0 %vm10223_vm5, %v10222_v25 }
0x1fd8   : > { %9290 = vmatprep.subr.bf16.mxu0 %v10222_v25  ;;  %v9803_v19 = vpop.eup %9802 }
0x1fd9   : > { %v7328_v2 = vmul.f32 %v9803_v19, %v11565_v28 }
0x1fdb   : > { %v7329_v50 = vpack.c.bf16 %v7328_v2, %v7328_v2 }
0x1fde   : > { %9281 = vmatmul.mubr.msk.bf16.vlgmr.msra.gmra.mrb[164].mxu0 %vm3246_vm4, %v7227_v49  ;;  %v5314_v49 = vadd.f32 %v8366_v47, %v11378_v61 }
0x1fdf   : > { %9291 = vmatpush3.bf16.msra.mxu0 %v6617_v15  ;;  %9292 = vmatprep.mubr.msk.bf16.mxu0 %vm10223_vm5, %v10222_v25 }
0x1fe0   : > { %9304 = vmatprep.subr.bf16.mxu0 %v10222_v25 }
0x1fe6   : > { %9293 = vmatmul.mubr.msk.bf16.vlgmr.msra.gmra.mrb[168].mxu0 %vm3246_vm4, %v7329_v50 }
0x1fe7   : > { %9308 = vmatprep.mubr.msk.bf16.mxu0 %vm10223_vm5, %v10222_v25 }
0x2081   : > { %v6653_v38 = vpop.f32.mrb[140].mxu0 }
0x2082   : > { %v9210_v55 = vpop.f32.mrb[141].mxu0  ;;  %v6659_v63 = vmul.f32 %v10941_v40, %v6653_v38  ;;  %v5319_v38 = vadd.f32 %v5314_v49, %v11298_v36  ;;  %v9640_v36 = vld [vmem:[%s11858_s15] sm:$0xff]  }
0x2083   : > { %v6656_v58 = vpop.f32.mrb[142].mxu0 }
0x2084   : > { %v9211_v59 = vpop.f32.mrb[143].mxu0  ;;  %v5320_v55 = vsel %vm4078_vm7, %v5319_v38, 0.0 }
0x2089   : > { %v6755_v62 = vpop.f32.mrb[144].mxu0 }
0x208a   : > { %v6761_v1 = vmul.f32 %v10954_v43, %v6755_v62  ;;  %v9222_v3 = vpop.f32.mrb[145].mxu0 }
0x208b   : > { %v6758_v5 = vpop.f32.mrb[146].mxu0  ;;  %v9641_v3 = vld [vmem:[%s11858_s15 + $0x8] sm:$0xff]  }
0x208c   : > { %v6762_v6 = vadd.f32 %v6761_v1, %v6659_v63  ;;  %v9223_v8 = vpop.f32.mrb[147].mxu0  ;;  %v9638_v1 = vld [vmem:[%s11857_s14] sm:$0xff]  }
0x208d   : > { %9305 = vmatpush3.bf16.msra.mxu0 %v9638_v1 }
0x208e   : > { %9306 = vmatprep.subr.bf16.mxu0 %v10222_v25 }
0x2091   : > { %v6857_v9 = vpop.f32.mrb[148].mxu0 }
0x2092   : > { %v6863_v28 = vmul.f32 %v10966_v46, %v6857_v9  ;;  %v9234_v45 = vpop.f32.mrb[149].mxu0 }
0x2093   : > { %v6860_v10 = vpop.f32.mrb[150].mxu0 }
0x2094   : > { %v6864_v7 = vadd.f32 %v6863_v28, %v6762_v6  ;;  %v9235_v11 = vpop.f32.mrb[151].mxu0  ;;  %v8432_v28 = vld [vmem:[%s11859_s17] ss:$0 sm:$0xff] }
0x2095   : > { %v8433_v10 = vld [vmem:[%s11860_s19] ss:$0 sm:$0xff] }
0x2099   : > { %v6959_v14 = vpop.f32.mrb[152].mxu0 }
0x209a   : > { %v6965_v30 = vmul.f32 %v10978_v48, %v6959_v14  ;;  %v9246_v13 = vpop.f32.mrb[153].mxu0 }
0x209b   : > { %v6962_v15 = vpop.f32.mrb[154].mxu0  ;;  %v9643_v13 = vld [vmem:[%s11858_s15 + $0x18] sm:$0xff]  }
0x209c   : > { %v6966_v18 = vadd.f32 %v6965_v30, %v6864_v7  ;;  %v9247_v40 = vpop.f32.mrb[155].mxu0  ;;  %v9642_v30 = vld [vmem:[%s11858_s15 + $0x10] sm:$0xff]   ;;  %v8434_v15 = vld [vmem:[%s11861_s7] ss:$0 sm:$0xff] }
0x20a1   : > { %v7061_v17 = vpop.f32.mrb[156].mxu0 }
0x20a2   : > { %v7067_v43 = vmul.f32 %v10990_v31, %v7061_v17  ;;  %v9258_v21 = vpop.f32.mrb[157].mxu0 }
0x20a3   : > { %v7064_v32 = vpop.f32.mrb[158].mxu0 }
0x20a4   : > { %v7068_v16 = vadd.f32 %v7067_v43, %v6966_v18  ;;  %v9259_v22 = vpop.f32.mrb[159].mxu0 }
0x20a9   : > { %v7163_v20 = vpop.f32.mrb[160].mxu0 }
0x20aa   : > { %v7169_v46 = vmul.f32 %v11002_v53, %v7163_v20  ;;  %v9270_v23 = vpop.f32.mrb[161].mxu0 }
0x20ab   : > { %v7166_v24 = vpop.f32.mrb[162].mxu0 }
0x20ac   : > { %v7170_v26 = vadd.f32 %v7169_v46, %v7068_v16  ;;  %v9271_v27 = vpop.f32.mrb[163].mxu0  ;;  %v8438_v46 = vld [vmem:[%s11862_s11] ss:$0 sm:$0xff] }
0x20b1   : > { %v7265_v48 = vpop.f32.mrb[164].mxu0 }
0x20b2   : > { %v7271_v29 = vmul.f32 %v11014_v57, %v7265_v48  ;;  %v9282_v34 = vpop.f32.mrb[165].mxu0 }
0x20b3   : > { %v7268_v35 = vpop.f32.mrb[166].mxu0 }
0x20b4   : > { %v7272_v37 = vadd.f32 %v7271_v29, %v7170_v26  ;;  %v9283_v31 = vpop.f32.mrb[167].mxu0 }
0x20b9   : > { %v7367_v0 = vpop.f32.mrb[168].mxu0 }
0x20ba   : > { %v7373_v41 = vmul.f32 %v11026_v60, %v7367_v0  ;;  %v9294_v42 = vpop.f32.mrb[169].mxu0 }
0x20bb   : > { %v7370_v33 = vpop.f32.mrb[170].mxu0 }
0x20bc   : > { %v7374_v44 = vadd.f32 %v7373_v41, %v7272_v37  ;;  %v9295_v53 = vpop.f32.mrb[171].mxu0 }
0x20be   : > { %v7375_v12 = vpack.c.bf16 %v7374_v44, %v7374_v44 }
0x20c0   : > { %9301 = vmatmul.mubr.msk.bf16.vlgmr.msra.gmra.mrb[172].mxu1 %vm1809_vm8, %v7375_v12 }
0x20c1   : > { %9320 = vmatprep.mubr.msk.bf16.mxu1 %vm10223_vm5, %v10222_v25  ;;  %9313 = vmatpush3.bf16.msra.mxu1 %v9640_v36  ;;  %v9647_v36 = vld [vmem:[%s11866_s4 + $0x8] sm:$0xff]  }
0x20c2   : > { %9314 = vmatprep.subr.bf16.mxu1 %v10222_v25 }
0x20c5   : > { %9315 = vmatpush3.bf16.msra.mxu1 %v9641_v3  ;;  %v9648_v3 = vld [vmem:[%s11866_s4 + $0x10] sm:$0xff]  }
0x20c6   : > { %9316 = vmatprep.subr.bf16.mxu1 %v10222_v25 }
0x20c9   : > { %9317 = vmatpush3.bf16.msra.mxu1 %v9642_v30 }
0x20ca   : > { %9318 = vmatprep.subr.bf16.mxu1 %v10222_v25 }
0x20cd   : > { %9319 = vmatpush3.bf16.msra.mxu1 %v9643_v13  ;;  %v9650_v13 = vld [vmem:[%s11866_s4 + $0x40] sm:$0xff]  }
0x2193   : > { %v7436_v57 = vpop.f32.mrb[172].mxu1 }
0x2194   : > { %v7437_v19 = vadd.f32 %v8428_v51, %v7436_v57  ;;  %v9302_v2 = vpop.f32.mrb[173].mxu1  ;;  %v8372_v57 = vld [vmem:[%s11863_s1] ss:$0 sm:$0xff]  ;;  %s11867_s1 = sshll.u32 %s11869_s0, 3 }
0x2195   : > { %v7439_v50 = vpop.f32.mrb[174].mxu1 }
0x2196   : > { %v9303_v60 = vpop.f32.mrb[175].mxu1  ;;  %v7442_v54 = vadd.f32 %v7437_v19, %v11486_v4  ;;  %v9639_v4 = vld [vmem:[%s11857_s14 + $0x8] sm:$0xff]   ;;  %v8373_v19 = vld [vmem:[%s11864_s2] ss:$0 sm:$0xff]  ;;  %s1805_s2 = scalar_lea.vmem %s10513_s8, %s11867_s1 }
0x2197   : > { %9307 = vmatpush3.bf16.msra.mxu0 %v9639_v4  ;;  %v9644_v60 = vld [vmem:[%s11865_s3] sm:$0xff]  }
0x2198   : > { %v7443_v52 = vsel %vm4078_vm7, %v7442_v54, 0.0  ;;  %9324 = vmatprep.subr.bf16.mxu0 %v10222_v25  ;;  %v9646_v4 = vld [vmem:[%s11866_s4] sm:$0xff]  }
0x2199   : > { %7444 = vadd.xlane.f32.xlu0 %v7443_v52 }
0x219d   : > { %5321 = vadd.xlane.f32.xlu0 %v5320_v55 }
0x2226   : > { %v7445_v58 = vpop.xlane.xlu0 %7444 }
0x2227   : > { %v7446_v61 = vmul.f32 0.03125, %v7445_v58 }
0x2229   : > { %v7447_v59 = vsub.f32 %v7442_v54, %v7446_v61  ;;  %v9645_v54 = vld [vmem:[%s11865_s3 + $0x8] sm:$0xff]  }
0x222a   : > { %v5322_v22 = vpop.xlane.xlu0 %5321 }
0x222b   : > { %v7448_v62 = vmul.f32 %v7447_v59, %v7447_v59  ;;  %v5323_v20 = vmul.f32 0.03125, %v5322_v22 }
0x222d   : > { %v7449_v63 = vsel %vm4078_vm7, %v7448_v62, 0.0  ;;  %v5324_v24 = vsub.f32 %v5319_v38, %v5323_v20 }
0x222e   : > { %7450 = vadd.xlane.f32.xlu1 %v7449_v63 }
0x222f   : > { %v5325_v37 = vmul.f32 %v5324_v24, %v5324_v24 }
0x2231   : > { %v5326_v31 = vsel %vm4078_vm7, %v5325_v37, 0.0 }
0x22bb   : > { %v7451_v5 = vpop.xlane.xlu1 %7450 }
0x22bc   : > { %v7452_v6 = vmul.f32 0.03125, %v7451_v5  ;;  %v9649_v5 = vld [vmem:[%s11866_s4 + $0x18] sm:$0xff]  }
0x22be   : > { %v7453_v8 = vadd.f32 1e-05, %v7452_v6  ;;  %v8446_v6 = vld [vmem:[#allocation19] ss:$0 sm:$0xff] }
0x22c0   : > { %9804 = vrsqrt.f32 %v7453_v8 }
0x22ca   : > { %v9805_v9 = vpop.eup %9804 }
0x22cb   : > { %v7455_v45 = vmul.f32 %v9805_v9, %v7447_v59 }
0x22cd   : > { %v7463_v7 = vmul.f32 %v8432_v28, %v7455_v45 }
0x22cf   : > { %v7471_v11 = vadd.f32 %v8433_v10, %v7463_v7 }
0x22d1   : > { %v7472_v14 = vpack.c.bf16 %v7471_v11, %v7471_v11 }
0x22d3   : > { %9309 = vmatmul.mubr.msk.bf16.vlgmr.msra.gmra.mrb[172].mxu0 %vm1809_vm8, %v7472_v14 }
0x22d4   : > { %9328 = vmatprep.mubr.msk.bf16.mxu0 %vm10223_vm5, %v10222_v25  ;;  %9325 = vmatpush3.bf16.msra.mxu0 %v9644_v60 }
0x22d5   : > { %9326 = vmatprep.subr.bf16.mxu0 %v10222_v25 }
0x22d8   : > { %9327 = vmatpush3.bf16.msra.mxu0 %v9645_v54 }
0x22d9   : > { %9332 = vmatprep.subr.bf16.mxu0 %v10222_v25 }
0x23a6   : > { %v7533_v18 = vpop.f32.mrb[172].mxu0 }
0x23a7   : > { %v7534_v40 = vadd.f32 %v8434_v15, %v7533_v18  ;;  %v9310_v17 = vpop.f32.mrb[173].mxu0  ;;  %v9651_v18 = vld [vmem:[%s11866_s4 + $0x48] sm:$0xff]  }
0x23a8   : > { %v7536_v43 = vpop.f32.mrb[174].mxu0 }
0x23a9   : > { %v7539_v21 = vmax.f32 %v7534_v40, 0.0  ;;  %v9311_v32 = vpop.f32.mrb[175].mxu0  ;;  %v9654_v40 = vld [vmem:[%s11866_s4 + $0x20] sm:$0xff]   ;;  %v9655_v43 = vld [vmem:[%s11866_s4 + $0x28] sm:$0xff]  }
0x23aa   : > { %v9657_v32 = vld [vmem:[%s11866_s4 + $0x38] sm:$0xff]  }
0x23ab   : > { %v7540_v16 = vpack.c.bf16 %v7539_v21, %v7539_v21  ;;  %v9656_v21 = vld [vmem:[%s11866_s4 + $0x30] sm:$0xff]  }
0x23ad   : > { %9321 = vmatmul.mubr.msk.bf16.vlgmr.msra.gmra.mrb[176].mxu1 %vm1807_vm6, %v7540_v16 }
0x2480   : > { %v7617_v23 = vpop.f32.mrb[176].mxu1 }
0x2481   : > { %v7618_v26 = vadd.f32 %v8438_v46, %v7617_v23  ;;  %v9322_v27 = vpop.f32.mrb[177].mxu1 }
0x2482   : > { %v7620_v48 = vpop.f32.mrb[178].mxu1 }
0x2483   : > { %v9323_v29 = vpop.f32.mrb[179].mxu1  ;;  %v7623_v34 = vadd.f32 %v7618_v26, %v7471_v11 }
0x2485   : > { %v7624_v35 = vsel %vm4078_vm7, %v7623_v34, 0.0 }
0x2486   : > { %7625 = vadd.xlane.f32.xlu0 %v7624_v35 }
0x248a   : > { %5327 = vadd.xlane.f32.xlu0 %v5326_v31 }
0x2513   : > { %v7626_v0 = vpop.xlane.xlu0 %7625 }
0x2514   : > { %v7627_v41 = vmul.f32 0.03125, %v7626_v0 }
0x2516   : > { %v7628_v42 = vsub.f32 %v7623_v34, %v7627_v41 }
0x2517   : > { %v5328_v33 = vpop.xlane.xlu0 %5327 }
0x2518   : > { %v5329_v44 = vmul.f32 0.03125, %v5328_v33  ;;  %v7629_v53 = vmul.f32 %v7628_v42, %v7628_v42 }
0x251a   : > { %v5330_v12 = vadd.f32 1e-05, %v5329_v44  ;;  %v7630_v47 = vsel %vm4078_vm7, %v7629_v53, 0.0 }
0x251b   : > { %7631 = vadd.xlane.f32.xlu0 %v7630_v47 }
0x251c   : > { %9806 = vrsqrt.f32 %v5330_v12 }
0x2526   : > { %v9807_v51 = vpop.eup %9806 }
0x2527   : > { %v5332_v49 = vmul.f32 %v9807_v51, %v5324_v24 }
0x2529   : > { %v5340_v2 = vmul.f32 %v8372_v57, %v5332_v49 }
0x252b   : > { %v5348_v50 = vadd.f32 %v8373_v19, %v5340_v2 }
0x252d   : > { %5349 = vst.msk [vmem:[#allocation4] sm:$0xf] %vm4078_vm7, %v5348_v50 }
0x25a8   : > { %v7632_v52 = vpop.xlane.xlu0 %7631 }
0x25a9   : > { %v7633_v38 = vmul.f32 0.03125, %v7632_v52 }
0x25ab   : > { %v7634_v55 = vadd.f32 1e-05, %v7633_v38 }
0x25ad   : > { %9808 = vrsqrt.f32 %v7634_v55 }
0x25b7   : > { %v9809_v58 = vpop.eup %9808 }
0x25b8   : > { %v7636_v61 = vmul.f32 %v9809_v58, %v7628_v42 }
0x25ba   : > { %v7644_v59 = vmul.f32 %v8372_v57, %v7636_v61 }
0x25bc   : > { %v7652_v62 = vadd.f32 %v8373_v19, %v7644_v59 }
0x25be   : > { %7653 = vst.msk [vmem:[#allocation4 + $0x4] sm:$0xf] %vm4078_vm7, %v7652_v62 }
0x25c5   : > { %v7654_v63 = vld [vmem:[#allocation4] sm:$0xff] }
0x25c6   : > { %v7655_v1 = vpack.c.bf16 %v7654_v63, %v7654_v63 }
0x25c8   : > { %9329 = vmatmul.mubr.msk.bf16.vlgmr.msra.gmra.mrb[176].mxu0 %vm1809_vm8, %v7655_v1 }
0x25c9   : > { %9340 = vmatprep.mubr.msk.bf16.mxu0 %vm10223_vm5, %v10222_v25  ;;  %9333 = vmatpush3.bf16.msra.mxu0 %v9646_v4 }
0x25ca   : > { %9334 = vmatprep.subr.bf16.mxu0 %v10222_v25 }
0x25cd   : > { %9335 = vmatpush3.bf16.msra.mxu0 %v9647_v36 }
0x25ce   : > { %9336 = vmatprep.subr.bf16.mxu0 %v10222_v25 }
0x25d1   : > { %9337 = vmatpush3.bf16.msra.mxu0 %v9648_v3 }
0x25d2   : > { %9338 = vmatprep.subr.bf16.mxu0 %v10222_v25 }
0x25d5   : > { %9339 = vmatpush3.bf16.msra.mxu0 %v9649_v5 }
0x25d6   : > { %9344 = vmatprep.subr.bf16.mxu0 %v10222_v25 }
0x269b   : > { %v7716_v8 = vpop.f32.mrb[176].mxu0 }
0x269c   : > { %v7717_v9 = vadd.f32 %v8446_v6, %v7716_v8  ;;  %v9330_v28 = vpop.f32.mrb[177].mxu0 }
0x269d   : > { %v7719_v45 = vpop.f32.mrb[178].mxu0 }
0x269e   : > { %v7722_v10 = vmax.f32 %v7717_v9, 0.0  ;;  %v9331_v7 = vpop.f32.mrb[179].mxu0 }
0x26a0   : > { %v7723_v11 = vadd.f32 %v7722_v10, %v10899_v39  ;;  %v9653_v39 = vld [vmem:[%s11866_s4 + $0x58] sm:$0xff]  }
0x26a2   : > { %v7724_v14 = vmul.f32 %v7723_v11, %v10755_v56  ;;  %v9652_v56 = vld [vmem:[%s11866_s4 + $0x50] sm:$0xff]  }
0x26a4   : > { %7735 = vst.msk [vmem:[#allocation5 + $0x8] sm:$0xff] %vm1807_vm6, %v7724_v14  ;;  %v7725_v17 = vpack.c.bf16 %v7724_v14, %v7724_v14 }
0x26ab   : > { %v7736_v30 = vld [vmem:[#allocation5 + $0x6] sm:$0xff] }
0x26ac   : > { %v7737_v15 = vpack.c.bf16 %v7736_v30, %v7736_v30  ;;  %7880 = vst.msk [vmem:[#allocation5 + $0x8] sm:$0xff] %vm1807_vm6, %v7724_v14 }
0x26ae   : > { %9341 = vmatmul.mubr.msk.bf16.vlgmr.msra.gmra.mrb[180].mxu0 %vm1807_vm6, %v7737_v15 }
0x26af   : > { %9345 = vmatpush3.bf16.msra.mxu0 %v9650_v13  ;;  %9352 = vmatprep.mubr.msk.bf16.mxu0 %vm10223_vm5, %v10222_v25 }
0x26b0   : > { %9346 = vmatprep.subr.bf16.mxu0 %v10222_v25 }
0x26b3   : > { %9347 = vmatpush3.bf16.msra.mxu0 %v9651_v18  ;;  %v7881_v16 = vld [vmem:[#allocation5 + $0x7] sm:$0xff] }
0x26b4   : > { %9348 = vmatprep.subr.bf16.mxu0 %v10222_v25  ;;  %v7882_v22 = vpack.c.bf16 %v7881_v16, %v7881_v16 }
0x26b7   : > { %9349 = vmatpush3.bf16.msra.mxu0 %v9652_v56 }
0x26b8   : > { %9350 = vmatprep.subr.bf16.mxu0 %v10222_v25 }
0x26bb   : > { %9351 = vmatpush3.bf16.msra.mxu0 %v9653_v39 }
0x26bc   : > { %9356 = vmatprep.subr.bf16.mxu0 %v10222_v25 }
0x26be   : > { %9353 = vmatmul.mubr.msk.bf16.vlgmr.msra.gmra.mrb[180].mxu0 %vm1807_vm6, %v7725_v17 }
0x26bf   : > { %9357 = vmatpush3.bf16.msra.mxu0 %v9654_v40  ;;  %9364 = vmatprep.mubr.msk.bf16.mxu0 %vm10223_vm5, %v10222_v25  ;;  %vm7961_vm5 = vcmask 64512  }
0x26c0   : > { %9358 = vmatprep.subr.bf16.mxu0 %v10222_v25 }
0x26c3   : > { %9359 = vmatpush3.bf16.msra.mxu0 %v9655_v43 }
0x26c4   : > { %9360 = vmatprep.subr.bf16.mxu0 %v10222_v25 }
0x26c7   : > { %9361 = vmatpush3.bf16.msra.mxu0 %v9656_v21 }
0x26c8   : > { %9362 = vmatprep.subr.bf16.mxu0 %v10222_v25 }
0x26cb   : > { %9363 = vmatpush3.bf16.msra.mxu0 %v9657_v32 }
0x26ce   : > { %9365 = vmatmul.mubr.msk.bf16.vlgmr.msra.gmra.mrb[180].mxu0 %vm1807_vm6, %v7882_v22 }
0x27a1   : > { %v7953_v20 = vpop.f32.mrb[180].mxu0 }
0x27a2   : > { %9810 = vtanh.f32 %v7953_v20  ;;  %v9366_v46 = vpop.f32.mrb[181].mxu0 }
0x27a3   : > { %v7956_v23 = vpop.f32.mrb[182].mxu0 }
0x27a4   : > { %v9367_v24 = vpop.f32.mrb[183].mxu0 }
0x27ac   : > { %v9811_v26 = vpop.eup %9810 }
0x27ad   : > { %7962 = vst.msk [vmem:[%s1805_s2] sm:$0xff] %vm7961_vm5, %v9811_v26 }
0x27ae PF: > { %s129_s28 = sadd.s32 1, %s10150_s28  }
0x27af   : > { %p126_p11 = scmp.ge.s32.totalorder %s129_s28, 4  }
0x27b1   :  { %128 = sbr.rel (!%p126_p11) target bundleno = 115 (0x73), region = 380 }
0x27b8   :  { %7982 = vsyncpa [#allocation7], 1 }
0x27b9   :  { %7984 = vsyncpa [#allocation7 + $0x1], 1 }
0x27ba   :  { %7985 = vsyncpa [#allocation9], 1 }
0x27bb   :  { %7986 = vsyncpa [#allocation12], 1 }
0x27bc   :  { %7987 = vsyncpa [#allocation15], 1 }
0x27bd   :  { %7988 = vsyncpa [#allocation18], 1 }
0x27be   :  { %7989 = vsyncpa [#allocation21], 1 }

</bundles_post_ra>
